<compile_context>
chip_gen: v7x
topology: tpu7x:2x2x1
jax: 0.10.0
libtpu: 0.0.40
codegen_flags: <defaults>
</compile_context>

<pallas_src>
import math
import jax
import jax.numpy as jnp
from jax.experimental import pallas as pl
from jax.experimental.pallas import tpu as pltpu

# ConfNet dims (PyTorch layout: weight (out, in), bias (out,))
F_IN, H1, H2, N_OUT = 4, 32, 16, 2

# One in-kernel chunk = one f32 vreg worth of batch elements (8 sublanes x 128 lanes).
_SUB, _LANE = 8, 128
_CHUNK = _SUB * _LANE  # 1024


def confnet_kernel(x_ref, w1_ref, b1_ref, w2_ref, b2_ref, w3_ref, b3_ref, o_ref):
    # x_ref: (4, s_chunks, 8, 128) VMEM block  -- batch on (sublane, lane)
    # w*/b*: flat 1-D f32 SMEM refs (PyTorch (out,in) flattened row-major)
    # o_ref: (2, s_chunks, 8, 128) VMEM block
    n_chunks = x_ref.shape[1]
    plane = (_SUB, _LANE)

    @pl.loop(0, n_chunks)
    def _(c):
        # 4 input-feature planes for this chunk of 1024 batch elements.
        xs = [x_ref[k, c, :, :] for k in range(F_IN)]

        # Layer-2 accumulators initialized with their bias (removes the +b2 pass).
        acc2 = [jnp.full(plane, b2_ref[i], jnp.float32) for i in range(H2)]

        # Layer 1 (+ReLU), streamed straight into the layer-2 accumulators so the
        # 32 hidden planes are never materialized in VMEM.
        for j in range(H1):
            h = jnp.full(plane, b1_ref[j], jnp.float32)
            for k in range(F_IN):
                h = h + w1_ref[j * F_IN + k] * xs[k]
            h = jnp.maximum(h, 0.0)
            for i in range(H2):
                acc2[i] = acc2[i] + w2_ref[i * H1 + j] * h

        # ReLU on layer 2, then the 2-wide output layer.
        l0 = jnp.full(plane, b3_ref[0], jnp.float32)
        l1 = jnp.full(plane, b3_ref[1], jnp.float32)
        for i in range(H2):
            h = jnp.maximum(acc2[i], 0.0)
            l0 = l0 + w3_ref[i] * h
            l1 = l1 + w3_ref[H2 + i] * h

        # 2-class softmax over PyTorch dim=1: purely elementwise, no cross-lane
        # reductions.  Exact divide preserves the 1e-5 f32 check.
        m = jnp.maximum(l0, l1)
        e0 = jnp.exp(l0 - m)
        e1 = jnp.exp(l1 - m)
        inv = 1.0 / (e0 + e1)
        o_ref[0, c, :, :] = (e0 * inv).astype(o_ref.dtype)
        o_ref[1, c, :, :] = (e1 * inv).astype(o_ref.dtype)


def _round_up(a, m):
    return ((a + m - 1) // m) * m


def confnet_forward(x, params, *, max_tb=16384):
    """x: (B, 4) float32 -> (B, 2) softmax probabilities (PyTorch semantics)."""
    B, f_in = x.shape
    assert f_in == F_IN and B >= 1
    assert max_tb % _CHUNK == 0 and max_tb >= _CHUNK

    # Flatten weights/biases to 1-D so they sit in SMEM without 2-D padding.
    w1 = params["w1"].reshape(-1).astype(jnp.float32)   # (32*4,)
    w2 = params["w2"].reshape(-1).astype(jnp.float32)   # (16*32,)
    w3 = params["w3"].reshape(-1).astype(jnp.float32)   # (2*16,)
    b1 = params["b1"].astype(jnp.float32)
    b2 = params["b2"].astype(jnp.float32)
    b3 = params["b3"].astype(jnp.float32)

    # --- batch tiling -------------------------------------------------------
    # Per-step tile tb is a multiple of the 1024-element chunk, capped at max_tb.
    # Keep >=2 parallel grid steps whenever the batch allows (v7x megacore).
    b_c = _round_up(B, _CHUNK)
    n_steps = max(1, -(-b_c // max_tb))
    if b_c > _CHUNK:
        n_steps = max(n_steps, 2)
    tb = _round_up(-(-b_c // n_steps), _CHUNK)
    b_pad = tb * n_steps
    s_chunks = tb // _CHUNK
    n_chunks_total = b_pad // _CHUNK

    # Feature-major (batch on lanes), zero-padded, viewed as dense (8,128) planes.
    # Padded columns produce finite bias-only probabilities and are sliced off.
    x_t = jnp.zeros((F_IN, b_pad), jnp.float32).at[:, :B].set(x.T)
    x_t = x_t.reshape(F_IN, n_chunks_total, _SUB, _LANE)

    smem = pl.BlockSpec(memory_space=pltpu.MemorySpace.SMEM)

    out = pl.pallas_call(
        confnet_kernel,
        out_shape=jax.ShapeDtypeStruct((N_OUT, n_chunks_total, _SUB, _LANE), jnp.float32),
        grid_spec=pltpu.PrefetchScalarGridSpec(
            num_scalar_prefetch=0,
            grid=(n_steps,),
            in_specs=[
                pl.BlockSpec((F_IN, s_chunks, _SUB, _LANE), lambda i: (0, i, 0, 0)),
                smem, smem, smem, smem, smem, smem,
            ],
            out_specs=pl.BlockSpec((N_OUT, s_chunks, _SUB, _LANE), lambda i: (0, i, 0, 0)),
        ),
        compiler_params=pltpu.CompilerParams(
            dimension_semantics=("parallel",),
        ),
    )(x_t, w1, b1, w2, b2, w3, b3)

    # Back to PyTorch layout (B, 2); drop batch padding.
    return out.reshape(N_OUT, b_pad)[:, :B].T


def init_params(key):
    """PyTorch nn.Linear default init: U(-1/sqrt(fan_in), 1/sqrt(fan_in)).
    Weights stored PyTorch-style as (out_features, in_features), biases (out,)."""
    dims = [(F_IN, H1), (H1, H2), (H2, N_OUT)]
    names = [("w1", "b1"), ("w2", "b2"), ("w3", "b3")]
    params = {}
    for (fan_in, fan_out), (wn, bn) in zip(dims, names):
        key, kw, kb = jax.random.split(key, 3)
        bound = 1.0 / math.sqrt(fan_in)
        params[wn] = jax.random.uniform(
            kw, (fan_out, fan_in), jnp.float32, minval=-bound, maxval=bound)
        params[bn] = jax.random.uniform(
            kb, (fan_out,), jnp.float32, minval=-bound, maxval=bound)
    return params


def reference_forward(x, params):
    # True-f32 reference (HIGHEST avoids reduced-precision MXU passes) matching
    # PyTorch's f32 semantics; the kernel accumulates in exact f32 on the VPU.
    hp = jax.lax.Precision.HIGHEST
    h1 = jnp.maximum(jnp.dot(x, params["w1"].T, precision=hp) + params["b1"], 0.0)
    h2 = jnp.maximum(jnp.dot(h1, params["w2"].T, precision=hp) + params["b2"], 0.0)
    logits = jnp.dot(h2, params["w3"].T, precision=hp) + params["b3"]
    return jax.nn.softmax(logits, axis=1)


if __name__ == "__main__":
    key = jax.random.PRNGKey(0)
    key, kx = jax.random.split(key)
    params = init_params(key)

    # Small batch consistent with the module's (B, 4) input.
    B = 16
    x = jax.random.normal(kx, (B, 4), jnp.float32)
    out = jax.block_until_ready(confnet_forward(x, params))
    ref = reference_forward(x, params)
    assert out.shape == (B, 2)
    assert jnp.allclose(out, ref, atol=1e-5, rtol=1e-5), "mismatch vs reference (small B)"
    assert jnp.allclose(jnp.sum(out, axis=1), jnp.ones((B,)), atol=1e-5)

    # Second check: non-multiple-of-1024 batch exercising padding and a
    # 2-step "parallel" grid (both v7x TensorCores when present).
    B2 = 2500
    x2 = jax.random.normal(jax.random.fold_in(key, 1), (B2, 4), jnp.float32)
    out2 = jax.block_until_ready(confnet_forward(x2, params))
    ref2 = reference_forward(x2, params)
    assert out2.shape == (B2, 2)
    assert jnp.allclose(out2, ref2, atol=1e-5, rtol=1e-5), "mismatch vs reference (large B)"

    print("KERNEL_OK")
</pallas_src>

<mosaic_0001>
module attributes {stable_mosaic.version = 11 : i64} {
  func.func @confnet_kernel(%arg0: i32, %arg1: memref<4x1x8x128xf32, #tpu.memory_space<vmem>>, %arg2: memref<128xf32, #tpu.memory_space<smem>>, %arg3: memref<32xf32, #tpu.memory_space<smem>>, %arg4: memref<512xf32, #tpu.memory_space<smem>>, %arg5: memref<16xf32, #tpu.memory_space<smem>>, %arg6: memref<32xf32, #tpu.memory_space<smem>>, %arg7: memref<2xf32, #tpu.memory_space<smem>>, %arg8: memref<2x1x8x128xf32, #tpu.memory_space<vmem>>) attributes {dimension_semantics = [#tpu.dimension_semantics<parallel>], iteration_bounds = array<i64: 1>, scalar_prefetch = 0 : i64, scratch_operands = 0 : i64, tpu.core_type = #tpu.core_type<tc>, window_params = [{transform_indices = @transform_0, window_bounds = array<i64: 4, 1, 8, 128>}, {transform_indices = @transform_1, window_bounds = array<i64: 128>}, {transform_indices = @transform_2, window_bounds = array<i64: 32>}, {transform_indices = @transform_3, window_bounds = array<i64: 512>}, {transform_indices = @transform_4, window_bounds = array<i64: 16>}, {transform_indices = @transform_5, window_bounds = array<i64: 32>}, {transform_indices = @transform_6, window_bounds = array<i64: 2>}, {transform_indices = @transform_7, window_bounds = array<i64: 2, 1, 8, 128>}]} {
    %c0_i32 = arith.constant 0 : i32
    %c1_i32 = arith.constant 1 : i32
    %0 = arith.muli %c0_i32, %c1_i32 : i32
    %c0_i32_0 = arith.constant 0 : i32
    %1 = arith.addi %c0_i32_0, %0 : i32
    %c0 = arith.constant 0 : index
    %2 = arith.index_cast %1 : i32 to index
    %c0_1 = arith.constant 0 : index
    %c0_2 = arith.constant 0 : index
    %3 = vector.load %arg1[%c0, %2, %c0_1, %c0_2] : memref<4x1x8x128xf32, #tpu.memory_space<vmem>>, vector<1x1x8x128xf32>
    %4 = vector.shape_cast %3 : vector<1x1x8x128xf32> to vector<8x128xf32>
    %c1 = arith.constant 1 : index
    %5 = arith.index_cast %1 : i32 to index
    %c0_3 = arith.constant 0 : index
    %c0_4 = arith.constant 0 : index
    %6 = vector.load %arg1[%c1, %5, %c0_3, %c0_4] : memref<4x1x8x128xf32, #tpu.memory_space<vmem>>, vector<1x1x8x128xf32>
    %7 = vector.shape_cast %6 : vector<1x1x8x128xf32> to vector<8x128xf32>
    %c2 = arith.constant 2 : index
    %8 = arith.index_cast %1 : i32 to index
    %c0_5 = arith.constant 0 : index
    %c0_6 = arith.constant 0 : index
    %9 = vector.load %arg1[%c2, %8, %c0_5, %c0_6] : memref<4x1x8x128xf32, #tpu.memory_space<vmem>>, vector<1x1x8x128xf32>
    %10 = vector.shape_cast %9 : vector<1x1x8x128xf32> to vector<8x128xf32>
    %c3 = arith.constant 3 : index
    %11 = arith.index_cast %1 : i32 to index
    %c0_7 = arith.constant 0 : index
    %c0_8 = arith.constant 0 : index
    %12 = vector.load %arg1[%c3, %11, %c0_7, %c0_8] : memref<4x1x8x128xf32, #tpu.memory_space<vmem>>, vector<1x1x8x128xf32>
    %13 = vector.shape_cast %12 : vector<1x1x8x128xf32> to vector<8x128xf32>
    %c0_9 = arith.constant 0 : index
    %14 = memref.load %arg5[%c0_9] : memref<16xf32, #tpu.memory_space<smem>>
    %15 = vector.broadcast %14 : f32 to vector<8x128xf32>
    %c1_10 = arith.constant 1 : index
    %16 = memref.load %arg5[%c1_10] : memref<16xf32, #tpu.memory_space<smem>>
    %17 = vector.broadcast %16 : f32 to vector<8x128xf32>
    %c2_11 = arith.constant 2 : index
    %18 = memref.load %arg5[%c2_11] : memref<16xf32, #tpu.memory_space<smem>>
    %19 = vector.broadcast %18 : f32 to vector<8x128xf32>
    %c3_12 = arith.constant 3 : index
    %20 = memref.load %arg5[%c3_12] : memref<16xf32, #tpu.memory_space<smem>>
    %21 = vector.broadcast %20 : f32 to vector<8x128xf32>
    %c4 = arith.constant 4 : index
    %22 = memref.load %arg5[%c4] : memref<16xf32, #tpu.memory_space<smem>>
    %23 = vector.broadcast %22 : f32 to vector<8x128xf32>
    %c5 = arith.constant 5 : index
    %24 = memref.load %arg5[%c5] : memref<16xf32, #tpu.memory_space<smem>>
    %25 = vector.broadcast %24 : f32 to vector<8x128xf32>
    %c6 = arith.constant 6 : index
    %26 = memref.load %arg5[%c6] : memref<16xf32, #tpu.memory_space<smem>>
    %27 = vector.broadcast %26 : f32 to vector<8x128xf32>
    %c7 = arith.constant 7 : index
    %28 = memref.load %arg5[%c7] : memref<16xf32, #tpu.memory_space<smem>>
    %29 = vector.broadcast %28 : f32 to vector<8x128xf32>
    %c8 = arith.constant 8 : index
    %30 = memref.load %arg5[%c8] : memref<16xf32, #tpu.memory_space<smem>>
    %31 = vector.broadcast %30 : f32 to vector<8x128xf32>
    %c9 = arith.constant 9 : index
    %32 = memref.load %arg5[%c9] : memref<16xf32, #tpu.memory_space<smem>>
    %33 = vector.broadcast %32 : f32 to vector<8x128xf32>
    %c10 = arith.constant 10 : index
    %34 = memref.load %arg5[%c10] : memref<16xf32, #tpu.memory_space<smem>>
    %35 = vector.broadcast %34 : f32 to vector<8x128xf32>
    %c11 = arith.constant 11 : index
    %36 = memref.load %arg5[%c11] : memref<16xf32, #tpu.memory_space<smem>>
    %37 = vector.broadcast %36 : f32 to vector<8x128xf32>
    %c12 = arith.constant 12 : index
    %38 = memref.load %arg5[%c12] : memref<16xf32, #tpu.memory_space<smem>>
    %39 = vector.broadcast %38 : f32 to vector<8x128xf32>
    %c13 = arith.constant 13 : index
    %40 = memref.load %arg5[%c13] : memref<16xf32, #tpu.memory_space<smem>>
    %41 = vector.broadcast %40 : f32 to vector<8x128xf32>
    %c14 = arith.constant 14 : index
    %42 = memref.load %arg5[%c14] : memref<16xf32, #tpu.memory_space<smem>>
    %43 = vector.broadcast %42 : f32 to vector<8x128xf32>
    %c15 = arith.constant 15 : index
    %44 = memref.load %arg5[%c15] : memref<16xf32, #tpu.memory_space<smem>>
    %45 = vector.broadcast %44 : f32 to vector<8x128xf32>
    %c0_13 = arith.constant 0 : index
    %46 = memref.load %arg3[%c0_13] : memref<32xf32, #tpu.memory_space<smem>>
    %47 = vector.broadcast %46 : f32 to vector<8x128xf32>
    %c0_14 = arith.constant 0 : index
    %48 = memref.load %arg2[%c0_14] : memref<128xf32, #tpu.memory_space<smem>>
    %49 = vector.broadcast %48 : f32 to vector<8x128xf32>
    %50 = arith.mulf %49, %4 : vector<8x128xf32>
    %51 = arith.addf %47, %50 : vector<8x128xf32>
    %c1_15 = arith.constant 1 : index
    %52 = memref.load %arg2[%c1_15] : memref<128xf32, #tpu.memory_space<smem>>
    %53 = vector.broadcast %52 : f32 to vector<8x128xf32>
    %54 = arith.mulf %53, %7 : vector<8x128xf32>
    %55 = arith.addf %51, %54 : vector<8x128xf32>
    %c2_16 = arith.constant 2 : index
    %56 = memref.load %arg2[%c2_16] : memref<128xf32, #tpu.memory_space<smem>>
    %57 = vector.broadcast %56 : f32 to vector<8x128xf32>
    %58 = arith.mulf %57, %10 : vector<8x128xf32>
    %59 = arith.addf %55, %58 : vector<8x128xf32>
    %c3_17 = arith.constant 3 : index
    %60 = memref.load %arg2[%c3_17] : memref<128xf32, #tpu.memory_space<smem>>
    %61 = vector.broadcast %60 : f32 to vector<8x128xf32>
    %62 = arith.mulf %61, %13 : vector<8x128xf32>
    %63 = arith.addf %59, %62 : vector<8x128xf32>
    %cst = arith.constant 0.000000e+00 : f32
    %64 = vector.broadcast %cst : f32 to vector<8x128xf32>
    %65 = arith.maximumf %63, %64 : vector<8x128xf32>
    %c0_18 = arith.constant 0 : index
    %66 = memref.load %arg4[%c0_18] : memref<512xf32, #tpu.memory_space<smem>>
    %67 = vector.broadcast %66 : f32 to vector<8x128xf32>
    %68 = arith.mulf %67, %65 : vector<8x128xf32>
    %69 = arith.addf %15, %68 : vector<8x128xf32>
    %c32 = arith.constant 32 : index
    %70 = memref.load %arg4[%c32] : memref<512xf32, #tpu.memory_space<smem>>
    %71 = vector.broadcast %70 : f32 to vector<8x128xf32>
    %72 = arith.mulf %71, %65 : vector<8x128xf32>
    %73 = arith.addf %17, %72 : vector<8x128xf32>
    %c64 = arith.constant 64 : index
    %74 = memref.load %arg4[%c64] : memref<512xf32, #tpu.memory_space<smem>>
    %75 = vector.broadcast %74 : f32 to vector<8x128xf32>
    %76 = arith.mulf %75, %65 : vector<8x128xf32>
    %77 = arith.addf %19, %76 : vector<8x128xf32>
    %c96 = arith.constant 96 : index
    %78 = memref.load %arg4[%c96] : memref<512xf32, #tpu.memory_space<smem>>
    %79 = vector.broadcast %78 : f32 to vector<8x128xf32>
    %80 = arith.mulf %79, %65 : vector<8x128xf32>
    %81 = arith.addf %21, %80 : vector<8x128xf32>
    %c128 = arith.constant 128 : index
    %82 = memref.load %arg4[%c128] : memref<512xf32, #tpu.memory_space<smem>>
    %83 = vector.broadcast %82 : f32 to vector<8x128xf32>
    %84 = arith.mulf %83, %65 : vector<8x128xf32>
    %85 = arith.addf %23, %84 : vector<8x128xf32>
    %c160 = arith.constant 160 : index
    %86 = memref.load %arg4[%c160] : memref<512xf32, #tpu.memory_space<smem>>
    %87 = vector.broadcast %86 : f32 to vector<8x128xf32>
    %88 = arith.mulf %87, %65 : vector<8x128xf32>
    %89 = arith.addf %25, %88 : vector<8x128xf32>
    %c192 = arith.constant 192 : index
    %90 = memref.load %arg4[%c192] : memref<512xf32, #tpu.memory_space<smem>>
    %91 = vector.broadcast %90 : f32 to vector<8x128xf32>
    %92 = arith.mulf %91, %65 : vector<8x128xf32>
    %93 = arith.addf %27, %92 : vector<8x128xf32>
    %c224 = arith.constant 224 : index
    %94 = memref.load %arg4[%c224] : memref<512xf32, #tpu.memory_space<smem>>
    %95 = vector.broadcast %94 : f32 to vector<8x128xf32>
    %96 = arith.mulf %95, %65 : vector<8x128xf32>
    %97 = arith.addf %29, %96 : vector<8x128xf32>
    %c256 = arith.constant 256 : index
    %98 = memref.load %arg4[%c256] : memref<512xf32, #tpu.memory_space<smem>>
    %99 = vector.broadcast %98 : f32 to vector<8x128xf32>
    %100 = arith.mulf %99, %65 : vector<8x128xf32>
    %101 = arith.addf %31, %100 : vector<8x128xf32>
    %c288 = arith.constant 288 : index
    %102 = memref.load %arg4[%c288] : memref<512xf32, #tpu.memory_space<smem>>
    %103 = vector.broadcast %102 : f32 to vector<8x128xf32>
    %104 = arith.mulf %103, %65 : vector<8x128xf32>
    %105 = arith.addf %33, %104 : vector<8x128xf32>
    %c320 = arith.constant 320 : index
    %106 = memref.load %arg4[%c320] : memref<512xf32, #tpu.memory_space<smem>>
    %107 = vector.broadcast %106 : f32 to vector<8x128xf32>
    %108 = arith.mulf %107, %65 : vector<8x128xf32>
    %109 = arith.addf %35, %108 : vector<8x128xf32>
    %c352 = arith.constant 352 : index
    %110 = memref.load %arg4[%c352] : memref<512xf32, #tpu.memory_space<smem>>
    %111 = vector.broadcast %110 : f32 to vector<8x128xf32>
    %112 = arith.mulf %111, %65 : vector<8x128xf32>
    %113 = arith.addf %37, %112 : vector<8x128xf32>
    %c384 = arith.constant 384 : index
    %114 = memref.load %arg4[%c384] : memref<512xf32, #tpu.memory_space<smem>>
    %115 = vector.broadcast %114 : f32 to vector<8x128xf32>
    %116 = arith.mulf %115, %65 : vector<8x128xf32>
    %117 = arith.addf %39, %116 : vector<8x128xf32>
    %c416 = arith.constant 416 : index
    %118 = memref.load %arg4[%c416] : memref<512xf32, #tpu.memory_space<smem>>
    %119 = vector.broadcast %118 : f32 to vector<8x128xf32>
    %120 = arith.mulf %119, %65 : vector<8x128xf32>
    %121 = arith.addf %41, %120 : vector<8x128xf32>
    %c448 = arith.constant 448 : index
    %122 = memref.load %arg4[%c448] : memref<512xf32, #tpu.memory_space<smem>>
    %123 = vector.broadcast %122 : f32 to vector<8x128xf32>
    %124 = arith.mulf %123, %65 : vector<8x128xf32>
    %125 = arith.addf %43, %124 : vector<8x128xf32>
    %c480 = arith.constant 480 : index
    %126 = memref.load %arg4[%c480] : memref<512xf32, #tpu.memory_space<smem>>
    %127 = vector.broadcast %126 : f32 to vector<8x128xf32>
    %128 = arith.mulf %127, %65 : vector<8x128xf32>
    %129 = arith.addf %45, %128 : vector<8x128xf32>
    %c1_19 = arith.constant 1 : index
    %130 = memref.load %arg3[%c1_19] : memref<32xf32, #tpu.memory_space<smem>>
    %131 = vector.broadcast %130 : f32 to vector<8x128xf32>
    %c4_20 = arith.constant 4 : index
    %132 = memref.load %arg2[%c4_20] : memref<128xf32, #tpu.memory_space<smem>>
    %133 = vector.broadcast %132 : f32 to vector<8x128xf32>
    %134 = arith.mulf %133, %4 : vector<8x128xf32>
    %135 = arith.addf %131, %134 : vector<8x128xf32>
    %c5_21 = arith.constant 5 : index
    %136 = memref.load %arg2[%c5_21] : memref<128xf32, #tpu.memory_space<smem>>
    %137 = vector.broadcast %136 : f32 to vector<8x128xf32>
    %138 = arith.mulf %137, %7 : vector<8x128xf32>
    %139 = arith.addf %135, %138 : vector<8x128xf32>
    %c6_22 = arith.constant 6 : index
    %140 = memref.load %arg2[%c6_22] : memref<128xf32, #tpu.memory_space<smem>>
    %141 = vector.broadcast %140 : f32 to vector<8x128xf32>
    %142 = arith.mulf %141, %10 : vector<8x128xf32>
    %143 = arith.addf %139, %142 : vector<8x128xf32>
    %c7_23 = arith.constant 7 : index
    %144 = memref.load %arg2[%c7_23] : memref<128xf32, #tpu.memory_space<smem>>
    %145 = vector.broadcast %144 : f32 to vector<8x128xf32>
    %146 = arith.mulf %145, %13 : vector<8x128xf32>
    %147 = arith.addf %143, %146 : vector<8x128xf32>
    %cst_24 = arith.constant 0.000000e+00 : f32
    %148 = vector.broadcast %cst_24 : f32 to vector<8x128xf32>
    %149 = arith.maximumf %147, %148 : vector<8x128xf32>
    %c1_25 = arith.constant 1 : index
    %150 = memref.load %arg4[%c1_25] : memref<512xf32, #tpu.memory_space<smem>>
    %151 = vector.broadcast %150 : f32 to vector<8x128xf32>
    %152 = arith.mulf %151, %149 : vector<8x128xf32>
    %153 = arith.addf %69, %152 : vector<8x128xf32>
    %c33 = arith.constant 33 : index
    %154 = memref.load %arg4[%c33] : memref<512xf32, #tpu.memory_space<smem>>
    %155 = vector.broadcast %154 : f32 to vector<8x128xf32>
    %156 = arith.mulf %155, %149 : vector<8x128xf32>
    %157 = arith.addf %73, %156 : vector<8x128xf32>
    %c65 = arith.constant 65 : index
    %158 = memref.load %arg4[%c65] : memref<512xf32, #tpu.memory_space<smem>>
    %159 = vector.broadcast %158 : f32 to vector<8x128xf32>
    %160 = arith.mulf %159, %149 : vector<8x128xf32>
    %161 = arith.addf %77, %160 : vector<8x128xf32>
    %c97 = arith.constant 97 : index
    %162 = memref.load %arg4[%c97] : memref<512xf32, #tpu.memory_space<smem>>
    %163 = vector.broadcast %162 : f32 to vector<8x128xf32>
    %164 = arith.mulf %163, %149 : vector<8x128xf32>
    %165 = arith.addf %81, %164 : vector<8x128xf32>
    %c129 = arith.constant 129 : index
    %166 = memref.load %arg4[%c129] : memref<512xf32, #tpu.memory_space<smem>>
    %167 = vector.broadcast %166 : f32 to vector<8x128xf32>
    %168 = arith.mulf %167, %149 : vector<8x128xf32>
    %169 = arith.addf %85, %168 : vector<8x128xf32>
    %c161 = arith.constant 161 : index
    %170 = memref.load %arg4[%c161] : memref<512xf32, #tpu.memory_space<smem>>
    %171 = vector.broadcast %170 : f32 to vector<8x128xf32>
    %172 = arith.mulf %171, %149 : vector<8x128xf32>
    %173 = arith.addf %89, %172 : vector<8x128xf32>
    %c193 = arith.constant 193 : index
    %174 = memref.load %arg4[%c193] : memref<512xf32, #tpu.memory_space<smem>>
    %175 = vector.broadcast %174 : f32 to vector<8x128xf32>
    %176 = arith.mulf %175, %149 : vector<8x128xf32>
    %177 = arith.addf %93, %176 : vector<8x128xf32>
    %c225 = arith.constant 225 : index
    %178 = memref.load %arg4[%c225] : memref<512xf32, #tpu.memory_space<smem>>
    %179 = vector.broadcast %178 : f32 to vector<8x128xf32>
    %180 = arith.mulf %179, %149 : vector<8x128xf32>
    %181 = arith.addf %97, %180 : vector<8x128xf32>
    %c257 = arith.constant 257 : index
    %182 = memref.load %arg4[%c257] : memref<512xf32, #tpu.memory_space<smem>>
    %183 = vector.broadcast %182 : f32 to vector<8x128xf32>
    %184 = arith.mulf %183, %149 : vector<8x128xf32>
    %185 = arith.addf %101, %184 : vector<8x128xf32>
    %c289 = arith.constant 289 : index
    %186 = memref.load %arg4[%c289] : memref<512xf32, #tpu.memory_space<smem>>
    %187 = vector.broadcast %186 : f32 to vector<8x128xf32>
    %188 = arith.mulf %187, %149 : vector<8x128xf32>
    %189 = arith.addf %105, %188 : vector<8x128xf32>
    %c321 = arith.constant 321 : index
    %190 = memref.load %arg4[%c321] : memref<512xf32, #tpu.memory_space<smem>>
    %191 = vector.broadcast %190 : f32 to vector<8x128xf32>
    %192 = arith.mulf %191, %149 : vector<8x128xf32>
    %193 = arith.addf %109, %192 : vector<8x128xf32>
    %c353 = arith.constant 353 : index
    %194 = memref.load %arg4[%c353] : memref<512xf32, #tpu.memory_space<smem>>
    %195 = vector.broadcast %194 : f32 to vector<8x128xf32>
    %196 = arith.mulf %195, %149 : vector<8x128xf32>
    %197 = arith.addf %113, %196 : vector<8x128xf32>
    %c385 = arith.constant 385 : index
    %198 = memref.load %arg4[%c385] : memref<512xf32, #tpu.memory_space<smem>>
    %199 = vector.broadcast %198 : f32 to vector<8x128xf32>
    %200 = arith.mulf %199, %149 : vector<8x128xf32>
    %201 = arith.addf %117, %200 : vector<8x128xf32>
    %c417 = arith.constant 417 : index
    %202 = memref.load %arg4[%c417] : memref<512xf32, #tpu.memory_space<smem>>
    %203 = vector.broadcast %202 : f32 to vector<8x128xf32>
    %204 = arith.mulf %203, %149 : vector<8x128xf32>
    %205 = arith.addf %121, %204 : vector<8x128xf32>
    %c449 = arith.constant 449 : index
    %206 = memref.load %arg4[%c449] : memref<512xf32, #tpu.memory_space<smem>>
    %207 = vector.broadcast %206 : f32 to vector<8x128xf32>
    %208 = arith.mulf %207, %149 : vector<8x128xf32>
    %209 = arith.addf %125, %208 : vector<8x128xf32>
    %c481 = arith.constant 481 : index
    %210 = memref.load %arg4[%c481] : memref<512xf32, #tpu.memory_space<smem>>
    %211 = vector.broadcast %210 : f32 to vector<8x128xf32>
    %212 = arith.mulf %211, %149 : vector<8x128xf32>
    %213 = arith.addf %129, %212 : vector<8x128xf32>
    %c2_26 = arith.constant 2 : index
    %214 = memref.load %arg3[%c2_26] : memref<32xf32, #tpu.memory_space<smem>>
    %215 = vector.broadcast %214 : f32 to vector<8x128xf32>
    %c8_27 = arith.constant 8 : index
    %216 = memref.load %arg2[%c8_27] : memref<128xf32, #tpu.memory_space<smem>>
    %217 = vector.broadcast %216 : f32 to vector<8x128xf32>
    %218 = arith.mulf %217, %4 : vector<8x128xf32>
    %219 = arith.addf %215, %218 : vector<8x128xf32>
    %c9_28 = arith.constant 9 : index
    %220 = memref.load %arg2[%c9_28] : memref<128xf32, #tpu.memory_space<smem>>
    %221 = vector.broadcast %220 : f32 to vector<8x128xf32>
    %222 = arith.mulf %221, %7 : vector<8x128xf32>
    %223 = arith.addf %219, %222 : vector<8x128xf32>
    %c10_29 = arith.constant 10 : index
    %224 = memref.load %arg2[%c10_29] : memref<128xf32, #tpu.memory_space<smem>>
    %225 = vector.broadcast %224 : f32 to vector<8x128xf32>
    %226 = arith.mulf %225, %10 : vector<8x128xf32>
    %227 = arith.addf %223, %226 : vector<8x128xf32>
    %c11_30 = arith.constant 11 : index
    %228 = memref.load %arg2[%c11_30] : memref<128xf32, #tpu.memory_space<smem>>
    %229 = vector.broadcast %228 : f32 to vector<8x128xf32>
    %230 = arith.mulf %229, %13 : vector<8x128xf32>
    %231 = arith.addf %227, %230 : vector<8x128xf32>
    %cst_31 = arith.constant 0.000000e+00 : f32
    %232 = vector.broadcast %cst_31 : f32 to vector<8x128xf32>
    %233 = arith.maximumf %231, %232 : vector<8x128xf32>
    %c2_32 = arith.constant 2 : index
    %234 = memref.load %arg4[%c2_32] : memref<512xf32, #tpu.memory_space<smem>>
    %235 = vector.broadcast %234 : f32 to vector<8x128xf32>
    %236 = arith.mulf %235, %233 : vector<8x128xf32>
    %237 = arith.addf %153, %236 : vector<8x128xf32>
    %c34 = arith.constant 34 : index
    %238 = memref.load %arg4[%c34] : memref<512xf32, #tpu.memory_space<smem>>
    %239 = vector.broadcast %238 : f32 to vector<8x128xf32>
    %240 = arith.mulf %239, %233 : vector<8x128xf32>
    %241 = arith.addf %157, %240 : vector<8x128xf32>
    %c66 = arith.constant 66 : index
    %242 = memref.load %arg4[%c66] : memref<512xf32, #tpu.memory_space<smem>>
    %243 = vector.broadcast %242 : f32 to vector<8x128xf32>
    %244 = arith.mulf %243, %233 : vector<8x128xf32>
    %245 = arith.addf %161, %244 : vector<8x128xf32>
    %c98 = arith.constant 98 : index
    %246 = memref.load %arg4[%c98] : memref<512xf32, #tpu.memory_space<smem>>
    %247 = vector.broadcast %246 : f32 to vector<8x128xf32>
    %248 = arith.mulf %247, %233 : vector<8x128xf32>
    %249 = arith.addf %165, %248 : vector<8x128xf32>
    %c130 = arith.constant 130 : index
    %250 = memref.load %arg4[%c130] : memref<512xf32, #tpu.memory_space<smem>>
    %251 = vector.broadcast %250 : f32 to vector<8x128xf32>
    %252 = arith.mulf %251, %233 : vector<8x128xf32>
    %253 = arith.addf %169, %252 : vector<8x128xf32>
    %c162 = arith.constant 162 : index
    %254 = memref.load %arg4[%c162] : memref<512xf32, #tpu.memory_space<smem>>
    %255 = vector.broadcast %254 : f32 to vector<8x128xf32>
    %256 = arith.mulf %255, %233 : vector<8x128xf32>
    %257 = arith.addf %173, %256 : vector<8x128xf32>
    %c194 = arith.constant 194 : index
    %258 = memref.load %arg4[%c194] : memref<512xf32, #tpu.memory_space<smem>>
    %259 = vector.broadcast %258 : f32 to vector<8x128xf32>
    %260 = arith.mulf %259, %233 : vector<8x128xf32>
    %261 = arith.addf %177, %260 : vector<8x128xf32>
    %c226 = arith.constant 226 : index
    %262 = memref.load %arg4[%c226] : memref<512xf32, #tpu.memory_space<smem>>
    %263 = vector.broadcast %262 : f32 to vector<8x128xf32>
    %264 = arith.mulf %263, %233 : vector<8x128xf32>
    %265 = arith.addf %181, %264 : vector<8x128xf32>
    %c258 = arith.constant 258 : index
    %266 = memref.load %arg4[%c258] : memref<512xf32, #tpu.memory_space<smem>>
    %267 = vector.broadcast %266 : f32 to vector<8x128xf32>
    %268 = arith.mulf %267, %233 : vector<8x128xf32>
    %269 = arith.addf %185, %268 : vector<8x128xf32>
    %c290 = arith.constant 290 : index
    %270 = memref.load %arg4[%c290] : memref<512xf32, #tpu.memory_space<smem>>
    %271 = vector.broadcast %270 : f32 to vector<8x128xf32>
    %272 = arith.mulf %271, %233 : vector<8x128xf32>
    %273 = arith.addf %189, %272 : vector<8x128xf32>
    %c322 = arith.constant 322 : index
    %274 = memref.load %arg4[%c322] : memref<512xf32, #tpu.memory_space<smem>>
    %275 = vector.broadcast %274 : f32 to vector<8x128xf32>
    %276 = arith.mulf %275, %233 : vector<8x128xf32>
    %277 = arith.addf %193, %276 : vector<8x128xf32>
    %c354 = arith.constant 354 : index
    %278 = memref.load %arg4[%c354] : memref<512xf32, #tpu.memory_space<smem>>
    %279 = vector.broadcast %278 : f32 to vector<8x128xf32>
    %280 = arith.mulf %279, %233 : vector<8x128xf32>
    %281 = arith.addf %197, %280 : vector<8x128xf32>
    %c386 = arith.constant 386 : index
    %282 = memref.load %arg4[%c386] : memref<512xf32, #tpu.memory_space<smem>>
    %283 = vector.broadcast %282 : f32 to vector<8x128xf32>
    %284 = arith.mulf %283, %233 : vector<8x128xf32>
    %285 = arith.addf %201, %284 : vector<8x128xf32>
    %c418 = arith.constant 418 : index
    %286 = memref.load %arg4[%c418] : memref<512xf32, #tpu.memory_space<smem>>
    %287 = vector.broadcast %286 : f32 to vector<8x128xf32>
    %288 = arith.mulf %287, %233 : vector<8x128xf32>
    %289 = arith.addf %205, %288 : vector<8x128xf32>
    %c450 = arith.constant 450 : index
    %290 = memref.load %arg4[%c450] : memref<512xf32, #tpu.memory_space<smem>>
    %291 = vector.broadcast %290 : f32 to vector<8x128xf32>
    %292 = arith.mulf %291, %233 : vector<8x128xf32>
    %293 = arith.addf %209, %292 : vector<8x128xf32>
    %c482 = arith.constant 482 : index
    %294 = memref.load %arg4[%c482] : memref<512xf32, #tpu.memory_space<smem>>
    %295 = vector.broadcast %294 : f32 to vector<8x128xf32>
    %296 = arith.mulf %295, %233 : vector<8x128xf32>
    %297 = arith.addf %213, %296 : vector<8x128xf32>
    %c3_33 = arith.constant 3 : index
    %298 = memref.load %arg3[%c3_33] : memref<32xf32, #tpu.memory_space<smem>>
    %299 = vector.broadcast %298 : f32 to vector<8x128xf32>
    %c12_34 = arith.constant 12 : index
    %300 = memref.load %arg2[%c12_34] : memref<128xf32, #tpu.memory_space<smem>>
    %301 = vector.broadcast %300 : f32 to vector<8x128xf32>
    %302 = arith.mulf %301, %4 : vector<8x128xf32>
    %303 = arith.addf %299, %302 : vector<8x128xf32>
    %c13_35 = arith.constant 13 : index
    %304 = memref.load %arg2[%c13_35] : memref<128xf32, #tpu.memory_space<smem>>
    %305 = vector.broadcast %304 : f32 to vector<8x128xf32>
    %306 = arith.mulf %305, %7 : vector<8x128xf32>
    %307 = arith.addf %303, %306 : vector<8x128xf32>
    %c14_36 = arith.constant 14 : index
    %308 = memref.load %arg2[%c14_36] : memref<128xf32, #tpu.memory_space<smem>>
    %309 = vector.broadcast %308 : f32 to vector<8x128xf32>
    %310 = arith.mulf %309, %10 : vector<8x128xf32>
    %311 = arith.addf %307, %310 : vector<8x128xf32>
    %c15_37 = arith.constant 15 : index
    %312 = memref.load %arg2[%c15_37] : memref<128xf32, #tpu.memory_space<smem>>
    %313 = vector.broadcast %312 : f32 to vector<8x128xf32>
    %314 = arith.mulf %313, %13 : vector<8x128xf32>
    %315 = arith.addf %311, %314 : vector<8x128xf32>
    %cst_38 = arith.constant 0.000000e+00 : f32
    %316 = vector.broadcast %cst_38 : f32 to vector<8x128xf32>
    %317 = arith.maximumf %315, %316 : vector<8x128xf32>
    %c3_39 = arith.constant 3 : index
    %318 = memref.load %arg4[%c3_39] : memref<512xf32, #tpu.memory_space<smem>>
    %319 = vector.broadcast %318 : f32 to vector<8x128xf32>
    %320 = arith.mulf %319, %317 : vector<8x128xf32>
    %321 = arith.addf %237, %320 : vector<8x128xf32>
    %c35 = arith.constant 35 : index
    %322 = memref.load %arg4[%c35] : memref<512xf32, #tpu.memory_space<smem>>
    %323 = vector.broadcast %322 : f32 to vector<8x128xf32>
    %324 = arith.mulf %323, %317 : vector<8x128xf32>
    %325 = arith.addf %241, %324 : vector<8x128xf32>
    %c67 = arith.constant 67 : index
    %326 = memref.load %arg4[%c67] : memref<512xf32, #tpu.memory_space<smem>>
    %327 = vector.broadcast %326 : f32 to vector<8x128xf32>
    %328 = arith.mulf %327, %317 : vector<8x128xf32>
    %329 = arith.addf %245, %328 : vector<8x128xf32>
    %c99 = arith.constant 99 : index
    %330 = memref.load %arg4[%c99] : memref<512xf32, #tpu.memory_space<smem>>
    %331 = vector.broadcast %330 : f32 to vector<8x128xf32>
    %332 = arith.mulf %331, %317 : vector<8x128xf32>
    %333 = arith.addf %249, %332 : vector<8x128xf32>
    %c131 = arith.constant 131 : index
    %334 = memref.load %arg4[%c131] : memref<512xf32, #tpu.memory_space<smem>>
    %335 = vector.broadcast %334 : f32 to vector<8x128xf32>
    %336 = arith.mulf %335, %317 : vector<8x128xf32>
    %337 = arith.addf %253, %336 : vector<8x128xf32>
    %c163 = arith.constant 163 : index
    %338 = memref.load %arg4[%c163] : memref<512xf32, #tpu.memory_space<smem>>
    %339 = vector.broadcast %338 : f32 to vector<8x128xf32>
    %340 = arith.mulf %339, %317 : vector<8x128xf32>
    %341 = arith.addf %257, %340 : vector<8x128xf32>
    %c195 = arith.constant 195 : index
    %342 = memref.load %arg4[%c195] : memref<512xf32, #tpu.memory_space<smem>>
    %343 = vector.broadcast %342 : f32 to vector<8x128xf32>
    %344 = arith.mulf %343, %317 : vector<8x128xf32>
    %345 = arith.addf %261, %344 : vector<8x128xf32>
    %c227 = arith.constant 227 : index
    %346 = memref.load %arg4[%c227] : memref<512xf32, #tpu.memory_space<smem>>
    %347 = vector.broadcast %346 : f32 to vector<8x128xf32>
    %348 = arith.mulf %347, %317 : vector<8x128xf32>
    %349 = arith.addf %265, %348 : vector<8x128xf32>
    %c259 = arith.constant 259 : index
    %350 = memref.load %arg4[%c259] : memref<512xf32, #tpu.memory_space<smem>>
    %351 = vector.broadcast %350 : f32 to vector<8x128xf32>
    %352 = arith.mulf %351, %317 : vector<8x128xf32>
    %353 = arith.addf %269, %352 : vector<8x128xf32>
    %c291 = arith.constant 291 : index
    %354 = memref.load %arg4[%c291] : memref<512xf32, #tpu.memory_space<smem>>
    %355 = vector.broadcast %354 : f32 to vector<8x128xf32>
    %356 = arith.mulf %355, %317 : vector<8x128xf32>
    %357 = arith.addf %273, %356 : vector<8x128xf32>
    %c323 = arith.constant 323 : index
    %358 = memref.load %arg4[%c323] : memref<512xf32, #tpu.memory_space<smem>>
    %359 = vector.broadcast %358 : f32 to vector<8x128xf32>
    %360 = arith.mulf %359, %317 : vector<8x128xf32>
    %361 = arith.addf %277, %360 : vector<8x128xf32>
    %c355 = arith.constant 355 : index
    %362 = memref.load %arg4[%c355] : memref<512xf32, #tpu.memory_space<smem>>
    %363 = vector.broadcast %362 : f32 to vector<8x128xf32>
    %364 = arith.mulf %363, %317 : vector<8x128xf32>
    %365 = arith.addf %281, %364 : vector<8x128xf32>
    %c387 = arith.constant 387 : index
    %366 = memref.load %arg4[%c387] : memref<512xf32, #tpu.memory_space<smem>>
    %367 = vector.broadcast %366 : f32 to vector<8x128xf32>
    %368 = arith.mulf %367, %317 : vector<8x128xf32>
    %369 = arith.addf %285, %368 : vector<8x128xf32>
    %c419 = arith.constant 419 : index
    %370 = memref.load %arg4[%c419] : memref<512xf32, #tpu.memory_space<smem>>
    %371 = vector.broadcast %370 : f32 to vector<8x128xf32>
    %372 = arith.mulf %371, %317 : vector<8x128xf32>
    %373 = arith.addf %289, %372 : vector<8x128xf32>
    %c451 = arith.constant 451 : index
    %374 = memref.load %arg4[%c451] : memref<512xf32, #tpu.memory_space<smem>>
    %375 = vector.broadcast %374 : f32 to vector<8x128xf32>
    %376 = arith.mulf %375, %317 : vector<8x128xf32>
    %377 = arith.addf %293, %376 : vector<8x128xf32>
    %c483 = arith.constant 483 : index
    %378 = memref.load %arg4[%c483] : memref<512xf32, #tpu.memory_space<smem>>
    %379 = vector.broadcast %378 : f32 to vector<8x128xf32>
    %380 = arith.mulf %379, %317 : vector<8x128xf32>
    %381 = arith.addf %297, %380 : vector<8x128xf32>
    %c4_40 = arith.constant 4 : index
    %382 = memref.load %arg3[%c4_40] : memref<32xf32, #tpu.memory_space<smem>>
    %383 = vector.broadcast %382 : f32 to vector<8x128xf32>
    %c16 = arith.constant 16 : index
    %384 = memref.load %arg2[%c16] : memref<128xf32, #tpu.memory_space<smem>>
    %385 = vector.broadcast %384 : f32 to vector<8x128xf32>
    %386 = arith.mulf %385, %4 : vector<8x128xf32>
    %387 = arith.addf %383, %386 : vector<8x128xf32>
    %c17 = arith.constant 17 : index
    %388 = memref.load %arg2[%c17] : memref<128xf32, #tpu.memory_space<smem>>
    %389 = vector.broadcast %388 : f32 to vector<8x128xf32>
    %390 = arith.mulf %389, %7 : vector<8x128xf32>
    %391 = arith.addf %387, %390 : vector<8x128xf32>
    %c18 = arith.constant 18 : index
    %392 = memref.load %arg2[%c18] : memref<128xf32, #tpu.memory_space<smem>>
    %393 = vector.broadcast %392 : f32 to vector<8x128xf32>
    %394 = arith.mulf %393, %10 : vector<8x128xf32>
    %395 = arith.addf %391, %394 : vector<8x128xf32>
    %c19 = arith.constant 19 : index
    %396 = memref.load %arg2[%c19] : memref<128xf32, #tpu.memory_space<smem>>
    %397 = vector.broadcast %396 : f32 to vector<8x128xf32>
    %398 = arith.mulf %397, %13 : vector<8x128xf32>
    %399 = arith.addf %395, %398 : vector<8x128xf32>
    %cst_41 = arith.constant 0.000000e+00 : f32
    %400 = vector.broadcast %cst_41 : f32 to vector<8x128xf32>
    %401 = arith.maximumf %399, %400 : vector<8x128xf32>
    %c4_42 = arith.constant 4 : index
    %402 = memref.load %arg4[%c4_42] : memref<512xf32, #tpu.memory_space<smem>>
    %403 = vector.broadcast %402 : f32 to vector<8x128xf32>
    %404 = arith.mulf %403, %401 : vector<8x128xf32>
    %405 = arith.addf %321, %404 : vector<8x128xf32>
    %c36 = arith.constant 36 : index
    %406 = memref.load %arg4[%c36] : memref<512xf32, #tpu.memory_space<smem>>
    %407 = vector.broadcast %406 : f32 to vector<8x128xf32>
    %408 = arith.mulf %407, %401 : vector<8x128xf32>
    %409 = arith.addf %325, %408 : vector<8x128xf32>
    %c68 = arith.constant 68 : index
    %410 = memref.load %arg4[%c68] : memref<512xf32, #tpu.memory_space<smem>>
    %411 = vector.broadcast %410 : f32 to vector<8x128xf32>
    %412 = arith.mulf %411, %401 : vector<8x128xf32>
    %413 = arith.addf %329, %412 : vector<8x128xf32>
    %c100 = arith.constant 100 : index
    %414 = memref.load %arg4[%c100] : memref<512xf32, #tpu.memory_space<smem>>
    %415 = vector.broadcast %414 : f32 to vector<8x128xf32>
    %416 = arith.mulf %415, %401 : vector<8x128xf32>
    %417 = arith.addf %333, %416 : vector<8x128xf32>
    %c132 = arith.constant 132 : index
    %418 = memref.load %arg4[%c132] : memref<512xf32, #tpu.memory_space<smem>>
    %419 = vector.broadcast %418 : f32 to vector<8x128xf32>
    %420 = arith.mulf %419, %401 : vector<8x128xf32>
    %421 = arith.addf %337, %420 : vector<8x128xf32>
    %c164 = arith.constant 164 : index
    %422 = memref.load %arg4[%c164] : memref<512xf32, #tpu.memory_space<smem>>
    %423 = vector.broadcast %422 : f32 to vector<8x128xf32>
    %424 = arith.mulf %423, %401 : vector<8x128xf32>
    %425 = arith.addf %341, %424 : vector<8x128xf32>
    %c196 = arith.constant 196 : index
    %426 = memref.load %arg4[%c196] : memref<512xf32, #tpu.memory_space<smem>>
    %427 = vector.broadcast %426 : f32 to vector<8x128xf32>
    %428 = arith.mulf %427, %401 : vector<8x128xf32>
    %429 = arith.addf %345, %428 : vector<8x128xf32>
    %c228 = arith.constant 228 : index
    %430 = memref.load %arg4[%c228] : memref<512xf32, #tpu.memory_space<smem>>
    %431 = vector.broadcast %430 : f32 to vector<8x128xf32>
    %432 = arith.mulf %431, %401 : vector<8x128xf32>
    %433 = arith.addf %349, %432 : vector<8x128xf32>
    %c260 = arith.constant 260 : index
    %434 = memref.load %arg4[%c260] : memref<512xf32, #tpu.memory_space<smem>>
    %435 = vector.broadcast %434 : f32 to vector<8x128xf32>
    %436 = arith.mulf %435, %401 : vector<8x128xf32>
    %437 = arith.addf %353, %436 : vector<8x128xf32>
    %c292 = arith.constant 292 : index
    %438 = memref.load %arg4[%c292] : memref<512xf32, #tpu.memory_space<smem>>
    %439 = vector.broadcast %438 : f32 to vector<8x128xf32>
    %440 = arith.mulf %439, %401 : vector<8x128xf32>
    %441 = arith.addf %357, %440 : vector<8x128xf32>
    %c324 = arith.constant 324 : index
    %442 = memref.load %arg4[%c324] : memref<512xf32, #tpu.memory_space<smem>>
    %443 = vector.broadcast %442 : f32 to vector<8x128xf32>
    %444 = arith.mulf %443, %401 : vector<8x128xf32>
    %445 = arith.addf %361, %444 : vector<8x128xf32>
    %c356 = arith.constant 356 : index
    %446 = memref.load %arg4[%c356] : memref<512xf32, #tpu.memory_space<smem>>
    %447 = vector.broadcast %446 : f32 to vector<8x128xf32>
    %448 = arith.mulf %447, %401 : vector<8x128xf32>
    %449 = arith.addf %365, %448 : vector<8x128xf32>
    %c388 = arith.constant 388 : index
    %450 = memref.load %arg4[%c388] : memref<512xf32, #tpu.memory_space<smem>>
    %451 = vector.broadcast %450 : f32 to vector<8x128xf32>
    %452 = arith.mulf %451, %401 : vector<8x128xf32>
    %453 = arith.addf %369, %452 : vector<8x128xf32>
    %c420 = arith.constant 420 : index
    %454 = memref.load %arg4[%c420] : memref<512xf32, #tpu.memory_space<smem>>
    %455 = vector.broadcast %454 : f32 to vector<8x128xf32>
    %456 = arith.mulf %455, %401 : vector<8x128xf32>
    %457 = arith.addf %373, %456 : vector<8x128xf32>
    %c452 = arith.constant 452 : index
    %458 = memref.load %arg4[%c452] : memref<512xf32, #tpu.memory_space<smem>>
    %459 = vector.broadcast %458 : f32 to vector<8x128xf32>
    %460 = arith.mulf %459, %401 : vector<8x128xf32>
    %461 = arith.addf %377, %460 : vector<8x128xf32>
    %c484 = arith.constant 484 : index
    %462 = memref.load %arg4[%c484] : memref<512xf32, #tpu.memory_space<smem>>
    %463 = vector.broadcast %462 : f32 to vector<8x128xf32>
    %464 = arith.mulf %463, %401 : vector<8x128xf32>
    %465 = arith.addf %381, %464 : vector<8x128xf32>
    %c5_43 = arith.constant 5 : index
    %466 = memref.load %arg3[%c5_43] : memref<32xf32, #tpu.memory_space<smem>>
    %467 = vector.broadcast %466 : f32 to vector<8x128xf32>
    %c20 = arith.constant 20 : index
    %468 = memref.load %arg2[%c20] : memref<128xf32, #tpu.memory_space<smem>>
    %469 = vector.broadcast %468 : f32 to vector<8x128xf32>
    %470 = arith.mulf %469, %4 : vector<8x128xf32>
    %471 = arith.addf %467, %470 : vector<8x128xf32>
    %c21 = arith.constant 21 : index
    %472 = memref.load %arg2[%c21] : memref<128xf32, #tpu.memory_space<smem>>
    %473 = vector.broadcast %472 : f32 to vector<8x128xf32>
    %474 = arith.mulf %473, %7 : vector<8x128xf32>
    %475 = arith.addf %471, %474 : vector<8x128xf32>
    %c22 = arith.constant 22 : index
    %476 = memref.load %arg2[%c22] : memref<128xf32, #tpu.memory_space<smem>>
    %477 = vector.broadcast %476 : f32 to vector<8x128xf32>
    %478 = arith.mulf %477, %10 : vector<8x128xf32>
    %479 = arith.addf %475, %478 : vector<8x128xf32>
    %c23 = arith.constant 23 : index
    %480 = memref.load %arg2[%c23] : memref<128xf32, #tpu.memory_space<smem>>
    %481 = vector.broadcast %480 : f32 to vector<8x128xf32>
    %482 = arith.mulf %481, %13 : vector<8x128xf32>
    %483 = arith.addf %479, %482 : vector<8x128xf32>
    %cst_44 = arith.constant 0.000000e+00 : f32
    %484 = vector.broadcast %cst_44 : f32 to vector<8x128xf32>
    %485 = arith.maximumf %483, %484 : vector<8x128xf32>
    %c5_45 = arith.constant 5 : index
    %486 = memref.load %arg4[%c5_45] : memref<512xf32, #tpu.memory_space<smem>>
    %487 = vector.broadcast %486 : f32 to vector<8x128xf32>
    %488 = arith.mulf %487, %485 : vector<8x128xf32>
    %489 = arith.addf %405, %488 : vector<8x128xf32>
    %c37 = arith.constant 37 : index
    %490 = memref.load %arg4[%c37] : memref<512xf32, #tpu.memory_space<smem>>
    %491 = vector.broadcast %490 : f32 to vector<8x128xf32>
    %492 = arith.mulf %491, %485 : vector<8x128xf32>
    %493 = arith.addf %409, %492 : vector<8x128xf32>
    %c69 = arith.constant 69 : index
    %494 = memref.load %arg4[%c69] : memref<512xf32, #tpu.memory_space<smem>>
    %495 = vector.broadcast %494 : f32 to vector<8x128xf32>
    %496 = arith.mulf %495, %485 : vector<8x128xf32>
    %497 = arith.addf %413, %496 : vector<8x128xf32>
    %c101 = arith.constant 101 : index
    %498 = memref.load %arg4[%c101] : memref<512xf32, #tpu.memory_space<smem>>
    %499 = vector.broadcast %498 : f32 to vector<8x128xf32>
    %500 = arith.mulf %499, %485 : vector<8x128xf32>
    %501 = arith.addf %417, %500 : vector<8x128xf32>
    %c133 = arith.constant 133 : index
    %502 = memref.load %arg4[%c133] : memref<512xf32, #tpu.memory_space<smem>>
    %503 = vector.broadcast %502 : f32 to vector<8x128xf32>
    %504 = arith.mulf %503, %485 : vector<8x128xf32>
    %505 = arith.addf %421, %504 : vector<8x128xf32>
    %c165 = arith.constant 165 : index
    %506 = memref.load %arg4[%c165] : memref<512xf32, #tpu.memory_space<smem>>
    %507 = vector.broadcast %506 : f32 to vector<8x128xf32>
    %508 = arith.mulf %507, %485 : vector<8x128xf32>
    %509 = arith.addf %425, %508 : vector<8x128xf32>
    %c197 = arith.constant 197 : index
    %510 = memref.load %arg4[%c197] : memref<512xf32, #tpu.memory_space<smem>>
    %511 = vector.broadcast %510 : f32 to vector<8x128xf32>
    %512 = arith.mulf %511, %485 : vector<8x128xf32>
    %513 = arith.addf %429, %512 : vector<8x128xf32>
    %c229 = arith.constant 229 : index
    %514 = memref.load %arg4[%c229] : memref<512xf32, #tpu.memory_space<smem>>
    %515 = vector.broadcast %514 : f32 to vector<8x128xf32>
    %516 = arith.mulf %515, %485 : vector<8x128xf32>
    %517 = arith.addf %433, %516 : vector<8x128xf32>
    %c261 = arith.constant 261 : index
    %518 = memref.load %arg4[%c261] : memref<512xf32, #tpu.memory_space<smem>>
    %519 = vector.broadcast %518 : f32 to vector<8x128xf32>
    %520 = arith.mulf %519, %485 : vector<8x128xf32>
    %521 = arith.addf %437, %520 : vector<8x128xf32>
    %c293 = arith.constant 293 : index
    %522 = memref.load %arg4[%c293] : memref<512xf32, #tpu.memory_space<smem>>
    %523 = vector.broadcast %522 : f32 to vector<8x128xf32>
    %524 = arith.mulf %523, %485 : vector<8x128xf32>
    %525 = arith.addf %441, %524 : vector<8x128xf32>
    %c325 = arith.constant 325 : index
    %526 = memref.load %arg4[%c325] : memref<512xf32, #tpu.memory_space<smem>>
    %527 = vector.broadcast %526 : f32 to vector<8x128xf32>
    %528 = arith.mulf %527, %485 : vector<8x128xf32>
    %529 = arith.addf %445, %528 : vector<8x128xf32>
    %c357 = arith.constant 357 : index
    %530 = memref.load %arg4[%c357] : memref<512xf32, #tpu.memory_space<smem>>
    %531 = vector.broadcast %530 : f32 to vector<8x128xf32>
    %532 = arith.mulf %531, %485 : vector<8x128xf32>
    %533 = arith.addf %449, %532 : vector<8x128xf32>
    %c389 = arith.constant 389 : index
    %534 = memref.load %arg4[%c389] : memref<512xf32, #tpu.memory_space<smem>>
    %535 = vector.broadcast %534 : f32 to vector<8x128xf32>
    %536 = arith.mulf %535, %485 : vector<8x128xf32>
    %537 = arith.addf %453, %536 : vector<8x128xf32>
    %c421 = arith.constant 421 : index
    %538 = memref.load %arg4[%c421] : memref<512xf32, #tpu.memory_space<smem>>
    %539 = vector.broadcast %538 : f32 to vector<8x128xf32>
    %540 = arith.mulf %539, %485 : vector<8x128xf32>
    %541 = arith.addf %457, %540 : vector<8x128xf32>
    %c453 = arith.constant 453 : index
    %542 = memref.load %arg4[%c453] : memref<512xf32, #tpu.memory_space<smem>>
    %543 = vector.broadcast %542 : f32 to vector<8x128xf32>
    %544 = arith.mulf %543, %485 : vector<8x128xf32>
    %545 = arith.addf %461, %544 : vector<8x128xf32>
    %c485 = arith.constant 485 : index
    %546 = memref.load %arg4[%c485] : memref<512xf32, #tpu.memory_space<smem>>
    %547 = vector.broadcast %546 : f32 to vector<8x128xf32>
    %548 = arith.mulf %547, %485 : vector<8x128xf32>
    %549 = arith.addf %465, %548 : vector<8x128xf32>
    %c6_46 = arith.constant 6 : index
    %550 = memref.load %arg3[%c6_46] : memref<32xf32, #tpu.memory_space<smem>>
    %551 = vector.broadcast %550 : f32 to vector<8x128xf32>
    %c24 = arith.constant 24 : index
    %552 = memref.load %arg2[%c24] : memref<128xf32, #tpu.memory_space<smem>>
    %553 = vector.broadcast %552 : f32 to vector<8x128xf32>
    %554 = arith.mulf %553, %4 : vector<8x128xf32>
    %555 = arith.addf %551, %554 : vector<8x128xf32>
    %c25 = arith.constant 25 : index
    %556 = memref.load %arg2[%c25] : memref<128xf32, #tpu.memory_space<smem>>
    %557 = vector.broadcast %556 : f32 to vector<8x128xf32>
    %558 = arith.mulf %557, %7 : vector<8x128xf32>
    %559 = arith.addf %555, %558 : vector<8x128xf32>
    %c26 = arith.constant 26 : index
    %560 = memref.load %arg2[%c26] : memref<128xf32, #tpu.memory_space<smem>>
    %561 = vector.broadcast %560 : f32 to vector<8x128xf32>
    %562 = arith.mulf %561, %10 : vector<8x128xf32>
    %563 = arith.addf %559, %562 : vector<8x128xf32>
    %c27 = arith.constant 27 : index
    %564 = memref.load %arg2[%c27] : memref<128xf32, #tpu.memory_space<smem>>
    %565 = vector.broadcast %564 : f32 to vector<8x128xf32>
    %566 = arith.mulf %565, %13 : vector<8x128xf32>
    %567 = arith.addf %563, %566 : vector<8x128xf32>
    %cst_47 = arith.constant 0.000000e+00 : f32
    %568 = vector.broadcast %cst_47 : f32 to vector<8x128xf32>
    %569 = arith.maximumf %567, %568 : vector<8x128xf32>
    %c6_48 = arith.constant 6 : index
    %570 = memref.load %arg4[%c6_48] : memref<512xf32, #tpu.memory_space<smem>>
    %571 = vector.broadcast %570 : f32 to vector<8x128xf32>
    %572 = arith.mulf %571, %569 : vector<8x128xf32>
    %573 = arith.addf %489, %572 : vector<8x128xf32>
    %c38 = arith.constant 38 : index
    %574 = memref.load %arg4[%c38] : memref<512xf32, #tpu.memory_space<smem>>
    %575 = vector.broadcast %574 : f32 to vector<8x128xf32>
    %576 = arith.mulf %575, %569 : vector<8x128xf32>
    %577 = arith.addf %493, %576 : vector<8x128xf32>
    %c70 = arith.constant 70 : index
    %578 = memref.load %arg4[%c70] : memref<512xf32, #tpu.memory_space<smem>>
    %579 = vector.broadcast %578 : f32 to vector<8x128xf32>
    %580 = arith.mulf %579, %569 : vector<8x128xf32>
    %581 = arith.addf %497, %580 : vector<8x128xf32>
    %c102 = arith.constant 102 : index
    %582 = memref.load %arg4[%c102] : memref<512xf32, #tpu.memory_space<smem>>
    %583 = vector.broadcast %582 : f32 to vector<8x128xf32>
    %584 = arith.mulf %583, %569 : vector<8x128xf32>
    %585 = arith.addf %501, %584 : vector<8x128xf32>
    %c134 = arith.constant 134 : index
    %586 = memref.load %arg4[%c134] : memref<512xf32, #tpu.memory_space<smem>>
    %587 = vector.broadcast %586 : f32 to vector<8x128xf32>
    %588 = arith.mulf %587, %569 : vector<8x128xf32>
    %589 = arith.addf %505, %588 : vector<8x128xf32>
    %c166 = arith.constant 166 : index
    %590 = memref.load %arg4[%c166] : memref<512xf32, #tpu.memory_space<smem>>
    %591 = vector.broadcast %590 : f32 to vector<8x128xf32>
    %592 = arith.mulf %591, %569 : vector<8x128xf32>
    %593 = arith.addf %509, %592 : vector<8x128xf32>
    %c198 = arith.constant 198 : index
    %594 = memref.load %arg4[%c198] : memref<512xf32, #tpu.memory_space<smem>>
    %595 = vector.broadcast %594 : f32 to vector<8x128xf32>
    %596 = arith.mulf %595, %569 : vector<8x128xf32>
    %597 = arith.addf %513, %596 : vector<8x128xf32>
    %c230 = arith.constant 230 : index
    %598 = memref.load %arg4[%c230] : memref<512xf32, #tpu.memory_space<smem>>
    %599 = vector.broadcast %598 : f32 to vector<8x128xf32>
    %600 = arith.mulf %599, %569 : vector<8x128xf32>
    %601 = arith.addf %517, %600 : vector<8x128xf32>
    %c262 = arith.constant 262 : index
    %602 = memref.load %arg4[%c262] : memref<512xf32, #tpu.memory_space<smem>>
    %603 = vector.broadcast %602 : f32 to vector<8x128xf32>
    %604 = arith.mulf %603, %569 : vector<8x128xf32>
    %605 = arith.addf %521, %604 : vector<8x128xf32>
    %c294 = arith.constant 294 : index
    %606 = memref.load %arg4[%c294] : memref<512xf32, #tpu.memory_space<smem>>
    %607 = vector.broadcast %606 : f32 to vector<8x128xf32>
    %608 = arith.mulf %607, %569 : vector<8x128xf32>
    %609 = arith.addf %525, %608 : vector<8x128xf32>
    %c326 = arith.constant 326 : index
    %610 = memref.load %arg4[%c326] : memref<512xf32, #tpu.memory_space<smem>>
    %611 = vector.broadcast %610 : f32 to vector<8x128xf32>
    %612 = arith.mulf %611, %569 : vector<8x128xf32>
    %613 = arith.addf %529, %612 : vector<8x128xf32>
    %c358 = arith.constant 358 : index
    %614 = memref.load %arg4[%c358] : memref<512xf32, #tpu.memory_space<smem>>
    %615 = vector.broadcast %614 : f32 to vector<8x128xf32>
    %616 = arith.mulf %615, %569 : vector<8x128xf32>
    %617 = arith.addf %533, %616 : vector<8x128xf32>
    %c390 = arith.constant 390 : index
    %618 = memref.load %arg4[%c390] : memref<512xf32, #tpu.memory_space<smem>>
    %619 = vector.broadcast %618 : f32 to vector<8x128xf32>
    %620 = arith.mulf %619, %569 : vector<8x128xf32>
    %621 = arith.addf %537, %620 : vector<8x128xf32>
    %c422 = arith.constant 422 : index
    %622 = memref.load %arg4[%c422] : memref<512xf32, #tpu.memory_space<smem>>
    %623 = vector.broadcast %622 : f32 to vector<8x128xf32>
    %624 = arith.mulf %623, %569 : vector<8x128xf32>
    %625 = arith.addf %541, %624 : vector<8x128xf32>
    %c454 = arith.constant 454 : index
    %626 = memref.load %arg4[%c454] : memref<512xf32, #tpu.memory_space<smem>>
    %627 = vector.broadcast %626 : f32 to vector<8x128xf32>
    %628 = arith.mulf %627, %569 : vector<8x128xf32>
    %629 = arith.addf %545, %628 : vector<8x128xf32>
    %c486 = arith.constant 486 : index
    %630 = memref.load %arg4[%c486] : memref<512xf32, #tpu.memory_space<smem>>
    %631 = vector.broadcast %630 : f32 to vector<8x128xf32>
    %632 = arith.mulf %631, %569 : vector<8x128xf32>
    %633 = arith.addf %549, %632 : vector<8x128xf32>
    %c7_49 = arith.constant 7 : index
    %634 = memref.load %arg3[%c7_49] : memref<32xf32, #tpu.memory_space<smem>>
    %635 = vector.broadcast %634 : f32 to vector<8x128xf32>
    %c28 = arith.constant 28 : index
    %636 = memref.load %arg2[%c28] : memref<128xf32, #tpu.memory_space<smem>>
    %637 = vector.broadcast %636 : f32 to vector<8x128xf32>
    %638 = arith.mulf %637, %4 : vector<8x128xf32>
    %639 = arith.addf %635, %638 : vector<8x128xf32>
    %c29 = arith.constant 29 : index
    %640 = memref.load %arg2[%c29] : memref<128xf32, #tpu.memory_space<smem>>
    %641 = vector.broadcast %640 : f32 to vector<8x128xf32>
    %642 = arith.mulf %641, %7 : vector<8x128xf32>
    %643 = arith.addf %639, %642 : vector<8x128xf32>
    %c30 = arith.constant 30 : index
    %644 = memref.load %arg2[%c30] : memref<128xf32, #tpu.memory_space<smem>>
    %645 = vector.broadcast %644 : f32 to vector<8x128xf32>
    %646 = arith.mulf %645, %10 : vector<8x128xf32>
    %647 = arith.addf %643, %646 : vector<8x128xf32>
    %c31 = arith.constant 31 : index
    %648 = memref.load %arg2[%c31] : memref<128xf32, #tpu.memory_space<smem>>
    %649 = vector.broadcast %648 : f32 to vector<8x128xf32>
    %650 = arith.mulf %649, %13 : vector<8x128xf32>
    %651 = arith.addf %647, %650 : vector<8x128xf32>
    %cst_50 = arith.constant 0.000000e+00 : f32
    %652 = vector.broadcast %cst_50 : f32 to vector<8x128xf32>
    %653 = arith.maximumf %651, %652 : vector<8x128xf32>
    %c7_51 = arith.constant 7 : index
    %654 = memref.load %arg4[%c7_51] : memref<512xf32, #tpu.memory_space<smem>>
    %655 = vector.broadcast %654 : f32 to vector<8x128xf32>
    %656 = arith.mulf %655, %653 : vector<8x128xf32>
    %657 = arith.addf %573, %656 : vector<8x128xf32>
    %c39 = arith.constant 39 : index
    %658 = memref.load %arg4[%c39] : memref<512xf32, #tpu.memory_space<smem>>
    %659 = vector.broadcast %658 : f32 to vector<8x128xf32>
    %660 = arith.mulf %659, %653 : vector<8x128xf32>
    %661 = arith.addf %577, %660 : vector<8x128xf32>
    %c71 = arith.constant 71 : index
    %662 = memref.load %arg4[%c71] : memref<512xf32, #tpu.memory_space<smem>>
    %663 = vector.broadcast %662 : f32 to vector<8x128xf32>
    %664 = arith.mulf %663, %653 : vector<8x128xf32>
    %665 = arith.addf %581, %664 : vector<8x128xf32>
    %c103 = arith.constant 103 : index
    %666 = memref.load %arg4[%c103] : memref<512xf32, #tpu.memory_space<smem>>
    %667 = vector.broadcast %666 : f32 to vector<8x128xf32>
    %668 = arith.mulf %667, %653 : vector<8x128xf32>
    %669 = arith.addf %585, %668 : vector<8x128xf32>
    %c135 = arith.constant 135 : index
    %670 = memref.load %arg4[%c135] : memref<512xf32, #tpu.memory_space<smem>>
    %671 = vector.broadcast %670 : f32 to vector<8x128xf32>
    %672 = arith.mulf %671, %653 : vector<8x128xf32>
    %673 = arith.addf %589, %672 : vector<8x128xf32>
    %c167 = arith.constant 167 : index
    %674 = memref.load %arg4[%c167] : memref<512xf32, #tpu.memory_space<smem>>
    %675 = vector.broadcast %674 : f32 to vector<8x128xf32>
    %676 = arith.mulf %675, %653 : vector<8x128xf32>
    %677 = arith.addf %593, %676 : vector<8x128xf32>
    %c199 = arith.constant 199 : index
    %678 = memref.load %arg4[%c199] : memref<512xf32, #tpu.memory_space<smem>>
    %679 = vector.broadcast %678 : f32 to vector<8x128xf32>
    %680 = arith.mulf %679, %653 : vector<8x128xf32>
    %681 = arith.addf %597, %680 : vector<8x128xf32>
    %c231 = arith.constant 231 : index
    %682 = memref.load %arg4[%c231] : memref<512xf32, #tpu.memory_space<smem>>
    %683 = vector.broadcast %682 : f32 to vector<8x128xf32>
    %684 = arith.mulf %683, %653 : vector<8x128xf32>
    %685 = arith.addf %601, %684 : vector<8x128xf32>
    %c263 = arith.constant 263 : index
    %686 = memref.load %arg4[%c263] : memref<512xf32, #tpu.memory_space<smem>>
    %687 = vector.broadcast %686 : f32 to vector<8x128xf32>
    %688 = arith.mulf %687, %653 : vector<8x128xf32>
    %689 = arith.addf %605, %688 : vector<8x128xf32>
    %c295 = arith.constant 295 : index
    %690 = memref.load %arg4[%c295] : memref<512xf32, #tpu.memory_space<smem>>
    %691 = vector.broadcast %690 : f32 to vector<8x128xf32>
    %692 = arith.mulf %691, %653 : vector<8x128xf32>
    %693 = arith.addf %609, %692 : vector<8x128xf32>
    %c327 = arith.constant 327 : index
    %694 = memref.load %arg4[%c327] : memref<512xf32, #tpu.memory_space<smem>>
    %695 = vector.broadcast %694 : f32 to vector<8x128xf32>
    %696 = arith.mulf %695, %653 : vector<8x128xf32>
    %697 = arith.addf %613, %696 : vector<8x128xf32>
    %c359 = arith.constant 359 : index
    %698 = memref.load %arg4[%c359] : memref<512xf32, #tpu.memory_space<smem>>
    %699 = vector.broadcast %698 : f32 to vector<8x128xf32>
    %700 = arith.mulf %699, %653 : vector<8x128xf32>
    %701 = arith.addf %617, %700 : vector<8x128xf32>
    %c391 = arith.constant 391 : index
    %702 = memref.load %arg4[%c391] : memref<512xf32, #tpu.memory_space<smem>>
    %703 = vector.broadcast %702 : f32 to vector<8x128xf32>
    %704 = arith.mulf %703, %653 : vector<8x128xf32>
    %705 = arith.addf %621, %704 : vector<8x128xf32>
    %c423 = arith.constant 423 : index
    %706 = memref.load %arg4[%c423] : memref<512xf32, #tpu.memory_space<smem>>
    %707 = vector.broadcast %706 : f32 to vector<8x128xf32>
    %708 = arith.mulf %707, %653 : vector<8x128xf32>
    %709 = arith.addf %625, %708 : vector<8x128xf32>
    %c455 = arith.constant 455 : index
    %710 = memref.load %arg4[%c455] : memref<512xf32, #tpu.memory_space<smem>>
    %711 = vector.broadcast %710 : f32 to vector<8x128xf32>
    %712 = arith.mulf %711, %653 : vector<8x128xf32>
    %713 = arith.addf %629, %712 : vector<8x128xf32>
    %c487 = arith.constant 487 : index
    %714 = memref.load %arg4[%c487] : memref<512xf32, #tpu.memory_space<smem>>
    %715 = vector.broadcast %714 : f32 to vector<8x128xf32>
    %716 = arith.mulf %715, %653 : vector<8x128xf32>
    %717 = arith.addf %633, %716 : vector<8x128xf32>
    %c8_52 = arith.constant 8 : index
    %718 = memref.load %arg3[%c8_52] : memref<32xf32, #tpu.memory_space<smem>>
    %719 = vector.broadcast %718 : f32 to vector<8x128xf32>
    %c32_53 = arith.constant 32 : index
    %720 = memref.load %arg2[%c32_53] : memref<128xf32, #tpu.memory_space<smem>>
    %721 = vector.broadcast %720 : f32 to vector<8x128xf32>
    %722 = arith.mulf %721, %4 : vector<8x128xf32>
    %723 = arith.addf %719, %722 : vector<8x128xf32>
    %c33_54 = arith.constant 33 : index
    %724 = memref.load %arg2[%c33_54] : memref<128xf32, #tpu.memory_space<smem>>
    %725 = vector.broadcast %724 : f32 to vector<8x128xf32>
    %726 = arith.mulf %725, %7 : vector<8x128xf32>
    %727 = arith.addf %723, %726 : vector<8x128xf32>
    %c34_55 = arith.constant 34 : index
    %728 = memref.load %arg2[%c34_55] : memref<128xf32, #tpu.memory_space<smem>>
    %729 = vector.broadcast %728 : f32 to vector<8x128xf32>
    %730 = arith.mulf %729, %10 : vector<8x128xf32>
    %731 = arith.addf %727, %730 : vector<8x128xf32>
    %c35_56 = arith.constant 35 : index
    %732 = memref.load %arg2[%c35_56] : memref<128xf32, #tpu.memory_space<smem>>
    %733 = vector.broadcast %732 : f32 to vector<8x128xf32>
    %734 = arith.mulf %733, %13 : vector<8x128xf32>
    %735 = arith.addf %731, %734 : vector<8x128xf32>
    %cst_57 = arith.constant 0.000000e+00 : f32
    %736 = vector.broadcast %cst_57 : f32 to vector<8x128xf32>
    %737 = arith.maximumf %735, %736 : vector<8x128xf32>
    %c8_58 = arith.constant 8 : index
    %738 = memref.load %arg4[%c8_58] : memref<512xf32, #tpu.memory_space<smem>>
    %739 = vector.broadcast %738 : f32 to vector<8x128xf32>
    %740 = arith.mulf %739, %737 : vector<8x128xf32>
    %741 = arith.addf %657, %740 : vector<8x128xf32>
    %c40 = arith.constant 40 : index
    %742 = memref.load %arg4[%c40] : memref<512xf32, #tpu.memory_space<smem>>
    %743 = vector.broadcast %742 : f32 to vector<8x128xf32>
    %744 = arith.mulf %743, %737 : vector<8x128xf32>
    %745 = arith.addf %661, %744 : vector<8x128xf32>
    %c72 = arith.constant 72 : index
    %746 = memref.load %arg4[%c72] : memref<512xf32, #tpu.memory_space<smem>>
    %747 = vector.broadcast %746 : f32 to vector<8x128xf32>
    %748 = arith.mulf %747, %737 : vector<8x128xf32>
    %749 = arith.addf %665, %748 : vector<8x128xf32>
    %c104 = arith.constant 104 : index
    %750 = memref.load %arg4[%c104] : memref<512xf32, #tpu.memory_space<smem>>
    %751 = vector.broadcast %750 : f32 to vector<8x128xf32>
    %752 = arith.mulf %751, %737 : vector<8x128xf32>
    %753 = arith.addf %669, %752 : vector<8x128xf32>
    %c136 = arith.constant 136 : index
    %754 = memref.load %arg4[%c136] : memref<512xf32, #tpu.memory_space<smem>>
    %755 = vector.broadcast %754 : f32 to vector<8x128xf32>
    %756 = arith.mulf %755, %737 : vector<8x128xf32>
    %757 = arith.addf %673, %756 : vector<8x128xf32>
    %c168 = arith.constant 168 : index
    %758 = memref.load %arg4[%c168] : memref<512xf32, #tpu.memory_space<smem>>
    %759 = vector.broadcast %758 : f32 to vector<8x128xf32>
    %760 = arith.mulf %759, %737 : vector<8x128xf32>
    %761 = arith.addf %677, %760 : vector<8x128xf32>
    %c200 = arith.constant 200 : index
    %762 = memref.load %arg4[%c200] : memref<512xf32, #tpu.memory_space<smem>>
    %763 = vector.broadcast %762 : f32 to vector<8x128xf32>
    %764 = arith.mulf %763, %737 : vector<8x128xf32>
    %765 = arith.addf %681, %764 : vector<8x128xf32>
    %c232 = arith.constant 232 : index
    %766 = memref.load %arg4[%c232] : memref<512xf32, #tpu.memory_space<smem>>
    %767 = vector.broadcast %766 : f32 to vector<8x128xf32>
    %768 = arith.mulf %767, %737 : vector<8x128xf32>
    %769 = arith.addf %685, %768 : vector<8x128xf32>
    %c264 = arith.constant 264 : index
    %770 = memref.load %arg4[%c264] : memref<512xf32, #tpu.memory_space<smem>>
    %771 = vector.broadcast %770 : f32 to vector<8x128xf32>
    %772 = arith.mulf %771, %737 : vector<8x128xf32>
    %773 = arith.addf %689, %772 : vector<8x128xf32>
    %c296 = arith.constant 296 : index
    %774 = memref.load %arg4[%c296] : memref<512xf32, #tpu.memory_space<smem>>
    %775 = vector.broadcast %774 : f32 to vector<8x128xf32>
    %776 = arith.mulf %775, %737 : vector<8x128xf32>
    %777 = arith.addf %693, %776 : vector<8x128xf32>
    %c328 = arith.constant 328 : index
    %778 = memref.load %arg4[%c328] : memref<512xf32, #tpu.memory_space<smem>>
    %779 = vector.broadcast %778 : f32 to vector<8x128xf32>
    %780 = arith.mulf %779, %737 : vector<8x128xf32>
    %781 = arith.addf %697, %780 : vector<8x128xf32>
    %c360 = arith.constant 360 : index
    %782 = memref.load %arg4[%c360] : memref<512xf32, #tpu.memory_space<smem>>
    %783 = vector.broadcast %782 : f32 to vector<8x128xf32>
    %784 = arith.mulf %783, %737 : vector<8x128xf32>
    %785 = arith.addf %701, %784 : vector<8x128xf32>
    %c392 = arith.constant 392 : index
    %786 = memref.load %arg4[%c392] : memref<512xf32, #tpu.memory_space<smem>>
    %787 = vector.broadcast %786 : f32 to vector<8x128xf32>
    %788 = arith.mulf %787, %737 : vector<8x128xf32>
    %789 = arith.addf %705, %788 : vector<8x128xf32>
    %c424 = arith.constant 424 : index
    %790 = memref.load %arg4[%c424] : memref<512xf32, #tpu.memory_space<smem>>
    %791 = vector.broadcast %790 : f32 to vector<8x128xf32>
    %792 = arith.mulf %791, %737 : vector<8x128xf32>
    %793 = arith.addf %709, %792 : vector<8x128xf32>
    %c456 = arith.constant 456 : index
    %794 = memref.load %arg4[%c456] : memref<512xf32, #tpu.memory_space<smem>>
    %795 = vector.broadcast %794 : f32 to vector<8x128xf32>
    %796 = arith.mulf %795, %737 : vector<8x128xf32>
    %797 = arith.addf %713, %796 : vector<8x128xf32>
    %c488 = arith.constant 488 : index
    %798 = memref.load %arg4[%c488] : memref<512xf32, #tpu.memory_space<smem>>
    %799 = vector.broadcast %798 : f32 to vector<8x128xf32>
    %800 = arith.mulf %799, %737 : vector<8x128xf32>
    %801 = arith.addf %717, %800 : vector<8x128xf32>
    %c9_59 = arith.constant 9 : index
    %802 = memref.load %arg3[%c9_59] : memref<32xf32, #tpu.memory_space<smem>>
    %803 = vector.broadcast %802 : f32 to vector<8x128xf32>
    %c36_60 = arith.constant 36 : index
    %804 = memref.load %arg2[%c36_60] : memref<128xf32, #tpu.memory_space<smem>>
    %805 = vector.broadcast %804 : f32 to vector<8x128xf32>
    %806 = arith.mulf %805, %4 : vector<8x128xf32>
    %807 = arith.addf %803, %806 : vector<8x128xf32>
    %c37_61 = arith.constant 37 : index
    %808 = memref.load %arg2[%c37_61] : memref<128xf32, #tpu.memory_space<smem>>
    %809 = vector.broadcast %808 : f32 to vector<8x128xf32>
    %810 = arith.mulf %809, %7 : vector<8x128xf32>
    %811 = arith.addf %807, %810 : vector<8x128xf32>
    %c38_62 = arith.constant 38 : index
    %812 = memref.load %arg2[%c38_62] : memref<128xf32, #tpu.memory_space<smem>>
    %813 = vector.broadcast %812 : f32 to vector<8x128xf32>
    %814 = arith.mulf %813, %10 : vector<8x128xf32>
    %815 = arith.addf %811, %814 : vector<8x128xf32>
    %c39_63 = arith.constant 39 : index
    %816 = memref.load %arg2[%c39_63] : memref<128xf32, #tpu.memory_space<smem>>
    %817 = vector.broadcast %816 : f32 to vector<8x128xf32>
    %818 = arith.mulf %817, %13 : vector<8x128xf32>
    %819 = arith.addf %815, %818 : vector<8x128xf32>
    %cst_64 = arith.constant 0.000000e+00 : f32
    %820 = vector.broadcast %cst_64 : f32 to vector<8x128xf32>
    %821 = arith.maximumf %819, %820 : vector<8x128xf32>
    %c9_65 = arith.constant 9 : index
    %822 = memref.load %arg4[%c9_65] : memref<512xf32, #tpu.memory_space<smem>>
    %823 = vector.broadcast %822 : f32 to vector<8x128xf32>
    %824 = arith.mulf %823, %821 : vector<8x128xf32>
    %825 = arith.addf %741, %824 : vector<8x128xf32>
    %c41 = arith.constant 41 : index
    %826 = memref.load %arg4[%c41] : memref<512xf32, #tpu.memory_space<smem>>
    %827 = vector.broadcast %826 : f32 to vector<8x128xf32>
    %828 = arith.mulf %827, %821 : vector<8x128xf32>
    %829 = arith.addf %745, %828 : vector<8x128xf32>
    %c73 = arith.constant 73 : index
    %830 = memref.load %arg4[%c73] : memref<512xf32, #tpu.memory_space<smem>>
    %831 = vector.broadcast %830 : f32 to vector<8x128xf32>
    %832 = arith.mulf %831, %821 : vector<8x128xf32>
    %833 = arith.addf %749, %832 : vector<8x128xf32>
    %c105 = arith.constant 105 : index
    %834 = memref.load %arg4[%c105] : memref<512xf32, #tpu.memory_space<smem>>
    %835 = vector.broadcast %834 : f32 to vector<8x128xf32>
    %836 = arith.mulf %835, %821 : vector<8x128xf32>
    %837 = arith.addf %753, %836 : vector<8x128xf32>
    %c137 = arith.constant 137 : index
    %838 = memref.load %arg4[%c137] : memref<512xf32, #tpu.memory_space<smem>>
    %839 = vector.broadcast %838 : f32 to vector<8x128xf32>
    %840 = arith.mulf %839, %821 : vector<8x128xf32>
    %841 = arith.addf %757, %840 : vector<8x128xf32>
    %c169 = arith.constant 169 : index
    %842 = memref.load %arg4[%c169] : memref<512xf32, #tpu.memory_space<smem>>
    %843 = vector.broadcast %842 : f32 to vector<8x128xf32>
    %844 = arith.mulf %843, %821 : vector<8x128xf32>
    %845 = arith.addf %761, %844 : vector<8x128xf32>
    %c201 = arith.constant 201 : index
    %846 = memref.load %arg4[%c201] : memref<512xf32, #tpu.memory_space<smem>>
    %847 = vector.broadcast %846 : f32 to vector<8x128xf32>
    %848 = arith.mulf %847, %821 : vector<8x128xf32>
    %849 = arith.addf %765, %848 : vector<8x128xf32>
    %c233 = arith.constant 233 : index
    %850 = memref.load %arg4[%c233] : memref<512xf32, #tpu.memory_space<smem>>
    %851 = vector.broadcast %850 : f32 to vector<8x128xf32>
    %852 = arith.mulf %851, %821 : vector<8x128xf32>
    %853 = arith.addf %769, %852 : vector<8x128xf32>
    %c265 = arith.constant 265 : index
    %854 = memref.load %arg4[%c265] : memref<512xf32, #tpu.memory_space<smem>>
    %855 = vector.broadcast %854 : f32 to vector<8x128xf32>
    %856 = arith.mulf %855, %821 : vector<8x128xf32>
    %857 = arith.addf %773, %856 : vector<8x128xf32>
    %c297 = arith.constant 297 : index
    %858 = memref.load %arg4[%c297] : memref<512xf32, #tpu.memory_space<smem>>
    %859 = vector.broadcast %858 : f32 to vector<8x128xf32>
    %860 = arith.mulf %859, %821 : vector<8x128xf32>
    %861 = arith.addf %777, %860 : vector<8x128xf32>
    %c329 = arith.constant 329 : index
    %862 = memref.load %arg4[%c329] : memref<512xf32, #tpu.memory_space<smem>>
    %863 = vector.broadcast %862 : f32 to vector<8x128xf32>
    %864 = arith.mulf %863, %821 : vector<8x128xf32>
    %865 = arith.addf %781, %864 : vector<8x128xf32>
    %c361 = arith.constant 361 : index
    %866 = memref.load %arg4[%c361] : memref<512xf32, #tpu.memory_space<smem>>
    %867 = vector.broadcast %866 : f32 to vector<8x128xf32>
    %868 = arith.mulf %867, %821 : vector<8x128xf32>
    %869 = arith.addf %785, %868 : vector<8x128xf32>
    %c393 = arith.constant 393 : index
    %870 = memref.load %arg4[%c393] : memref<512xf32, #tpu.memory_space<smem>>
    %871 = vector.broadcast %870 : f32 to vector<8x128xf32>
    %872 = arith.mulf %871, %821 : vector<8x128xf32>
    %873 = arith.addf %789, %872 : vector<8x128xf32>
    %c425 = arith.constant 425 : index
    %874 = memref.load %arg4[%c425] : memref<512xf32, #tpu.memory_space<smem>>
    %875 = vector.broadcast %874 : f32 to vector<8x128xf32>
    %876 = arith.mulf %875, %821 : vector<8x128xf32>
    %877 = arith.addf %793, %876 : vector<8x128xf32>
    %c457 = arith.constant 457 : index
    %878 = memref.load %arg4[%c457] : memref<512xf32, #tpu.memory_space<smem>>
    %879 = vector.broadcast %878 : f32 to vector<8x128xf32>
    %880 = arith.mulf %879, %821 : vector<8x128xf32>
    %881 = arith.addf %797, %880 : vector<8x128xf32>
    %c489 = arith.constant 489 : index
    %882 = memref.load %arg4[%c489] : memref<512xf32, #tpu.memory_space<smem>>
    %883 = vector.broadcast %882 : f32 to vector<8x128xf32>
    %884 = arith.mulf %883, %821 : vector<8x128xf32>
    %885 = arith.addf %801, %884 : vector<8x128xf32>
    %c10_66 = arith.constant 10 : index
    %886 = memref.load %arg3[%c10_66] : memref<32xf32, #tpu.memory_space<smem>>
    %887 = vector.broadcast %886 : f32 to vector<8x128xf32>
    %c40_67 = arith.constant 40 : index
    %888 = memref.load %arg2[%c40_67] : memref<128xf32, #tpu.memory_space<smem>>
    %889 = vector.broadcast %888 : f32 to vector<8x128xf32>
    %890 = arith.mulf %889, %4 : vector<8x128xf32>
    %891 = arith.addf %887, %890 : vector<8x128xf32>
    %c41_68 = arith.constant 41 : index
    %892 = memref.load %arg2[%c41_68] : memref<128xf32, #tpu.memory_space<smem>>
    %893 = vector.broadcast %892 : f32 to vector<8x128xf32>
    %894 = arith.mulf %893, %7 : vector<8x128xf32>
    %895 = arith.addf %891, %894 : vector<8x128xf32>
    %c42 = arith.constant 42 : index
    %896 = memref.load %arg2[%c42] : memref<128xf32, #tpu.memory_space<smem>>
    %897 = vector.broadcast %896 : f32 to vector<8x128xf32>
    %898 = arith.mulf %897, %10 : vector<8x128xf32>
    %899 = arith.addf %895, %898 : vector<8x128xf32>
    %c43 = arith.constant 43 : index
    %900 = memref.load %arg2[%c43] : memref<128xf32, #tpu.memory_space<smem>>
    %901 = vector.broadcast %900 : f32 to vector<8x128xf32>
    %902 = arith.mulf %901, %13 : vector<8x128xf32>
    %903 = arith.addf %899, %902 : vector<8x128xf32>
    %cst_69 = arith.constant 0.000000e+00 : f32
    %904 = vector.broadcast %cst_69 : f32 to vector<8x128xf32>
    %905 = arith.maximumf %903, %904 : vector<8x128xf32>
    %c10_70 = arith.constant 10 : index
    %906 = memref.load %arg4[%c10_70] : memref<512xf32, #tpu.memory_space<smem>>
    %907 = vector.broadcast %906 : f32 to vector<8x128xf32>
    %908 = arith.mulf %907, %905 : vector<8x128xf32>
    %909 = arith.addf %825, %908 : vector<8x128xf32>
    %c42_71 = arith.constant 42 : index
    %910 = memref.load %arg4[%c42_71] : memref<512xf32, #tpu.memory_space<smem>>
    %911 = vector.broadcast %910 : f32 to vector<8x128xf32>
    %912 = arith.mulf %911, %905 : vector<8x128xf32>
    %913 = arith.addf %829, %912 : vector<8x128xf32>
    %c74 = arith.constant 74 : index
    %914 = memref.load %arg4[%c74] : memref<512xf32, #tpu.memory_space<smem>>
    %915 = vector.broadcast %914 : f32 to vector<8x128xf32>
    %916 = arith.mulf %915, %905 : vector<8x128xf32>
    %917 = arith.addf %833, %916 : vector<8x128xf32>
    %c106 = arith.constant 106 : index
    %918 = memref.load %arg4[%c106] : memref<512xf32, #tpu.memory_space<smem>>
    %919 = vector.broadcast %918 : f32 to vector<8x128xf32>
    %920 = arith.mulf %919, %905 : vector<8x128xf32>
    %921 = arith.addf %837, %920 : vector<8x128xf32>
    %c138 = arith.constant 138 : index
    %922 = memref.load %arg4[%c138] : memref<512xf32, #tpu.memory_space<smem>>
    %923 = vector.broadcast %922 : f32 to vector<8x128xf32>
    %924 = arith.mulf %923, %905 : vector<8x128xf32>
    %925 = arith.addf %841, %924 : vector<8x128xf32>
    %c170 = arith.constant 170 : index
    %926 = memref.load %arg4[%c170] : memref<512xf32, #tpu.memory_space<smem>>
    %927 = vector.broadcast %926 : f32 to vector<8x128xf32>
    %928 = arith.mulf %927, %905 : vector<8x128xf32>
    %929 = arith.addf %845, %928 : vector<8x128xf32>
    %c202 = arith.constant 202 : index
    %930 = memref.load %arg4[%c202] : memref<512xf32, #tpu.memory_space<smem>>
    %931 = vector.broadcast %930 : f32 to vector<8x128xf32>
    %932 = arith.mulf %931, %905 : vector<8x128xf32>
    %933 = arith.addf %849, %932 : vector<8x128xf32>
    %c234 = arith.constant 234 : index
    %934 = memref.load %arg4[%c234] : memref<512xf32, #tpu.memory_space<smem>>
    %935 = vector.broadcast %934 : f32 to vector<8x128xf32>
    %936 = arith.mulf %935, %905 : vector<8x128xf32>
    %937 = arith.addf %853, %936 : vector<8x128xf32>
    %c266 = arith.constant 266 : index
    %938 = memref.load %arg4[%c266] : memref<512xf32, #tpu.memory_space<smem>>
    %939 = vector.broadcast %938 : f32 to vector<8x128xf32>
    %940 = arith.mulf %939, %905 : vector<8x128xf32>
    %941 = arith.addf %857, %940 : vector<8x128xf32>
    %c298 = arith.constant 298 : index
    %942 = memref.load %arg4[%c298] : memref<512xf32, #tpu.memory_space<smem>>
    %943 = vector.broadcast %942 : f32 to vector<8x128xf32>
    %944 = arith.mulf %943, %905 : vector<8x128xf32>
    %945 = arith.addf %861, %944 : vector<8x128xf32>
    %c330 = arith.constant 330 : index
    %946 = memref.load %arg4[%c330] : memref<512xf32, #tpu.memory_space<smem>>
    %947 = vector.broadcast %946 : f32 to vector<8x128xf32>
    %948 = arith.mulf %947, %905 : vector<8x128xf32>
    %949 = arith.addf %865, %948 : vector<8x128xf32>
    %c362 = arith.constant 362 : index
    %950 = memref.load %arg4[%c362] : memref<512xf32, #tpu.memory_space<smem>>
    %951 = vector.broadcast %950 : f32 to vector<8x128xf32>
    %952 = arith.mulf %951, %905 : vector<8x128xf32>
    %953 = arith.addf %869, %952 : vector<8x128xf32>
    %c394 = arith.constant 394 : index
    %954 = memref.load %arg4[%c394] : memref<512xf32, #tpu.memory_space<smem>>
    %955 = vector.broadcast %954 : f32 to vector<8x128xf32>
    %956 = arith.mulf %955, %905 : vector<8x128xf32>
    %957 = arith.addf %873, %956 : vector<8x128xf32>
    %c426 = arith.constant 426 : index
    %958 = memref.load %arg4[%c426] : memref<512xf32, #tpu.memory_space<smem>>
    %959 = vector.broadcast %958 : f32 to vector<8x128xf32>
    %960 = arith.mulf %959, %905 : vector<8x128xf32>
    %961 = arith.addf %877, %960 : vector<8x128xf32>
    %c458 = arith.constant 458 : index
    %962 = memref.load %arg4[%c458] : memref<512xf32, #tpu.memory_space<smem>>
    %963 = vector.broadcast %962 : f32 to vector<8x128xf32>
    %964 = arith.mulf %963, %905 : vector<8x128xf32>
    %965 = arith.addf %881, %964 : vector<8x128xf32>
    %c490 = arith.constant 490 : index
    %966 = memref.load %arg4[%c490] : memref<512xf32, #tpu.memory_space<smem>>
    %967 = vector.broadcast %966 : f32 to vector<8x128xf32>
    %968 = arith.mulf %967, %905 : vector<8x128xf32>
    %969 = arith.addf %885, %968 : vector<8x128xf32>
    %c11_72 = arith.constant 11 : index
    %970 = memref.load %arg3[%c11_72] : memref<32xf32, #tpu.memory_space<smem>>
    %971 = vector.broadcast %970 : f32 to vector<8x128xf32>
    %c44 = arith.constant 44 : index
    %972 = memref.load %arg2[%c44] : memref<128xf32, #tpu.memory_space<smem>>
    %973 = vector.broadcast %972 : f32 to vector<8x128xf32>
    %974 = arith.mulf %973, %4 : vector<8x128xf32>
    %975 = arith.addf %971, %974 : vector<8x128xf32>
    %c45 = arith.constant 45 : index
    %976 = memref.load %arg2[%c45] : memref<128xf32, #tpu.memory_space<smem>>
    %977 = vector.broadcast %976 : f32 to vector<8x128xf32>
    %978 = arith.mulf %977, %7 : vector<8x128xf32>
    %979 = arith.addf %975, %978 : vector<8x128xf32>
    %c46 = arith.constant 46 : index
    %980 = memref.load %arg2[%c46] : memref<128xf32, #tpu.memory_space<smem>>
    %981 = vector.broadcast %980 : f32 to vector<8x128xf32>
    %982 = arith.mulf %981, %10 : vector<8x128xf32>
    %983 = arith.addf %979, %982 : vector<8x128xf32>
    %c47 = arith.constant 47 : index
    %984 = memref.load %arg2[%c47] : memref<128xf32, #tpu.memory_space<smem>>
    %985 = vector.broadcast %984 : f32 to vector<8x128xf32>
    %986 = arith.mulf %985, %13 : vector<8x128xf32>
    %987 = arith.addf %983, %986 : vector<8x128xf32>
    %cst_73 = arith.constant 0.000000e+00 : f32
    %988 = vector.broadcast %cst_73 : f32 to vector<8x128xf32>
    %989 = arith.maximumf %987, %988 : vector<8x128xf32>
    %c11_74 = arith.constant 11 : index
    %990 = memref.load %arg4[%c11_74] : memref<512xf32, #tpu.memory_space<smem>>
    %991 = vector.broadcast %990 : f32 to vector<8x128xf32>
    %992 = arith.mulf %991, %989 : vector<8x128xf32>
    %993 = arith.addf %909, %992 : vector<8x128xf32>
    %c43_75 = arith.constant 43 : index
    %994 = memref.load %arg4[%c43_75] : memref<512xf32, #tpu.memory_space<smem>>
    %995 = vector.broadcast %994 : f32 to vector<8x128xf32>
    %996 = arith.mulf %995, %989 : vector<8x128xf32>
    %997 = arith.addf %913, %996 : vector<8x128xf32>
    %c75 = arith.constant 75 : index
    %998 = memref.load %arg4[%c75] : memref<512xf32, #tpu.memory_space<smem>>
    %999 = vector.broadcast %998 : f32 to vector<8x128xf32>
    %1000 = arith.mulf %999, %989 : vector<8x128xf32>
    %1001 = arith.addf %917, %1000 : vector<8x128xf32>
    %c107 = arith.constant 107 : index
    %1002 = memref.load %arg4[%c107] : memref<512xf32, #tpu.memory_space<smem>>
    %1003 = vector.broadcast %1002 : f32 to vector<8x128xf32>
    %1004 = arith.mulf %1003, %989 : vector<8x128xf32>
    %1005 = arith.addf %921, %1004 : vector<8x128xf32>
    %c139 = arith.constant 139 : index
    %1006 = memref.load %arg4[%c139] : memref<512xf32, #tpu.memory_space<smem>>
    %1007 = vector.broadcast %1006 : f32 to vector<8x128xf32>
    %1008 = arith.mulf %1007, %989 : vector<8x128xf32>
    %1009 = arith.addf %925, %1008 : vector<8x128xf32>
    %c171 = arith.constant 171 : index
    %1010 = memref.load %arg4[%c171] : memref<512xf32, #tpu.memory_space<smem>>
    %1011 = vector.broadcast %1010 : f32 to vector<8x128xf32>
    %1012 = arith.mulf %1011, %989 : vector<8x128xf32>
    %1013 = arith.addf %929, %1012 : vector<8x128xf32>
    %c203 = arith.constant 203 : index
    %1014 = memref.load %arg4[%c203] : memref<512xf32, #tpu.memory_space<smem>>
    %1015 = vector.broadcast %1014 : f32 to vector<8x128xf32>
    %1016 = arith.mulf %1015, %989 : vector<8x128xf32>
    %1017 = arith.addf %933, %1016 : vector<8x128xf32>
    %c235 = arith.constant 235 : index
    %1018 = memref.load %arg4[%c235] : memref<512xf32, #tpu.memory_space<smem>>
    %1019 = vector.broadcast %1018 : f32 to vector<8x128xf32>
    %1020 = arith.mulf %1019, %989 : vector<8x128xf32>
    %1021 = arith.addf %937, %1020 : vector<8x128xf32>
    %c267 = arith.constant 267 : index
    %1022 = memref.load %arg4[%c267] : memref<512xf32, #tpu.memory_space<smem>>
    %1023 = vector.broadcast %1022 : f32 to vector<8x128xf32>
    %1024 = arith.mulf %1023, %989 : vector<8x128xf32>
    %1025 = arith.addf %941, %1024 : vector<8x128xf32>
    %c299 = arith.constant 299 : index
    %1026 = memref.load %arg4[%c299] : memref<512xf32, #tpu.memory_space<smem>>
    %1027 = vector.broadcast %1026 : f32 to vector<8x128xf32>
    %1028 = arith.mulf %1027, %989 : vector<8x128xf32>
    %1029 = arith.addf %945, %1028 : vector<8x128xf32>
    %c331 = arith.constant 331 : index
    %1030 = memref.load %arg4[%c331] : memref<512xf32, #tpu.memory_space<smem>>
    %1031 = vector.broadcast %1030 : f32 to vector<8x128xf32>
    %1032 = arith.mulf %1031, %989 : vector<8x128xf32>
    %1033 = arith.addf %949, %1032 : vector<8x128xf32>
    %c363 = arith.constant 363 : index
    %1034 = memref.load %arg4[%c363] : memref<512xf32, #tpu.memory_space<smem>>
    %1035 = vector.broadcast %1034 : f32 to vector<8x128xf32>
    %1036 = arith.mulf %1035, %989 : vector<8x128xf32>
    %1037 = arith.addf %953, %1036 : vector<8x128xf32>
    %c395 = arith.constant 395 : index
    %1038 = memref.load %arg4[%c395] : memref<512xf32, #tpu.memory_space<smem>>
    %1039 = vector.broadcast %1038 : f32 to vector<8x128xf32>
    %1040 = arith.mulf %1039, %989 : vector<8x128xf32>
    %1041 = arith.addf %957, %1040 : vector<8x128xf32>
    %c427 = arith.constant 427 : index
    %1042 = memref.load %arg4[%c427] : memref<512xf32, #tpu.memory_space<smem>>
    %1043 = vector.broadcast %1042 : f32 to vector<8x128xf32>
    %1044 = arith.mulf %1043, %989 : vector<8x128xf32>
    %1045 = arith.addf %961, %1044 : vector<8x128xf32>
    %c459 = arith.constant 459 : index
    %1046 = memref.load %arg4[%c459] : memref<512xf32, #tpu.memory_space<smem>>
    %1047 = vector.broadcast %1046 : f32 to vector<8x128xf32>
    %1048 = arith.mulf %1047, %989 : vector<8x128xf32>
    %1049 = arith.addf %965, %1048 : vector<8x128xf32>
    %c491 = arith.constant 491 : index
    %1050 = memref.load %arg4[%c491] : memref<512xf32, #tpu.memory_space<smem>>
    %1051 = vector.broadcast %1050 : f32 to vector<8x128xf32>
    %1052 = arith.mulf %1051, %989 : vector<8x128xf32>
    %1053 = arith.addf %969, %1052 : vector<8x128xf32>
    %c12_76 = arith.constant 12 : index
    %1054 = memref.load %arg3[%c12_76] : memref<32xf32, #tpu.memory_space<smem>>
    %1055 = vector.broadcast %1054 : f32 to vector<8x128xf32>
    %c48 = arith.constant 48 : index
    %1056 = memref.load %arg2[%c48] : memref<128xf32, #tpu.memory_space<smem>>
    %1057 = vector.broadcast %1056 : f32 to vector<8x128xf32>
    %1058 = arith.mulf %1057, %4 : vector<8x128xf32>
    %1059 = arith.addf %1055, %1058 : vector<8x128xf32>
    %c49 = arith.constant 49 : index
    %1060 = memref.load %arg2[%c49] : memref<128xf32, #tpu.memory_space<smem>>
    %1061 = vector.broadcast %1060 : f32 to vector<8x128xf32>
    %1062 = arith.mulf %1061, %7 : vector<8x128xf32>
    %1063 = arith.addf %1059, %1062 : vector<8x128xf32>
    %c50 = arith.constant 50 : index
    %1064 = memref.load %arg2[%c50] : memref<128xf32, #tpu.memory_space<smem>>
    %1065 = vector.broadcast %1064 : f32 to vector<8x128xf32>
    %1066 = arith.mulf %1065, %10 : vector<8x128xf32>
    %1067 = arith.addf %1063, %1066 : vector<8x128xf32>
    %c51 = arith.constant 51 : index
    %1068 = memref.load %arg2[%c51] : memref<128xf32, #tpu.memory_space<smem>>
    %1069 = vector.broadcast %1068 : f32 to vector<8x128xf32>
    %1070 = arith.mulf %1069, %13 : vector<8x128xf32>
    %1071 = arith.addf %1067, %1070 : vector<8x128xf32>
    %cst_77 = arith.constant 0.000000e+00 : f32
    %1072 = vector.broadcast %cst_77 : f32 to vector<8x128xf32>
    %1073 = arith.maximumf %1071, %1072 : vector<8x128xf32>
    %c12_78 = arith.constant 12 : index
    %1074 = memref.load %arg4[%c12_78] : memref<512xf32, #tpu.memory_space<smem>>
    %1075 = vector.broadcast %1074 : f32 to vector<8x128xf32>
    %1076 = arith.mulf %1075, %1073 : vector<8x128xf32>
    %1077 = arith.addf %993, %1076 : vector<8x128xf32>
    %c44_79 = arith.constant 44 : index
    %1078 = memref.load %arg4[%c44_79] : memref<512xf32, #tpu.memory_space<smem>>
    %1079 = vector.broadcast %1078 : f32 to vector<8x128xf32>
    %1080 = arith.mulf %1079, %1073 : vector<8x128xf32>
    %1081 = arith.addf %997, %1080 : vector<8x128xf32>
    %c76 = arith.constant 76 : index
    %1082 = memref.load %arg4[%c76] : memref<512xf32, #tpu.memory_space<smem>>
    %1083 = vector.broadcast %1082 : f32 to vector<8x128xf32>
    %1084 = arith.mulf %1083, %1073 : vector<8x128xf32>
    %1085 = arith.addf %1001, %1084 : vector<8x128xf32>
    %c108 = arith.constant 108 : index
    %1086 = memref.load %arg4[%c108] : memref<512xf32, #tpu.memory_space<smem>>
    %1087 = vector.broadcast %1086 : f32 to vector<8x128xf32>
    %1088 = arith.mulf %1087, %1073 : vector<8x128xf32>
    %1089 = arith.addf %1005, %1088 : vector<8x128xf32>
    %c140 = arith.constant 140 : index
    %1090 = memref.load %arg4[%c140] : memref<512xf32, #tpu.memory_space<smem>>
    %1091 = vector.broadcast %1090 : f32 to vector<8x128xf32>
    %1092 = arith.mulf %1091, %1073 : vector<8x128xf32>
    %1093 = arith.addf %1009, %1092 : vector<8x128xf32>
    %c172 = arith.constant 172 : index
    %1094 = memref.load %arg4[%c172] : memref<512xf32, #tpu.memory_space<smem>>
    %1095 = vector.broadcast %1094 : f32 to vector<8x128xf32>
    %1096 = arith.mulf %1095, %1073 : vector<8x128xf32>
    %1097 = arith.addf %1013, %1096 : vector<8x128xf32>
    %c204 = arith.constant 204 : index
    %1098 = memref.load %arg4[%c204] : memref<512xf32, #tpu.memory_space<smem>>
    %1099 = vector.broadcast %1098 : f32 to vector<8x128xf32>
    %1100 = arith.mulf %1099, %1073 : vector<8x128xf32>
    %1101 = arith.addf %1017, %1100 : vector<8x128xf32>
    %c236 = arith.constant 236 : index
    %1102 = memref.load %arg4[%c236] : memref<512xf32, #tpu.memory_space<smem>>
    %1103 = vector.broadcast %1102 : f32 to vector<8x128xf32>
    %1104 = arith.mulf %1103, %1073 : vector<8x128xf32>
    %1105 = arith.addf %1021, %1104 : vector<8x128xf32>
    %c268 = arith.constant 268 : index
    %1106 = memref.load %arg4[%c268] : memref<512xf32, #tpu.memory_space<smem>>
    %1107 = vector.broadcast %1106 : f32 to vector<8x128xf32>
    %1108 = arith.mulf %1107, %1073 : vector<8x128xf32>
    %1109 = arith.addf %1025, %1108 : vector<8x128xf32>
    %c300 = arith.constant 300 : index
    %1110 = memref.load %arg4[%c300] : memref<512xf32, #tpu.memory_space<smem>>
    %1111 = vector.broadcast %1110 : f32 to vector<8x128xf32>
    %1112 = arith.mulf %1111, %1073 : vector<8x128xf32>
    %1113 = arith.addf %1029, %1112 : vector<8x128xf32>
    %c332 = arith.constant 332 : index
    %1114 = memref.load %arg4[%c332] : memref<512xf32, #tpu.memory_space<smem>>
    %1115 = vector.broadcast %1114 : f32 to vector<8x128xf32>
    %1116 = arith.mulf %1115, %1073 : vector<8x128xf32>
    %1117 = arith.addf %1033, %1116 : vector<8x128xf32>
    %c364 = arith.constant 364 : index
    %1118 = memref.load %arg4[%c364] : memref<512xf32, #tpu.memory_space<smem>>
    %1119 = vector.broadcast %1118 : f32 to vector<8x128xf32>
    %1120 = arith.mulf %1119, %1073 : vector<8x128xf32>
    %1121 = arith.addf %1037, %1120 : vector<8x128xf32>
    %c396 = arith.constant 396 : index
    %1122 = memref.load %arg4[%c396] : memref<512xf32, #tpu.memory_space<smem>>
    %1123 = vector.broadcast %1122 : f32 to vector<8x128xf32>
    %1124 = arith.mulf %1123, %1073 : vector<8x128xf32>
    %1125 = arith.addf %1041, %1124 : vector<8x128xf32>
    %c428 = arith.constant 428 : index
    %1126 = memref.load %arg4[%c428] : memref<512xf32, #tpu.memory_space<smem>>
    %1127 = vector.broadcast %1126 : f32 to vector<8x128xf32>
    %1128 = arith.mulf %1127, %1073 : vector<8x128xf32>
    %1129 = arith.addf %1045, %1128 : vector<8x128xf32>
    %c460 = arith.constant 460 : index
    %1130 = memref.load %arg4[%c460] : memref<512xf32, #tpu.memory_space<smem>>
    %1131 = vector.broadcast %1130 : f32 to vector<8x128xf32>
    %1132 = arith.mulf %1131, %1073 : vector<8x128xf32>
    %1133 = arith.addf %1049, %1132 : vector<8x128xf32>
    %c492 = arith.constant 492 : index
    %1134 = memref.load %arg4[%c492] : memref<512xf32, #tpu.memory_space<smem>>
    %1135 = vector.broadcast %1134 : f32 to vector<8x128xf32>
    %1136 = arith.mulf %1135, %1073 : vector<8x128xf32>
    %1137 = arith.addf %1053, %1136 : vector<8x128xf32>
    %c13_80 = arith.constant 13 : index
    %1138 = memref.load %arg3[%c13_80] : memref<32xf32, #tpu.memory_space<smem>>
    %1139 = vector.broadcast %1138 : f32 to vector<8x128xf32>
    %c52 = arith.constant 52 : index
    %1140 = memref.load %arg2[%c52] : memref<128xf32, #tpu.memory_space<smem>>
    %1141 = vector.broadcast %1140 : f32 to vector<8x128xf32>
    %1142 = arith.mulf %1141, %4 : vector<8x128xf32>
    %1143 = arith.addf %1139, %1142 : vector<8x128xf32>
    %c53 = arith.constant 53 : index
    %1144 = memref.load %arg2[%c53] : memref<128xf32, #tpu.memory_space<smem>>
    %1145 = vector.broadcast %1144 : f32 to vector<8x128xf32>
    %1146 = arith.mulf %1145, %7 : vector<8x128xf32>
    %1147 = arith.addf %1143, %1146 : vector<8x128xf32>
    %c54 = arith.constant 54 : index
    %1148 = memref.load %arg2[%c54] : memref<128xf32, #tpu.memory_space<smem>>
    %1149 = vector.broadcast %1148 : f32 to vector<8x128xf32>
    %1150 = arith.mulf %1149, %10 : vector<8x128xf32>
    %1151 = arith.addf %1147, %1150 : vector<8x128xf32>
    %c55 = arith.constant 55 : index
    %1152 = memref.load %arg2[%c55] : memref<128xf32, #tpu.memory_space<smem>>
    %1153 = vector.broadcast %1152 : f32 to vector<8x128xf32>
    %1154 = arith.mulf %1153, %13 : vector<8x128xf32>
    %1155 = arith.addf %1151, %1154 : vector<8x128xf32>
    %cst_81 = arith.constant 0.000000e+00 : f32
    %1156 = vector.broadcast %cst_81 : f32 to vector<8x128xf32>
    %1157 = arith.maximumf %1155, %1156 : vector<8x128xf32>
    %c13_82 = arith.constant 13 : index
    %1158 = memref.load %arg4[%c13_82] : memref<512xf32, #tpu.memory_space<smem>>
    %1159 = vector.broadcast %1158 : f32 to vector<8x128xf32>
    %1160 = arith.mulf %1159, %1157 : vector<8x128xf32>
    %1161 = arith.addf %1077, %1160 : vector<8x128xf32>
    %c45_83 = arith.constant 45 : index
    %1162 = memref.load %arg4[%c45_83] : memref<512xf32, #tpu.memory_space<smem>>
    %1163 = vector.broadcast %1162 : f32 to vector<8x128xf32>
    %1164 = arith.mulf %1163, %1157 : vector<8x128xf32>
    %1165 = arith.addf %1081, %1164 : vector<8x128xf32>
    %c77 = arith.constant 77 : index
    %1166 = memref.load %arg4[%c77] : memref<512xf32, #tpu.memory_space<smem>>
    %1167 = vector.broadcast %1166 : f32 to vector<8x128xf32>
    %1168 = arith.mulf %1167, %1157 : vector<8x128xf32>
    %1169 = arith.addf %1085, %1168 : vector<8x128xf32>
    %c109 = arith.constant 109 : index
    %1170 = memref.load %arg4[%c109] : memref<512xf32, #tpu.memory_space<smem>>
    %1171 = vector.broadcast %1170 : f32 to vector<8x128xf32>
    %1172 = arith.mulf %1171, %1157 : vector<8x128xf32>
    %1173 = arith.addf %1089, %1172 : vector<8x128xf32>
    %c141 = arith.constant 141 : index
    %1174 = memref.load %arg4[%c141] : memref<512xf32, #tpu.memory_space<smem>>
    %1175 = vector.broadcast %1174 : f32 to vector<8x128xf32>
    %1176 = arith.mulf %1175, %1157 : vector<8x128xf32>
    %1177 = arith.addf %1093, %1176 : vector<8x128xf32>
    %c173 = arith.constant 173 : index
    %1178 = memref.load %arg4[%c173] : memref<512xf32, #tpu.memory_space<smem>>
    %1179 = vector.broadcast %1178 : f32 to vector<8x128xf32>
    %1180 = arith.mulf %1179, %1157 : vector<8x128xf32>
    %1181 = arith.addf %1097, %1180 : vector<8x128xf32>
    %c205 = arith.constant 205 : index
    %1182 = memref.load %arg4[%c205] : memref<512xf32, #tpu.memory_space<smem>>
    %1183 = vector.broadcast %1182 : f32 to vector<8x128xf32>
    %1184 = arith.mulf %1183, %1157 : vector<8x128xf32>
    %1185 = arith.addf %1101, %1184 : vector<8x128xf32>
    %c237 = arith.constant 237 : index
    %1186 = memref.load %arg4[%c237] : memref<512xf32, #tpu.memory_space<smem>>
    %1187 = vector.broadcast %1186 : f32 to vector<8x128xf32>
    %1188 = arith.mulf %1187, %1157 : vector<8x128xf32>
    %1189 = arith.addf %1105, %1188 : vector<8x128xf32>
    %c269 = arith.constant 269 : index
    %1190 = memref.load %arg4[%c269] : memref<512xf32, #tpu.memory_space<smem>>
    %1191 = vector.broadcast %1190 : f32 to vector<8x128xf32>
    %1192 = arith.mulf %1191, %1157 : vector<8x128xf32>
    %1193 = arith.addf %1109, %1192 : vector<8x128xf32>
    %c301 = arith.constant 301 : index
    %1194 = memref.load %arg4[%c301] : memref<512xf32, #tpu.memory_space<smem>>
    %1195 = vector.broadcast %1194 : f32 to vector<8x128xf32>
    %1196 = arith.mulf %1195, %1157 : vector<8x128xf32>
    %1197 = arith.addf %1113, %1196 : vector<8x128xf32>
    %c333 = arith.constant 333 : index
    %1198 = memref.load %arg4[%c333] : memref<512xf32, #tpu.memory_space<smem>>
    %1199 = vector.broadcast %1198 : f32 to vector<8x128xf32>
    %1200 = arith.mulf %1199, %1157 : vector<8x128xf32>
    %1201 = arith.addf %1117, %1200 : vector<8x128xf32>
    %c365 = arith.constant 365 : index
    %1202 = memref.load %arg4[%c365] : memref<512xf32, #tpu.memory_space<smem>>
    %1203 = vector.broadcast %1202 : f32 to vector<8x128xf32>
    %1204 = arith.mulf %1203, %1157 : vector<8x128xf32>
    %1205 = arith.addf %1121, %1204 : vector<8x128xf32>
    %c397 = arith.constant 397 : index
    %1206 = memref.load %arg4[%c397] : memref<512xf32, #tpu.memory_space<smem>>
    %1207 = vector.broadcast %1206 : f32 to vector<8x128xf32>
    %1208 = arith.mulf %1207, %1157 : vector<8x128xf32>
    %1209 = arith.addf %1125, %1208 : vector<8x128xf32>
    %c429 = arith.constant 429 : index
    %1210 = memref.load %arg4[%c429] : memref<512xf32, #tpu.memory_space<smem>>
    %1211 = vector.broadcast %1210 : f32 to vector<8x128xf32>
    %1212 = arith.mulf %1211, %1157 : vector<8x128xf32>
    %1213 = arith.addf %1129, %1212 : vector<8x128xf32>
    %c461 = arith.constant 461 : index
    %1214 = memref.load %arg4[%c461] : memref<512xf32, #tpu.memory_space<smem>>
    %1215 = vector.broadcast %1214 : f32 to vector<8x128xf32>
    %1216 = arith.mulf %1215, %1157 : vector<8x128xf32>
    %1217 = arith.addf %1133, %1216 : vector<8x128xf32>
    %c493 = arith.constant 493 : index
    %1218 = memref.load %arg4[%c493] : memref<512xf32, #tpu.memory_space<smem>>
    %1219 = vector.broadcast %1218 : f32 to vector<8x128xf32>
    %1220 = arith.mulf %1219, %1157 : vector<8x128xf32>
    %1221 = arith.addf %1137, %1220 : vector<8x128xf32>
    %c14_84 = arith.constant 14 : index
    %1222 = memref.load %arg3[%c14_84] : memref<32xf32, #tpu.memory_space<smem>>
    %1223 = vector.broadcast %1222 : f32 to vector<8x128xf32>
    %c56 = arith.constant 56 : index
    %1224 = memref.load %arg2[%c56] : memref<128xf32, #tpu.memory_space<smem>>
    %1225 = vector.broadcast %1224 : f32 to vector<8x128xf32>
    %1226 = arith.mulf %1225, %4 : vector<8x128xf32>
    %1227 = arith.addf %1223, %1226 : vector<8x128xf32>
    %c57 = arith.constant 57 : index
    %1228 = memref.load %arg2[%c57] : memref<128xf32, #tpu.memory_space<smem>>
    %1229 = vector.broadcast %1228 : f32 to vector<8x128xf32>
    %1230 = arith.mulf %1229, %7 : vector<8x128xf32>
    %1231 = arith.addf %1227, %1230 : vector<8x128xf32>
    %c58 = arith.constant 58 : index
    %1232 = memref.load %arg2[%c58] : memref<128xf32, #tpu.memory_space<smem>>
    %1233 = vector.broadcast %1232 : f32 to vector<8x128xf32>
    %1234 = arith.mulf %1233, %10 : vector<8x128xf32>
    %1235 = arith.addf %1231, %1234 : vector<8x128xf32>
    %c59 = arith.constant 59 : index
    %1236 = memref.load %arg2[%c59] : memref<128xf32, #tpu.memory_space<smem>>
    %1237 = vector.broadcast %1236 : f32 to vector<8x128xf32>
    %1238 = arith.mulf %1237, %13 : vector<8x128xf32>
    %1239 = arith.addf %1235, %1238 : vector<8x128xf32>
    %cst_85 = arith.constant 0.000000e+00 : f32
    %1240 = vector.broadcast %cst_85 : f32 to vector<8x128xf32>
    %1241 = arith.maximumf %1239, %1240 : vector<8x128xf32>
    %c14_86 = arith.constant 14 : index
    %1242 = memref.load %arg4[%c14_86] : memref<512xf32, #tpu.memory_space<smem>>
    %1243 = vector.broadcast %1242 : f32 to vector<8x128xf32>
    %1244 = arith.mulf %1243, %1241 : vector<8x128xf32>
    %1245 = arith.addf %1161, %1244 : vector<8x128xf32>
    %c46_87 = arith.constant 46 : index
    %1246 = memref.load %arg4[%c46_87] : memref<512xf32, #tpu.memory_space<smem>>
    %1247 = vector.broadcast %1246 : f32 to vector<8x128xf32>
    %1248 = arith.mulf %1247, %1241 : vector<8x128xf32>
    %1249 = arith.addf %1165, %1248 : vector<8x128xf32>
    %c78 = arith.constant 78 : index
    %1250 = memref.load %arg4[%c78] : memref<512xf32, #tpu.memory_space<smem>>
    %1251 = vector.broadcast %1250 : f32 to vector<8x128xf32>
    %1252 = arith.mulf %1251, %1241 : vector<8x128xf32>
    %1253 = arith.addf %1169, %1252 : vector<8x128xf32>
    %c110 = arith.constant 110 : index
    %1254 = memref.load %arg4[%c110] : memref<512xf32, #tpu.memory_space<smem>>
    %1255 = vector.broadcast %1254 : f32 to vector<8x128xf32>
    %1256 = arith.mulf %1255, %1241 : vector<8x128xf32>
    %1257 = arith.addf %1173, %1256 : vector<8x128xf32>
    %c142 = arith.constant 142 : index
    %1258 = memref.load %arg4[%c142] : memref<512xf32, #tpu.memory_space<smem>>
    %1259 = vector.broadcast %1258 : f32 to vector<8x128xf32>
    %1260 = arith.mulf %1259, %1241 : vector<8x128xf32>
    %1261 = arith.addf %1177, %1260 : vector<8x128xf32>
    %c174 = arith.constant 174 : index
    %1262 = memref.load %arg4[%c174] : memref<512xf32, #tpu.memory_space<smem>>
    %1263 = vector.broadcast %1262 : f32 to vector<8x128xf32>
    %1264 = arith.mulf %1263, %1241 : vector<8x128xf32>
    %1265 = arith.addf %1181, %1264 : vector<8x128xf32>
    %c206 = arith.constant 206 : index
    %1266 = memref.load %arg4[%c206] : memref<512xf32, #tpu.memory_space<smem>>
    %1267 = vector.broadcast %1266 : f32 to vector<8x128xf32>
    %1268 = arith.mulf %1267, %1241 : vector<8x128xf32>
    %1269 = arith.addf %1185, %1268 : vector<8x128xf32>
    %c238 = arith.constant 238 : index
    %1270 = memref.load %arg4[%c238] : memref<512xf32, #tpu.memory_space<smem>>
    %1271 = vector.broadcast %1270 : f32 to vector<8x128xf32>
    %1272 = arith.mulf %1271, %1241 : vector<8x128xf32>
    %1273 = arith.addf %1189, %1272 : vector<8x128xf32>
    %c270 = arith.constant 270 : index
    %1274 = memref.load %arg4[%c270] : memref<512xf32, #tpu.memory_space<smem>>
    %1275 = vector.broadcast %1274 : f32 to vector<8x128xf32>
    %1276 = arith.mulf %1275, %1241 : vector<8x128xf32>
    %1277 = arith.addf %1193, %1276 : vector<8x128xf32>
    %c302 = arith.constant 302 : index
    %1278 = memref.load %arg4[%c302] : memref<512xf32, #tpu.memory_space<smem>>
    %1279 = vector.broadcast %1278 : f32 to vector<8x128xf32>
    %1280 = arith.mulf %1279, %1241 : vector<8x128xf32>
    %1281 = arith.addf %1197, %1280 : vector<8x128xf32>
    %c334 = arith.constant 334 : index
    %1282 = memref.load %arg4[%c334] : memref<512xf32, #tpu.memory_space<smem>>
    %1283 = vector.broadcast %1282 : f32 to vector<8x128xf32>
    %1284 = arith.mulf %1283, %1241 : vector<8x128xf32>
    %1285 = arith.addf %1201, %1284 : vector<8x128xf32>
    %c366 = arith.constant 366 : index
    %1286 = memref.load %arg4[%c366] : memref<512xf32, #tpu.memory_space<smem>>
    %1287 = vector.broadcast %1286 : f32 to vector<8x128xf32>
    %1288 = arith.mulf %1287, %1241 : vector<8x128xf32>
    %1289 = arith.addf %1205, %1288 : vector<8x128xf32>
    %c398 = arith.constant 398 : index
    %1290 = memref.load %arg4[%c398] : memref<512xf32, #tpu.memory_space<smem>>
    %1291 = vector.broadcast %1290 : f32 to vector<8x128xf32>
    %1292 = arith.mulf %1291, %1241 : vector<8x128xf32>
    %1293 = arith.addf %1209, %1292 : vector<8x128xf32>
    %c430 = arith.constant 430 : index
    %1294 = memref.load %arg4[%c430] : memref<512xf32, #tpu.memory_space<smem>>
    %1295 = vector.broadcast %1294 : f32 to vector<8x128xf32>
    %1296 = arith.mulf %1295, %1241 : vector<8x128xf32>
    %1297 = arith.addf %1213, %1296 : vector<8x128xf32>
    %c462 = arith.constant 462 : index
    %1298 = memref.load %arg4[%c462] : memref<512xf32, #tpu.memory_space<smem>>
    %1299 = vector.broadcast %1298 : f32 to vector<8x128xf32>
    %1300 = arith.mulf %1299, %1241 : vector<8x128xf32>
    %1301 = arith.addf %1217, %1300 : vector<8x128xf32>
    %c494 = arith.constant 494 : index
    %1302 = memref.load %arg4[%c494] : memref<512xf32, #tpu.memory_space<smem>>
    %1303 = vector.broadcast %1302 : f32 to vector<8x128xf32>
    %1304 = arith.mulf %1303, %1241 : vector<8x128xf32>
    %1305 = arith.addf %1221, %1304 : vector<8x128xf32>
    %c15_88 = arith.constant 15 : index
    %1306 = memref.load %arg3[%c15_88] : memref<32xf32, #tpu.memory_space<smem>>
    %1307 = vector.broadcast %1306 : f32 to vector<8x128xf32>
    %c60 = arith.constant 60 : index
    %1308 = memref.load %arg2[%c60] : memref<128xf32, #tpu.memory_space<smem>>
    %1309 = vector.broadcast %1308 : f32 to vector<8x128xf32>
    %1310 = arith.mulf %1309, %4 : vector<8x128xf32>
    %1311 = arith.addf %1307, %1310 : vector<8x128xf32>
    %c61 = arith.constant 61 : index
    %1312 = memref.load %arg2[%c61] : memref<128xf32, #tpu.memory_space<smem>>
    %1313 = vector.broadcast %1312 : f32 to vector<8x128xf32>
    %1314 = arith.mulf %1313, %7 : vector<8x128xf32>
    %1315 = arith.addf %1311, %1314 : vector<8x128xf32>
    %c62 = arith.constant 62 : index
    %1316 = memref.load %arg2[%c62] : memref<128xf32, #tpu.memory_space<smem>>
    %1317 = vector.broadcast %1316 : f32 to vector<8x128xf32>
    %1318 = arith.mulf %1317, %10 : vector<8x128xf32>
    %1319 = arith.addf %1315, %1318 : vector<8x128xf32>
    %c63 = arith.constant 63 : index
    %1320 = memref.load %arg2[%c63] : memref<128xf32, #tpu.memory_space<smem>>
    %1321 = vector.broadcast %1320 : f32 to vector<8x128xf32>
    %1322 = arith.mulf %1321, %13 : vector<8x128xf32>
    %1323 = arith.addf %1319, %1322 : vector<8x128xf32>
    %cst_89 = arith.constant 0.000000e+00 : f32
    %1324 = vector.broadcast %cst_89 : f32 to vector<8x128xf32>
    %1325 = arith.maximumf %1323, %1324 : vector<8x128xf32>
    %c15_90 = arith.constant 15 : index
    %1326 = memref.load %arg4[%c15_90] : memref<512xf32, #tpu.memory_space<smem>>
    %1327 = vector.broadcast %1326 : f32 to vector<8x128xf32>
    %1328 = arith.mulf %1327, %1325 : vector<8x128xf32>
    %1329 = arith.addf %1245, %1328 : vector<8x128xf32>
    %c47_91 = arith.constant 47 : index
    %1330 = memref.load %arg4[%c47_91] : memref<512xf32, #tpu.memory_space<smem>>
    %1331 = vector.broadcast %1330 : f32 to vector<8x128xf32>
    %1332 = arith.mulf %1331, %1325 : vector<8x128xf32>
    %1333 = arith.addf %1249, %1332 : vector<8x128xf32>
    %c79 = arith.constant 79 : index
    %1334 = memref.load %arg4[%c79] : memref<512xf32, #tpu.memory_space<smem>>
    %1335 = vector.broadcast %1334 : f32 to vector<8x128xf32>
    %1336 = arith.mulf %1335, %1325 : vector<8x128xf32>
    %1337 = arith.addf %1253, %1336 : vector<8x128xf32>
    %c111 = arith.constant 111 : index
    %1338 = memref.load %arg4[%c111] : memref<512xf32, #tpu.memory_space<smem>>
    %1339 = vector.broadcast %1338 : f32 to vector<8x128xf32>
    %1340 = arith.mulf %1339, %1325 : vector<8x128xf32>
    %1341 = arith.addf %1257, %1340 : vector<8x128xf32>
    %c143 = arith.constant 143 : index
    %1342 = memref.load %arg4[%c143] : memref<512xf32, #tpu.memory_space<smem>>
    %1343 = vector.broadcast %1342 : f32 to vector<8x128xf32>
    %1344 = arith.mulf %1343, %1325 : vector<8x128xf32>
    %1345 = arith.addf %1261, %1344 : vector<8x128xf32>
    %c175 = arith.constant 175 : index
    %1346 = memref.load %arg4[%c175] : memref<512xf32, #tpu.memory_space<smem>>
    %1347 = vector.broadcast %1346 : f32 to vector<8x128xf32>
    %1348 = arith.mulf %1347, %1325 : vector<8x128xf32>
    %1349 = arith.addf %1265, %1348 : vector<8x128xf32>
    %c207 = arith.constant 207 : index
    %1350 = memref.load %arg4[%c207] : memref<512xf32, #tpu.memory_space<smem>>
    %1351 = vector.broadcast %1350 : f32 to vector<8x128xf32>
    %1352 = arith.mulf %1351, %1325 : vector<8x128xf32>
    %1353 = arith.addf %1269, %1352 : vector<8x128xf32>
    %c239 = arith.constant 239 : index
    %1354 = memref.load %arg4[%c239] : memref<512xf32, #tpu.memory_space<smem>>
    %1355 = vector.broadcast %1354 : f32 to vector<8x128xf32>
    %1356 = arith.mulf %1355, %1325 : vector<8x128xf32>
    %1357 = arith.addf %1273, %1356 : vector<8x128xf32>
    %c271 = arith.constant 271 : index
    %1358 = memref.load %arg4[%c271] : memref<512xf32, #tpu.memory_space<smem>>
    %1359 = vector.broadcast %1358 : f32 to vector<8x128xf32>
    %1360 = arith.mulf %1359, %1325 : vector<8x128xf32>
    %1361 = arith.addf %1277, %1360 : vector<8x128xf32>
    %c303 = arith.constant 303 : index
    %1362 = memref.load %arg4[%c303] : memref<512xf32, #tpu.memory_space<smem>>
    %1363 = vector.broadcast %1362 : f32 to vector<8x128xf32>
    %1364 = arith.mulf %1363, %1325 : vector<8x128xf32>
    %1365 = arith.addf %1281, %1364 : vector<8x128xf32>
    %c335 = arith.constant 335 : index
    %1366 = memref.load %arg4[%c335] : memref<512xf32, #tpu.memory_space<smem>>
    %1367 = vector.broadcast %1366 : f32 to vector<8x128xf32>
    %1368 = arith.mulf %1367, %1325 : vector<8x128xf32>
    %1369 = arith.addf %1285, %1368 : vector<8x128xf32>
    %c367 = arith.constant 367 : index
    %1370 = memref.load %arg4[%c367] : memref<512xf32, #tpu.memory_space<smem>>
    %1371 = vector.broadcast %1370 : f32 to vector<8x128xf32>
    %1372 = arith.mulf %1371, %1325 : vector<8x128xf32>
    %1373 = arith.addf %1289, %1372 : vector<8x128xf32>
    %c399 = arith.constant 399 : index
    %1374 = memref.load %arg4[%c399] : memref<512xf32, #tpu.memory_space<smem>>
    %1375 = vector.broadcast %1374 : f32 to vector<8x128xf32>
    %1376 = arith.mulf %1375, %1325 : vector<8x128xf32>
    %1377 = arith.addf %1293, %1376 : vector<8x128xf32>
    %c431 = arith.constant 431 : index
    %1378 = memref.load %arg4[%c431] : memref<512xf32, #tpu.memory_space<smem>>
    %1379 = vector.broadcast %1378 : f32 to vector<8x128xf32>
    %1380 = arith.mulf %1379, %1325 : vector<8x128xf32>
    %1381 = arith.addf %1297, %1380 : vector<8x128xf32>
    %c463 = arith.constant 463 : index
    %1382 = memref.load %arg4[%c463] : memref<512xf32, #tpu.memory_space<smem>>
    %1383 = vector.broadcast %1382 : f32 to vector<8x128xf32>
    %1384 = arith.mulf %1383, %1325 : vector<8x128xf32>
    %1385 = arith.addf %1301, %1384 : vector<8x128xf32>
    %c495 = arith.constant 495 : index
    %1386 = memref.load %arg4[%c495] : memref<512xf32, #tpu.memory_space<smem>>
    %1387 = vector.broadcast %1386 : f32 to vector<8x128xf32>
    %1388 = arith.mulf %1387, %1325 : vector<8x128xf32>
    %1389 = arith.addf %1305, %1388 : vector<8x128xf32>
    %c16_92 = arith.constant 16 : index
    %1390 = memref.load %arg3[%c16_92] : memref<32xf32, #tpu.memory_space<smem>>
    %1391 = vector.broadcast %1390 : f32 to vector<8x128xf32>
    %c64_93 = arith.constant 64 : index
    %1392 = memref.load %arg2[%c64_93] : memref<128xf32, #tpu.memory_space<smem>>
    %1393 = vector.broadcast %1392 : f32 to vector<8x128xf32>
    %1394 = arith.mulf %1393, %4 : vector<8x128xf32>
    %1395 = arith.addf %1391, %1394 : vector<8x128xf32>
    %c65_94 = arith.constant 65 : index
    %1396 = memref.load %arg2[%c65_94] : memref<128xf32, #tpu.memory_space<smem>>
    %1397 = vector.broadcast %1396 : f32 to vector<8x128xf32>
    %1398 = arith.mulf %1397, %7 : vector<8x128xf32>
    %1399 = arith.addf %1395, %1398 : vector<8x128xf32>
    %c66_95 = arith.constant 66 : index
    %1400 = memref.load %arg2[%c66_95] : memref<128xf32, #tpu.memory_space<smem>>
    %1401 = vector.broadcast %1400 : f32 to vector<8x128xf32>
    %1402 = arith.mulf %1401, %10 : vector<8x128xf32>
    %1403 = arith.addf %1399, %1402 : vector<8x128xf32>
    %c67_96 = arith.constant 67 : index
    %1404 = memref.load %arg2[%c67_96] : memref<128xf32, #tpu.memory_space<smem>>
    %1405 = vector.broadcast %1404 : f32 to vector<8x128xf32>
    %1406 = arith.mulf %1405, %13 : vector<8x128xf32>
    %1407 = arith.addf %1403, %1406 : vector<8x128xf32>
    %cst_97 = arith.constant 0.000000e+00 : f32
    %1408 = vector.broadcast %cst_97 : f32 to vector<8x128xf32>
    %1409 = arith.maximumf %1407, %1408 : vector<8x128xf32>
    %c16_98 = arith.constant 16 : index
    %1410 = memref.load %arg4[%c16_98] : memref<512xf32, #tpu.memory_space<smem>>
    %1411 = vector.broadcast %1410 : f32 to vector<8x128xf32>
    %1412 = arith.mulf %1411, %1409 : vector<8x128xf32>
    %1413 = arith.addf %1329, %1412 : vector<8x128xf32>
    %c48_99 = arith.constant 48 : index
    %1414 = memref.load %arg4[%c48_99] : memref<512xf32, #tpu.memory_space<smem>>
    %1415 = vector.broadcast %1414 : f32 to vector<8x128xf32>
    %1416 = arith.mulf %1415, %1409 : vector<8x128xf32>
    %1417 = arith.addf %1333, %1416 : vector<8x128xf32>
    %c80 = arith.constant 80 : index
    %1418 = memref.load %arg4[%c80] : memref<512xf32, #tpu.memory_space<smem>>
    %1419 = vector.broadcast %1418 : f32 to vector<8x128xf32>
    %1420 = arith.mulf %1419, %1409 : vector<8x128xf32>
    %1421 = arith.addf %1337, %1420 : vector<8x128xf32>
    %c112 = arith.constant 112 : index
    %1422 = memref.load %arg4[%c112] : memref<512xf32, #tpu.memory_space<smem>>
    %1423 = vector.broadcast %1422 : f32 to vector<8x128xf32>
    %1424 = arith.mulf %1423, %1409 : vector<8x128xf32>
    %1425 = arith.addf %1341, %1424 : vector<8x128xf32>
    %c144 = arith.constant 144 : index
    %1426 = memref.load %arg4[%c144] : memref<512xf32, #tpu.memory_space<smem>>
    %1427 = vector.broadcast %1426 : f32 to vector<8x128xf32>
    %1428 = arith.mulf %1427, %1409 : vector<8x128xf32>
    %1429 = arith.addf %1345, %1428 : vector<8x128xf32>
    %c176 = arith.constant 176 : index
    %1430 = memref.load %arg4[%c176] : memref<512xf32, #tpu.memory_space<smem>>
    %1431 = vector.broadcast %1430 : f32 to vector<8x128xf32>
    %1432 = arith.mulf %1431, %1409 : vector<8x128xf32>
    %1433 = arith.addf %1349, %1432 : vector<8x128xf32>
    %c208 = arith.constant 208 : index
    %1434 = memref.load %arg4[%c208] : memref<512xf32, #tpu.memory_space<smem>>
    %1435 = vector.broadcast %1434 : f32 to vector<8x128xf32>
    %1436 = arith.mulf %1435, %1409 : vector<8x128xf32>
    %1437 = arith.addf %1353, %1436 : vector<8x128xf32>
    %c240 = arith.constant 240 : index
    %1438 = memref.load %arg4[%c240] : memref<512xf32, #tpu.memory_space<smem>>
    %1439 = vector.broadcast %1438 : f32 to vector<8x128xf32>
    %1440 = arith.mulf %1439, %1409 : vector<8x128xf32>
    %1441 = arith.addf %1357, %1440 : vector<8x128xf32>
    %c272 = arith.constant 272 : index
    %1442 = memref.load %arg4[%c272] : memref<512xf32, #tpu.memory_space<smem>>
    %1443 = vector.broadcast %1442 : f32 to vector<8x128xf32>
    %1444 = arith.mulf %1443, %1409 : vector<8x128xf32>
    %1445 = arith.addf %1361, %1444 : vector<8x128xf32>
    %c304 = arith.constant 304 : index
    %1446 = memref.load %arg4[%c304] : memref<512xf32, #tpu.memory_space<smem>>
    %1447 = vector.broadcast %1446 : f32 to vector<8x128xf32>
    %1448 = arith.mulf %1447, %1409 : vector<8x128xf32>
    %1449 = arith.addf %1365, %1448 : vector<8x128xf32>
    %c336 = arith.constant 336 : index
    %1450 = memref.load %arg4[%c336] : memref<512xf32, #tpu.memory_space<smem>>
    %1451 = vector.broadcast %1450 : f32 to vector<8x128xf32>
    %1452 = arith.mulf %1451, %1409 : vector<8x128xf32>
    %1453 = arith.addf %1369, %1452 : vector<8x128xf32>
    %c368 = arith.constant 368 : index
    %1454 = memref.load %arg4[%c368] : memref<512xf32, #tpu.memory_space<smem>>
    %1455 = vector.broadcast %1454 : f32 to vector<8x128xf32>
    %1456 = arith.mulf %1455, %1409 : vector<8x128xf32>
    %1457 = arith.addf %1373, %1456 : vector<8x128xf32>
    %c400 = arith.constant 400 : index
    %1458 = memref.load %arg4[%c400] : memref<512xf32, #tpu.memory_space<smem>>
    %1459 = vector.broadcast %1458 : f32 to vector<8x128xf32>
    %1460 = arith.mulf %1459, %1409 : vector<8x128xf32>
    %1461 = arith.addf %1377, %1460 : vector<8x128xf32>
    %c432 = arith.constant 432 : index
    %1462 = memref.load %arg4[%c432] : memref<512xf32, #tpu.memory_space<smem>>
    %1463 = vector.broadcast %1462 : f32 to vector<8x128xf32>
    %1464 = arith.mulf %1463, %1409 : vector<8x128xf32>
    %1465 = arith.addf %1381, %1464 : vector<8x128xf32>
    %c464 = arith.constant 464 : index
    %1466 = memref.load %arg4[%c464] : memref<512xf32, #tpu.memory_space<smem>>
    %1467 = vector.broadcast %1466 : f32 to vector<8x128xf32>
    %1468 = arith.mulf %1467, %1409 : vector<8x128xf32>
    %1469 = arith.addf %1385, %1468 : vector<8x128xf32>
    %c496 = arith.constant 496 : index
    %1470 = memref.load %arg4[%c496] : memref<512xf32, #tpu.memory_space<smem>>
    %1471 = vector.broadcast %1470 : f32 to vector<8x128xf32>
    %1472 = arith.mulf %1471, %1409 : vector<8x128xf32>
    %1473 = arith.addf %1389, %1472 : vector<8x128xf32>
    %c17_100 = arith.constant 17 : index
    %1474 = memref.load %arg3[%c17_100] : memref<32xf32, #tpu.memory_space<smem>>
    %1475 = vector.broadcast %1474 : f32 to vector<8x128xf32>
    %c68_101 = arith.constant 68 : index
    %1476 = memref.load %arg2[%c68_101] : memref<128xf32, #tpu.memory_space<smem>>
    %1477 = vector.broadcast %1476 : f32 to vector<8x128xf32>
    %1478 = arith.mulf %1477, %4 : vector<8x128xf32>
    %1479 = arith.addf %1475, %1478 : vector<8x128xf32>
    %c69_102 = arith.constant 69 : index
    %1480 = memref.load %arg2[%c69_102] : memref<128xf32, #tpu.memory_space<smem>>
    %1481 = vector.broadcast %1480 : f32 to vector<8x128xf32>
    %1482 = arith.mulf %1481, %7 : vector<8x128xf32>
    %1483 = arith.addf %1479, %1482 : vector<8x128xf32>
    %c70_103 = arith.constant 70 : index
    %1484 = memref.load %arg2[%c70_103] : memref<128xf32, #tpu.memory_space<smem>>
    %1485 = vector.broadcast %1484 : f32 to vector<8x128xf32>
    %1486 = arith.mulf %1485, %10 : vector<8x128xf32>
    %1487 = arith.addf %1483, %1486 : vector<8x128xf32>
    %c71_104 = arith.constant 71 : index
    %1488 = memref.load %arg2[%c71_104] : memref<128xf32, #tpu.memory_space<smem>>
    %1489 = vector.broadcast %1488 : f32 to vector<8x128xf32>
    %1490 = arith.mulf %1489, %13 : vector<8x128xf32>
    %1491 = arith.addf %1487, %1490 : vector<8x128xf32>
    %cst_105 = arith.constant 0.000000e+00 : f32
    %1492 = vector.broadcast %cst_105 : f32 to vector<8x128xf32>
    %1493 = arith.maximumf %1491, %1492 : vector<8x128xf32>
    %c17_106 = arith.constant 17 : index
    %1494 = memref.load %arg4[%c17_106] : memref<512xf32, #tpu.memory_space<smem>>
    %1495 = vector.broadcast %1494 : f32 to vector<8x128xf32>
    %1496 = arith.mulf %1495, %1493 : vector<8x128xf32>
    %1497 = arith.addf %1413, %1496 : vector<8x128xf32>
    %c49_107 = arith.constant 49 : index
    %1498 = memref.load %arg4[%c49_107] : memref<512xf32, #tpu.memory_space<smem>>
    %1499 = vector.broadcast %1498 : f32 to vector<8x128xf32>
    %1500 = arith.mulf %1499, %1493 : vector<8x128xf32>
    %1501 = arith.addf %1417, %1500 : vector<8x128xf32>
    %c81 = arith.constant 81 : index
    %1502 = memref.load %arg4[%c81] : memref<512xf32, #tpu.memory_space<smem>>
    %1503 = vector.broadcast %1502 : f32 to vector<8x128xf32>
    %1504 = arith.mulf %1503, %1493 : vector<8x128xf32>
    %1505 = arith.addf %1421, %1504 : vector<8x128xf32>
    %c113 = arith.constant 113 : index
    %1506 = memref.load %arg4[%c113] : memref<512xf32, #tpu.memory_space<smem>>
    %1507 = vector.broadcast %1506 : f32 to vector<8x128xf32>
    %1508 = arith.mulf %1507, %1493 : vector<8x128xf32>
    %1509 = arith.addf %1425, %1508 : vector<8x128xf32>
    %c145 = arith.constant 145 : index
    %1510 = memref.load %arg4[%c145] : memref<512xf32, #tpu.memory_space<smem>>
    %1511 = vector.broadcast %1510 : f32 to vector<8x128xf32>
    %1512 = arith.mulf %1511, %1493 : vector<8x128xf32>
    %1513 = arith.addf %1429, %1512 : vector<8x128xf32>
    %c177 = arith.constant 177 : index
    %1514 = memref.load %arg4[%c177] : memref<512xf32, #tpu.memory_space<smem>>
    %1515 = vector.broadcast %1514 : f32 to vector<8x128xf32>
    %1516 = arith.mulf %1515, %1493 : vector<8x128xf32>
    %1517 = arith.addf %1433, %1516 : vector<8x128xf32>
    %c209 = arith.constant 209 : index
    %1518 = memref.load %arg4[%c209] : memref<512xf32, #tpu.memory_space<smem>>
    %1519 = vector.broadcast %1518 : f32 to vector<8x128xf32>
    %1520 = arith.mulf %1519, %1493 : vector<8x128xf32>
    %1521 = arith.addf %1437, %1520 : vector<8x128xf32>
    %c241 = arith.constant 241 : index
    %1522 = memref.load %arg4[%c241] : memref<512xf32, #tpu.memory_space<smem>>
    %1523 = vector.broadcast %1522 : f32 to vector<8x128xf32>
    %1524 = arith.mulf %1523, %1493 : vector<8x128xf32>
    %1525 = arith.addf %1441, %1524 : vector<8x128xf32>
    %c273 = arith.constant 273 : index
    %1526 = memref.load %arg4[%c273] : memref<512xf32, #tpu.memory_space<smem>>
    %1527 = vector.broadcast %1526 : f32 to vector<8x128xf32>
    %1528 = arith.mulf %1527, %1493 : vector<8x128xf32>
    %1529 = arith.addf %1445, %1528 : vector<8x128xf32>
    %c305 = arith.constant 305 : index
    %1530 = memref.load %arg4[%c305] : memref<512xf32, #tpu.memory_space<smem>>
    %1531 = vector.broadcast %1530 : f32 to vector<8x128xf32>
    %1532 = arith.mulf %1531, %1493 : vector<8x128xf32>
    %1533 = arith.addf %1449, %1532 : vector<8x128xf32>
    %c337 = arith.constant 337 : index
    %1534 = memref.load %arg4[%c337] : memref<512xf32, #tpu.memory_space<smem>>
    %1535 = vector.broadcast %1534 : f32 to vector<8x128xf32>
    %1536 = arith.mulf %1535, %1493 : vector<8x128xf32>
    %1537 = arith.addf %1453, %1536 : vector<8x128xf32>
    %c369 = arith.constant 369 : index
    %1538 = memref.load %arg4[%c369] : memref<512xf32, #tpu.memory_space<smem>>
    %1539 = vector.broadcast %1538 : f32 to vector<8x128xf32>
    %1540 = arith.mulf %1539, %1493 : vector<8x128xf32>
    %1541 = arith.addf %1457, %1540 : vector<8x128xf32>
    %c401 = arith.constant 401 : index
    %1542 = memref.load %arg4[%c401] : memref<512xf32, #tpu.memory_space<smem>>
    %1543 = vector.broadcast %1542 : f32 to vector<8x128xf32>
    %1544 = arith.mulf %1543, %1493 : vector<8x128xf32>
    %1545 = arith.addf %1461, %1544 : vector<8x128xf32>
    %c433 = arith.constant 433 : index
    %1546 = memref.load %arg4[%c433] : memref<512xf32, #tpu.memory_space<smem>>
    %1547 = vector.broadcast %1546 : f32 to vector<8x128xf32>
    %1548 = arith.mulf %1547, %1493 : vector<8x128xf32>
    %1549 = arith.addf %1465, %1548 : vector<8x128xf32>
    %c465 = arith.constant 465 : index
    %1550 = memref.load %arg4[%c465] : memref<512xf32, #tpu.memory_space<smem>>
    %1551 = vector.broadcast %1550 : f32 to vector<8x128xf32>
    %1552 = arith.mulf %1551, %1493 : vector<8x128xf32>
    %1553 = arith.addf %1469, %1552 : vector<8x128xf32>
    %c497 = arith.constant 497 : index
    %1554 = memref.load %arg4[%c497] : memref<512xf32, #tpu.memory_space<smem>>
    %1555 = vector.broadcast %1554 : f32 to vector<8x128xf32>
    %1556 = arith.mulf %1555, %1493 : vector<8x128xf32>
    %1557 = arith.addf %1473, %1556 : vector<8x128xf32>
    %c18_108 = arith.constant 18 : index
    %1558 = memref.load %arg3[%c18_108] : memref<32xf32, #tpu.memory_space<smem>>
    %1559 = vector.broadcast %1558 : f32 to vector<8x128xf32>
    %c72_109 = arith.constant 72 : index
    %1560 = memref.load %arg2[%c72_109] : memref<128xf32, #tpu.memory_space<smem>>
    %1561 = vector.broadcast %1560 : f32 to vector<8x128xf32>
    %1562 = arith.mulf %1561, %4 : vector<8x128xf32>
    %1563 = arith.addf %1559, %1562 : vector<8x128xf32>
    %c73_110 = arith.constant 73 : index
    %1564 = memref.load %arg2[%c73_110] : memref<128xf32, #tpu.memory_space<smem>>
    %1565 = vector.broadcast %1564 : f32 to vector<8x128xf32>
    %1566 = arith.mulf %1565, %7 : vector<8x128xf32>
    %1567 = arith.addf %1563, %1566 : vector<8x128xf32>
    %c74_111 = arith.constant 74 : index
    %1568 = memref.load %arg2[%c74_111] : memref<128xf32, #tpu.memory_space<smem>>
    %1569 = vector.broadcast %1568 : f32 to vector<8x128xf32>
    %1570 = arith.mulf %1569, %10 : vector<8x128xf32>
    %1571 = arith.addf %1567, %1570 : vector<8x128xf32>
    %c75_112 = arith.constant 75 : index
    %1572 = memref.load %arg2[%c75_112] : memref<128xf32, #tpu.memory_space<smem>>
    %1573 = vector.broadcast %1572 : f32 to vector<8x128xf32>
    %1574 = arith.mulf %1573, %13 : vector<8x128xf32>
    %1575 = arith.addf %1571, %1574 : vector<8x128xf32>
    %cst_113 = arith.constant 0.000000e+00 : f32
    %1576 = vector.broadcast %cst_113 : f32 to vector<8x128xf32>
    %1577 = arith.maximumf %1575, %1576 : vector<8x128xf32>
    %c18_114 = arith.constant 18 : index
    %1578 = memref.load %arg4[%c18_114] : memref<512xf32, #tpu.memory_space<smem>>
    %1579 = vector.broadcast %1578 : f32 to vector<8x128xf32>
    %1580 = arith.mulf %1579, %1577 : vector<8x128xf32>
    %1581 = arith.addf %1497, %1580 : vector<8x128xf32>
    %c50_115 = arith.constant 50 : index
    %1582 = memref.load %arg4[%c50_115] : memref<512xf32, #tpu.memory_space<smem>>
    %1583 = vector.broadcast %1582 : f32 to vector<8x128xf32>
    %1584 = arith.mulf %1583, %1577 : vector<8x128xf32>
    %1585 = arith.addf %1501, %1584 : vector<8x128xf32>
    %c82 = arith.constant 82 : index
    %1586 = memref.load %arg4[%c82] : memref<512xf32, #tpu.memory_space<smem>>
    %1587 = vector.broadcast %1586 : f32 to vector<8x128xf32>
    %1588 = arith.mulf %1587, %1577 : vector<8x128xf32>
    %1589 = arith.addf %1505, %1588 : vector<8x128xf32>
    %c114 = arith.constant 114 : index
    %1590 = memref.load %arg4[%c114] : memref<512xf32, #tpu.memory_space<smem>>
    %1591 = vector.broadcast %1590 : f32 to vector<8x128xf32>
    %1592 = arith.mulf %1591, %1577 : vector<8x128xf32>
    %1593 = arith.addf %1509, %1592 : vector<8x128xf32>
    %c146 = arith.constant 146 : index
    %1594 = memref.load %arg4[%c146] : memref<512xf32, #tpu.memory_space<smem>>
    %1595 = vector.broadcast %1594 : f32 to vector<8x128xf32>
    %1596 = arith.mulf %1595, %1577 : vector<8x128xf32>
    %1597 = arith.addf %1513, %1596 : vector<8x128xf32>
    %c178 = arith.constant 178 : index
    %1598 = memref.load %arg4[%c178] : memref<512xf32, #tpu.memory_space<smem>>
    %1599 = vector.broadcast %1598 : f32 to vector<8x128xf32>
    %1600 = arith.mulf %1599, %1577 : vector<8x128xf32>
    %1601 = arith.addf %1517, %1600 : vector<8x128xf32>
    %c210 = arith.constant 210 : index
    %1602 = memref.load %arg4[%c210] : memref<512xf32, #tpu.memory_space<smem>>
    %1603 = vector.broadcast %1602 : f32 to vector<8x128xf32>
    %1604 = arith.mulf %1603, %1577 : vector<8x128xf32>
    %1605 = arith.addf %1521, %1604 : vector<8x128xf32>
    %c242 = arith.constant 242 : index
    %1606 = memref.load %arg4[%c242] : memref<512xf32, #tpu.memory_space<smem>>
    %1607 = vector.broadcast %1606 : f32 to vector<8x128xf32>
    %1608 = arith.mulf %1607, %1577 : vector<8x128xf32>
    %1609 = arith.addf %1525, %1608 : vector<8x128xf32>
    %c274 = arith.constant 274 : index
    %1610 = memref.load %arg4[%c274] : memref<512xf32, #tpu.memory_space<smem>>
    %1611 = vector.broadcast %1610 : f32 to vector<8x128xf32>
    %1612 = arith.mulf %1611, %1577 : vector<8x128xf32>
    %1613 = arith.addf %1529, %1612 : vector<8x128xf32>
    %c306 = arith.constant 306 : index
    %1614 = memref.load %arg4[%c306] : memref<512xf32, #tpu.memory_space<smem>>
    %1615 = vector.broadcast %1614 : f32 to vector<8x128xf32>
    %1616 = arith.mulf %1615, %1577 : vector<8x128xf32>
    %1617 = arith.addf %1533, %1616 : vector<8x128xf32>
    %c338 = arith.constant 338 : index
    %1618 = memref.load %arg4[%c338] : memref<512xf32, #tpu.memory_space<smem>>
    %1619 = vector.broadcast %1618 : f32 to vector<8x128xf32>
    %1620 = arith.mulf %1619, %1577 : vector<8x128xf32>
    %1621 = arith.addf %1537, %1620 : vector<8x128xf32>
    %c370 = arith.constant 370 : index
    %1622 = memref.load %arg4[%c370] : memref<512xf32, #tpu.memory_space<smem>>
    %1623 = vector.broadcast %1622 : f32 to vector<8x128xf32>
    %1624 = arith.mulf %1623, %1577 : vector<8x128xf32>
    %1625 = arith.addf %1541, %1624 : vector<8x128xf32>
    %c402 = arith.constant 402 : index
    %1626 = memref.load %arg4[%c402] : memref<512xf32, #tpu.memory_space<smem>>
    %1627 = vector.broadcast %1626 : f32 to vector<8x128xf32>
    %1628 = arith.mulf %1627, %1577 : vector<8x128xf32>
    %1629 = arith.addf %1545, %1628 : vector<8x128xf32>
    %c434 = arith.constant 434 : index
    %1630 = memref.load %arg4[%c434] : memref<512xf32, #tpu.memory_space<smem>>
    %1631 = vector.broadcast %1630 : f32 to vector<8x128xf32>
    %1632 = arith.mulf %1631, %1577 : vector<8x128xf32>
    %1633 = arith.addf %1549, %1632 : vector<8x128xf32>
    %c466 = arith.constant 466 : index
    %1634 = memref.load %arg4[%c466] : memref<512xf32, #tpu.memory_space<smem>>
    %1635 = vector.broadcast %1634 : f32 to vector<8x128xf32>
    %1636 = arith.mulf %1635, %1577 : vector<8x128xf32>
    %1637 = arith.addf %1553, %1636 : vector<8x128xf32>
    %c498 = arith.constant 498 : index
    %1638 = memref.load %arg4[%c498] : memref<512xf32, #tpu.memory_space<smem>>
    %1639 = vector.broadcast %1638 : f32 to vector<8x128xf32>
    %1640 = arith.mulf %1639, %1577 : vector<8x128xf32>
    %1641 = arith.addf %1557, %1640 : vector<8x128xf32>
    %c19_116 = arith.constant 19 : index
    %1642 = memref.load %arg3[%c19_116] : memref<32xf32, #tpu.memory_space<smem>>
    %1643 = vector.broadcast %1642 : f32 to vector<8x128xf32>
    %c76_117 = arith.constant 76 : index
    %1644 = memref.load %arg2[%c76_117] : memref<128xf32, #tpu.memory_space<smem>>
    %1645 = vector.broadcast %1644 : f32 to vector<8x128xf32>
    %1646 = arith.mulf %1645, %4 : vector<8x128xf32>
    %1647 = arith.addf %1643, %1646 : vector<8x128xf32>
    %c77_118 = arith.constant 77 : index
    %1648 = memref.load %arg2[%c77_118] : memref<128xf32, #tpu.memory_space<smem>>
    %1649 = vector.broadcast %1648 : f32 to vector<8x128xf32>
    %1650 = arith.mulf %1649, %7 : vector<8x128xf32>
    %1651 = arith.addf %1647, %1650 : vector<8x128xf32>
    %c78_119 = arith.constant 78 : index
    %1652 = memref.load %arg2[%c78_119] : memref<128xf32, #tpu.memory_space<smem>>
    %1653 = vector.broadcast %1652 : f32 to vector<8x128xf32>
    %1654 = arith.mulf %1653, %10 : vector<8x128xf32>
    %1655 = arith.addf %1651, %1654 : vector<8x128xf32>
    %c79_120 = arith.constant 79 : index
    %1656 = memref.load %arg2[%c79_120] : memref<128xf32, #tpu.memory_space<smem>>
    %1657 = vector.broadcast %1656 : f32 to vector<8x128xf32>
    %1658 = arith.mulf %1657, %13 : vector<8x128xf32>
    %1659 = arith.addf %1655, %1658 : vector<8x128xf32>
    %cst_121 = arith.constant 0.000000e+00 : f32
    %1660 = vector.broadcast %cst_121 : f32 to vector<8x128xf32>
    %1661 = arith.maximumf %1659, %1660 : vector<8x128xf32>
    %c19_122 = arith.constant 19 : index
    %1662 = memref.load %arg4[%c19_122] : memref<512xf32, #tpu.memory_space<smem>>
    %1663 = vector.broadcast %1662 : f32 to vector<8x128xf32>
    %1664 = arith.mulf %1663, %1661 : vector<8x128xf32>
    %1665 = arith.addf %1581, %1664 : vector<8x128xf32>
    %c51_123 = arith.constant 51 : index
    %1666 = memref.load %arg4[%c51_123] : memref<512xf32, #tpu.memory_space<smem>>
    %1667 = vector.broadcast %1666 : f32 to vector<8x128xf32>
    %1668 = arith.mulf %1667, %1661 : vector<8x128xf32>
    %1669 = arith.addf %1585, %1668 : vector<8x128xf32>
    %c83 = arith.constant 83 : index
    %1670 = memref.load %arg4[%c83] : memref<512xf32, #tpu.memory_space<smem>>
    %1671 = vector.broadcast %1670 : f32 to vector<8x128xf32>
    %1672 = arith.mulf %1671, %1661 : vector<8x128xf32>
    %1673 = arith.addf %1589, %1672 : vector<8x128xf32>
    %c115 = arith.constant 115 : index
    %1674 = memref.load %arg4[%c115] : memref<512xf32, #tpu.memory_space<smem>>
    %1675 = vector.broadcast %1674 : f32 to vector<8x128xf32>
    %1676 = arith.mulf %1675, %1661 : vector<8x128xf32>
    %1677 = arith.addf %1593, %1676 : vector<8x128xf32>
    %c147 = arith.constant 147 : index
    %1678 = memref.load %arg4[%c147] : memref<512xf32, #tpu.memory_space<smem>>
    %1679 = vector.broadcast %1678 : f32 to vector<8x128xf32>
    %1680 = arith.mulf %1679, %1661 : vector<8x128xf32>
    %1681 = arith.addf %1597, %1680 : vector<8x128xf32>
    %c179 = arith.constant 179 : index
    %1682 = memref.load %arg4[%c179] : memref<512xf32, #tpu.memory_space<smem>>
    %1683 = vector.broadcast %1682 : f32 to vector<8x128xf32>
    %1684 = arith.mulf %1683, %1661 : vector<8x128xf32>
    %1685 = arith.addf %1601, %1684 : vector<8x128xf32>
    %c211 = arith.constant 211 : index
    %1686 = memref.load %arg4[%c211] : memref<512xf32, #tpu.memory_space<smem>>
    %1687 = vector.broadcast %1686 : f32 to vector<8x128xf32>
    %1688 = arith.mulf %1687, %1661 : vector<8x128xf32>
    %1689 = arith.addf %1605, %1688 : vector<8x128xf32>
    %c243 = arith.constant 243 : index
    %1690 = memref.load %arg4[%c243] : memref<512xf32, #tpu.memory_space<smem>>
    %1691 = vector.broadcast %1690 : f32 to vector<8x128xf32>
    %1692 = arith.mulf %1691, %1661 : vector<8x128xf32>
    %1693 = arith.addf %1609, %1692 : vector<8x128xf32>
    %c275 = arith.constant 275 : index
    %1694 = memref.load %arg4[%c275] : memref<512xf32, #tpu.memory_space<smem>>
    %1695 = vector.broadcast %1694 : f32 to vector<8x128xf32>
    %1696 = arith.mulf %1695, %1661 : vector<8x128xf32>
    %1697 = arith.addf %1613, %1696 : vector<8x128xf32>
    %c307 = arith.constant 307 : index
    %1698 = memref.load %arg4[%c307] : memref<512xf32, #tpu.memory_space<smem>>
    %1699 = vector.broadcast %1698 : f32 to vector<8x128xf32>
    %1700 = arith.mulf %1699, %1661 : vector<8x128xf32>
    %1701 = arith.addf %1617, %1700 : vector<8x128xf32>
    %c339 = arith.constant 339 : index
    %1702 = memref.load %arg4[%c339] : memref<512xf32, #tpu.memory_space<smem>>
    %1703 = vector.broadcast %1702 : f32 to vector<8x128xf32>
    %1704 = arith.mulf %1703, %1661 : vector<8x128xf32>
    %1705 = arith.addf %1621, %1704 : vector<8x128xf32>
    %c371 = arith.constant 371 : index
    %1706 = memref.load %arg4[%c371] : memref<512xf32, #tpu.memory_space<smem>>
    %1707 = vector.broadcast %1706 : f32 to vector<8x128xf32>
    %1708 = arith.mulf %1707, %1661 : vector<8x128xf32>
    %1709 = arith.addf %1625, %1708 : vector<8x128xf32>
    %c403 = arith.constant 403 : index
    %1710 = memref.load %arg4[%c403] : memref<512xf32, #tpu.memory_space<smem>>
    %1711 = vector.broadcast %1710 : f32 to vector<8x128xf32>
    %1712 = arith.mulf %1711, %1661 : vector<8x128xf32>
    %1713 = arith.addf %1629, %1712 : vector<8x128xf32>
    %c435 = arith.constant 435 : index
    %1714 = memref.load %arg4[%c435] : memref<512xf32, #tpu.memory_space<smem>>
    %1715 = vector.broadcast %1714 : f32 to vector<8x128xf32>
    %1716 = arith.mulf %1715, %1661 : vector<8x128xf32>
    %1717 = arith.addf %1633, %1716 : vector<8x128xf32>
    %c467 = arith.constant 467 : index
    %1718 = memref.load %arg4[%c467] : memref<512xf32, #tpu.memory_space<smem>>
    %1719 = vector.broadcast %1718 : f32 to vector<8x128xf32>
    %1720 = arith.mulf %1719, %1661 : vector<8x128xf32>
    %1721 = arith.addf %1637, %1720 : vector<8x128xf32>
    %c499 = arith.constant 499 : index
    %1722 = memref.load %arg4[%c499] : memref<512xf32, #tpu.memory_space<smem>>
    %1723 = vector.broadcast %1722 : f32 to vector<8x128xf32>
    %1724 = arith.mulf %1723, %1661 : vector<8x128xf32>
    %1725 = arith.addf %1641, %1724 : vector<8x128xf32>
    %c20_124 = arith.constant 20 : index
    %1726 = memref.load %arg3[%c20_124] : memref<32xf32, #tpu.memory_space<smem>>
    %1727 = vector.broadcast %1726 : f32 to vector<8x128xf32>
    %c80_125 = arith.constant 80 : index
    %1728 = memref.load %arg2[%c80_125] : memref<128xf32, #tpu.memory_space<smem>>
    %1729 = vector.broadcast %1728 : f32 to vector<8x128xf32>
    %1730 = arith.mulf %1729, %4 : vector<8x128xf32>
    %1731 = arith.addf %1727, %1730 : vector<8x128xf32>
    %c81_126 = arith.constant 81 : index
    %1732 = memref.load %arg2[%c81_126] : memref<128xf32, #tpu.memory_space<smem>>
    %1733 = vector.broadcast %1732 : f32 to vector<8x128xf32>
    %1734 = arith.mulf %1733, %7 : vector<8x128xf32>
    %1735 = arith.addf %1731, %1734 : vector<8x128xf32>
    %c82_127 = arith.constant 82 : index
    %1736 = memref.load %arg2[%c82_127] : memref<128xf32, #tpu.memory_space<smem>>
    %1737 = vector.broadcast %1736 : f32 to vector<8x128xf32>
    %1738 = arith.mulf %1737, %10 : vector<8x128xf32>
    %1739 = arith.addf %1735, %1738 : vector<8x128xf32>
    %c83_128 = arith.constant 83 : index
    %1740 = memref.load %arg2[%c83_128] : memref<128xf32, #tpu.memory_space<smem>>
    %1741 = vector.broadcast %1740 : f32 to vector<8x128xf32>
    %1742 = arith.mulf %1741, %13 : vector<8x128xf32>
    %1743 = arith.addf %1739, %1742 : vector<8x128xf32>
    %cst_129 = arith.constant 0.000000e+00 : f32
    %1744 = vector.broadcast %cst_129 : f32 to vector<8x128xf32>
    %1745 = arith.maximumf %1743, %1744 : vector<8x128xf32>
    %c20_130 = arith.constant 20 : index
    %1746 = memref.load %arg4[%c20_130] : memref<512xf32, #tpu.memory_space<smem>>
    %1747 = vector.broadcast %1746 : f32 to vector<8x128xf32>
    %1748 = arith.mulf %1747, %1745 : vector<8x128xf32>
    %1749 = arith.addf %1665, %1748 : vector<8x128xf32>
    %c52_131 = arith.constant 52 : index
    %1750 = memref.load %arg4[%c52_131] : memref<512xf32, #tpu.memory_space<smem>>
    %1751 = vector.broadcast %1750 : f32 to vector<8x128xf32>
    %1752 = arith.mulf %1751, %1745 : vector<8x128xf32>
    %1753 = arith.addf %1669, %1752 : vector<8x128xf32>
    %c84 = arith.constant 84 : index
    %1754 = memref.load %arg4[%c84] : memref<512xf32, #tpu.memory_space<smem>>
    %1755 = vector.broadcast %1754 : f32 to vector<8x128xf32>
    %1756 = arith.mulf %1755, %1745 : vector<8x128xf32>
    %1757 = arith.addf %1673, %1756 : vector<8x128xf32>
    %c116 = arith.constant 116 : index
    %1758 = memref.load %arg4[%c116] : memref<512xf32, #tpu.memory_space<smem>>
    %1759 = vector.broadcast %1758 : f32 to vector<8x128xf32>
    %1760 = arith.mulf %1759, %1745 : vector<8x128xf32>
    %1761 = arith.addf %1677, %1760 : vector<8x128xf32>
    %c148 = arith.constant 148 : index
    %1762 = memref.load %arg4[%c148] : memref<512xf32, #tpu.memory_space<smem>>
    %1763 = vector.broadcast %1762 : f32 to vector<8x128xf32>
    %1764 = arith.mulf %1763, %1745 : vector<8x128xf32>
    %1765 = arith.addf %1681, %1764 : vector<8x128xf32>
    %c180 = arith.constant 180 : index
    %1766 = memref.load %arg4[%c180] : memref<512xf32, #tpu.memory_space<smem>>
    %1767 = vector.broadcast %1766 : f32 to vector<8x128xf32>
    %1768 = arith.mulf %1767, %1745 : vector<8x128xf32>
    %1769 = arith.addf %1685, %1768 : vector<8x128xf32>
    %c212 = arith.constant 212 : index
    %1770 = memref.load %arg4[%c212] : memref<512xf32, #tpu.memory_space<smem>>
    %1771 = vector.broadcast %1770 : f32 to vector<8x128xf32>
    %1772 = arith.mulf %1771, %1745 : vector<8x128xf32>
    %1773 = arith.addf %1689, %1772 : vector<8x128xf32>
    %c244 = arith.constant 244 : index
    %1774 = memref.load %arg4[%c244] : memref<512xf32, #tpu.memory_space<smem>>
    %1775 = vector.broadcast %1774 : f32 to vector<8x128xf32>
    %1776 = arith.mulf %1775, %1745 : vector<8x128xf32>
    %1777 = arith.addf %1693, %1776 : vector<8x128xf32>
    %c276 = arith.constant 276 : index
    %1778 = memref.load %arg4[%c276] : memref<512xf32, #tpu.memory_space<smem>>
    %1779 = vector.broadcast %1778 : f32 to vector<8x128xf32>
    %1780 = arith.mulf %1779, %1745 : vector<8x128xf32>
    %1781 = arith.addf %1697, %1780 : vector<8x128xf32>
    %c308 = arith.constant 308 : index
    %1782 = memref.load %arg4[%c308] : memref<512xf32, #tpu.memory_space<smem>>
    %1783 = vector.broadcast %1782 : f32 to vector<8x128xf32>
    %1784 = arith.mulf %1783, %1745 : vector<8x128xf32>
    %1785 = arith.addf %1701, %1784 : vector<8x128xf32>
    %c340 = arith.constant 340 : index
    %1786 = memref.load %arg4[%c340] : memref<512xf32, #tpu.memory_space<smem>>
    %1787 = vector.broadcast %1786 : f32 to vector<8x128xf32>
    %1788 = arith.mulf %1787, %1745 : vector<8x128xf32>
    %1789 = arith.addf %1705, %1788 : vector<8x128xf32>
    %c372 = arith.constant 372 : index
    %1790 = memref.load %arg4[%c372] : memref<512xf32, #tpu.memory_space<smem>>
    %1791 = vector.broadcast %1790 : f32 to vector<8x128xf32>
    %1792 = arith.mulf %1791, %1745 : vector<8x128xf32>
    %1793 = arith.addf %1709, %1792 : vector<8x128xf32>
    %c404 = arith.constant 404 : index
    %1794 = memref.load %arg4[%c404] : memref<512xf32, #tpu.memory_space<smem>>
    %1795 = vector.broadcast %1794 : f32 to vector<8x128xf32>
    %1796 = arith.mulf %1795, %1745 : vector<8x128xf32>
    %1797 = arith.addf %1713, %1796 : vector<8x128xf32>
    %c436 = arith.constant 436 : index
    %1798 = memref.load %arg4[%c436] : memref<512xf32, #tpu.memory_space<smem>>
    %1799 = vector.broadcast %1798 : f32 to vector<8x128xf32>
    %1800 = arith.mulf %1799, %1745 : vector<8x128xf32>
    %1801 = arith.addf %1717, %1800 : vector<8x128xf32>
    %c468 = arith.constant 468 : index
    %1802 = memref.load %arg4[%c468] : memref<512xf32, #tpu.memory_space<smem>>
    %1803 = vector.broadcast %1802 : f32 to vector<8x128xf32>
    %1804 = arith.mulf %1803, %1745 : vector<8x128xf32>
    %1805 = arith.addf %1721, %1804 : vector<8x128xf32>
    %c500 = arith.constant 500 : index
    %1806 = memref.load %arg4[%c500] : memref<512xf32, #tpu.memory_space<smem>>
    %1807 = vector.broadcast %1806 : f32 to vector<8x128xf32>
    %1808 = arith.mulf %1807, %1745 : vector<8x128xf32>
    %1809 = arith.addf %1725, %1808 : vector<8x128xf32>
    %c21_132 = arith.constant 21 : index
    %1810 = memref.load %arg3[%c21_132] : memref<32xf32, #tpu.memory_space<smem>>
    %1811 = vector.broadcast %1810 : f32 to vector<8x128xf32>
    %c84_133 = arith.constant 84 : index
    %1812 = memref.load %arg2[%c84_133] : memref<128xf32, #tpu.memory_space<smem>>
    %1813 = vector.broadcast %1812 : f32 to vector<8x128xf32>
    %1814 = arith.mulf %1813, %4 : vector<8x128xf32>
    %1815 = arith.addf %1811, %1814 : vector<8x128xf32>
    %c85 = arith.constant 85 : index
    %1816 = memref.load %arg2[%c85] : memref<128xf32, #tpu.memory_space<smem>>
    %1817 = vector.broadcast %1816 : f32 to vector<8x128xf32>
    %1818 = arith.mulf %1817, %7 : vector<8x128xf32>
    %1819 = arith.addf %1815, %1818 : vector<8x128xf32>
    %c86 = arith.constant 86 : index
    %1820 = memref.load %arg2[%c86] : memref<128xf32, #tpu.memory_space<smem>>
    %1821 = vector.broadcast %1820 : f32 to vector<8x128xf32>
    %1822 = arith.mulf %1821, %10 : vector<8x128xf32>
    %1823 = arith.addf %1819, %1822 : vector<8x128xf32>
    %c87 = arith.constant 87 : index
    %1824 = memref.load %arg2[%c87] : memref<128xf32, #tpu.memory_space<smem>>
    %1825 = vector.broadcast %1824 : f32 to vector<8x128xf32>
    %1826 = arith.mulf %1825, %13 : vector<8x128xf32>
    %1827 = arith.addf %1823, %1826 : vector<8x128xf32>
    %cst_134 = arith.constant 0.000000e+00 : f32
    %1828 = vector.broadcast %cst_134 : f32 to vector<8x128xf32>
    %1829 = arith.maximumf %1827, %1828 : vector<8x128xf32>
    %c21_135 = arith.constant 21 : index
    %1830 = memref.load %arg4[%c21_135] : memref<512xf32, #tpu.memory_space<smem>>
    %1831 = vector.broadcast %1830 : f32 to vector<8x128xf32>
    %1832 = arith.mulf %1831, %1829 : vector<8x128xf32>
    %1833 = arith.addf %1749, %1832 : vector<8x128xf32>
    %c53_136 = arith.constant 53 : index
    %1834 = memref.load %arg4[%c53_136] : memref<512xf32, #tpu.memory_space<smem>>
    %1835 = vector.broadcast %1834 : f32 to vector<8x128xf32>
    %1836 = arith.mulf %1835, %1829 : vector<8x128xf32>
    %1837 = arith.addf %1753, %1836 : vector<8x128xf32>
    %c85_137 = arith.constant 85 : index
    %1838 = memref.load %arg4[%c85_137] : memref<512xf32, #tpu.memory_space<smem>>
    %1839 = vector.broadcast %1838 : f32 to vector<8x128xf32>
    %1840 = arith.mulf %1839, %1829 : vector<8x128xf32>
    %1841 = arith.addf %1757, %1840 : vector<8x128xf32>
    %c117 = arith.constant 117 : index
    %1842 = memref.load %arg4[%c117] : memref<512xf32, #tpu.memory_space<smem>>
    %1843 = vector.broadcast %1842 : f32 to vector<8x128xf32>
    %1844 = arith.mulf %1843, %1829 : vector<8x128xf32>
    %1845 = arith.addf %1761, %1844 : vector<8x128xf32>
    %c149 = arith.constant 149 : index
    %1846 = memref.load %arg4[%c149] : memref<512xf32, #tpu.memory_space<smem>>
    %1847 = vector.broadcast %1846 : f32 to vector<8x128xf32>
    %1848 = arith.mulf %1847, %1829 : vector<8x128xf32>
    %1849 = arith.addf %1765, %1848 : vector<8x128xf32>
    %c181 = arith.constant 181 : index
    %1850 = memref.load %arg4[%c181] : memref<512xf32, #tpu.memory_space<smem>>
    %1851 = vector.broadcast %1850 : f32 to vector<8x128xf32>
    %1852 = arith.mulf %1851, %1829 : vector<8x128xf32>
    %1853 = arith.addf %1769, %1852 : vector<8x128xf32>
    %c213 = arith.constant 213 : index
    %1854 = memref.load %arg4[%c213] : memref<512xf32, #tpu.memory_space<smem>>
    %1855 = vector.broadcast %1854 : f32 to vector<8x128xf32>
    %1856 = arith.mulf %1855, %1829 : vector<8x128xf32>
    %1857 = arith.addf %1773, %1856 : vector<8x128xf32>
    %c245 = arith.constant 245 : index
    %1858 = memref.load %arg4[%c245] : memref<512xf32, #tpu.memory_space<smem>>
    %1859 = vector.broadcast %1858 : f32 to vector<8x128xf32>
    %1860 = arith.mulf %1859, %1829 : vector<8x128xf32>
    %1861 = arith.addf %1777, %1860 : vector<8x128xf32>
    %c277 = arith.constant 277 : index
    %1862 = memref.load %arg4[%c277] : memref<512xf32, #tpu.memory_space<smem>>
    %1863 = vector.broadcast %1862 : f32 to vector<8x128xf32>
    %1864 = arith.mulf %1863, %1829 : vector<8x128xf32>
    %1865 = arith.addf %1781, %1864 : vector<8x128xf32>
    %c309 = arith.constant 309 : index
    %1866 = memref.load %arg4[%c309] : memref<512xf32, #tpu.memory_space<smem>>
    %1867 = vector.broadcast %1866 : f32 to vector<8x128xf32>
    %1868 = arith.mulf %1867, %1829 : vector<8x128xf32>
    %1869 = arith.addf %1785, %1868 : vector<8x128xf32>
    %c341 = arith.constant 341 : index
    %1870 = memref.load %arg4[%c341] : memref<512xf32, #tpu.memory_space<smem>>
    %1871 = vector.broadcast %1870 : f32 to vector<8x128xf32>
    %1872 = arith.mulf %1871, %1829 : vector<8x128xf32>
    %1873 = arith.addf %1789, %1872 : vector<8x128xf32>
    %c373 = arith.constant 373 : index
    %1874 = memref.load %arg4[%c373] : memref<512xf32, #tpu.memory_space<smem>>
    %1875 = vector.broadcast %1874 : f32 to vector<8x128xf32>
    %1876 = arith.mulf %1875, %1829 : vector<8x128xf32>
    %1877 = arith.addf %1793, %1876 : vector<8x128xf32>
    %c405 = arith.constant 405 : index
    %1878 = memref.load %arg4[%c405] : memref<512xf32, #tpu.memory_space<smem>>
    %1879 = vector.broadcast %1878 : f32 to vector<8x128xf32>
    %1880 = arith.mulf %1879, %1829 : vector<8x128xf32>
    %1881 = arith.addf %1797, %1880 : vector<8x128xf32>
    %c437 = arith.constant 437 : index
    %1882 = memref.load %arg4[%c437] : memref<512xf32, #tpu.memory_space<smem>>
    %1883 = vector.broadcast %1882 : f32 to vector<8x128xf32>
    %1884 = arith.mulf %1883, %1829 : vector<8x128xf32>
    %1885 = arith.addf %1801, %1884 : vector<8x128xf32>
    %c469 = arith.constant 469 : index
    %1886 = memref.load %arg4[%c469] : memref<512xf32, #tpu.memory_space<smem>>
    %1887 = vector.broadcast %1886 : f32 to vector<8x128xf32>
    %1888 = arith.mulf %1887, %1829 : vector<8x128xf32>
    %1889 = arith.addf %1805, %1888 : vector<8x128xf32>
    %c501 = arith.constant 501 : index
    %1890 = memref.load %arg4[%c501] : memref<512xf32, #tpu.memory_space<smem>>
    %1891 = vector.broadcast %1890 : f32 to vector<8x128xf32>
    %1892 = arith.mulf %1891, %1829 : vector<8x128xf32>
    %1893 = arith.addf %1809, %1892 : vector<8x128xf32>
    %c22_138 = arith.constant 22 : index
    %1894 = memref.load %arg3[%c22_138] : memref<32xf32, #tpu.memory_space<smem>>
    %1895 = vector.broadcast %1894 : f32 to vector<8x128xf32>
    %c88 = arith.constant 88 : index
    %1896 = memref.load %arg2[%c88] : memref<128xf32, #tpu.memory_space<smem>>
    %1897 = vector.broadcast %1896 : f32 to vector<8x128xf32>
    %1898 = arith.mulf %1897, %4 : vector<8x128xf32>
    %1899 = arith.addf %1895, %1898 : vector<8x128xf32>
    %c89 = arith.constant 89 : index
    %1900 = memref.load %arg2[%c89] : memref<128xf32, #tpu.memory_space<smem>>
    %1901 = vector.broadcast %1900 : f32 to vector<8x128xf32>
    %1902 = arith.mulf %1901, %7 : vector<8x128xf32>
    %1903 = arith.addf %1899, %1902 : vector<8x128xf32>
    %c90 = arith.constant 90 : index
    %1904 = memref.load %arg2[%c90] : memref<128xf32, #tpu.memory_space<smem>>
    %1905 = vector.broadcast %1904 : f32 to vector<8x128xf32>
    %1906 = arith.mulf %1905, %10 : vector<8x128xf32>
    %1907 = arith.addf %1903, %1906 : vector<8x128xf32>
    %c91 = arith.constant 91 : index
    %1908 = memref.load %arg2[%c91] : memref<128xf32, #tpu.memory_space<smem>>
    %1909 = vector.broadcast %1908 : f32 to vector<8x128xf32>
    %1910 = arith.mulf %1909, %13 : vector<8x128xf32>
    %1911 = arith.addf %1907, %1910 : vector<8x128xf32>
    %cst_139 = arith.constant 0.000000e+00 : f32
    %1912 = vector.broadcast %cst_139 : f32 to vector<8x128xf32>
    %1913 = arith.maximumf %1911, %1912 : vector<8x128xf32>
    %c22_140 = arith.constant 22 : index
    %1914 = memref.load %arg4[%c22_140] : memref<512xf32, #tpu.memory_space<smem>>
    %1915 = vector.broadcast %1914 : f32 to vector<8x128xf32>
    %1916 = arith.mulf %1915, %1913 : vector<8x128xf32>
    %1917 = arith.addf %1833, %1916 : vector<8x128xf32>
    %c54_141 = arith.constant 54 : index
    %1918 = memref.load %arg4[%c54_141] : memref<512xf32, #tpu.memory_space<smem>>
    %1919 = vector.broadcast %1918 : f32 to vector<8x128xf32>
    %1920 = arith.mulf %1919, %1913 : vector<8x128xf32>
    %1921 = arith.addf %1837, %1920 : vector<8x128xf32>
    %c86_142 = arith.constant 86 : index
    %1922 = memref.load %arg4[%c86_142] : memref<512xf32, #tpu.memory_space<smem>>
    %1923 = vector.broadcast %1922 : f32 to vector<8x128xf32>
    %1924 = arith.mulf %1923, %1913 : vector<8x128xf32>
    %1925 = arith.addf %1841, %1924 : vector<8x128xf32>
    %c118 = arith.constant 118 : index
    %1926 = memref.load %arg4[%c118] : memref<512xf32, #tpu.memory_space<smem>>
    %1927 = vector.broadcast %1926 : f32 to vector<8x128xf32>
    %1928 = arith.mulf %1927, %1913 : vector<8x128xf32>
    %1929 = arith.addf %1845, %1928 : vector<8x128xf32>
    %c150 = arith.constant 150 : index
    %1930 = memref.load %arg4[%c150] : memref<512xf32, #tpu.memory_space<smem>>
    %1931 = vector.broadcast %1930 : f32 to vector<8x128xf32>
    %1932 = arith.mulf %1931, %1913 : vector<8x128xf32>
    %1933 = arith.addf %1849, %1932 : vector<8x128xf32>
    %c182 = arith.constant 182 : index
    %1934 = memref.load %arg4[%c182] : memref<512xf32, #tpu.memory_space<smem>>
    %1935 = vector.broadcast %1934 : f32 to vector<8x128xf32>
    %1936 = arith.mulf %1935, %1913 : vector<8x128xf32>
    %1937 = arith.addf %1853, %1936 : vector<8x128xf32>
    %c214 = arith.constant 214 : index
    %1938 = memref.load %arg4[%c214] : memref<512xf32, #tpu.memory_space<smem>>
    %1939 = vector.broadcast %1938 : f32 to vector<8x128xf32>
    %1940 = arith.mulf %1939, %1913 : vector<8x128xf32>
    %1941 = arith.addf %1857, %1940 : vector<8x128xf32>
    %c246 = arith.constant 246 : index
    %1942 = memref.load %arg4[%c246] : memref<512xf32, #tpu.memory_space<smem>>
    %1943 = vector.broadcast %1942 : f32 to vector<8x128xf32>
    %1944 = arith.mulf %1943, %1913 : vector<8x128xf32>
    %1945 = arith.addf %1861, %1944 : vector<8x128xf32>
    %c278 = arith.constant 278 : index
    %1946 = memref.load %arg4[%c278] : memref<512xf32, #tpu.memory_space<smem>>
    %1947 = vector.broadcast %1946 : f32 to vector<8x128xf32>
    %1948 = arith.mulf %1947, %1913 : vector<8x128xf32>
    %1949 = arith.addf %1865, %1948 : vector<8x128xf32>
    %c310 = arith.constant 310 : index
    %1950 = memref.load %arg4[%c310] : memref<512xf32, #tpu.memory_space<smem>>
    %1951 = vector.broadcast %1950 : f32 to vector<8x128xf32>
    %1952 = arith.mulf %1951, %1913 : vector<8x128xf32>
    %1953 = arith.addf %1869, %1952 : vector<8x128xf32>
    %c342 = arith.constant 342 : index
    %1954 = memref.load %arg4[%c342] : memref<512xf32, #tpu.memory_space<smem>>
    %1955 = vector.broadcast %1954 : f32 to vector<8x128xf32>
    %1956 = arith.mulf %1955, %1913 : vector<8x128xf32>
    %1957 = arith.addf %1873, %1956 : vector<8x128xf32>
    %c374 = arith.constant 374 : index
    %1958 = memref.load %arg4[%c374] : memref<512xf32, #tpu.memory_space<smem>>
    %1959 = vector.broadcast %1958 : f32 to vector<8x128xf32>
    %1960 = arith.mulf %1959, %1913 : vector<8x128xf32>
    %1961 = arith.addf %1877, %1960 : vector<8x128xf32>
    %c406 = arith.constant 406 : index
    %1962 = memref.load %arg4[%c406] : memref<512xf32, #tpu.memory_space<smem>>
    %1963 = vector.broadcast %1962 : f32 to vector<8x128xf32>
    %1964 = arith.mulf %1963, %1913 : vector<8x128xf32>
    %1965 = arith.addf %1881, %1964 : vector<8x128xf32>
    %c438 = arith.constant 438 : index
    %1966 = memref.load %arg4[%c438] : memref<512xf32, #tpu.memory_space<smem>>
    %1967 = vector.broadcast %1966 : f32 to vector<8x128xf32>
    %1968 = arith.mulf %1967, %1913 : vector<8x128xf32>
    %1969 = arith.addf %1885, %1968 : vector<8x128xf32>
    %c470 = arith.constant 470 : index
    %1970 = memref.load %arg4[%c470] : memref<512xf32, #tpu.memory_space<smem>>
    %1971 = vector.broadcast %1970 : f32 to vector<8x128xf32>
    %1972 = arith.mulf %1971, %1913 : vector<8x128xf32>
    %1973 = arith.addf %1889, %1972 : vector<8x128xf32>
    %c502 = arith.constant 502 : index
    %1974 = memref.load %arg4[%c502] : memref<512xf32, #tpu.memory_space<smem>>
    %1975 = vector.broadcast %1974 : f32 to vector<8x128xf32>
    %1976 = arith.mulf %1975, %1913 : vector<8x128xf32>
    %1977 = arith.addf %1893, %1976 : vector<8x128xf32>
    %c23_143 = arith.constant 23 : index
    %1978 = memref.load %arg3[%c23_143] : memref<32xf32, #tpu.memory_space<smem>>
    %1979 = vector.broadcast %1978 : f32 to vector<8x128xf32>
    %c92 = arith.constant 92 : index
    %1980 = memref.load %arg2[%c92] : memref<128xf32, #tpu.memory_space<smem>>
    %1981 = vector.broadcast %1980 : f32 to vector<8x128xf32>
    %1982 = arith.mulf %1981, %4 : vector<8x128xf32>
    %1983 = arith.addf %1979, %1982 : vector<8x128xf32>
    %c93 = arith.constant 93 : index
    %1984 = memref.load %arg2[%c93] : memref<128xf32, #tpu.memory_space<smem>>
    %1985 = vector.broadcast %1984 : f32 to vector<8x128xf32>
    %1986 = arith.mulf %1985, %7 : vector<8x128xf32>
    %1987 = arith.addf %1983, %1986 : vector<8x128xf32>
    %c94 = arith.constant 94 : index
    %1988 = memref.load %arg2[%c94] : memref<128xf32, #tpu.memory_space<smem>>
    %1989 = vector.broadcast %1988 : f32 to vector<8x128xf32>
    %1990 = arith.mulf %1989, %10 : vector<8x128xf32>
    %1991 = arith.addf %1987, %1990 : vector<8x128xf32>
    %c95 = arith.constant 95 : index
    %1992 = memref.load %arg2[%c95] : memref<128xf32, #tpu.memory_space<smem>>
    %1993 = vector.broadcast %1992 : f32 to vector<8x128xf32>
    %1994 = arith.mulf %1993, %13 : vector<8x128xf32>
    %1995 = arith.addf %1991, %1994 : vector<8x128xf32>
    %cst_144 = arith.constant 0.000000e+00 : f32
    %1996 = vector.broadcast %cst_144 : f32 to vector<8x128xf32>
    %1997 = arith.maximumf %1995, %1996 : vector<8x128xf32>
    %c23_145 = arith.constant 23 : index
    %1998 = memref.load %arg4[%c23_145] : memref<512xf32, #tpu.memory_space<smem>>
    %1999 = vector.broadcast %1998 : f32 to vector<8x128xf32>
    %2000 = arith.mulf %1999, %1997 : vector<8x128xf32>
    %2001 = arith.addf %1917, %2000 : vector<8x128xf32>
    %c55_146 = arith.constant 55 : index
    %2002 = memref.load %arg4[%c55_146] : memref<512xf32, #tpu.memory_space<smem>>
    %2003 = vector.broadcast %2002 : f32 to vector<8x128xf32>
    %2004 = arith.mulf %2003, %1997 : vector<8x128xf32>
    %2005 = arith.addf %1921, %2004 : vector<8x128xf32>
    %c87_147 = arith.constant 87 : index
    %2006 = memref.load %arg4[%c87_147] : memref<512xf32, #tpu.memory_space<smem>>
    %2007 = vector.broadcast %2006 : f32 to vector<8x128xf32>
    %2008 = arith.mulf %2007, %1997 : vector<8x128xf32>
    %2009 = arith.addf %1925, %2008 : vector<8x128xf32>
    %c119 = arith.constant 119 : index
    %2010 = memref.load %arg4[%c119] : memref<512xf32, #tpu.memory_space<smem>>
    %2011 = vector.broadcast %2010 : f32 to vector<8x128xf32>
    %2012 = arith.mulf %2011, %1997 : vector<8x128xf32>
    %2013 = arith.addf %1929, %2012 : vector<8x128xf32>
    %c151 = arith.constant 151 : index
    %2014 = memref.load %arg4[%c151] : memref<512xf32, #tpu.memory_space<smem>>
    %2015 = vector.broadcast %2014 : f32 to vector<8x128xf32>
    %2016 = arith.mulf %2015, %1997 : vector<8x128xf32>
    %2017 = arith.addf %1933, %2016 : vector<8x128xf32>
    %c183 = arith.constant 183 : index
    %2018 = memref.load %arg4[%c183] : memref<512xf32, #tpu.memory_space<smem>>
    %2019 = vector.broadcast %2018 : f32 to vector<8x128xf32>
    %2020 = arith.mulf %2019, %1997 : vector<8x128xf32>
    %2021 = arith.addf %1937, %2020 : vector<8x128xf32>
    %c215 = arith.constant 215 : index
    %2022 = memref.load %arg4[%c215] : memref<512xf32, #tpu.memory_space<smem>>
    %2023 = vector.broadcast %2022 : f32 to vector<8x128xf32>
    %2024 = arith.mulf %2023, %1997 : vector<8x128xf32>
    %2025 = arith.addf %1941, %2024 : vector<8x128xf32>
    %c247 = arith.constant 247 : index
    %2026 = memref.load %arg4[%c247] : memref<512xf32, #tpu.memory_space<smem>>
    %2027 = vector.broadcast %2026 : f32 to vector<8x128xf32>
    %2028 = arith.mulf %2027, %1997 : vector<8x128xf32>
    %2029 = arith.addf %1945, %2028 : vector<8x128xf32>
    %c279 = arith.constant 279 : index
    %2030 = memref.load %arg4[%c279] : memref<512xf32, #tpu.memory_space<smem>>
    %2031 = vector.broadcast %2030 : f32 to vector<8x128xf32>
    %2032 = arith.mulf %2031, %1997 : vector<8x128xf32>
    %2033 = arith.addf %1949, %2032 : vector<8x128xf32>
    %c311 = arith.constant 311 : index
    %2034 = memref.load %arg4[%c311] : memref<512xf32, #tpu.memory_space<smem>>
    %2035 = vector.broadcast %2034 : f32 to vector<8x128xf32>
    %2036 = arith.mulf %2035, %1997 : vector<8x128xf32>
    %2037 = arith.addf %1953, %2036 : vector<8x128xf32>
    %c343 = arith.constant 343 : index
    %2038 = memref.load %arg4[%c343] : memref<512xf32, #tpu.memory_space<smem>>
    %2039 = vector.broadcast %2038 : f32 to vector<8x128xf32>
    %2040 = arith.mulf %2039, %1997 : vector<8x128xf32>
    %2041 = arith.addf %1957, %2040 : vector<8x128xf32>
    %c375 = arith.constant 375 : index
    %2042 = memref.load %arg4[%c375] : memref<512xf32, #tpu.memory_space<smem>>
    %2043 = vector.broadcast %2042 : f32 to vector<8x128xf32>
    %2044 = arith.mulf %2043, %1997 : vector<8x128xf32>
    %2045 = arith.addf %1961, %2044 : vector<8x128xf32>
    %c407 = arith.constant 407 : index
    %2046 = memref.load %arg4[%c407] : memref<512xf32, #tpu.memory_space<smem>>
    %2047 = vector.broadcast %2046 : f32 to vector<8x128xf32>
    %2048 = arith.mulf %2047, %1997 : vector<8x128xf32>
    %2049 = arith.addf %1965, %2048 : vector<8x128xf32>
    %c439 = arith.constant 439 : index
    %2050 = memref.load %arg4[%c439] : memref<512xf32, #tpu.memory_space<smem>>
    %2051 = vector.broadcast %2050 : f32 to vector<8x128xf32>
    %2052 = arith.mulf %2051, %1997 : vector<8x128xf32>
    %2053 = arith.addf %1969, %2052 : vector<8x128xf32>
    %c471 = arith.constant 471 : index
    %2054 = memref.load %arg4[%c471] : memref<512xf32, #tpu.memory_space<smem>>
    %2055 = vector.broadcast %2054 : f32 to vector<8x128xf32>
    %2056 = arith.mulf %2055, %1997 : vector<8x128xf32>
    %2057 = arith.addf %1973, %2056 : vector<8x128xf32>
    %c503 = arith.constant 503 : index
    %2058 = memref.load %arg4[%c503] : memref<512xf32, #tpu.memory_space<smem>>
    %2059 = vector.broadcast %2058 : f32 to vector<8x128xf32>
    %2060 = arith.mulf %2059, %1997 : vector<8x128xf32>
    %2061 = arith.addf %1977, %2060 : vector<8x128xf32>
    %c24_148 = arith.constant 24 : index
    %2062 = memref.load %arg3[%c24_148] : memref<32xf32, #tpu.memory_space<smem>>
    %2063 = vector.broadcast %2062 : f32 to vector<8x128xf32>
    %c96_149 = arith.constant 96 : index
    %2064 = memref.load %arg2[%c96_149] : memref<128xf32, #tpu.memory_space<smem>>
    %2065 = vector.broadcast %2064 : f32 to vector<8x128xf32>
    %2066 = arith.mulf %2065, %4 : vector<8x128xf32>
    %2067 = arith.addf %2063, %2066 : vector<8x128xf32>
    %c97_150 = arith.constant 97 : index
    %2068 = memref.load %arg2[%c97_150] : memref<128xf32, #tpu.memory_space<smem>>
    %2069 = vector.broadcast %2068 : f32 to vector<8x128xf32>
    %2070 = arith.mulf %2069, %7 : vector<8x128xf32>
    %2071 = arith.addf %2067, %2070 : vector<8x128xf32>
    %c98_151 = arith.constant 98 : index
    %2072 = memref.load %arg2[%c98_151] : memref<128xf32, #tpu.memory_space<smem>>
    %2073 = vector.broadcast %2072 : f32 to vector<8x128xf32>
    %2074 = arith.mulf %2073, %10 : vector<8x128xf32>
    %2075 = arith.addf %2071, %2074 : vector<8x128xf32>
    %c99_152 = arith.constant 99 : index
    %2076 = memref.load %arg2[%c99_152] : memref<128xf32, #tpu.memory_space<smem>>
    %2077 = vector.broadcast %2076 : f32 to vector<8x128xf32>
    %2078 = arith.mulf %2077, %13 : vector<8x128xf32>
    %2079 = arith.addf %2075, %2078 : vector<8x128xf32>
    %cst_153 = arith.constant 0.000000e+00 : f32
    %2080 = vector.broadcast %cst_153 : f32 to vector<8x128xf32>
    %2081 = arith.maximumf %2079, %2080 : vector<8x128xf32>
    %c24_154 = arith.constant 24 : index
    %2082 = memref.load %arg4[%c24_154] : memref<512xf32, #tpu.memory_space<smem>>
    %2083 = vector.broadcast %2082 : f32 to vector<8x128xf32>
    %2084 = arith.mulf %2083, %2081 : vector<8x128xf32>
    %2085 = arith.addf %2001, %2084 : vector<8x128xf32>
    %c56_155 = arith.constant 56 : index
    %2086 = memref.load %arg4[%c56_155] : memref<512xf32, #tpu.memory_space<smem>>
    %2087 = vector.broadcast %2086 : f32 to vector<8x128xf32>
    %2088 = arith.mulf %2087, %2081 : vector<8x128xf32>
    %2089 = arith.addf %2005, %2088 : vector<8x128xf32>
    %c88_156 = arith.constant 88 : index
    %2090 = memref.load %arg4[%c88_156] : memref<512xf32, #tpu.memory_space<smem>>
    %2091 = vector.broadcast %2090 : f32 to vector<8x128xf32>
    %2092 = arith.mulf %2091, %2081 : vector<8x128xf32>
    %2093 = arith.addf %2009, %2092 : vector<8x128xf32>
    %c120 = arith.constant 120 : index
    %2094 = memref.load %arg4[%c120] : memref<512xf32, #tpu.memory_space<smem>>
    %2095 = vector.broadcast %2094 : f32 to vector<8x128xf32>
    %2096 = arith.mulf %2095, %2081 : vector<8x128xf32>
    %2097 = arith.addf %2013, %2096 : vector<8x128xf32>
    %c152 = arith.constant 152 : index
    %2098 = memref.load %arg4[%c152] : memref<512xf32, #tpu.memory_space<smem>>
    %2099 = vector.broadcast %2098 : f32 to vector<8x128xf32>
    %2100 = arith.mulf %2099, %2081 : vector<8x128xf32>
    %2101 = arith.addf %2017, %2100 : vector<8x128xf32>
    %c184 = arith.constant 184 : index
    %2102 = memref.load %arg4[%c184] : memref<512xf32, #tpu.memory_space<smem>>
    %2103 = vector.broadcast %2102 : f32 to vector<8x128xf32>
    %2104 = arith.mulf %2103, %2081 : vector<8x128xf32>
    %2105 = arith.addf %2021, %2104 : vector<8x128xf32>
    %c216 = arith.constant 216 : index
    %2106 = memref.load %arg4[%c216] : memref<512xf32, #tpu.memory_space<smem>>
    %2107 = vector.broadcast %2106 : f32 to vector<8x128xf32>
    %2108 = arith.mulf %2107, %2081 : vector<8x128xf32>
    %2109 = arith.addf %2025, %2108 : vector<8x128xf32>
    %c248 = arith.constant 248 : index
    %2110 = memref.load %arg4[%c248] : memref<512xf32, #tpu.memory_space<smem>>
    %2111 = vector.broadcast %2110 : f32 to vector<8x128xf32>
    %2112 = arith.mulf %2111, %2081 : vector<8x128xf32>
    %2113 = arith.addf %2029, %2112 : vector<8x128xf32>
    %c280 = arith.constant 280 : index
    %2114 = memref.load %arg4[%c280] : memref<512xf32, #tpu.memory_space<smem>>
    %2115 = vector.broadcast %2114 : f32 to vector<8x128xf32>
    %2116 = arith.mulf %2115, %2081 : vector<8x128xf32>
    %2117 = arith.addf %2033, %2116 : vector<8x128xf32>
    %c312 = arith.constant 312 : index
    %2118 = memref.load %arg4[%c312] : memref<512xf32, #tpu.memory_space<smem>>
    %2119 = vector.broadcast %2118 : f32 to vector<8x128xf32>
    %2120 = arith.mulf %2119, %2081 : vector<8x128xf32>
    %2121 = arith.addf %2037, %2120 : vector<8x128xf32>
    %c344 = arith.constant 344 : index
    %2122 = memref.load %arg4[%c344] : memref<512xf32, #tpu.memory_space<smem>>
    %2123 = vector.broadcast %2122 : f32 to vector<8x128xf32>
    %2124 = arith.mulf %2123, %2081 : vector<8x128xf32>
    %2125 = arith.addf %2041, %2124 : vector<8x128xf32>
    %c376 = arith.constant 376 : index
    %2126 = memref.load %arg4[%c376] : memref<512xf32, #tpu.memory_space<smem>>
    %2127 = vector.broadcast %2126 : f32 to vector<8x128xf32>
    %2128 = arith.mulf %2127, %2081 : vector<8x128xf32>
    %2129 = arith.addf %2045, %2128 : vector<8x128xf32>
    %c408 = arith.constant 408 : index
    %2130 = memref.load %arg4[%c408] : memref<512xf32, #tpu.memory_space<smem>>
    %2131 = vector.broadcast %2130 : f32 to vector<8x128xf32>
    %2132 = arith.mulf %2131, %2081 : vector<8x128xf32>
    %2133 = arith.addf %2049, %2132 : vector<8x128xf32>
    %c440 = arith.constant 440 : index
    %2134 = memref.load %arg4[%c440] : memref<512xf32, #tpu.memory_space<smem>>
    %2135 = vector.broadcast %2134 : f32 to vector<8x128xf32>
    %2136 = arith.mulf %2135, %2081 : vector<8x128xf32>
    %2137 = arith.addf %2053, %2136 : vector<8x128xf32>
    %c472 = arith.constant 472 : index
    %2138 = memref.load %arg4[%c472] : memref<512xf32, #tpu.memory_space<smem>>
    %2139 = vector.broadcast %2138 : f32 to vector<8x128xf32>
    %2140 = arith.mulf %2139, %2081 : vector<8x128xf32>
    %2141 = arith.addf %2057, %2140 : vector<8x128xf32>
    %c504 = arith.constant 504 : index
    %2142 = memref.load %arg4[%c504] : memref<512xf32, #tpu.memory_space<smem>>
    %2143 = vector.broadcast %2142 : f32 to vector<8x128xf32>
    %2144 = arith.mulf %2143, %2081 : vector<8x128xf32>
    %2145 = arith.addf %2061, %2144 : vector<8x128xf32>
    %c25_157 = arith.constant 25 : index
    %2146 = memref.load %arg3[%c25_157] : memref<32xf32, #tpu.memory_space<smem>>
    %2147 = vector.broadcast %2146 : f32 to vector<8x128xf32>
    %c100_158 = arith.constant 100 : index
    %2148 = memref.load %arg2[%c100_158] : memref<128xf32, #tpu.memory_space<smem>>
    %2149 = vector.broadcast %2148 : f32 to vector<8x128xf32>
    %2150 = arith.mulf %2149, %4 : vector<8x128xf32>
    %2151 = arith.addf %2147, %2150 : vector<8x128xf32>
    %c101_159 = arith.constant 101 : index
    %2152 = memref.load %arg2[%c101_159] : memref<128xf32, #tpu.memory_space<smem>>
    %2153 = vector.broadcast %2152 : f32 to vector<8x128xf32>
    %2154 = arith.mulf %2153, %7 : vector<8x128xf32>
    %2155 = arith.addf %2151, %2154 : vector<8x128xf32>
    %c102_160 = arith.constant 102 : index
    %2156 = memref.load %arg2[%c102_160] : memref<128xf32, #tpu.memory_space<smem>>
    %2157 = vector.broadcast %2156 : f32 to vector<8x128xf32>
    %2158 = arith.mulf %2157, %10 : vector<8x128xf32>
    %2159 = arith.addf %2155, %2158 : vector<8x128xf32>
    %c103_161 = arith.constant 103 : index
    %2160 = memref.load %arg2[%c103_161] : memref<128xf32, #tpu.memory_space<smem>>
    %2161 = vector.broadcast %2160 : f32 to vector<8x128xf32>
    %2162 = arith.mulf %2161, %13 : vector<8x128xf32>
    %2163 = arith.addf %2159, %2162 : vector<8x128xf32>
    %cst_162 = arith.constant 0.000000e+00 : f32
    %2164 = vector.broadcast %cst_162 : f32 to vector<8x128xf32>
    %2165 = arith.maximumf %2163, %2164 : vector<8x128xf32>
    %c25_163 = arith.constant 25 : index
    %2166 = memref.load %arg4[%c25_163] : memref<512xf32, #tpu.memory_space<smem>>
    %2167 = vector.broadcast %2166 : f32 to vector<8x128xf32>
    %2168 = arith.mulf %2167, %2165 : vector<8x128xf32>
    %2169 = arith.addf %2085, %2168 : vector<8x128xf32>
    %c57_164 = arith.constant 57 : index
    %2170 = memref.load %arg4[%c57_164] : memref<512xf32, #tpu.memory_space<smem>>
    %2171 = vector.broadcast %2170 : f32 to vector<8x128xf32>
    %2172 = arith.mulf %2171, %2165 : vector<8x128xf32>
    %2173 = arith.addf %2089, %2172 : vector<8x128xf32>
    %c89_165 = arith.constant 89 : index
    %2174 = memref.load %arg4[%c89_165] : memref<512xf32, #tpu.memory_space<smem>>
    %2175 = vector.broadcast %2174 : f32 to vector<8x128xf32>
    %2176 = arith.mulf %2175, %2165 : vector<8x128xf32>
    %2177 = arith.addf %2093, %2176 : vector<8x128xf32>
    %c121 = arith.constant 121 : index
    %2178 = memref.load %arg4[%c121] : memref<512xf32, #tpu.memory_space<smem>>
    %2179 = vector.broadcast %2178 : f32 to vector<8x128xf32>
    %2180 = arith.mulf %2179, %2165 : vector<8x128xf32>
    %2181 = arith.addf %2097, %2180 : vector<8x128xf32>
    %c153 = arith.constant 153 : index
    %2182 = memref.load %arg4[%c153] : memref<512xf32, #tpu.memory_space<smem>>
    %2183 = vector.broadcast %2182 : f32 to vector<8x128xf32>
    %2184 = arith.mulf %2183, %2165 : vector<8x128xf32>
    %2185 = arith.addf %2101, %2184 : vector<8x128xf32>
    %c185 = arith.constant 185 : index
    %2186 = memref.load %arg4[%c185] : memref<512xf32, #tpu.memory_space<smem>>
    %2187 = vector.broadcast %2186 : f32 to vector<8x128xf32>
    %2188 = arith.mulf %2187, %2165 : vector<8x128xf32>
    %2189 = arith.addf %2105, %2188 : vector<8x128xf32>
    %c217 = arith.constant 217 : index
    %2190 = memref.load %arg4[%c217] : memref<512xf32, #tpu.memory_space<smem>>
    %2191 = vector.broadcast %2190 : f32 to vector<8x128xf32>
    %2192 = arith.mulf %2191, %2165 : vector<8x128xf32>
    %2193 = arith.addf %2109, %2192 : vector<8x128xf32>
    %c249 = arith.constant 249 : index
    %2194 = memref.load %arg4[%c249] : memref<512xf32, #tpu.memory_space<smem>>
    %2195 = vector.broadcast %2194 : f32 to vector<8x128xf32>
    %2196 = arith.mulf %2195, %2165 : vector<8x128xf32>
    %2197 = arith.addf %2113, %2196 : vector<8x128xf32>
    %c281 = arith.constant 281 : index
    %2198 = memref.load %arg4[%c281] : memref<512xf32, #tpu.memory_space<smem>>
    %2199 = vector.broadcast %2198 : f32 to vector<8x128xf32>
    %2200 = arith.mulf %2199, %2165 : vector<8x128xf32>
    %2201 = arith.addf %2117, %2200 : vector<8x128xf32>
    %c313 = arith.constant 313 : index
    %2202 = memref.load %arg4[%c313] : memref<512xf32, #tpu.memory_space<smem>>
    %2203 = vector.broadcast %2202 : f32 to vector<8x128xf32>
    %2204 = arith.mulf %2203, %2165 : vector<8x128xf32>
    %2205 = arith.addf %2121, %2204 : vector<8x128xf32>
    %c345 = arith.constant 345 : index
    %2206 = memref.load %arg4[%c345] : memref<512xf32, #tpu.memory_space<smem>>
    %2207 = vector.broadcast %2206 : f32 to vector<8x128xf32>
    %2208 = arith.mulf %2207, %2165 : vector<8x128xf32>
    %2209 = arith.addf %2125, %2208 : vector<8x128xf32>
    %c377 = arith.constant 377 : index
    %2210 = memref.load %arg4[%c377] : memref<512xf32, #tpu.memory_space<smem>>
    %2211 = vector.broadcast %2210 : f32 to vector<8x128xf32>
    %2212 = arith.mulf %2211, %2165 : vector<8x128xf32>
    %2213 = arith.addf %2129, %2212 : vector<8x128xf32>
    %c409 = arith.constant 409 : index
    %2214 = memref.load %arg4[%c409] : memref<512xf32, #tpu.memory_space<smem>>
    %2215 = vector.broadcast %2214 : f32 to vector<8x128xf32>
    %2216 = arith.mulf %2215, %2165 : vector<8x128xf32>
    %2217 = arith.addf %2133, %2216 : vector<8x128xf32>
    %c441 = arith.constant 441 : index
    %2218 = memref.load %arg4[%c441] : memref<512xf32, #tpu.memory_space<smem>>
    %2219 = vector.broadcast %2218 : f32 to vector<8x128xf32>
    %2220 = arith.mulf %2219, %2165 : vector<8x128xf32>
    %2221 = arith.addf %2137, %2220 : vector<8x128xf32>
    %c473 = arith.constant 473 : index
    %2222 = memref.load %arg4[%c473] : memref<512xf32, #tpu.memory_space<smem>>
    %2223 = vector.broadcast %2222 : f32 to vector<8x128xf32>
    %2224 = arith.mulf %2223, %2165 : vector<8x128xf32>
    %2225 = arith.addf %2141, %2224 : vector<8x128xf32>
    %c505 = arith.constant 505 : index
    %2226 = memref.load %arg4[%c505] : memref<512xf32, #tpu.memory_space<smem>>
    %2227 = vector.broadcast %2226 : f32 to vector<8x128xf32>
    %2228 = arith.mulf %2227, %2165 : vector<8x128xf32>
    %2229 = arith.addf %2145, %2228 : vector<8x128xf32>
    %c26_166 = arith.constant 26 : index
    %2230 = memref.load %arg3[%c26_166] : memref<32xf32, #tpu.memory_space<smem>>
    %2231 = vector.broadcast %2230 : f32 to vector<8x128xf32>
    %c104_167 = arith.constant 104 : index
    %2232 = memref.load %arg2[%c104_167] : memref<128xf32, #tpu.memory_space<smem>>
    %2233 = vector.broadcast %2232 : f32 to vector<8x128xf32>
    %2234 = arith.mulf %2233, %4 : vector<8x128xf32>
    %2235 = arith.addf %2231, %2234 : vector<8x128xf32>
    %c105_168 = arith.constant 105 : index
    %2236 = memref.load %arg2[%c105_168] : memref<128xf32, #tpu.memory_space<smem>>
    %2237 = vector.broadcast %2236 : f32 to vector<8x128xf32>
    %2238 = arith.mulf %2237, %7 : vector<8x128xf32>
    %2239 = arith.addf %2235, %2238 : vector<8x128xf32>
    %c106_169 = arith.constant 106 : index
    %2240 = memref.load %arg2[%c106_169] : memref<128xf32, #tpu.memory_space<smem>>
    %2241 = vector.broadcast %2240 : f32 to vector<8x128xf32>
    %2242 = arith.mulf %2241, %10 : vector<8x128xf32>
    %2243 = arith.addf %2239, %2242 : vector<8x128xf32>
    %c107_170 = arith.constant 107 : index
    %2244 = memref.load %arg2[%c107_170] : memref<128xf32, #tpu.memory_space<smem>>
    %2245 = vector.broadcast %2244 : f32 to vector<8x128xf32>
    %2246 = arith.mulf %2245, %13 : vector<8x128xf32>
    %2247 = arith.addf %2243, %2246 : vector<8x128xf32>
    %cst_171 = arith.constant 0.000000e+00 : f32
    %2248 = vector.broadcast %cst_171 : f32 to vector<8x128xf32>
    %2249 = arith.maximumf %2247, %2248 : vector<8x128xf32>
    %c26_172 = arith.constant 26 : index
    %2250 = memref.load %arg4[%c26_172] : memref<512xf32, #tpu.memory_space<smem>>
    %2251 = vector.broadcast %2250 : f32 to vector<8x128xf32>
    %2252 = arith.mulf %2251, %2249 : vector<8x128xf32>
    %2253 = arith.addf %2169, %2252 : vector<8x128xf32>
    %c58_173 = arith.constant 58 : index
    %2254 = memref.load %arg4[%c58_173] : memref<512xf32, #tpu.memory_space<smem>>
    %2255 = vector.broadcast %2254 : f32 to vector<8x128xf32>
    %2256 = arith.mulf %2255, %2249 : vector<8x128xf32>
    %2257 = arith.addf %2173, %2256 : vector<8x128xf32>
    %c90_174 = arith.constant 90 : index
    %2258 = memref.load %arg4[%c90_174] : memref<512xf32, #tpu.memory_space<smem>>
    %2259 = vector.broadcast %2258 : f32 to vector<8x128xf32>
    %2260 = arith.mulf %2259, %2249 : vector<8x128xf32>
    %2261 = arith.addf %2177, %2260 : vector<8x128xf32>
    %c122 = arith.constant 122 : index
    %2262 = memref.load %arg4[%c122] : memref<512xf32, #tpu.memory_space<smem>>
    %2263 = vector.broadcast %2262 : f32 to vector<8x128xf32>
    %2264 = arith.mulf %2263, %2249 : vector<8x128xf32>
    %2265 = arith.addf %2181, %2264 : vector<8x128xf32>
    %c154 = arith.constant 154 : index
    %2266 = memref.load %arg4[%c154] : memref<512xf32, #tpu.memory_space<smem>>
    %2267 = vector.broadcast %2266 : f32 to vector<8x128xf32>
    %2268 = arith.mulf %2267, %2249 : vector<8x128xf32>
    %2269 = arith.addf %2185, %2268 : vector<8x128xf32>
    %c186 = arith.constant 186 : index
    %2270 = memref.load %arg4[%c186] : memref<512xf32, #tpu.memory_space<smem>>
    %2271 = vector.broadcast %2270 : f32 to vector<8x128xf32>
    %2272 = arith.mulf %2271, %2249 : vector<8x128xf32>
    %2273 = arith.addf %2189, %2272 : vector<8x128xf32>
    %c218 = arith.constant 218 : index
    %2274 = memref.load %arg4[%c218] : memref<512xf32, #tpu.memory_space<smem>>
    %2275 = vector.broadcast %2274 : f32 to vector<8x128xf32>
    %2276 = arith.mulf %2275, %2249 : vector<8x128xf32>
    %2277 = arith.addf %2193, %2276 : vector<8x128xf32>
    %c250 = arith.constant 250 : index
    %2278 = memref.load %arg4[%c250] : memref<512xf32, #tpu.memory_space<smem>>
    %2279 = vector.broadcast %2278 : f32 to vector<8x128xf32>
    %2280 = arith.mulf %2279, %2249 : vector<8x128xf32>
    %2281 = arith.addf %2197, %2280 : vector<8x128xf32>
    %c282 = arith.constant 282 : index
    %2282 = memref.load %arg4[%c282] : memref<512xf32, #tpu.memory_space<smem>>
    %2283 = vector.broadcast %2282 : f32 to vector<8x128xf32>
    %2284 = arith.mulf %2283, %2249 : vector<8x128xf32>
    %2285 = arith.addf %2201, %2284 : vector<8x128xf32>
    %c314 = arith.constant 314 : index
    %2286 = memref.load %arg4[%c314] : memref<512xf32, #tpu.memory_space<smem>>
    %2287 = vector.broadcast %2286 : f32 to vector<8x128xf32>
    %2288 = arith.mulf %2287, %2249 : vector<8x128xf32>
    %2289 = arith.addf %2205, %2288 : vector<8x128xf32>
    %c346 = arith.constant 346 : index
    %2290 = memref.load %arg4[%c346] : memref<512xf32, #tpu.memory_space<smem>>
    %2291 = vector.broadcast %2290 : f32 to vector<8x128xf32>
    %2292 = arith.mulf %2291, %2249 : vector<8x128xf32>
    %2293 = arith.addf %2209, %2292 : vector<8x128xf32>
    %c378 = arith.constant 378 : index
    %2294 = memref.load %arg4[%c378] : memref<512xf32, #tpu.memory_space<smem>>
    %2295 = vector.broadcast %2294 : f32 to vector<8x128xf32>
    %2296 = arith.mulf %2295, %2249 : vector<8x128xf32>
    %2297 = arith.addf %2213, %2296 : vector<8x128xf32>
    %c410 = arith.constant 410 : index
    %2298 = memref.load %arg4[%c410] : memref<512xf32, #tpu.memory_space<smem>>
    %2299 = vector.broadcast %2298 : f32 to vector<8x128xf32>
    %2300 = arith.mulf %2299, %2249 : vector<8x128xf32>
    %2301 = arith.addf %2217, %2300 : vector<8x128xf32>
    %c442 = arith.constant 442 : index
    %2302 = memref.load %arg4[%c442] : memref<512xf32, #tpu.memory_space<smem>>
    %2303 = vector.broadcast %2302 : f32 to vector<8x128xf32>
    %2304 = arith.mulf %2303, %2249 : vector<8x128xf32>
    %2305 = arith.addf %2221, %2304 : vector<8x128xf32>
    %c474 = arith.constant 474 : index
    %2306 = memref.load %arg4[%c474] : memref<512xf32, #tpu.memory_space<smem>>
    %2307 = vector.broadcast %2306 : f32 to vector<8x128xf32>
    %2308 = arith.mulf %2307, %2249 : vector<8x128xf32>
    %2309 = arith.addf %2225, %2308 : vector<8x128xf32>
    %c506 = arith.constant 506 : index
    %2310 = memref.load %arg4[%c506] : memref<512xf32, #tpu.memory_space<smem>>
    %2311 = vector.broadcast %2310 : f32 to vector<8x128xf32>
    %2312 = arith.mulf %2311, %2249 : vector<8x128xf32>
    %2313 = arith.addf %2229, %2312 : vector<8x128xf32>
    %c27_175 = arith.constant 27 : index
    %2314 = memref.load %arg3[%c27_175] : memref<32xf32, #tpu.memory_space<smem>>
    %2315 = vector.broadcast %2314 : f32 to vector<8x128xf32>
    %c108_176 = arith.constant 108 : index
    %2316 = memref.load %arg2[%c108_176] : memref<128xf32, #tpu.memory_space<smem>>
    %2317 = vector.broadcast %2316 : f32 to vector<8x128xf32>
    %2318 = arith.mulf %2317, %4 : vector<8x128xf32>
    %2319 = arith.addf %2315, %2318 : vector<8x128xf32>
    %c109_177 = arith.constant 109 : index
    %2320 = memref.load %arg2[%c109_177] : memref<128xf32, #tpu.memory_space<smem>>
    %2321 = vector.broadcast %2320 : f32 to vector<8x128xf32>
    %2322 = arith.mulf %2321, %7 : vector<8x128xf32>
    %2323 = arith.addf %2319, %2322 : vector<8x128xf32>
    %c110_178 = arith.constant 110 : index
    %2324 = memref.load %arg2[%c110_178] : memref<128xf32, #tpu.memory_space<smem>>
    %2325 = vector.broadcast %2324 : f32 to vector<8x128xf32>
    %2326 = arith.mulf %2325, %10 : vector<8x128xf32>
    %2327 = arith.addf %2323, %2326 : vector<8x128xf32>
    %c111_179 = arith.constant 111 : index
    %2328 = memref.load %arg2[%c111_179] : memref<128xf32, #tpu.memory_space<smem>>
    %2329 = vector.broadcast %2328 : f32 to vector<8x128xf32>
    %2330 = arith.mulf %2329, %13 : vector<8x128xf32>
    %2331 = arith.addf %2327, %2330 : vector<8x128xf32>
    %cst_180 = arith.constant 0.000000e+00 : f32
    %2332 = vector.broadcast %cst_180 : f32 to vector<8x128xf32>
    %2333 = arith.maximumf %2331, %2332 : vector<8x128xf32>
    %c27_181 = arith.constant 27 : index
    %2334 = memref.load %arg4[%c27_181] : memref<512xf32, #tpu.memory_space<smem>>
    %2335 = vector.broadcast %2334 : f32 to vector<8x128xf32>
    %2336 = arith.mulf %2335, %2333 : vector<8x128xf32>
    %2337 = arith.addf %2253, %2336 : vector<8x128xf32>
    %c59_182 = arith.constant 59 : index
    %2338 = memref.load %arg4[%c59_182] : memref<512xf32, #tpu.memory_space<smem>>
    %2339 = vector.broadcast %2338 : f32 to vector<8x128xf32>
    %2340 = arith.mulf %2339, %2333 : vector<8x128xf32>
    %2341 = arith.addf %2257, %2340 : vector<8x128xf32>
    %c91_183 = arith.constant 91 : index
    %2342 = memref.load %arg4[%c91_183] : memref<512xf32, #tpu.memory_space<smem>>
    %2343 = vector.broadcast %2342 : f32 to vector<8x128xf32>
    %2344 = arith.mulf %2343, %2333 : vector<8x128xf32>
    %2345 = arith.addf %2261, %2344 : vector<8x128xf32>
    %c123 = arith.constant 123 : index
    %2346 = memref.load %arg4[%c123] : memref<512xf32, #tpu.memory_space<smem>>
    %2347 = vector.broadcast %2346 : f32 to vector<8x128xf32>
    %2348 = arith.mulf %2347, %2333 : vector<8x128xf32>
    %2349 = arith.addf %2265, %2348 : vector<8x128xf32>
    %c155 = arith.constant 155 : index
    %2350 = memref.load %arg4[%c155] : memref<512xf32, #tpu.memory_space<smem>>
    %2351 = vector.broadcast %2350 : f32 to vector<8x128xf32>
    %2352 = arith.mulf %2351, %2333 : vector<8x128xf32>
    %2353 = arith.addf %2269, %2352 : vector<8x128xf32>
    %c187 = arith.constant 187 : index
    %2354 = memref.load %arg4[%c187] : memref<512xf32, #tpu.memory_space<smem>>
    %2355 = vector.broadcast %2354 : f32 to vector<8x128xf32>
    %2356 = arith.mulf %2355, %2333 : vector<8x128xf32>
    %2357 = arith.addf %2273, %2356 : vector<8x128xf32>
    %c219 = arith.constant 219 : index
    %2358 = memref.load %arg4[%c219] : memref<512xf32, #tpu.memory_space<smem>>
    %2359 = vector.broadcast %2358 : f32 to vector<8x128xf32>
    %2360 = arith.mulf %2359, %2333 : vector<8x128xf32>
    %2361 = arith.addf %2277, %2360 : vector<8x128xf32>
    %c251 = arith.constant 251 : index
    %2362 = memref.load %arg4[%c251] : memref<512xf32, #tpu.memory_space<smem>>
    %2363 = vector.broadcast %2362 : f32 to vector<8x128xf32>
    %2364 = arith.mulf %2363, %2333 : vector<8x128xf32>
    %2365 = arith.addf %2281, %2364 : vector<8x128xf32>
    %c283 = arith.constant 283 : index
    %2366 = memref.load %arg4[%c283] : memref<512xf32, #tpu.memory_space<smem>>
    %2367 = vector.broadcast %2366 : f32 to vector<8x128xf32>
    %2368 = arith.mulf %2367, %2333 : vector<8x128xf32>
    %2369 = arith.addf %2285, %2368 : vector<8x128xf32>
    %c315 = arith.constant 315 : index
    %2370 = memref.load %arg4[%c315] : memref<512xf32, #tpu.memory_space<smem>>
    %2371 = vector.broadcast %2370 : f32 to vector<8x128xf32>
    %2372 = arith.mulf %2371, %2333 : vector<8x128xf32>
    %2373 = arith.addf %2289, %2372 : vector<8x128xf32>
    %c347 = arith.constant 347 : index
    %2374 = memref.load %arg4[%c347] : memref<512xf32, #tpu.memory_space<smem>>
    %2375 = vector.broadcast %2374 : f32 to vector<8x128xf32>
    %2376 = arith.mulf %2375, %2333 : vector<8x128xf32>
    %2377 = arith.addf %2293, %2376 : vector<8x128xf32>
    %c379 = arith.constant 379 : index
    %2378 = memref.load %arg4[%c379] : memref<512xf32, #tpu.memory_space<smem>>
    %2379 = vector.broadcast %2378 : f32 to vector<8x128xf32>
    %2380 = arith.mulf %2379, %2333 : vector<8x128xf32>
    %2381 = arith.addf %2297, %2380 : vector<8x128xf32>
    %c411 = arith.constant 411 : index
    %2382 = memref.load %arg4[%c411] : memref<512xf32, #tpu.memory_space<smem>>
    %2383 = vector.broadcast %2382 : f32 to vector<8x128xf32>
    %2384 = arith.mulf %2383, %2333 : vector<8x128xf32>
    %2385 = arith.addf %2301, %2384 : vector<8x128xf32>
    %c443 = arith.constant 443 : index
    %2386 = memref.load %arg4[%c443] : memref<512xf32, #tpu.memory_space<smem>>
    %2387 = vector.broadcast %2386 : f32 to vector<8x128xf32>
    %2388 = arith.mulf %2387, %2333 : vector<8x128xf32>
    %2389 = arith.addf %2305, %2388 : vector<8x128xf32>
    %c475 = arith.constant 475 : index
    %2390 = memref.load %arg4[%c475] : memref<512xf32, #tpu.memory_space<smem>>
    %2391 = vector.broadcast %2390 : f32 to vector<8x128xf32>
    %2392 = arith.mulf %2391, %2333 : vector<8x128xf32>
    %2393 = arith.addf %2309, %2392 : vector<8x128xf32>
    %c507 = arith.constant 507 : index
    %2394 = memref.load %arg4[%c507] : memref<512xf32, #tpu.memory_space<smem>>
    %2395 = vector.broadcast %2394 : f32 to vector<8x128xf32>
    %2396 = arith.mulf %2395, %2333 : vector<8x128xf32>
    %2397 = arith.addf %2313, %2396 : vector<8x128xf32>
    %c28_184 = arith.constant 28 : index
    %2398 = memref.load %arg3[%c28_184] : memref<32xf32, #tpu.memory_space<smem>>
    %2399 = vector.broadcast %2398 : f32 to vector<8x128xf32>
    %c112_185 = arith.constant 112 : index
    %2400 = memref.load %arg2[%c112_185] : memref<128xf32, #tpu.memory_space<smem>>
    %2401 = vector.broadcast %2400 : f32 to vector<8x128xf32>
    %2402 = arith.mulf %2401, %4 : vector<8x128xf32>
    %2403 = arith.addf %2399, %2402 : vector<8x128xf32>
    %c113_186 = arith.constant 113 : index
    %2404 = memref.load %arg2[%c113_186] : memref<128xf32, #tpu.memory_space<smem>>
    %2405 = vector.broadcast %2404 : f32 to vector<8x128xf32>
    %2406 = arith.mulf %2405, %7 : vector<8x128xf32>
    %2407 = arith.addf %2403, %2406 : vector<8x128xf32>
    %c114_187 = arith.constant 114 : index
    %2408 = memref.load %arg2[%c114_187] : memref<128xf32, #tpu.memory_space<smem>>
    %2409 = vector.broadcast %2408 : f32 to vector<8x128xf32>
    %2410 = arith.mulf %2409, %10 : vector<8x128xf32>
    %2411 = arith.addf %2407, %2410 : vector<8x128xf32>
    %c115_188 = arith.constant 115 : index
    %2412 = memref.load %arg2[%c115_188] : memref<128xf32, #tpu.memory_space<smem>>
    %2413 = vector.broadcast %2412 : f32 to vector<8x128xf32>
    %2414 = arith.mulf %2413, %13 : vector<8x128xf32>
    %2415 = arith.addf %2411, %2414 : vector<8x128xf32>
    %cst_189 = arith.constant 0.000000e+00 : f32
    %2416 = vector.broadcast %cst_189 : f32 to vector<8x128xf32>
    %2417 = arith.maximumf %2415, %2416 : vector<8x128xf32>
    %c28_190 = arith.constant 28 : index
    %2418 = memref.load %arg4[%c28_190] : memref<512xf32, #tpu.memory_space<smem>>
    %2419 = vector.broadcast %2418 : f32 to vector<8x128xf32>
    %2420 = arith.mulf %2419, %2417 : vector<8x128xf32>
    %2421 = arith.addf %2337, %2420 : vector<8x128xf32>
    %c60_191 = arith.constant 60 : index
    %2422 = memref.load %arg4[%c60_191] : memref<512xf32, #tpu.memory_space<smem>>
    %2423 = vector.broadcast %2422 : f32 to vector<8x128xf32>
    %2424 = arith.mulf %2423, %2417 : vector<8x128xf32>
    %2425 = arith.addf %2341, %2424 : vector<8x128xf32>
    %c92_192 = arith.constant 92 : index
    %2426 = memref.load %arg4[%c92_192] : memref<512xf32, #tpu.memory_space<smem>>
    %2427 = vector.broadcast %2426 : f32 to vector<8x128xf32>
    %2428 = arith.mulf %2427, %2417 : vector<8x128xf32>
    %2429 = arith.addf %2345, %2428 : vector<8x128xf32>
    %c124 = arith.constant 124 : index
    %2430 = memref.load %arg4[%c124] : memref<512xf32, #tpu.memory_space<smem>>
    %2431 = vector.broadcast %2430 : f32 to vector<8x128xf32>
    %2432 = arith.mulf %2431, %2417 : vector<8x128xf32>
    %2433 = arith.addf %2349, %2432 : vector<8x128xf32>
    %c156 = arith.constant 156 : index
    %2434 = memref.load %arg4[%c156] : memref<512xf32, #tpu.memory_space<smem>>
    %2435 = vector.broadcast %2434 : f32 to vector<8x128xf32>
    %2436 = arith.mulf %2435, %2417 : vector<8x128xf32>
    %2437 = arith.addf %2353, %2436 : vector<8x128xf32>
    %c188 = arith.constant 188 : index
    %2438 = memref.load %arg4[%c188] : memref<512xf32, #tpu.memory_space<smem>>
    %2439 = vector.broadcast %2438 : f32 to vector<8x128xf32>
    %2440 = arith.mulf %2439, %2417 : vector<8x128xf32>
    %2441 = arith.addf %2357, %2440 : vector<8x128xf32>
    %c220 = arith.constant 220 : index
    %2442 = memref.load %arg4[%c220] : memref<512xf32, #tpu.memory_space<smem>>
    %2443 = vector.broadcast %2442 : f32 to vector<8x128xf32>
    %2444 = arith.mulf %2443, %2417 : vector<8x128xf32>
    %2445 = arith.addf %2361, %2444 : vector<8x128xf32>
    %c252 = arith.constant 252 : index
    %2446 = memref.load %arg4[%c252] : memref<512xf32, #tpu.memory_space<smem>>
    %2447 = vector.broadcast %2446 : f32 to vector<8x128xf32>
    %2448 = arith.mulf %2447, %2417 : vector<8x128xf32>
    %2449 = arith.addf %2365, %2448 : vector<8x128xf32>
    %c284 = arith.constant 284 : index
    %2450 = memref.load %arg4[%c284] : memref<512xf32, #tpu.memory_space<smem>>
    %2451 = vector.broadcast %2450 : f32 to vector<8x128xf32>
    %2452 = arith.mulf %2451, %2417 : vector<8x128xf32>
    %2453 = arith.addf %2369, %2452 : vector<8x128xf32>
    %c316 = arith.constant 316 : index
    %2454 = memref.load %arg4[%c316] : memref<512xf32, #tpu.memory_space<smem>>
    %2455 = vector.broadcast %2454 : f32 to vector<8x128xf32>
    %2456 = arith.mulf %2455, %2417 : vector<8x128xf32>
    %2457 = arith.addf %2373, %2456 : vector<8x128xf32>
    %c348 = arith.constant 348 : index
    %2458 = memref.load %arg4[%c348] : memref<512xf32, #tpu.memory_space<smem>>
    %2459 = vector.broadcast %2458 : f32 to vector<8x128xf32>
    %2460 = arith.mulf %2459, %2417 : vector<8x128xf32>
    %2461 = arith.addf %2377, %2460 : vector<8x128xf32>
    %c380 = arith.constant 380 : index
    %2462 = memref.load %arg4[%c380] : memref<512xf32, #tpu.memory_space<smem>>
    %2463 = vector.broadcast %2462 : f32 to vector<8x128xf32>
    %2464 = arith.mulf %2463, %2417 : vector<8x128xf32>
    %2465 = arith.addf %2381, %2464 : vector<8x128xf32>
    %c412 = arith.constant 412 : index
    %2466 = memref.load %arg4[%c412] : memref<512xf32, #tpu.memory_space<smem>>
    %2467 = vector.broadcast %2466 : f32 to vector<8x128xf32>
    %2468 = arith.mulf %2467, %2417 : vector<8x128xf32>
    %2469 = arith.addf %2385, %2468 : vector<8x128xf32>
    %c444 = arith.constant 444 : index
    %2470 = memref.load %arg4[%c444] : memref<512xf32, #tpu.memory_space<smem>>
    %2471 = vector.broadcast %2470 : f32 to vector<8x128xf32>
    %2472 = arith.mulf %2471, %2417 : vector<8x128xf32>
    %2473 = arith.addf %2389, %2472 : vector<8x128xf32>
    %c476 = arith.constant 476 : index
    %2474 = memref.load %arg4[%c476] : memref<512xf32, #tpu.memory_space<smem>>
    %2475 = vector.broadcast %2474 : f32 to vector<8x128xf32>
    %2476 = arith.mulf %2475, %2417 : vector<8x128xf32>
    %2477 = arith.addf %2393, %2476 : vector<8x128xf32>
    %c508 = arith.constant 508 : index
    %2478 = memref.load %arg4[%c508] : memref<512xf32, #tpu.memory_space<smem>>
    %2479 = vector.broadcast %2478 : f32 to vector<8x128xf32>
    %2480 = arith.mulf %2479, %2417 : vector<8x128xf32>
    %2481 = arith.addf %2397, %2480 : vector<8x128xf32>
    %c29_193 = arith.constant 29 : index
    %2482 = memref.load %arg3[%c29_193] : memref<32xf32, #tpu.memory_space<smem>>
    %2483 = vector.broadcast %2482 : f32 to vector<8x128xf32>
    %c116_194 = arith.constant 116 : index
    %2484 = memref.load %arg2[%c116_194] : memref<128xf32, #tpu.memory_space<smem>>
    %2485 = vector.broadcast %2484 : f32 to vector<8x128xf32>
    %2486 = arith.mulf %2485, %4 : vector<8x128xf32>
    %2487 = arith.addf %2483, %2486 : vector<8x128xf32>
    %c117_195 = arith.constant 117 : index
    %2488 = memref.load %arg2[%c117_195] : memref<128xf32, #tpu.memory_space<smem>>
    %2489 = vector.broadcast %2488 : f32 to vector<8x128xf32>
    %2490 = arith.mulf %2489, %7 : vector<8x128xf32>
    %2491 = arith.addf %2487, %2490 : vector<8x128xf32>
    %c118_196 = arith.constant 118 : index
    %2492 = memref.load %arg2[%c118_196] : memref<128xf32, #tpu.memory_space<smem>>
    %2493 = vector.broadcast %2492 : f32 to vector<8x128xf32>
    %2494 = arith.mulf %2493, %10 : vector<8x128xf32>
    %2495 = arith.addf %2491, %2494 : vector<8x128xf32>
    %c119_197 = arith.constant 119 : index
    %2496 = memref.load %arg2[%c119_197] : memref<128xf32, #tpu.memory_space<smem>>
    %2497 = vector.broadcast %2496 : f32 to vector<8x128xf32>
    %2498 = arith.mulf %2497, %13 : vector<8x128xf32>
    %2499 = arith.addf %2495, %2498 : vector<8x128xf32>
    %cst_198 = arith.constant 0.000000e+00 : f32
    %2500 = vector.broadcast %cst_198 : f32 to vector<8x128xf32>
    %2501 = arith.maximumf %2499, %2500 : vector<8x128xf32>
    %c29_199 = arith.constant 29 : index
    %2502 = memref.load %arg4[%c29_199] : memref<512xf32, #tpu.memory_space<smem>>
    %2503 = vector.broadcast %2502 : f32 to vector<8x128xf32>
    %2504 = arith.mulf %2503, %2501 : vector<8x128xf32>
    %2505 = arith.addf %2421, %2504 : vector<8x128xf32>
    %c61_200 = arith.constant 61 : index
    %2506 = memref.load %arg4[%c61_200] : memref<512xf32, #tpu.memory_space<smem>>
    %2507 = vector.broadcast %2506 : f32 to vector<8x128xf32>
    %2508 = arith.mulf %2507, %2501 : vector<8x128xf32>
    %2509 = arith.addf %2425, %2508 : vector<8x128xf32>
    %c93_201 = arith.constant 93 : index
    %2510 = memref.load %arg4[%c93_201] : memref<512xf32, #tpu.memory_space<smem>>
    %2511 = vector.broadcast %2510 : f32 to vector<8x128xf32>
    %2512 = arith.mulf %2511, %2501 : vector<8x128xf32>
    %2513 = arith.addf %2429, %2512 : vector<8x128xf32>
    %c125 = arith.constant 125 : index
    %2514 = memref.load %arg4[%c125] : memref<512xf32, #tpu.memory_space<smem>>
    %2515 = vector.broadcast %2514 : f32 to vector<8x128xf32>
    %2516 = arith.mulf %2515, %2501 : vector<8x128xf32>
    %2517 = arith.addf %2433, %2516 : vector<8x128xf32>
    %c157 = arith.constant 157 : index
    %2518 = memref.load %arg4[%c157] : memref<512xf32, #tpu.memory_space<smem>>
    %2519 = vector.broadcast %2518 : f32 to vector<8x128xf32>
    %2520 = arith.mulf %2519, %2501 : vector<8x128xf32>
    %2521 = arith.addf %2437, %2520 : vector<8x128xf32>
    %c189 = arith.constant 189 : index
    %2522 = memref.load %arg4[%c189] : memref<512xf32, #tpu.memory_space<smem>>
    %2523 = vector.broadcast %2522 : f32 to vector<8x128xf32>
    %2524 = arith.mulf %2523, %2501 : vector<8x128xf32>
    %2525 = arith.addf %2441, %2524 : vector<8x128xf32>
    %c221 = arith.constant 221 : index
    %2526 = memref.load %arg4[%c221] : memref<512xf32, #tpu.memory_space<smem>>
    %2527 = vector.broadcast %2526 : f32 to vector<8x128xf32>
    %2528 = arith.mulf %2527, %2501 : vector<8x128xf32>
    %2529 = arith.addf %2445, %2528 : vector<8x128xf32>
    %c253 = arith.constant 253 : index
    %2530 = memref.load %arg4[%c253] : memref<512xf32, #tpu.memory_space<smem>>
    %2531 = vector.broadcast %2530 : f32 to vector<8x128xf32>
    %2532 = arith.mulf %2531, %2501 : vector<8x128xf32>
    %2533 = arith.addf %2449, %2532 : vector<8x128xf32>
    %c285 = arith.constant 285 : index
    %2534 = memref.load %arg4[%c285] : memref<512xf32, #tpu.memory_space<smem>>
    %2535 = vector.broadcast %2534 : f32 to vector<8x128xf32>
    %2536 = arith.mulf %2535, %2501 : vector<8x128xf32>
    %2537 = arith.addf %2453, %2536 : vector<8x128xf32>
    %c317 = arith.constant 317 : index
    %2538 = memref.load %arg4[%c317] : memref<512xf32, #tpu.memory_space<smem>>
    %2539 = vector.broadcast %2538 : f32 to vector<8x128xf32>
    %2540 = arith.mulf %2539, %2501 : vector<8x128xf32>
    %2541 = arith.addf %2457, %2540 : vector<8x128xf32>
    %c349 = arith.constant 349 : index
    %2542 = memref.load %arg4[%c349] : memref<512xf32, #tpu.memory_space<smem>>
    %2543 = vector.broadcast %2542 : f32 to vector<8x128xf32>
    %2544 = arith.mulf %2543, %2501 : vector<8x128xf32>
    %2545 = arith.addf %2461, %2544 : vector<8x128xf32>
    %c381 = arith.constant 381 : index
    %2546 = memref.load %arg4[%c381] : memref<512xf32, #tpu.memory_space<smem>>
    %2547 = vector.broadcast %2546 : f32 to vector<8x128xf32>
    %2548 = arith.mulf %2547, %2501 : vector<8x128xf32>
    %2549 = arith.addf %2465, %2548 : vector<8x128xf32>
    %c413 = arith.constant 413 : index
    %2550 = memref.load %arg4[%c413] : memref<512xf32, #tpu.memory_space<smem>>
    %2551 = vector.broadcast %2550 : f32 to vector<8x128xf32>
    %2552 = arith.mulf %2551, %2501 : vector<8x128xf32>
    %2553 = arith.addf %2469, %2552 : vector<8x128xf32>
    %c445 = arith.constant 445 : index
    %2554 = memref.load %arg4[%c445] : memref<512xf32, #tpu.memory_space<smem>>
    %2555 = vector.broadcast %2554 : f32 to vector<8x128xf32>
    %2556 = arith.mulf %2555, %2501 : vector<8x128xf32>
    %2557 = arith.addf %2473, %2556 : vector<8x128xf32>
    %c477 = arith.constant 477 : index
    %2558 = memref.load %arg4[%c477] : memref<512xf32, #tpu.memory_space<smem>>
    %2559 = vector.broadcast %2558 : f32 to vector<8x128xf32>
    %2560 = arith.mulf %2559, %2501 : vector<8x128xf32>
    %2561 = arith.addf %2477, %2560 : vector<8x128xf32>
    %c509 = arith.constant 509 : index
    %2562 = memref.load %arg4[%c509] : memref<512xf32, #tpu.memory_space<smem>>
    %2563 = vector.broadcast %2562 : f32 to vector<8x128xf32>
    %2564 = arith.mulf %2563, %2501 : vector<8x128xf32>
    %2565 = arith.addf %2481, %2564 : vector<8x128xf32>
    %c30_202 = arith.constant 30 : index
    %2566 = memref.load %arg3[%c30_202] : memref<32xf32, #tpu.memory_space<smem>>
    %2567 = vector.broadcast %2566 : f32 to vector<8x128xf32>
    %c120_203 = arith.constant 120 : index
    %2568 = memref.load %arg2[%c120_203] : memref<128xf32, #tpu.memory_space<smem>>
    %2569 = vector.broadcast %2568 : f32 to vector<8x128xf32>
    %2570 = arith.mulf %2569, %4 : vector<8x128xf32>
    %2571 = arith.addf %2567, %2570 : vector<8x128xf32>
    %c121_204 = arith.constant 121 : index
    %2572 = memref.load %arg2[%c121_204] : memref<128xf32, #tpu.memory_space<smem>>
    %2573 = vector.broadcast %2572 : f32 to vector<8x128xf32>
    %2574 = arith.mulf %2573, %7 : vector<8x128xf32>
    %2575 = arith.addf %2571, %2574 : vector<8x128xf32>
    %c122_205 = arith.constant 122 : index
    %2576 = memref.load %arg2[%c122_205] : memref<128xf32, #tpu.memory_space<smem>>
    %2577 = vector.broadcast %2576 : f32 to vector<8x128xf32>
    %2578 = arith.mulf %2577, %10 : vector<8x128xf32>
    %2579 = arith.addf %2575, %2578 : vector<8x128xf32>
    %c123_206 = arith.constant 123 : index
    %2580 = memref.load %arg2[%c123_206] : memref<128xf32, #tpu.memory_space<smem>>
    %2581 = vector.broadcast %2580 : f32 to vector<8x128xf32>
    %2582 = arith.mulf %2581, %13 : vector<8x128xf32>
    %2583 = arith.addf %2579, %2582 : vector<8x128xf32>
    %cst_207 = arith.constant 0.000000e+00 : f32
    %2584 = vector.broadcast %cst_207 : f32 to vector<8x128xf32>
    %2585 = arith.maximumf %2583, %2584 : vector<8x128xf32>
    %c30_208 = arith.constant 30 : index
    %2586 = memref.load %arg4[%c30_208] : memref<512xf32, #tpu.memory_space<smem>>
    %2587 = vector.broadcast %2586 : f32 to vector<8x128xf32>
    %2588 = arith.mulf %2587, %2585 : vector<8x128xf32>
    %2589 = arith.addf %2505, %2588 : vector<8x128xf32>
    %c62_209 = arith.constant 62 : index
    %2590 = memref.load %arg4[%c62_209] : memref<512xf32, #tpu.memory_space<smem>>
    %2591 = vector.broadcast %2590 : f32 to vector<8x128xf32>
    %2592 = arith.mulf %2591, %2585 : vector<8x128xf32>
    %2593 = arith.addf %2509, %2592 : vector<8x128xf32>
    %c94_210 = arith.constant 94 : index
    %2594 = memref.load %arg4[%c94_210] : memref<512xf32, #tpu.memory_space<smem>>
    %2595 = vector.broadcast %2594 : f32 to vector<8x128xf32>
    %2596 = arith.mulf %2595, %2585 : vector<8x128xf32>
    %2597 = arith.addf %2513, %2596 : vector<8x128xf32>
    %c126 = arith.constant 126 : index
    %2598 = memref.load %arg4[%c126] : memref<512xf32, #tpu.memory_space<smem>>
    %2599 = vector.broadcast %2598 : f32 to vector<8x128xf32>
    %2600 = arith.mulf %2599, %2585 : vector<8x128xf32>
    %2601 = arith.addf %2517, %2600 : vector<8x128xf32>
    %c158 = arith.constant 158 : index
    %2602 = memref.load %arg4[%c158] : memref<512xf32, #tpu.memory_space<smem>>
    %2603 = vector.broadcast %2602 : f32 to vector<8x128xf32>
    %2604 = arith.mulf %2603, %2585 : vector<8x128xf32>
    %2605 = arith.addf %2521, %2604 : vector<8x128xf32>
    %c190 = arith.constant 190 : index
    %2606 = memref.load %arg4[%c190] : memref<512xf32, #tpu.memory_space<smem>>
    %2607 = vector.broadcast %2606 : f32 to vector<8x128xf32>
    %2608 = arith.mulf %2607, %2585 : vector<8x128xf32>
    %2609 = arith.addf %2525, %2608 : vector<8x128xf32>
    %c222 = arith.constant 222 : index
    %2610 = memref.load %arg4[%c222] : memref<512xf32, #tpu.memory_space<smem>>
    %2611 = vector.broadcast %2610 : f32 to vector<8x128xf32>
    %2612 = arith.mulf %2611, %2585 : vector<8x128xf32>
    %2613 = arith.addf %2529, %2612 : vector<8x128xf32>
    %c254 = arith.constant 254 : index
    %2614 = memref.load %arg4[%c254] : memref<512xf32, #tpu.memory_space<smem>>
    %2615 = vector.broadcast %2614 : f32 to vector<8x128xf32>
    %2616 = arith.mulf %2615, %2585 : vector<8x128xf32>
    %2617 = arith.addf %2533, %2616 : vector<8x128xf32>
    %c286 = arith.constant 286 : index
    %2618 = memref.load %arg4[%c286] : memref<512xf32, #tpu.memory_space<smem>>
    %2619 = vector.broadcast %2618 : f32 to vector<8x128xf32>
    %2620 = arith.mulf %2619, %2585 : vector<8x128xf32>
    %2621 = arith.addf %2537, %2620 : vector<8x128xf32>
    %c318 = arith.constant 318 : index
    %2622 = memref.load %arg4[%c318] : memref<512xf32, #tpu.memory_space<smem>>
    %2623 = vector.broadcast %2622 : f32 to vector<8x128xf32>
    %2624 = arith.mulf %2623, %2585 : vector<8x128xf32>
    %2625 = arith.addf %2541, %2624 : vector<8x128xf32>
    %c350 = arith.constant 350 : index
    %2626 = memref.load %arg4[%c350] : memref<512xf32, #tpu.memory_space<smem>>
    %2627 = vector.broadcast %2626 : f32 to vector<8x128xf32>
    %2628 = arith.mulf %2627, %2585 : vector<8x128xf32>
    %2629 = arith.addf %2545, %2628 : vector<8x128xf32>
    %c382 = arith.constant 382 : index
    %2630 = memref.load %arg4[%c382] : memref<512xf32, #tpu.memory_space<smem>>
    %2631 = vector.broadcast %2630 : f32 to vector<8x128xf32>
    %2632 = arith.mulf %2631, %2585 : vector<8x128xf32>
    %2633 = arith.addf %2549, %2632 : vector<8x128xf32>
    %c414 = arith.constant 414 : index
    %2634 = memref.load %arg4[%c414] : memref<512xf32, #tpu.memory_space<smem>>
    %2635 = vector.broadcast %2634 : f32 to vector<8x128xf32>
    %2636 = arith.mulf %2635, %2585 : vector<8x128xf32>
    %2637 = arith.addf %2553, %2636 : vector<8x128xf32>
    %c446 = arith.constant 446 : index
    %2638 = memref.load %arg4[%c446] : memref<512xf32, #tpu.memory_space<smem>>
    %2639 = vector.broadcast %2638 : f32 to vector<8x128xf32>
    %2640 = arith.mulf %2639, %2585 : vector<8x128xf32>
    %2641 = arith.addf %2557, %2640 : vector<8x128xf32>
    %c478 = arith.constant 478 : index
    %2642 = memref.load %arg4[%c478] : memref<512xf32, #tpu.memory_space<smem>>
    %2643 = vector.broadcast %2642 : f32 to vector<8x128xf32>
    %2644 = arith.mulf %2643, %2585 : vector<8x128xf32>
    %2645 = arith.addf %2561, %2644 : vector<8x128xf32>
    %c510 = arith.constant 510 : index
    %2646 = memref.load %arg4[%c510] : memref<512xf32, #tpu.memory_space<smem>>
    %2647 = vector.broadcast %2646 : f32 to vector<8x128xf32>
    %2648 = arith.mulf %2647, %2585 : vector<8x128xf32>
    %2649 = arith.addf %2565, %2648 : vector<8x128xf32>
    %c31_211 = arith.constant 31 : index
    %2650 = memref.load %arg3[%c31_211] : memref<32xf32, #tpu.memory_space<smem>>
    %2651 = vector.broadcast %2650 : f32 to vector<8x128xf32>
    %c124_212 = arith.constant 124 : index
    %2652 = memref.load %arg2[%c124_212] : memref<128xf32, #tpu.memory_space<smem>>
    %2653 = vector.broadcast %2652 : f32 to vector<8x128xf32>
    %2654 = arith.mulf %2653, %4 : vector<8x128xf32>
    %2655 = arith.addf %2651, %2654 : vector<8x128xf32>
    %c125_213 = arith.constant 125 : index
    %2656 = memref.load %arg2[%c125_213] : memref<128xf32, #tpu.memory_space<smem>>
    %2657 = vector.broadcast %2656 : f32 to vector<8x128xf32>
    %2658 = arith.mulf %2657, %7 : vector<8x128xf32>
    %2659 = arith.addf %2655, %2658 : vector<8x128xf32>
    %c126_214 = arith.constant 126 : index
    %2660 = memref.load %arg2[%c126_214] : memref<128xf32, #tpu.memory_space<smem>>
    %2661 = vector.broadcast %2660 : f32 to vector<8x128xf32>
    %2662 = arith.mulf %2661, %10 : vector<8x128xf32>
    %2663 = arith.addf %2659, %2662 : vector<8x128xf32>
    %c127 = arith.constant 127 : index
    %2664 = memref.load %arg2[%c127] : memref<128xf32, #tpu.memory_space<smem>>
    %2665 = vector.broadcast %2664 : f32 to vector<8x128xf32>
    %2666 = arith.mulf %2665, %13 : vector<8x128xf32>
    %2667 = arith.addf %2663, %2666 : vector<8x128xf32>
    %cst_215 = arith.constant 0.000000e+00 : f32
    %2668 = vector.broadcast %cst_215 : f32 to vector<8x128xf32>
    %2669 = arith.maximumf %2667, %2668 : vector<8x128xf32>
    %c31_216 = arith.constant 31 : index
    %2670 = memref.load %arg4[%c31_216] : memref<512xf32, #tpu.memory_space<smem>>
    %2671 = vector.broadcast %2670 : f32 to vector<8x128xf32>
    %2672 = arith.mulf %2671, %2669 : vector<8x128xf32>
    %2673 = arith.addf %2589, %2672 : vector<8x128xf32>
    %c63_217 = arith.constant 63 : index
    %2674 = memref.load %arg4[%c63_217] : memref<512xf32, #tpu.memory_space<smem>>
    %2675 = vector.broadcast %2674 : f32 to vector<8x128xf32>
    %2676 = arith.mulf %2675, %2669 : vector<8x128xf32>
    %2677 = arith.addf %2593, %2676 : vector<8x128xf32>
    %c95_218 = arith.constant 95 : index
    %2678 = memref.load %arg4[%c95_218] : memref<512xf32, #tpu.memory_space<smem>>
    %2679 = vector.broadcast %2678 : f32 to vector<8x128xf32>
    %2680 = arith.mulf %2679, %2669 : vector<8x128xf32>
    %2681 = arith.addf %2597, %2680 : vector<8x128xf32>
    %c127_219 = arith.constant 127 : index
    %2682 = memref.load %arg4[%c127_219] : memref<512xf32, #tpu.memory_space<smem>>
    %2683 = vector.broadcast %2682 : f32 to vector<8x128xf32>
    %2684 = arith.mulf %2683, %2669 : vector<8x128xf32>
    %2685 = arith.addf %2601, %2684 : vector<8x128xf32>
    %c159 = arith.constant 159 : index
    %2686 = memref.load %arg4[%c159] : memref<512xf32, #tpu.memory_space<smem>>
    %2687 = vector.broadcast %2686 : f32 to vector<8x128xf32>
    %2688 = arith.mulf %2687, %2669 : vector<8x128xf32>
    %2689 = arith.addf %2605, %2688 : vector<8x128xf32>
    %c191 = arith.constant 191 : index
    %2690 = memref.load %arg4[%c191] : memref<512xf32, #tpu.memory_space<smem>>
    %2691 = vector.broadcast %2690 : f32 to vector<8x128xf32>
    %2692 = arith.mulf %2691, %2669 : vector<8x128xf32>
    %2693 = arith.addf %2609, %2692 : vector<8x128xf32>
    %c223 = arith.constant 223 : index
    %2694 = memref.load %arg4[%c223] : memref<512xf32, #tpu.memory_space<smem>>
    %2695 = vector.broadcast %2694 : f32 to vector<8x128xf32>
    %2696 = arith.mulf %2695, %2669 : vector<8x128xf32>
    %2697 = arith.addf %2613, %2696 : vector<8x128xf32>
    %c255 = arith.constant 255 : index
    %2698 = memref.load %arg4[%c255] : memref<512xf32, #tpu.memory_space<smem>>
    %2699 = vector.broadcast %2698 : f32 to vector<8x128xf32>
    %2700 = arith.mulf %2699, %2669 : vector<8x128xf32>
    %2701 = arith.addf %2617, %2700 : vector<8x128xf32>
    %c287 = arith.constant 287 : index
    %2702 = memref.load %arg4[%c287] : memref<512xf32, #tpu.memory_space<smem>>
    %2703 = vector.broadcast %2702 : f32 to vector<8x128xf32>
    %2704 = arith.mulf %2703, %2669 : vector<8x128xf32>
    %2705 = arith.addf %2621, %2704 : vector<8x128xf32>
    %c319 = arith.constant 319 : index
    %2706 = memref.load %arg4[%c319] : memref<512xf32, #tpu.memory_space<smem>>
    %2707 = vector.broadcast %2706 : f32 to vector<8x128xf32>
    %2708 = arith.mulf %2707, %2669 : vector<8x128xf32>
    %2709 = arith.addf %2625, %2708 : vector<8x128xf32>
    %c351 = arith.constant 351 : index
    %2710 = memref.load %arg4[%c351] : memref<512xf32, #tpu.memory_space<smem>>
    %2711 = vector.broadcast %2710 : f32 to vector<8x128xf32>
    %2712 = arith.mulf %2711, %2669 : vector<8x128xf32>
    %2713 = arith.addf %2629, %2712 : vector<8x128xf32>
    %c383 = arith.constant 383 : index
    %2714 = memref.load %arg4[%c383] : memref<512xf32, #tpu.memory_space<smem>>
    %2715 = vector.broadcast %2714 : f32 to vector<8x128xf32>
    %2716 = arith.mulf %2715, %2669 : vector<8x128xf32>
    %2717 = arith.addf %2633, %2716 : vector<8x128xf32>
    %c415 = arith.constant 415 : index
    %2718 = memref.load %arg4[%c415] : memref<512xf32, #tpu.memory_space<smem>>
    %2719 = vector.broadcast %2718 : f32 to vector<8x128xf32>
    %2720 = arith.mulf %2719, %2669 : vector<8x128xf32>
    %2721 = arith.addf %2637, %2720 : vector<8x128xf32>
    %c447 = arith.constant 447 : index
    %2722 = memref.load %arg4[%c447] : memref<512xf32, #tpu.memory_space<smem>>
    %2723 = vector.broadcast %2722 : f32 to vector<8x128xf32>
    %2724 = arith.mulf %2723, %2669 : vector<8x128xf32>
    %2725 = arith.addf %2641, %2724 : vector<8x128xf32>
    %c479 = arith.constant 479 : index
    %2726 = memref.load %arg4[%c479] : memref<512xf32, #tpu.memory_space<smem>>
    %2727 = vector.broadcast %2726 : f32 to vector<8x128xf32>
    %2728 = arith.mulf %2727, %2669 : vector<8x128xf32>
    %2729 = arith.addf %2645, %2728 : vector<8x128xf32>
    %c511 = arith.constant 511 : index
    %2730 = memref.load %arg4[%c511] : memref<512xf32, #tpu.memory_space<smem>>
    %2731 = vector.broadcast %2730 : f32 to vector<8x128xf32>
    %2732 = arith.mulf %2731, %2669 : vector<8x128xf32>
    %2733 = arith.addf %2649, %2732 : vector<8x128xf32>
    %c0_220 = arith.constant 0 : index
    %2734 = memref.load %arg7[%c0_220] : memref<2xf32, #tpu.memory_space<smem>>
    %2735 = vector.broadcast %2734 : f32 to vector<8x128xf32>
    %c1_221 = arith.constant 1 : index
    %2736 = memref.load %arg7[%c1_221] : memref<2xf32, #tpu.memory_space<smem>>
    %2737 = vector.broadcast %2736 : f32 to vector<8x128xf32>
    %cst_222 = arith.constant 0.000000e+00 : f32
    %2738 = vector.broadcast %cst_222 : f32 to vector<8x128xf32>
    %2739 = arith.maximumf %2673, %2738 : vector<8x128xf32>
    %c0_223 = arith.constant 0 : index
    %2740 = memref.load %arg6[%c0_223] : memref<32xf32, #tpu.memory_space<smem>>
    %2741 = vector.broadcast %2740 : f32 to vector<8x128xf32>
    %2742 = arith.mulf %2741, %2739 : vector<8x128xf32>
    %2743 = arith.addf %2735, %2742 : vector<8x128xf32>
    %c16_224 = arith.constant 16 : index
    %2744 = memref.load %arg6[%c16_224] : memref<32xf32, #tpu.memory_space<smem>>
    %2745 = vector.broadcast %2744 : f32 to vector<8x128xf32>
    %2746 = arith.mulf %2745, %2739 : vector<8x128xf32>
    %2747 = arith.addf %2737, %2746 : vector<8x128xf32>
    %cst_225 = arith.constant 0.000000e+00 : f32
    %2748 = vector.broadcast %cst_225 : f32 to vector<8x128xf32>
    %2749 = arith.maximumf %2677, %2748 : vector<8x128xf32>
    %c1_226 = arith.constant 1 : index
    %2750 = memref.load %arg6[%c1_226] : memref<32xf32, #tpu.memory_space<smem>>
    %2751 = vector.broadcast %2750 : f32 to vector<8x128xf32>
    %2752 = arith.mulf %2751, %2749 : vector<8x128xf32>
    %2753 = arith.addf %2743, %2752 : vector<8x128xf32>
    %c17_227 = arith.constant 17 : index
    %2754 = memref.load %arg6[%c17_227] : memref<32xf32, #tpu.memory_space<smem>>
    %2755 = vector.broadcast %2754 : f32 to vector<8x128xf32>
    %2756 = arith.mulf %2755, %2749 : vector<8x128xf32>
    %2757 = arith.addf %2747, %2756 : vector<8x128xf32>
    %cst_228 = arith.constant 0.000000e+00 : f32
    %2758 = vector.broadcast %cst_228 : f32 to vector<8x128xf32>
    %2759 = arith.maximumf %2681, %2758 : vector<8x128xf32>
    %c2_229 = arith.constant 2 : index
    %2760 = memref.load %arg6[%c2_229] : memref<32xf32, #tpu.memory_space<smem>>
    %2761 = vector.broadcast %2760 : f32 to vector<8x128xf32>
    %2762 = arith.mulf %2761, %2759 : vector<8x128xf32>
    %2763 = arith.addf %2753, %2762 : vector<8x128xf32>
    %c18_230 = arith.constant 18 : index
    %2764 = memref.load %arg6[%c18_230] : memref<32xf32, #tpu.memory_space<smem>>
    %2765 = vector.broadcast %2764 : f32 to vector<8x128xf32>
    %2766 = arith.mulf %2765, %2759 : vector<8x128xf32>
    %2767 = arith.addf %2757, %2766 : vector<8x128xf32>
    %cst_231 = arith.constant 0.000000e+00 : f32
    %2768 = vector.broadcast %cst_231 : f32 to vector<8x128xf32>
    %2769 = arith.maximumf %2685, %2768 : vector<8x128xf32>
    %c3_232 = arith.constant 3 : index
    %2770 = memref.load %arg6[%c3_232] : memref<32xf32, #tpu.memory_space<smem>>
    %2771 = vector.broadcast %2770 : f32 to vector<8x128xf32>
    %2772 = arith.mulf %2771, %2769 : vector<8x128xf32>
    %2773 = arith.addf %2763, %2772 : vector<8x128xf32>
    %c19_233 = arith.constant 19 : index
    %2774 = memref.load %arg6[%c19_233] : memref<32xf32, #tpu.memory_space<smem>>
    %2775 = vector.broadcast %2774 : f32 to vector<8x128xf32>
    %2776 = arith.mulf %2775, %2769 : vector<8x128xf32>
    %2777 = arith.addf %2767, %2776 : vector<8x128xf32>
    %cst_234 = arith.constant 0.000000e+00 : f32
    %2778 = vector.broadcast %cst_234 : f32 to vector<8x128xf32>
    %2779 = arith.maximumf %2689, %2778 : vector<8x128xf32>
    %c4_235 = arith.constant 4 : index
    %2780 = memref.load %arg6[%c4_235] : memref<32xf32, #tpu.memory_space<smem>>
    %2781 = vector.broadcast %2780 : f32 to vector<8x128xf32>
    %2782 = arith.mulf %2781, %2779 : vector<8x128xf32>
    %2783 = arith.addf %2773, %2782 : vector<8x128xf32>
    %c20_236 = arith.constant 20 : index
    %2784 = memref.load %arg6[%c20_236] : memref<32xf32, #tpu.memory_space<smem>>
    %2785 = vector.broadcast %2784 : f32 to vector<8x128xf32>
    %2786 = arith.mulf %2785, %2779 : vector<8x128xf32>
    %2787 = arith.addf %2777, %2786 : vector<8x128xf32>
    %cst_237 = arith.constant 0.000000e+00 : f32
    %2788 = vector.broadcast %cst_237 : f32 to vector<8x128xf32>
    %2789 = arith.maximumf %2693, %2788 : vector<8x128xf32>
    %c5_238 = arith.constant 5 : index
    %2790 = memref.load %arg6[%c5_238] : memref<32xf32, #tpu.memory_space<smem>>
    %2791 = vector.broadcast %2790 : f32 to vector<8x128xf32>
    %2792 = arith.mulf %2791, %2789 : vector<8x128xf32>
    %2793 = arith.addf %2783, %2792 : vector<8x128xf32>
    %c21_239 = arith.constant 21 : index
    %2794 = memref.load %arg6[%c21_239] : memref<32xf32, #tpu.memory_space<smem>>
    %2795 = vector.broadcast %2794 : f32 to vector<8x128xf32>
    %2796 = arith.mulf %2795, %2789 : vector<8x128xf32>
    %2797 = arith.addf %2787, %2796 : vector<8x128xf32>
    %cst_240 = arith.constant 0.000000e+00 : f32
    %2798 = vector.broadcast %cst_240 : f32 to vector<8x128xf32>
    %2799 = arith.maximumf %2697, %2798 : vector<8x128xf32>
    %c6_241 = arith.constant 6 : index
    %2800 = memref.load %arg6[%c6_241] : memref<32xf32, #tpu.memory_space<smem>>
    %2801 = vector.broadcast %2800 : f32 to vector<8x128xf32>
    %2802 = arith.mulf %2801, %2799 : vector<8x128xf32>
    %2803 = arith.addf %2793, %2802 : vector<8x128xf32>
    %c22_242 = arith.constant 22 : index
    %2804 = memref.load %arg6[%c22_242] : memref<32xf32, #tpu.memory_space<smem>>
    %2805 = vector.broadcast %2804 : f32 to vector<8x128xf32>
    %2806 = arith.mulf %2805, %2799 : vector<8x128xf32>
    %2807 = arith.addf %2797, %2806 : vector<8x128xf32>
    %cst_243 = arith.constant 0.000000e+00 : f32
    %2808 = vector.broadcast %cst_243 : f32 to vector<8x128xf32>
    %2809 = arith.maximumf %2701, %2808 : vector<8x128xf32>
    %c7_244 = arith.constant 7 : index
    %2810 = memref.load %arg6[%c7_244] : memref<32xf32, #tpu.memory_space<smem>>
    %2811 = vector.broadcast %2810 : f32 to vector<8x128xf32>
    %2812 = arith.mulf %2811, %2809 : vector<8x128xf32>
    %2813 = arith.addf %2803, %2812 : vector<8x128xf32>
    %c23_245 = arith.constant 23 : index
    %2814 = memref.load %arg6[%c23_245] : memref<32xf32, #tpu.memory_space<smem>>
    %2815 = vector.broadcast %2814 : f32 to vector<8x128xf32>
    %2816 = arith.mulf %2815, %2809 : vector<8x128xf32>
    %2817 = arith.addf %2807, %2816 : vector<8x128xf32>
    %cst_246 = arith.constant 0.000000e+00 : f32
    %2818 = vector.broadcast %cst_246 : f32 to vector<8x128xf32>
    %2819 = arith.maximumf %2705, %2818 : vector<8x128xf32>
    %c8_247 = arith.constant 8 : index
    %2820 = memref.load %arg6[%c8_247] : memref<32xf32, #tpu.memory_space<smem>>
    %2821 = vector.broadcast %2820 : f32 to vector<8x128xf32>
    %2822 = arith.mulf %2821, %2819 : vector<8x128xf32>
    %2823 = arith.addf %2813, %2822 : vector<8x128xf32>
    %c24_248 = arith.constant 24 : index
    %2824 = memref.load %arg6[%c24_248] : memref<32xf32, #tpu.memory_space<smem>>
    %2825 = vector.broadcast %2824 : f32 to vector<8x128xf32>
    %2826 = arith.mulf %2825, %2819 : vector<8x128xf32>
    %2827 = arith.addf %2817, %2826 : vector<8x128xf32>
    %cst_249 = arith.constant 0.000000e+00 : f32
    %2828 = vector.broadcast %cst_249 : f32 to vector<8x128xf32>
    %2829 = arith.maximumf %2709, %2828 : vector<8x128xf32>
    %c9_250 = arith.constant 9 : index
    %2830 = memref.load %arg6[%c9_250] : memref<32xf32, #tpu.memory_space<smem>>
    %2831 = vector.broadcast %2830 : f32 to vector<8x128xf32>
    %2832 = arith.mulf %2831, %2829 : vector<8x128xf32>
    %2833 = arith.addf %2823, %2832 : vector<8x128xf32>
    %c25_251 = arith.constant 25 : index
    %2834 = memref.load %arg6[%c25_251] : memref<32xf32, #tpu.memory_space<smem>>
    %2835 = vector.broadcast %2834 : f32 to vector<8x128xf32>
    %2836 = arith.mulf %2835, %2829 : vector<8x128xf32>
    %2837 = arith.addf %2827, %2836 : vector<8x128xf32>
    %cst_252 = arith.constant 0.000000e+00 : f32
    %2838 = vector.broadcast %cst_252 : f32 to vector<8x128xf32>
    %2839 = arith.maximumf %2713, %2838 : vector<8x128xf32>
    %c10_253 = arith.constant 10 : index
    %2840 = memref.load %arg6[%c10_253] : memref<32xf32, #tpu.memory_space<smem>>
    %2841 = vector.broadcast %2840 : f32 to vector<8x128xf32>
    %2842 = arith.mulf %2841, %2839 : vector<8x128xf32>
    %2843 = arith.addf %2833, %2842 : vector<8x128xf32>
    %c26_254 = arith.constant 26 : index
    %2844 = memref.load %arg6[%c26_254] : memref<32xf32, #tpu.memory_space<smem>>
    %2845 = vector.broadcast %2844 : f32 to vector<8x128xf32>
    %2846 = arith.mulf %2845, %2839 : vector<8x128xf32>
    %2847 = arith.addf %2837, %2846 : vector<8x128xf32>
    %cst_255 = arith.constant 0.000000e+00 : f32
    %2848 = vector.broadcast %cst_255 : f32 to vector<8x128xf32>
    %2849 = arith.maximumf %2717, %2848 : vector<8x128xf32>
    %c11_256 = arith.constant 11 : index
    %2850 = memref.load %arg6[%c11_256] : memref<32xf32, #tpu.memory_space<smem>>
    %2851 = vector.broadcast %2850 : f32 to vector<8x128xf32>
    %2852 = arith.mulf %2851, %2849 : vector<8x128xf32>
    %2853 = arith.addf %2843, %2852 : vector<8x128xf32>
    %c27_257 = arith.constant 27 : index
    %2854 = memref.load %arg6[%c27_257] : memref<32xf32, #tpu.memory_space<smem>>
    %2855 = vector.broadcast %2854 : f32 to vector<8x128xf32>
    %2856 = arith.mulf %2855, %2849 : vector<8x128xf32>
    %2857 = arith.addf %2847, %2856 : vector<8x128xf32>
    %cst_258 = arith.constant 0.000000e+00 : f32
    %2858 = vector.broadcast %cst_258 : f32 to vector<8x128xf32>
    %2859 = arith.maximumf %2721, %2858 : vector<8x128xf32>
    %c12_259 = arith.constant 12 : index
    %2860 = memref.load %arg6[%c12_259] : memref<32xf32, #tpu.memory_space<smem>>
    %2861 = vector.broadcast %2860 : f32 to vector<8x128xf32>
    %2862 = arith.mulf %2861, %2859 : vector<8x128xf32>
    %2863 = arith.addf %2853, %2862 : vector<8x128xf32>
    %c28_260 = arith.constant 28 : index
    %2864 = memref.load %arg6[%c28_260] : memref<32xf32, #tpu.memory_space<smem>>
    %2865 = vector.broadcast %2864 : f32 to vector<8x128xf32>
    %2866 = arith.mulf %2865, %2859 : vector<8x128xf32>
    %2867 = arith.addf %2857, %2866 : vector<8x128xf32>
    %cst_261 = arith.constant 0.000000e+00 : f32
    %2868 = vector.broadcast %cst_261 : f32 to vector<8x128xf32>
    %2869 = arith.maximumf %2725, %2868 : vector<8x128xf32>
    %c13_262 = arith.constant 13 : index
    %2870 = memref.load %arg6[%c13_262] : memref<32xf32, #tpu.memory_space<smem>>
    %2871 = vector.broadcast %2870 : f32 to vector<8x128xf32>
    %2872 = arith.mulf %2871, %2869 : vector<8x128xf32>
    %2873 = arith.addf %2863, %2872 : vector<8x128xf32>
    %c29_263 = arith.constant 29 : index
    %2874 = memref.load %arg6[%c29_263] : memref<32xf32, #tpu.memory_space<smem>>
    %2875 = vector.broadcast %2874 : f32 to vector<8x128xf32>
    %2876 = arith.mulf %2875, %2869 : vector<8x128xf32>
    %2877 = arith.addf %2867, %2876 : vector<8x128xf32>
    %cst_264 = arith.constant 0.000000e+00 : f32
    %2878 = vector.broadcast %cst_264 : f32 to vector<8x128xf32>
    %2879 = arith.maximumf %2729, %2878 : vector<8x128xf32>
    %c14_265 = arith.constant 14 : index
    %2880 = memref.load %arg6[%c14_265] : memref<32xf32, #tpu.memory_space<smem>>
    %2881 = vector.broadcast %2880 : f32 to vector<8x128xf32>
    %2882 = arith.mulf %2881, %2879 : vector<8x128xf32>
    %2883 = arith.addf %2873, %2882 : vector<8x128xf32>
    %c30_266 = arith.constant 30 : index
    %2884 = memref.load %arg6[%c30_266] : memref<32xf32, #tpu.memory_space<smem>>
    %2885 = vector.broadcast %2884 : f32 to vector<8x128xf32>
    %2886 = arith.mulf %2885, %2879 : vector<8x128xf32>
    %2887 = arith.addf %2877, %2886 : vector<8x128xf32>
    %cst_267 = arith.constant 0.000000e+00 : f32
    %2888 = vector.broadcast %cst_267 : f32 to vector<8x128xf32>
    %2889 = arith.maximumf %2733, %2888 : vector<8x128xf32>
    %c15_268 = arith.constant 15 : index
    %2890 = memref.load %arg6[%c15_268] : memref<32xf32, #tpu.memory_space<smem>>
    %2891 = vector.broadcast %2890 : f32 to vector<8x128xf32>
    %2892 = arith.mulf %2891, %2889 : vector<8x128xf32>
    %2893 = arith.addf %2883, %2892 : vector<8x128xf32>
    %c31_269 = arith.constant 31 : index
    %2894 = memref.load %arg6[%c31_269] : memref<32xf32, #tpu.memory_space<smem>>
    %2895 = vector.broadcast %2894 : f32 to vector<8x128xf32>
    %2896 = arith.mulf %2895, %2889 : vector<8x128xf32>
    %2897 = arith.addf %2887, %2896 : vector<8x128xf32>
    %2898 = arith.maximumf %2893, %2897 : vector<8x128xf32>
    %2899 = arith.subf %2893, %2898 : vector<8x128xf32>
    %2900 = math.exp %2899 : vector<8x128xf32>
    %2901 = arith.subf %2897, %2898 : vector<8x128xf32>
    %2902 = math.exp %2901 : vector<8x128xf32>
    %2903 = arith.addf %2900, %2902 : vector<8x128xf32>
    %cst_270 = arith.constant 1.000000e+00 : f32
    %2904 = vector.broadcast %cst_270 : f32 to vector<8x128xf32>
    %2905 = arith.divf %2904, %2903 : vector<8x128xf32>
    %2906 = arith.mulf %2900, %2905 : vector<8x128xf32>
    %c0_271 = arith.constant 0 : index
    %2907 = arith.index_cast %1 : i32 to index
    %c0_272 = arith.constant 0 : index
    %c0_273 = arith.constant 0 : index
    %2908 = vector.load %arg8[%c0_271, %2907, %c0_272, %c0_273] : memref<2x1x8x128xf32, #tpu.memory_space<vmem>>, vector<1x1x8x128xf32>
    %2909 = vector.shape_cast %2908 : vector<1x1x8x128xf32> to vector<8x128xf32>
    %2910 = vector.shape_cast %2906 : vector<8x128xf32> to vector<1x1x8x128xf32>
    tpu.vector_store %arg8[%c0_271, %2907, %c0_272, %c0_273], %2910 {strides = array<i32>} : memref<2x1x8x128xf32, #tpu.memory_space<vmem>>, vector<1x1x8x128xf32>,
    %2911 = arith.mulf %2902, %2905 : vector<8x128xf32>
    %c1_274 = arith.constant 1 : index
    %2912 = arith.index_cast %1 : i32 to index
    %c0_275 = arith.constant 0 : index
    %c0_276 = arith.constant 0 : index
    %2913 = vector.load %arg8[%c1_274, %2912, %c0_275, %c0_276] : memref<2x1x8x128xf32, #tpu.memory_space<vmem>>, vector<1x1x8x128xf32>
    %2914 = vector.shape_cast %2913 : vector<1x1x8x128xf32> to vector<8x128xf32>
    %2915 = vector.shape_cast %2911 : vector<8x128xf32> to vector<1x1x8x128xf32>
    tpu.vector_store %arg8[%c1_274, %2912, %c0_275, %c0_276], %2915 {strides = array<i32>} : memref<2x1x8x128xf32, #tpu.memory_space<vmem>>, vector<1x1x8x128xf32>,
    %c1_i32_277 = arith.constant 1 : i32
    return
  }
  func.func @transform_0(%arg0: i32) -> (i32, i32, i32, i32) {
    %c0_i32 = arith.constant 0 : i32
    %c0_i32_0 = arith.constant 0 : i32
    %c0_i32_1 = arith.constant 0 : i32
    %c0_i32_2 = arith.constant 0 : i32
    return %c0_i32, %arg0, %c0_i32_0, %c0_i32_1 : i32, i32, i32, i32
  }
  func.func @transform_1(%arg0: i32) -> i32 {
    %c0_i32 = arith.constant 0 : i32
    %c0_i32_0 = arith.constant 0 : i32
    return %c0_i32 : i32
  }
  func.func @transform_2(%arg0: i32) -> i32 {
    %c0_i32 = arith.constant 0 : i32
    %c0_i32_0 = arith.constant 0 : i32
    return %c0_i32 : i32
  }
  func.func @transform_3(%arg0: i32) -> i32 {
    %c0_i32 = arith.constant 0 : i32
    %c0_i32_0 = arith.constant 0 : i32
    return %c0_i32 : i32
  }
  func.func @transform_4(%arg0: i32) -> i32 {
    %c0_i32 = arith.constant 0 : i32
    %c0_i32_0 = arith.constant 0 : i32
    return %c0_i32 : i32
  }
  func.func @transform_5(%arg0: i32) -> i32 {
    %c0_i32 = arith.constant 0 : i32
    %c0_i32_0 = arith.constant 0 : i32
    return %c0_i32 : i32
  }
  func.func @transform_6(%arg0: i32) -> i32 {
    %c0_i32 = arith.constant 0 : i32
    %c0_i32_0 = arith.constant 0 : i32
    return %c0_i32 : i32
  }
  func.func @transform_7(%arg0: i32) -> (i32, i32, i32, i32) {
    %c0_i32 = arith.constant 0 : i32
    %c0_i32_0 = arith.constant 0 : i32
    %c0_i32_1 = arith.constant 0 : i32
    %c0_i32_2 = arith.constant 0 : i32
    return %c0_i32, %arg0, %c0_i32_0, %c0_i32_1 : i32, i32, i32, i32
  }
}

</mosaic_0001>

<bundles_post_ra>
// kernel: tpu_custom_call.1
= control target key start
LH: loop header
LB: loop body
LE: loop exit
PB: predicated region body
PF: predicated region fallthrough
CT: control target
= control target key end

     0   :  { %s8299_s0 = inlined_call_operand.hbm [shape: f32[4,1,8,128], index: 0, kind: input, shape index: {}]   ;;  %s8300_s1 = inlined_call_operand.vmem [shape: f32[128], index: 1, kind: input, shape index: {}]   ;;  %s8301_s2 = inlined_call_operand.vmem [shape: f32[32], index: 2, kind: input, shape index: {}]   ;;  %s8302_s3 = inlined_call_operand.vmem [shape: f32[512], index: 3, kind: input, shape index: {}]   ;;  %s8303_s4 = inlined_call_operand.vmem [shape: f32[16], index: 4, kind: input, shape index: {}]   ;;  %s8304_s5 = inlined_call_operand.vmem [shape: f32[32], index: 5, kind: input, shape index: {}]   ;;  %s8305_s6 = inlined_call_operand.vmem [shape: f32[2], index: 6, kind: input, shape index: {}]   ;;  %s8306_s7 = inlined_call_operand.hbm [shape: f32[2,1,8,128], index: 7, kind: output, shape index: {}]  }
   0x1   :  { %8318 = sst [smem:[#allocation32_spill]] %s8306_s7 }
   0x2   :  { %12 = vsyncpa [#allocation3], 0 }
   0x3   :  { %13 = vsyncpa [#allocation5], 0 }
   0x4   :  { %14 = vsyncpa [#allocation8], 0 }
   0x5   :  { %15 = vsyncpa [#allocation11], 0 }
   0x6   :  { %16 = vsyncpa [#allocation14], 0  ;;  %s46_s26 = sshll.u32 %s8301_s2, 4  ;;  %s47_s26 = int_to_ptr.vmem [resolvable:$true] %s46_s26 }
   0x7   :  { %17 = vsyncpa [#allocation4], 0  ;;  %s66_s29 = sshll.u32 %s8303_s4, 4  ;;  %s3739_s30 = scalar_lea.vmem %s47_s26, 16  ;;  %s67_s29 = int_to_ptr.vmem [resolvable:$true] %s66_s29 }
   0x8   :  { %p3740_p0 = scmp.ne.s32.totalorder %s47_s26, %s3739_s30  ;;  %p3744_p1 = scmp.lt.s32.totalorder %s47_s26, %s47_s26 }
   0x9   :  { %p3745_p2 = scmp.lt.s32.totalorder %s3739_s30, %s3739_s30 }
   0xb   :  { %p3746_p3 = por %p3745_p2, %p3744_p1 }
   0xd   :  { %p3747_p4 = pnand %p3746_p3, %p3740_p0 }
   0xf   :  { %3750 = shalt.err (!%p3747_p4)
}
  0x10   :  { %s3867_s8 = smov [#allocation7]   ;;  %s3751_s9 = scalar_lea.vmem %s67_s29, 16 }
  0x11   :  { %49 = dma.vmem_to_smem %s47_s26, 16, %s3867_s8, [#allocation8]  }
  0x12   :  { %p3752_p5 = scmp.ne.s32.totalorder %s67_s29, %s3751_s9  ;;  %p3756_p6 = scmp.lt.s32.totalorder %s67_s29, %s67_s29 }
  0x13   :  { %p3757_p7 = scmp.lt.s32.totalorder %s3751_s9, %s3751_s9 }
  0x15   :  { %p3758_p8 = por %p3757_p7, %p3756_p6 }
  0x17   :  { %p3759_p9 = pnand %p3758_p8, %p3752_p5 }
  0x19   :  { %3762 = shalt.err (!%p3759_p9)
}
  0x1a   :  { %s3868_s2 = smov [#allocation10]   ;;  %s3869_s4 = smov [#allocation2]  }
  0x1b   :  { %69 = dma.vmem_to_smem %s67_s29, 16, %s3868_s2, [#allocation11]  }
  0x1c   :  { %s23_s10 = sshll.u32 %s3869_s4, 4  ;;  %s36_s13 = sshll.u32 %s8300_s1, 4  ;;  %s24_s10 = int_to_ptr.vmem [resolvable:$true] %s23_s10  ;;  %s37_s13 = int_to_ptr.vmem [resolvable:$true] %s36_s13 }
  0x1d   :  { %s3763_s16 = scalar_lea.hbm %s8299_s0, 512 }
  0x1e   :  { %p3764_p10 = scmp.ne.s32.totalorder %s8299_s0, %s3763_s16  ;;  %p3767_p11 = scmp.lt.u32.totalorder %s3763_s16, %s8299_s0 }
  0x20   :  { %p3769_p12 = pnand %p3767_p11, %p3764_p10 }
  0x22   :  { %3772 = shalt.err (!%p3769_p12)
}
  0x23   :  { %s3773_s21 = scalar_lea.vmem %s24_s10, 512  ;;  %p3778_p0 = scmp.lt.s32.totalorder %s24_s10, %s24_s10 }
  0x24   :  { %p3774_p13 = scmp.ne.s32.totalorder %s24_s10, %s3773_s21  ;;  %p3779_p1 = scmp.lt.s32.totalorder %s3773_s21, %s3773_s21 }
  0x26   :  { %p3780_p2 = por %p3779_p1, %p3778_p0 }
  0x28   :  { %p3781_p3 = pnand %p3780_p2, %p3774_p13 }
  0x2a   :  { %3784 = shalt.err (!%p3781_p3)
}
  0x2b   :  { %s8307_s1 = smov 128   ;;  %s8308_s22 = smov 8  }
  0x2c   :  { %29 = dma.hbm_to_vmem [thread:$0]  %s8299_s0, 512, %s24_s10, [#allocation3], %s8307_s1, %s8307_s1, %s8308_s22  }
  0x2d   :  { %s3785_s25 = scalar_lea.vmem %s37_s13, 16  ;;  %p3790_p5 = scmp.lt.s32.totalorder %s37_s13, %s37_s13 }
  0x2e   :  { %p3786_p4 = scmp.ne.s32.totalorder %s37_s13, %s3785_s25  ;;  %p3791_p6 = scmp.lt.s32.totalorder %s3785_s25, %s3785_s25 }
  0x30   :  { %p3792_p7 = por %p3791_p6, %p3790_p5 }
  0x32   :  { %p3793_p8 = pnand %p3792_p7, %p3786_p4 }
  0x34   :  { %3796 = shalt.err (!%p3793_p8)
}
  0x35   :  { %s3872_s26 = smov [#allocation6]   ;;  %s56_s29 = sshll.u32 %s8302_s3, 4  ;;  %s57_s29 = int_to_ptr.vmem [resolvable:$true] %s56_s29 }
  0x36   :  { %39 = dma.vmem_to_smem %s37_s13, 16, %s3872_s26, [#allocation5]  }
  0x37   :  { %s76_s9 = sshll.u32 %s8304_s5, 4  ;;  %s3797_s0 = scalar_lea.vmem %s57_s29, 64  ;;  %s77_s9 = int_to_ptr.vmem [resolvable:$true] %s76_s9 }
  0x38   :  { %p3798_p9 = scmp.ne.s32.totalorder %s57_s29, %s3797_s0  ;;  %p3802_p10 = scmp.lt.s32.totalorder %s57_s29, %s57_s29 }
  0x39   :  { %p3803_p11 = scmp.lt.s32.totalorder %s3797_s0, %s3797_s0 }
  0x3b   :  { %p3804_p12 = por %p3803_p11, %p3802_p10 }
  0x3d   :  { %p3805_p13 = pnand %p3804_p12, %p3798_p9 }
  0x3f   :  { %3808 = shalt.err (!%p3805_p13)
}
  0x40   :  { %s3873_s2 = smov [#allocation9]   ;;  %s3809_s4 = scalar_lea.vmem %s77_s9, 16 }
  0x41   :  { %59 = dma.vmem_to_smem %s57_s29, 64, %s3873_s2, [#allocation8]  }
  0x42   :  { %p3810_p0 = scmp.ne.s32.totalorder %s77_s9, %s3809_s4  ;;  %p3814_p1 = scmp.lt.s32.totalorder %s77_s9, %s77_s9 }
  0x43   :  { %p3815_p2 = scmp.lt.s32.totalorder %s3809_s4, %s3809_s4 }
  0x45   :  { %p3816_p3 = por %p3815_p2, %p3814_p1 }
  0x47   :  { %p3817_p4 = pnand %p3816_p3, %p3810_p0 }
  0x49   :  { %3820 = shalt.err (!%p3817_p4)
}
  0x4a   :  { %s3874_s3 = smov [#allocation12]   ;;  %s86_s11 = sshll.u32 %s8305_s6, 4  ;;  %s87_s11 = int_to_ptr.vmem [resolvable:$true] %s86_s11 }
  0x4b   :  { %79 = dma.vmem_to_smem %s77_s9, 16, %s3874_s3, [#allocation11]  }
  0x4c   :  { %s3821_s12 = scalar_lea.vmem %s87_s11, 16  ;;  %p3826_p6 = scmp.lt.s32.totalorder %s87_s11, %s87_s11 }
  0x4d   :  { %p3822_p5 = scmp.ne.s32.totalorder %s87_s11, %s3821_s12  ;;  %p3827_p7 = scmp.lt.s32.totalorder %s3821_s12, %s3821_s12 }
  0x4f   :  { %p3828_p8 = por %p3827_p7, %p3826_p6 }
  0x51   :  { %p3829_p9 = pnand %p3828_p8, %p3822_p5 }
  0x53   :  { %3832 = shalt.err (!%p3829_p9)
}
  0x54   :  { %s3875_s13 = smov [#allocation13]  }
  0x55   :  { %89 = dma.vmem_to_smem %s87_s11, 16, %s3875_s13, [#allocation14]  }
  0x56   :  { %3855 = dma.done.wait [#allocation3], 512  }
  0x57   :  { %3856 = vsyncadd [#allocation3], 4294966784 }
  0x58   :  { %3857 = dma.done.wait [#allocation5], 16  }
  0x59   :  { %3858 = vsyncadd [#allocation5], 4294967280 }
  0x5a   :  { %3859 = dma.done.wait [#allocation8], 80  }
  0x5b   :  { %3860 = vsyncadd [#allocation8], 4294967216 }
  0x5c   :  { %3861 = dma.done.wait [#allocation11], 32  }
  0x5d   :  { %3862 = vsyncadd [#allocation11], 4294967264 }
  0x5e   :  { %3863 = dma.done.wait [#allocation14], 16  }
  0x5f   :  { %3864 = vsyncadd [#allocation14], 4294967280 }
  0x60   :  { %111 = sfence }
  0x61   :  { %s3950_s6 = sld [smem:[#allocation10]]  ;;  %s3952_s14 = sld [smem:[#allocation10 + $0x1]]  ;;  %v3978_v0 = vld [vmem:[#allocation2] sm:$0xff]  ;;  %v3980_v1 = vld [vmem:[#allocation2 + $0x8] sm:$0xff]  ;;  %v3990_v2 = vld [vmem:[#allocation2 + $0x10] sm:$0xff] }
  0x62   :  { %s3954_s15 = sld [smem:[#allocation10 + $0x2]]  ;;  %s3956_s16 = sld [smem:[#allocation10 + $0x3]]  ;;  %v4002_v9 = vld [vmem:[#allocation2 + $0x18] sm:$0xff] }
  0x63   :  { %s3958_s17 = sld [smem:[#allocation10 + $0x4]]  ;;  %s3960_s18 = sld [smem:[#allocation10 + $0x5]] }
  0x64   :  { %s3962_s19 = sld [smem:[#allocation10 + $0x6]]  ;;  %s3964_s20 = sld [smem:[#allocation10 + $0x7]] }
  0x65   :  { %s3966_s21 = sld [smem:[#allocation10 + $0x8]]  ;;  %s3006_s25 = sld [smem:[#allocation6 + $0x1]] }
  0x66   :  { %s151_s23 = sld [smem:[#allocation7]]  ;;  %s3007_s26 = sld [smem:[#allocation6 + $0x2]] }
  0x67   :  { %s153_s24 = sld [smem:[#allocation6]]  ;;  %s3968_s27 = sld [smem:[#allocation6 + $0x3]]  ;;  %v120_v15 = vstv %s3950_s6  ;;  %v122_v16 = vstv %s3952_s14 }
  0x68   :  { %8319 = sst [smem:[#allocation22_spill]] %s3954_s15  ;;  %s3970_s28 = sld [smem:[#allocation10 + $0x9]]  ;;  %v124_v17 = vstv %s3954_s15  ;;  %v126_v19 = vstv %s3956_s16 }
  0x69   :  { %8320 = sst [smem:[#allocation23_spill]] %s3956_s16  ;;  %s3972_s29 = sld [smem:[#allocation10 + $0xa]]  ;;  %v128_v20 = vstv %s3958_s17  ;;  %v130_v21 = vstv %s3960_s18 }
  0x6a   :  { %8321 = sst [smem:[#allocation24_spill]] %s3960_s18  ;;  %s3974_s30 = sld [smem:[#allocation10 + $0xb]]  ;;  %v132_v22 = vstv %s3962_s19  ;;  %v134_v23 = vstv %s3964_s20 }
  0x6b   :  { %8322 = sst [smem:[#allocation25_spill]] %s3962_s19  ;;  %s3976_s8 = sld [smem:[#allocation10 + $0xc]]  ;;  %v158_v5 = vstv %s3006_s25  ;;  %v136_v24 = vstv %s3966_s21 }
  0x6c   :  { %8323 = sst [smem:[#allocation26_spill]] %s3964_s20  ;;  %s3982_s9 = sld [smem:[#allocation10 + $0xd]]  ;;  %v152_v3 = vstv %s151_s23  ;;  %v159_v7 = vmul.f32 %v158_v5, %v3980_v1  ;;  %v162_v8 = vstv %s3007_s26 }
  0x6d   :  { %8324 = sst [smem:[#allocation27_spill]] %s3966_s21  ;;  %s3984_s0 = sld [smem:[#allocation10 + $0xe]]  ;;  %v154_v4 = vstv %s153_s24  ;;  %v166_v10 = vstv %s3968_s27  ;;  %v163_v12 = vmul.f32 %v162_v8, %v3990_v2 }
  0x6e   :  { %8325 = sst [smem:[#allocation28_spill]] %s3970_s28  ;;  %s3986_s2 = sld [smem:[#allocation10 + $0xf]]  ;;  %v155_v6 = vmul.f32 %v154_v4, %v3978_v0  ;;  %v167_v14 = vmul.f32 %v166_v10, %v4002_v9  ;;  %v138_v25 = vstv %s3970_s28 }
  0x6f   :  { %s3988_s4 = sld [smem:[#allocation9]]  ;;  %s4023_s22 = sld [smem:[#allocation6 + $0x4]]  ;;  %v140_v27 = vstv %s3972_s29 }
  0x70   :  { %s3992_s3 = sld [smem:[#allocation9 + $0x20]]  ;;  %v156_v11 = vadd.f32 %v155_v6, %v152_v3  ;;  %s4025_s7 = sld [smem:[#allocation6 + $0x5]]  ;;  %v142_v28 = vstv %s3974_s30 }
  0x71   :  { %s3994_s5 = sld [smem:[#allocation9 + $0x40]]  ;;  %s4045_s16 = sld [smem:[#allocation7 + $0x1]]  ;;  %v144_v29 = vstv %s3976_s8 }
  0x72   :  { %s3998_s10 = sld [smem:[#allocation9 + $0x60]]  ;;  %v160_v13 = vadd.f32 %v159_v7, %v156_v11  ;;  %v146_v30 = vstv %s3982_s9  ;;  %s4051_s21 = sld [smem:[#allocation6 + $0x7]] }
  0x73   :  { %s4000_s11 = sld [smem:[#allocation9 + $0x80]]  ;;  %s4053_s28 = sld [smem:[#allocation9 + $0x1]]  ;;  %v148_v31 = vstv %s3984_s0 }
  0x74   :  { %s4005_s12 = sld [smem:[#allocation9 + $0xa0]]  ;;  %v164_v18 = vadd.f32 %v163_v12, %v160_v13  ;;  %v150_v32 = vstv %s3986_s2  ;;  %s4155_s17 = sld [smem:[#allocation9 + $0x1e1]] }
  0x75   :  { %s4007_s13 = sld [smem:[#allocation9 + $0xc0]]  ;;  %v171_v33 = vstv %s3988_s4  ;;  %v237_v45 = vstv %s4023_s22  ;;  %s4074_s4 = sld [smem:[#allocation9 + $0x21]] }
  0x76   :  { %s4010_s23 = sld [smem:[#allocation9 + $0xe0]]  ;;  %v168_v26 = vadd.f32 %v167_v14, %v164_v18  ;;  %v175_v34 = vstv %s3992_s3  ;;  %v241_v46 = vstv %s4025_s7  ;;  %s4076_s3 = sld [smem:[#allocation9 + $0x41]]  ;;  %v238_v57 = vmul.f32 %v237_v45, %v3978_v0 }
  0x77   :  { %s4012_s24 = sld [smem:[#allocation9 + $0x100]]  ;;  %v179_v36 = vstv %s3994_s5  ;;  %v235_v56 = vstv %s4045_s16  ;;  %v242_v58 = vmul.f32 %v241_v46, %v3980_v1  ;;  %s4087_s7 = sld [smem:[#allocation9 + $0xa1]] }
  0x78   :  { %s4014_s25 = sld [smem:[#allocation9 + $0x120]]  ;;  %v169_v35 = vmax.f32 %v168_v26, 0.0  ;;  %v183_v37 = vstv %s3998_s10  ;;  %v249_v61 = vstv %s4051_s21  ;;  %s4098_s16 = sld [smem:[#allocation9 + $0x121]]  ;;  %v239_v14 = vadd.f32 %v238_v57, %v235_v56 }
  0x79   :  { %s4016_s26 = sld [smem:[#allocation9 + $0x140]]  ;;  %v187_v38 = vstv %s4000_s11  ;;  %v254_v62 = vstv %s4053_s28  ;;  %s4100_s5 = sld [smem:[#allocation9 + $0x141]] }
  0x7a   :  { %s4019_s27 = sld [smem:[#allocation9 + $0x160]]  ;;  %v191_v39 = vstv %s4005_s12  ;;  %v172_v51 = vmul.f32 %v171_v33, %v169_v35  ;;  %v176_v52 = vmul.f32 %v175_v34, %v169_v35  ;;  %v180_v53 = vmul.f32 %v179_v36, %v169_v35  ;;  %s4114_s10 = sld [smem:[#allocation9 + $0x161]] }
  0x7b   :  { %s4021_s1 = sld [smem:[#allocation9 + $0x180]]  ;;  %v195_v40 = vstv %s4007_s13  ;;  %v184_v59 = vmul.f32 %v183_v37, %v169_v35  ;;  %v188_v63 = vmul.f32 %v187_v38, %v169_v35  ;;  %v192_v3 = vmul.f32 %v191_v39, %v169_v35  ;;  %s4118_s13 = sld [smem:[#allocation9 + $0x181]] }
  0x7c   :  { %s4043_s15 = sld [smem:[#allocation9 + $0x1e0]]  ;;  %v199_v41 = vstv %s4010_s23  ;;  %v196_v4 = vmul.f32 %v195_v40, %v169_v35  ;;  %v4104_v6 = vadd.f32 %v172_v51, %v120_v15  ;;  %v4108_v7 = vadd.f32 %v176_v52, %v122_v16  ;;  %s4120_s23 = sld [smem:[#allocation6 + $0x9]] }
  0x7d   :  { %v203_v42 = vstv %s4012_s24  ;;  %v200_v5 = vmul.f32 %v199_v41, %v169_v35  ;;  %v4112_v8 = vadd.f32 %v180_v53, %v124_v17  ;;  %s4116_s11 = sld [smem:[#allocation6 + $0x8]]  ;;  %v4128_v26 = vadd.f32 %v184_v59, %v126_v19  ;;  %s4135_s22 = sld [smem:[#allocation9 + $0x1a1]] }
  0x7e   :  { %8326 = sst [smem:[#allocation29_spill]] %s4014_s25  ;;  %s4032_s25 = sld [smem:[#allocation6 + $0x6]]  ;;  %v204_v10 = vmul.f32 %v203_v42, %v169_v35  ;;  %v4132_v33 = vadd.f32 %v188_v63, %v128_v20  ;;  %v243_v34 = vadd.f32 %v242_v58, %v239_v14  ;;  %v250_v36 = vmul.f32 %v249_v61, %v4002_v9 }
  0x7f   :  { %8327 = sst [smem:[#allocation30_spill]] %s4016_s26  ;;  %s8329_s19 = sld [smem:[#allocation29_spill]]  ;;  %v4145_v19 = vadd.f32 %v196_v4, %v132_v22  ;;  %v4149_v20 = vadd.f32 %v200_v5, %v134_v23  ;;  %v262_v40 = vstv %s4076_s3  ;;  %v290_v45 = vstv %s4098_s16 }
  0x80   :  { %s4030_s26 = sld [smem:[#allocation9 + $0x1a0]]  ;;  %8331 = sst [smem:[#allocation29_spill]] %s4053_s28  ;;  %v215_v47 = vstv %s4019_s27  ;;  %v4153_v37 = vadd.f32 %v204_v10, %v136_v24  ;;  %v298_v51 = vstv %s4114_s10  ;;  %v314_v56 = vstv %s4155_s17 }
  0x81   :  { %8328 = sst [smem:[#allocation31_spill]] %s4021_s1  ;;  %s4038_s1 = sld [smem:[#allocation9 + $0x1c0]]  ;;  %v216_v13 = vmul.f32 %v215_v47, %v169_v35  ;;  %v302_v52 = vstv %s4118_s13 }
  0x82   :  { %s8330_s20 = sld [smem:[#allocation30_spill]]  ;;  %s8332_s18 = sld [smem:[#allocation31_spill]]  ;;  %v231_v55 = vstv %s4043_s15  ;;  %v324_v46 = vstv %s4120_s23 }
  0x83   :  { %s4096_s15 = sld [smem:[#allocation9 + $0x101]]  ;;  %v232_v18 = vmul.f32 %v231_v55, %v169_v35  ;;  %s4124_s27 = sld [smem:[#allocation6 + $0xb]]  ;;  %v4169_v22 = vadd.f32 %v216_v13, %v142_v28  ;;  %v320_v42 = vstv %s4116_s11  ;;  %v306_v53 = vstv %s4135_s22 }
  0x84   :  { %v245_v50 = vstv %s4032_s25  ;;  %s4137_s28 = sld [smem:[#allocation9 + $0x1c1]]  ;;  %s4157_s21 = sld [smem:[#allocation7 + $0x2]]  ;;  %v325_v58 = vmul.f32 %v324_v46, %v3980_v1 }
  0x85   :  { %v207_v43 = vstv %s8329_s19  ;;  %s4079_s19 = sld [smem:[#allocation9 + $0x61]]  ;;  %v246_v60 = vmul.f32 %v245_v50, %v3990_v2  ;;  %s4171_s12 = sld [smem:[#allocation9 + $0x2]]  ;;  %v4189_v28 = vadd.f32 %v232_v18, %v150_v32  ;;  %v274_v32 = vstv %s4087_s7 }
  0x86   :  { %v223_v49 = vstv %s4030_s26  ;;  %v208_v11 = vmul.f32 %v207_v43, %v169_v35  ;;  %s4122_s26 = sld [smem:[#allocation6 + $0xa]]  ;;  %s4254_s16 = sld [smem:[#allocation6 + $0xe]] }
  0x87   :  { %v227_v54 = vstv %s4038_s1  ;;  %s4094_s1 = sld [smem:[#allocation9 + $0xe1]]  ;;  %v224_v16 = vmul.f32 %v223_v49, %v169_v35  ;;  %v247_v23 = vadd.f32 %v246_v60, %v243_v34  ;;  %s4173_s6 = sld [smem:[#allocation9 + $0x22]] }
  0x88   :  { %v211_v44 = vstv %s8330_s20  ;;  %v219_v48 = vstv %s8332_s18  ;;  %s4081_s20 = sld [smem:[#allocation9 + $0x81]]  ;;  %v228_v17 = vmul.f32 %v227_v54, %v169_v35  ;;  %v4161_v38 = vadd.f32 %v208_v11, %v138_v25  ;;  %s4191_s29 = sld [smem:[#allocation9 + $0x42]] }
  0x89   :  { %s4089_s18 = sld [smem:[#allocation9 + $0xc1]]  ;;  %v212_v12 = vmul.f32 %v211_v44, %v169_v35  ;;  %v220_v15 = vmul.f32 %v219_v48, %v169_v35  ;;  %v4141_v35 = vadd.f32 %v192_v3, %v130_v21  ;;  %v4181_v25 = vadd.f32 %v224_v16, %v146_v30  ;;  %s4193_s30 = sld [smem:[#allocation9 + $0x62]] }
  0x8a   :  { %v251_v39 = vadd.f32 %v250_v36, %v247_v23  ;;  %s4198_s8 = sld [smem:[#allocation9 + $0x82]]  ;;  %v286_v44 = vstv %s4096_s15  ;;  %v294_v48 = vstv %s4100_s5  ;;  %v332_v50 = vstv %s4124_s27  ;;  %s4267_s10 = sld [smem:[#allocation6 + $0xf]] }
  0x8b   :  { %v4165_v21 = vadd.f32 %v212_v12, %v140_v27  ;;  %v4177_v24 = vadd.f32 %v220_v15, %v144_v29  ;;  %v4185_v27 = vadd.f32 %v228_v17, %v148_v31  ;;  %v258_v29 = vstv %s4074_s4  ;;  %s4200_s9 = sld [smem:[#allocation9 + $0xa2]]  ;;  %s4279_s14 = sld [smem:[#allocation9 + $0x3]] }
  0x8c   :  { %v266_v30 = vstv %s4079_s19  ;;  %s4206_s0 = sld [smem:[#allocation9 + $0xc2]]  ;;  %v252_v47 = vmax.f32 %v251_v39, 0.0  ;;  %v328_v49 = vstv %s4122_s26  ;;  %v321_v54 = vmul.f32 %v320_v42, %v3978_v0  ;;  %s4231_s19 = sld [smem:[#allocation6 + $0xc]] }
  0x8d   :  { %s4208_s2 = sld [smem:[#allocation9 + $0xe2]]  ;;  %v282_v43 = vstv %s4094_s1  ;;  %v310_v55 = vstv %s4137_s28  ;;  %v318_v57 = vstv %s4157_s21  ;;  %v329_v59 = vmul.f32 %v328_v49, %v3990_v2  ;;  %s4249_s1 = sld [smem:[#allocation6 + $0xd]] }
  0x8e   :  { %v270_v31 = vstv %s4081_s20  ;;  %s4214_s4 = sld [smem:[#allocation9 + $0x102]]  ;;  %v333_v60 = vmul.f32 %v332_v50, %v4002_v9  ;;  %v337_v61 = vstv %s4171_s12  ;;  %v341_v63 = vstv %s4173_s6  ;;  %s4281_s23 = sld [smem:[#allocation9 + $0x23]] }
  0x8f   :  { %v278_v41 = vstv %s4089_s18  ;;  %v255_v3 = vmul.f32 %v254_v62, %v252_v47  ;;  %v259_v4 = vmul.f32 %v258_v29, %v252_v47  ;;  %v263_v5 = vmul.f32 %v262_v40, %v252_v47  ;;  %s4236_s28 = sld [smem:[#allocation9 + $0x122]]  ;;  %s4247_s18 = sld [smem:[#allocation7 + $0x3]] }
  0x90   :  { %v345_v10 = vstv %s4191_s29  ;;  %v267_v11 = vmul.f32 %v266_v30, %v252_v47  ;;  %v322_v12 = vadd.f32 %v321_v54, %v318_v57  ;;  %v349_v13 = vstv %s4193_s30  ;;  %s4240_s20 = sld [smem:[#allocation9 + $0x142]]  ;;  %s4284_s24 = sld [smem:[#allocation9 + $0x43]] }
  0x91   :  { %v353_v14 = vstv %s4198_s8  ;;  %s4242_s7 = sld [smem:[#allocation9 + $0x162]]  ;;  %v271_v15 = vmul.f32 %v270_v31, %v252_v47  ;;  %v357_v16 = vstv %s4200_s9  ;;  %v275_v62 = vmul.f32 %v274_v32, %v252_v47  ;;  %s4286_s25 = sld [smem:[#allocation9 + $0x63]] }
  0x92   :  { %v361_v17 = vstv %s4206_s0  ;;  %v279_v34 = vmul.f32 %v278_v41, %v252_v47  ;;  %v283_v36 = vmul.f32 %v282_v43, %v252_v47  ;;  %s4252_s15 = sld [smem:[#allocation9 + $0x182]]  ;;  %v4257_v39 = vadd.f32 %v255_v3, %v4104_v6  ;;  %s4300_s26 = sld [smem:[#allocation9 + $0x83]] }
  0x93   :  { %v365_v18 = vstv %s4208_s2  ;;  %v4260_v29 = vadd.f32 %v259_v4, %v4108_v7  ;;  %v4263_v40 = vadd.f32 %v263_v5, %v4112_v8  ;;  %v287_v30 = vmul.f32 %v286_v44, %v252_v47  ;;  %s4265_s5 = sld [smem:[#allocation9 + $0x1a2]]  ;;  %s4302_s27 = sld [smem:[#allocation9 + $0xa3]] }
  0x94   :  { %v369_v23 = vstv %s4214_s4  ;;  %v4270_v31 = vadd.f32 %v267_v11, %v4128_v26  ;;  %v291_v32 = vmul.f32 %v290_v45, %v252_v47  ;;  %v295_v41 = vmul.f32 %v294_v48, %v252_v47  ;;  %s4272_s11 = sld [smem:[#allocation9 + $0x1c2]]  ;;  %s4311_s22 = sld [smem:[#allocation9 + $0xc3]] }
  0x95   :  { %v326_v42 = vadd.f32 %v325_v58, %v322_v12  ;;  %s4274_s13 = sld [smem:[#allocation9 + $0x1e2]]  ;;  %v4277_v6 = vadd.f32 %v271_v15, %v4132_v33  ;;  %v299_v7 = vmul.f32 %v298_v51, %v252_v47  ;;  %v303_v8 = vmul.f32 %v302_v52, %v252_v47  ;;  %s4313_s17 = sld [smem:[#allocation9 + $0xe3]] }
  0x96   :  { %v307_v43 = vmul.f32 %v306_v53, %v252_v47  ;;  %v311_v44 = vmul.f32 %v310_v55, %v252_v47  ;;  %v315_v26 = vmul.f32 %v314_v56, %v252_v47  ;;  %v403_v45 = vstv %s4231_s19  ;;  %s4323_s21 = sld [smem:[#allocation9 + $0x103]]  ;;  %s4357_s19 = sld [smem:[#allocation6 + $0x10]] }
  0x97   :  { %v330_v46 = vadd.f32 %v329_v59, %v326_v42  ;;  %v4289_v33 = vadd.f32 %v275_v62, %v4141_v35  ;;  %v4292_v48 = vadd.f32 %v279_v34, %v4145_v19  ;;  %v4295_v49 = vadd.f32 %v283_v36, %v4149_v20  ;;  %s4325_s3 = sld [smem:[#allocation9 + $0x123]]  ;;  %s4374_s6 = sld [smem:[#allocation6 + $0x11]] }
  0x98   :  { %v4298_v50 = vadd.f32 %v287_v30, %v4153_v37  ;;  %v4305_v47 = vadd.f32 %v291_v32, %v4161_v38  ;;  %v4308_v35 = vadd.f32 %v295_v41, %v4165_v21  ;;  %v404_v20 = vmul.f32 %v403_v45, %v3978_v0  ;;  %s4372_s12 = sld [smem:[#allocation9 + $0x183]]  ;;  %s4398_s8 = sld [smem:[#allocation7 + $0x4]] }
  0x99   :  { %v334_v19 = vadd.f32 %v333_v60, %v330_v46  ;;  %v4316_v37 = vadd.f32 %v299_v7, %v4169_v22  ;;  %v4319_v38 = vadd.f32 %v303_v8, %v4177_v24  ;;  %v401_v21 = vstv %s4247_s18  ;;  %s4386_s29 = sld [smem:[#allocation6 + $0x13]]  ;;  %s4410_s2 = sld [smem:[#allocation9 + $0x4]] }
  0x9a   :  { %v407_v51 = vstv %s4249_s1  ;;  %v4328_v52 = vadd.f32 %v307_v43, %v4181_v25  ;;  %v4331_v53 = vadd.f32 %v311_v44, %v4185_v27  ;;  %v4334_v22 = vadd.f32 %v315_v26, %v4189_v28  ;;  %s4396_s30 = sld [smem:[#allocation9 + $0x1a3]]  ;;  %s4418_s4 = sld [smem:[#allocation9 + $0x24]] }
  0x9b   :  { %v411_v24 = vstv %s4254_s16  ;;  %v335_v54 = vmax.f32 %v334_v19, 0.0  ;;  %v373_v55 = vstv %s4236_s28  ;;  %v377_v56 = vstv %s4240_s20  ;;  %s4362_s28 = sld [smem:[#allocation9 + $0x143]]  ;;  %s4420_s18 = sld [smem:[#allocation9 + $0x44]] }
  0x9c   :  { %v415_v57 = vstv %s4267_s10  ;;  %v381_v25 = vstv %s4242_s7  ;;  %v385_v58 = vstv %s4252_s15  ;;  %v405_v59 = vadd.f32 %v404_v20, %v401_v21  ;;  %s4364_s20 = sld [smem:[#allocation9 + $0x163]]  ;;  %s4384_s7 = sld [smem:[#allocation6 + $0x12]] }
  0x9d   :  { %v408_v27 = vmul.f32 %v407_v51, %v3980_v1  ;;  %v389_v28 = vstv %s4265_s5  ;;  %v393_v60 = vstv %s4272_s11  ;;  %v397_v3 = vstv %s4274_s13  ;;  %s4400_s9 = sld [smem:[#allocation9 + $0x1c3]]  ;;  %s4432_s1 = sld [smem:[#allocation9 + $0x64]] }
  0x9e   :  { %v412_v4 = vmul.f32 %v411_v24, %v3990_v2  ;;  %v416_v5 = vmul.f32 %v415_v57, %v4002_v9  ;;  %v420_v11 = vstv %s4279_s14  ;;  %v424_v12 = vstv %s4281_s23  ;;  %s4402_s0 = sld [smem:[#allocation9 + $0x1e3]]  ;;  %s4434_s15 = sld [smem:[#allocation9 + $0x84]] }
  0x9f   :  { %v428_v15 = vstv %s4284_s24  ;;  %v338_v62 = vmul.f32 %v337_v61, %v335_v54  ;;  %v342_v34 = vmul.f32 %v341_v63, %v335_v54  ;;  %v432_v36 = vstv %s4286_s25  ;;  %s4469_s16 = sld [smem:[#allocation9 + $0xa4]] }
  0xa0   :  { %v436_v30 = vstv %s4300_s26  ;;  %v409_v32 = vadd.f32 %v408_v27, %v405_v59  ;;  %v440_v41 = vstv %s4302_s27  ;;  %v444_v42 = vstv %s4311_s22  ;;  %s4477_s5 = sld [smem:[#allocation9 + $0xc4]]  ;;  %s4520_s26 = sld [smem:[#allocation6 + $0x15]] }
  0xa1   :  { %v448_v7 = vstv %s4313_s17  ;;  %v346_v61 = vmul.f32 %v345_v10, %v335_v54  ;;  %v350_v63 = vmul.f32 %v349_v13, %v335_v54  ;;  %v452_v8 = vstv %s4323_s21  ;;  %s4479_s10 = sld [smem:[#allocation9 + $0xe4]]  ;;  %s4522_s27 = sld [smem:[#allocation6 + $0x16]] }
  0xa2   :  { %v456_v43 = vstv %s4325_s3  ;;  %v354_v44 = vmul.f32 %v353_v14, %v335_v54  ;;  %v358_v26 = vmul.f32 %v357_v16, %v335_v54  ;;  %v362_v46 = vmul.f32 %v361_v17, %v335_v54  ;;  %s4485_s11 = sld [smem:[#allocation9 + $0x104]]  ;;  %s4529_s17 = sld [smem:[#allocation7 + $0x5]] }
  0xa3   :  { %v366_v45 = vmul.f32 %v365_v18, %v335_v54  ;;  %v4389_v10 = vadd.f32 %v338_v62, %v4257_v39  ;;  %v4392_v13 = vadd.f32 %v342_v34, %v4260_v29  ;;  %v370_v19 = vmul.f32 %v369_v23, %v335_v54  ;;  %s4487_s13 = sld [smem:[#allocation6 + $0x14]]  ;;  %s4533_s3 = sld [smem:[#allocation6 + $0x17]] }
  0xa4   :  { %v374_v20 = vmul.f32 %v373_v55, %v335_v54  ;;  %v378_v14 = vmul.f32 %v377_v56, %v335_v54  ;;  %v382_v16 = vmul.f32 %v381_v25, %v335_v54  ;;  %v386_v17 = vmul.f32 %v385_v58, %v335_v54  ;;  %s4494_s14 = sld [smem:[#allocation9 + $0x124]] }
  0xa5   :  { %v413_v18 = vadd.f32 %v412_v4, %v409_v32  ;;  %v4405_v39 = vadd.f32 %v346_v61, %v4263_v40  ;;  %v4408_v29 = vadd.f32 %v350_v63, %v4270_v31  ;;  %v390_v23 = vmul.f32 %v389_v28, %v335_v54  ;;  %s4496_s23 = sld [smem:[#allocation9 + $0x144]] }
  0xa6   :  { %v394_v21 = vmul.f32 %v393_v60, %v335_v54  ;;  %v4413_v51 = vadd.f32 %v354_v44, %v4277_v6  ;;  %v4416_v24 = vadd.f32 %v358_v26, %v4289_v33  ;;  %v398_v55 = vmul.f32 %v397_v3, %v335_v54  ;;  %s4506_s24 = sld [smem:[#allocation9 + $0x164]] }
  0xa7   :  { %v417_v56 = vadd.f32 %v416_v5, %v413_v18  ;;  %v4423_v40 = vadd.f32 %v362_v46, %v4292_v48  ;;  %v4426_v31 = vadd.f32 %v366_v45, %v4295_v49  ;;  %v4429_v6 = vadd.f32 %v370_v19, %v4298_v50  ;;  %s4508_s25 = sld [smem:[#allocation9 + $0x184]] }
  0xa8   :  { %v486_v33 = vstv %s4357_s19  ;;  %v4437_v48 = vadd.f32 %v374_v20, %v4305_v47  ;;  %v4440_v49 = vadd.f32 %v378_v14, %v4308_v35  ;;  %v4443_v50 = vadd.f32 %v382_v16, %v4316_v37  ;;  %s4527_s22 = sld [smem:[#allocation9 + $0x1a4]] }
  0xa9   :  { %v4446_v54 = vadd.f32 %v386_v17, %v4319_v38  ;;  %v4449_v57 = vadd.f32 %v390_v23, %v4328_v52  ;;  %v4452_v25 = vadd.f32 %v394_v21, %v4331_v53  ;;  %v418_v47 = vmax.f32 %v417_v56, 0.0  ;;  %s4531_s21 = sld [smem:[#allocation9 + $0x1c4]] }
  0xaa   :  { %v490_v58 = vstv %s4374_s6  ;;  %v4456_v35 = vadd.f32 %v398_v55, %v4334_v22  ;;  %v487_v37 = vmul.f32 %v486_v33, %v3978_v0  ;;  %v494_v59 = vstv %s4384_s7  ;;  %s4544_s19 = sld [smem:[#allocation9 + $0x1e4]]  ;;  %s4571_s6 = sld [smem:[#allocation9 + $0x65]] }
  0xab   :  { %v498_v27 = vstv %s4386_s29  ;;  %v460_v38 = vstv %s4362_s28  ;;  %v464_v28 = vstv %s4364_s20  ;;  %v468_v52 = vstv %s4372_s12  ;;  %s4546_s28 = sld [smem:[#allocation9 + $0x5]] }
  0xac   :  { %v484_v60 = vstv %s4398_s8  ;;  %v472_v53 = vstv %s4396_s30  ;;  %v476_v3 = vstv %s4400_s9  ;;  %v480_v4 = vstv %s4402_s0  ;;  %s4560_s20 = sld [smem:[#allocation9 + $0x25]] }
  0xad   :  { %v491_v5 = vmul.f32 %v490_v58, %v3980_v1  ;;  %v421_v22 = vmul.f32 %v420_v11, %v418_v47  ;;  %v425_v62 = vmul.f32 %v424_v12, %v418_v47  ;;  %v495_v34 = vmul.f32 %v494_v59, %v3990_v2  ;;  %s4562_s12 = sld [smem:[#allocation9 + $0x45]] }
  0xae   :  { %v499_v32 = vmul.f32 %v498_v27, %v4002_v9  ;;  %v429_v61 = vmul.f32 %v428_v15, %v418_v47  ;;  %v488_v63 = vadd.f32 %v487_v37, %v484_v60  ;;  %v503_v44 = vstv %s4410_s2  ;;  %s4573_s7 = sld [smem:[#allocation9 + $0x85]] }
  0xaf   :  { %v507_v26 = vstv %s4418_s4  ;;  %v433_v11 = vmul.f32 %v432_v36, %v418_v47  ;;  %v511_v12 = vstv %s4420_s18  ;;  %v515_v46 = vstv %s4432_s1  ;;  %s4587_s29 = sld [smem:[#allocation9 + $0xa5]]  ;;  %s4635_s4 = sld [smem:[#allocation6 + $0x18]] }
  0xb0   :  { %v519_v45 = vstv %s4434_s15  ;;  %v437_v15 = vmul.f32 %v436_v30, %v418_v47  ;;  %v441_v19 = vmul.f32 %v440_v41, %v418_v47  ;;  %v445_v20 = vmul.f32 %v444_v42, %v418_v47  ;;  %s4589_s30 = sld [smem:[#allocation9 + $0xc5]]  ;;  %s4649_s18 = sld [smem:[#allocation6 + $0x1a]] }
  0xb1   :  { %v449_v14 = vmul.f32 %v448_v7, %v418_v47  ;;  %v4511_v36 = vadd.f32 %v421_v22, %v4389_v10  ;;  %v4514_v16 = vadd.f32 %v425_v62, %v4392_v13  ;;  %v453_v17 = vmul.f32 %v452_v8, %v418_v47  ;;  %s4615_s8 = sld [smem:[#allocation9 + $0xe5]]  ;;  %s4651_s1 = sld [smem:[#allocation6 + $0x1b]] }
  0xb2   :  { %v457_v30 = vmul.f32 %v456_v43, %v418_v47  ;;  %v4525_v41 = vadd.f32 %v429_v61, %v4405_v39  ;;  %v461_v42 = vmul.f32 %v460_v38, %v418_v47  ;;  %v465_v7 = vmul.f32 %v464_v28, %v418_v47  ;;  %s4617_s9 = sld [smem:[#allocation9 + $0x105]] }
  0xb3   :  { %v492_v18 = vadd.f32 %v491_v5, %v488_v63  ;;  %v469_v10 = vmul.f32 %v468_v52, %v418_v47  ;;  %v473_v13 = vmul.f32 %v472_v53, %v418_v47  ;;  %v477_v23 = vmul.f32 %v476_v3, %v418_v47  ;;  %s4623_s0 = sld [smem:[#allocation9 + $0x125]] }
  0xb4   :  { %v481_v8 = vmul.f32 %v480_v4, %v418_v47  ;;  %v4536_v43 = vadd.f32 %v433_v11, %v4408_v29  ;;  %v4539_v39 = vadd.f32 %v437_v15, %v4413_v51  ;;  %v4542_v21 = vadd.f32 %v441_v19, %v4416_v24  ;;  %s4633_s2 = sld [smem:[#allocation9 + $0x165]] }
  0xb5   :  { %v496_v55 = vadd.f32 %v495_v34, %v492_v18  ;;  %v4549_v56 = vadd.f32 %v445_v20, %v4423_v40  ;;  %v4552_v33 = vadd.f32 %v449_v14, %v4426_v31  ;;  %v4555_v29 = vadd.f32 %v453_v17, %v4429_v6  ;;  %s4653_s15 = sld [smem:[#allocation9 + $0x1a5]] }
  0xb6   :  { %v4558_v51 = vadd.f32 %v457_v30, %v4437_v48  ;;  %v4565_v24 = vadd.f32 %v461_v42, %v4440_v49  ;;  %v4568_v40 = vadd.f32 %v465_v7, %v4443_v50  ;;  %v569_v6 = vstv %s4487_s13  ;;  %s4660_s13 = sld [smem:[#allocation9 + $0x1e5]] }
  0xb7   :  { %v500_v31 = vadd.f32 %v499_v32, %v496_v55  ;;  %v4576_v48 = vadd.f32 %v469_v10, %v4446_v54  ;;  %v4579_v49 = vadd.f32 %v473_v13, %v4449_v57  ;;  %v4582_v50 = vadd.f32 %v477_v23, %v4452_v25 }
  0xb8   :  { %v4585_v47 = vadd.f32 %v481_v8, %v4456_v35  ;;  %v523_v54 = vstv %s4469_s16  ;;  %v527_v58 = vstv %s4477_s5  ;;  %v531_v57 = vstv %s4479_s10  ;;  %s4625_s16 = sld [smem:[#allocation9 + $0x145]]  ;;  %s4641_s10 = sld [smem:[#allocation6 + $0x19]] }
  0xb9   :  { %v535_v37 = vstv %s4485_s11  ;;  %v501_v59 = vmax.f32 %v500_v31, 0.0  ;;  %v570_v25 = vmul.f32 %v569_v6, %v3978_v0  ;;  %v573_v35 = vstv %s4520_s26  ;;  %s4639_s5 = sld [smem:[#allocation9 + $0x185]]  ;;  %s4691_s26 = sld [smem:[#allocation9 + $0x66]] }
  0xba   :  { %v577_v27 = vstv %s4522_s27  ;;  %v539_v38 = vstv %s4494_s14  ;;  %v543_v28 = vstv %s4496_s23  ;;  %v547_v52 = vstv %s4506_s24  ;;  %s4655_s11 = sld [smem:[#allocation9 + $0x1c5]]  ;;  %s4662_s14 = sld [smem:[#allocation7 + $0x6]] }
  0xbb   :  { %v567_v60 = vstv %s4529_s17  ;;  %v551_v53 = vstv %s4508_s25  ;;  %v555_v3 = vstv %s4527_s22  ;;  %v559_v4 = vstv %s4531_s21  ;;  %s4673_s23 = sld [smem:[#allocation9 + $0x6]] }
  0xbc   :  { %v581_v5 = vstv %s4533_s3  ;;  %v563_v22 = vstv %s4544_s19  ;;  %v574_v62 = vmul.f32 %v573_v35, %v3980_v1  ;;  %v578_v34 = vmul.f32 %v577_v27, %v3990_v2  ;;  %s4675_s24 = sld [smem:[#allocation9 + $0x26]]  ;;  %s4741_s19 = sld [smem:[#allocation6 + $0x1c]] }
  0xbd   :  { %v586_v32 = vstv %s4546_s28  ;;  %v504_v61 = vmul.f32 %v503_v44, %v501_v59  ;;  %v508_v63 = vmul.f32 %v507_v26, %v501_v59  ;;  %v571_v11 = vadd.f32 %v570_v25, %v567_v60  ;;  %s4689_s25 = sld [smem:[#allocation9 + $0x46]]  ;;  %s4765_s28 = sld [smem:[#allocation7 + $0x7]] }
  0xbe   :  { %v590_v15 = vstv %s4560_s20  ;;  %v582_v19 = vmul.f32 %v581_v5, %v4002_v9  ;;  %v594_v20 = vstv %s4562_s12  ;;  %v598_v14 = vstv %s4571_s6  ;;  %s4702_s27 = sld [smem:[#allocation9 + $0x86]]  ;;  %s4767_s20 = sld [smem:[#allocation6 + $0x1d]] }
  0xbf   :  { %v602_v17 = vstv %s4573_s7  ;;  %v512_v44 = vmul.f32 %v511_v12, %v501_v59  ;;  %v516_v26 = vmul.f32 %v515_v46, %v501_v59  ;;  %v606_v30 = vstv %s4587_s29  ;;  %s4704_s22 = sld [smem:[#allocation9 + $0xa6]]  ;;  %s4789_s29 = sld [smem:[#allocation6 + $0x1f]] }
  0xc0   :  { %v610_v42 = vstv %s4589_s30  ;;  %v520_v7 = vmul.f32 %v519_v45, %v501_v59  ;;  %v524_v18 = vmul.f32 %v523_v54, %v501_v59  ;;  %v528_v10 = vmul.f32 %v527_v58, %v501_v59  ;;  %s4716_s17 = sld [smem:[#allocation9 + $0xc6]] }
  0xc1   :  { %v532_v13 = vmul.f32 %v531_v57, %v501_v59  ;;  %v4644_v23 = vadd.f32 %v504_v61, %v4511_v36  ;;  %v4647_v12 = vadd.f32 %v508_v63, %v4514_v16  ;;  %v536_v46 = vmul.f32 %v535_v37, %v501_v59  ;;  %s4718_s21 = sld [smem:[#allocation9 + $0xe6]] }
  0xc2   :  { %v540_v8 = vmul.f32 %v539_v38, %v501_v59  ;;  %v544_v45 = vmul.f32 %v543_v28, %v501_v59  ;;  %v548_v55 = vmul.f32 %v547_v52, %v501_v59  ;;  %v552_v31 = vmul.f32 %v551_v53, %v501_v59  ;;  %s4724_s3 = sld [smem:[#allocation9 + $0x106]] }
  0xc3   :  { %v575_v6 = vadd.f32 %v574_v62, %v571_v11  ;;  %v4658_v36 = vadd.f32 %v512_v44, %v4525_v41  ;;  %v556_v54 = vmul.f32 %v555_v3, %v501_v59  ;;  %v560_v16 = vmul.f32 %v559_v4, %v501_v59  ;;  %s4774_s12 = sld [smem:[#allocation9 + $0x186]] }
  0xc4   :  { %v564_v58 = vmul.f32 %v563_v22, %v501_v59  ;;  %v4665_v57 = vadd.f32 %v516_v26, %v4536_v43  ;;  %v4668_v37 = vadd.f32 %v520_v7, %v4539_v39  ;;  %v4671_v25 = vadd.f32 %v524_v18, %v4542_v21  ;;  %s4776_s6 = sld [smem:[#allocation6 + $0x1e]] }
  0xc5   :  { %v579_v35 = vadd.f32 %v578_v34, %v575_v6  ;;  %v4678_v41 = vadd.f32 %v528_v10, %v4549_v56  ;;  %v4681_v59 = vadd.f32 %v532_v13, %v4552_v33  ;;  %v4684_v43 = vadd.f32 %v536_v46, %v4555_v29  ;;  %s4787_s7 = sld [smem:[#allocation9 + $0x1a6]] }
  0xc6   :  { %v4687_v39 = vadd.f32 %v540_v8, %v4558_v51  ;;  %v4694_v21 = vadd.f32 %v544_v45, %v4565_v24  ;;  %v4697_v56 = vadd.f32 %v548_v55, %v4568_v40  ;;  %v4700_v33 = vadd.f32 %v552_v31, %v4576_v48  ;;  %s4794_s30 = sld [smem:[#allocation9 + $0x1c6]] }
  0xc7   :  { %v583_v29 = vadd.f32 %v582_v19, %v579_v35  ;;  %v4707_v51 = vadd.f32 %v556_v54, %v4579_v49  ;;  %v4710_v24 = vadd.f32 %v560_v16, %v4582_v50  ;;  %v4713_v40 = vadd.f32 %v564_v58, %v4585_v47 }
  0xc8   :  { %v652_v48 = vstv %s4635_s4  ;;  %v614_v27 = vstv %s4615_s8  ;;  %v618_v38 = vstv %s4617_s9  ;;  %v622_v49 = vstv %s4623_s0  ;;  %s4750_s8 = sld [smem:[#allocation9 + $0x126]]  ;;  %s4803_s4 = sld [smem:[#allocation9 + $0x27]] }
  0xc9   :  { %v656_v28 = vstv %s4641_s10  ;;  %v584_v50 = vmax.f32 %v583_v29, 0.0  ;;  %v626_v52 = vstv %s4625_s16  ;;  %v660_v47 = vstv %s4649_s18  ;;  %s4756_s9 = sld [smem:[#allocation9 + $0x146]]  ;;  %s4808_s10 = sld [smem:[#allocation9 + $0x67]] }
  0xca   :  { %v664_v60 = vstv %s4651_s1  ;;  %v630_v53 = vstv %s4633_s2  ;;  %v634_v3 = vstv %s4639_s5  ;;  %v638_v4 = vstv %s4653_s15  ;;  %s4758_s0 = sld [smem:[#allocation9 + $0x166]]  ;;  %s4801_s2 = sld [smem:[#allocation9 + $0x7]] }
  0xcb   :  { %v653_v5 = vmul.f32 %v652_v48, %v3978_v0  ;;  %v642_v22 = vstv %s4655_s11  ;;  %v646_v62 = vstv %s4660_s13  ;;  %v650_v34 = vstv %s4662_s14  ;;  %s4796_s16 = sld [smem:[#allocation9 + $0x1e6]]  ;;  %s4806_s5 = sld [smem:[#allocation9 + $0x47]] }
  0xcc   :  { %v657_v61 = vmul.f32 %v656_v28, %v3980_v1  ;;  %v661_v63 = vmul.f32 %v660_v47, %v3990_v2  ;;  %v665_v11 = vmul.f32 %v664_v60, %v4002_v9  ;;  %v669_v19 = vstv %s4673_s23  ;;  %s4822_s18 = sld [smem:[#allocation9 + $0x87]] }
  0xcd   :  { %v673_v44 = vstv %s4675_s24  ;;  %v587_v0 = vmul.f32 %v586_v32, %v584_v50  ;;  %v591_v26 = vmul.f32 %v590_v15, %v584_v50  ;;  %v595_v7 = vmul.f32 %v594_v20, %v584_v50  ;;  %s4824_s1 = sld [smem:[#allocation9 + $0xa7]]  ;;  %s4904_s24 = sld [smem:[#allocation6 + $0x21]] }
  0xce   :  { %v677_v1 = vstv %s4689_s25  ;;  %v599_v2 = vmul.f32 %v598_v14, %v584_v50  ;;  %v654_v9 = vadd.f32 %v653_v5, %v650_v34  ;;  %v681_v18 = vstv %s4691_s26  ;;  %s4835_s15 = sld [smem:[#allocation9 + $0xc7]]  ;;  %s4916_s25 = sld [smem:[#allocation6 + $0x23]] }
  0xcf   :  { %v685_v10 = vstv %s4702_s27  ;;  %v603_v32 = vmul.f32 %v602_v17, %v584_v50  ;;  %v689_v15 = vstv %s4704_s22  ;;  %v693_v13 = vstv %s4716_s17  ;;  %s4837_s11 = sld [smem:[#allocation9 + $0xe7]]  ;;  %s4928_s27 = sld [smem:[#allocation7 + $0x8]] }
  0xd0   :  { %v697_v46 = vstv %s4718_s21  ;;  %v607_v20 = vmul.f32 %v606_v30, %v584_v50  ;;  %v611_v14 = vmul.f32 %v610_v42, %v584_v50  ;;  %v615_v8 = vmul.f32 %v614_v27, %v584_v50  ;;  %s4847_s13 = sld [smem:[#allocation9 + $0x107]]  ;;  %s4940_s21 = sld [smem:[#allocation9 + $0x8]] }
  0xd1   :  { %v701_v45 = vstv %s4724_s3  ;;  %v4779_v55 = vadd.f32 %v587_v0, %v4644_v23  ;;  %v4782_v17 = vadd.f32 %v591_v26, %v4647_v12  ;;  %v4785_v31 = vadd.f32 %v595_v7, %v4658_v36  ;;  %s4849_s14 = sld [smem:[#allocation9 + $0x127]]  ;;  %v4875_v26 = vld [vmem:[#allocation2 + $0x18] sm:$0xff]  ;;  %s4948_s3 = sld [smem:[#allocation9 + $0x28]] }
  0xd2   :  { %v619_v6 = vmul.f32 %v618_v38, %v584_v50  ;;  %v4792_v30 = vadd.f32 %v599_v2, %v4665_v57  ;;  %v623_v42 = vmul.f32 %v622_v49, %v584_v50  ;;  %v627_v54 = vmul.f32 %v626_v52, %v584_v50  ;;  %s4902_s23 = sld [smem:[#allocation9 + $0x187]] }
  0xd3   :  { %v658_v16 = vadd.f32 %v657_v61, %v654_v9  ;;  %v4799_v23 = vadd.f32 %v603_v32, %v4668_v37  ;;  %v631_v12 = vmul.f32 %v630_v53, %v584_v50  ;;  %v635_v36 = vmul.f32 %v634_v3, %v584_v50  ;;  %s4926_s26 = sld [smem:[#allocation9 + $0x1a7]] }
  0xd4   :  { %v639_v58 = vmul.f32 %v638_v4, %v584_v50  ;;  %v643_v35 = vmul.f32 %v642_v22, %v584_v50  ;;  %v647_v57 = vmul.f32 %v646_v62, %v584_v50  ;;  %v735_v48 = vstv %s4741_s19  ;;  %s4887_s19 = sld [smem:[#allocation6 + $0x20]]  ;;  %s4930_s22 = sld [smem:[#allocation9 + $0x1c7]] }
  0xd5   :  { %v662_v29 = vadd.f32 %v661_v63, %v658_v16  ;;  %v4811_v27 = vadd.f32 %v607_v20, %v4671_v25  ;;  %v4814_v37 = vadd.f32 %v611_v14, %v4678_v41  ;;  %v4817_v38 = vadd.f32 %v615_v8, %v4681_v59  ;;  %v4832_v41 = vld [vmem:[#allocation2] sm:$0xff]  ;;  %s4932_s17 = sld [smem:[#allocation9 + $0x1e7]] }
  0xd6   :  { %v4820_v49 = vadd.f32 %v619_v6, %v4684_v43  ;;  %v4827_v28 = vadd.f32 %v623_v42, %v4687_v39  ;;  %v4830_v25 = vadd.f32 %v627_v54, %v4694_v21  ;;  %v736_v59 = vmul.f32 %v4832_v41, %v735_v48 }
  0xd7   :  { %v666_v50 = vadd.f32 %v665_v11, %v662_v29  ;;  %v4840_v43 = vadd.f32 %v631_v12, %v4697_v56  ;;  %v4843_v39 = vadd.f32 %v635_v36, %v4700_v33  ;;  %v733_v21 = vstv %s4765_s28  ;;  %v4872_v11 = vld [vmem:[#allocation2 + $0x10] sm:$0xff]  ;;  %s4950_s28 = sld [smem:[#allocation9 + $0x48]] }
  0xd8   :  { %v739_v52 = vstv %s4767_s20  ;;  %v4852_v47 = vadd.f32 %v639_v58, %v4707_v51  ;;  %v4855_v60 = vadd.f32 %v643_v35, %v4710_v24  ;;  %v4858_v56 = vadd.f32 %v647_v57, %v4713_v40  ;;  %v4866_v24 = vld [vmem:[#allocation2 + $0x8] sm:$0xff]  ;;  %s4962_s20 = sld [smem:[#allocation9 + $0x68]] }
  0xd9   :  { %v743_v33 = vstv %s4776_s6  ;;  %v667_v53 = vmax.f32 %v666_v50, 0.0  ;;  %v705_v3 = vstv %s4750_s8  ;;  %v709_v4 = vstv %s4756_s9  ;;  %s4892_s8 = sld [smem:[#allocation9 + $0x147]]  ;;  %s4999_s6 = sld [smem:[#allocation9 + $0xa8]] }
  0xda   :  { %v747_v5 = vstv %s4789_s29  ;;  %v713_v22 = vstv %s4758_s0  ;;  %v717_v62 = vstv %s4774_s12  ;;  %v737_v51 = vadd.f32 %v736_v59, %v733_v21  ;;  %s4894_s9 = sld [smem:[#allocation9 + $0x167]]  ;;  %s4914_s0 = sld [smem:[#allocation6 + $0x22]] }
  0xdb   :  { %v740_v40 = vmul.f32 %v4866_v24, %v739_v52  ;;  %v721_v34 = vstv %s4787_s7  ;;  %v725_v61 = vstv %s4794_s30  ;;  %v729_v63 = vstv %s4796_s16  ;;  %s4964_s12 = sld [smem:[#allocation9 + $0x88]]  ;;  %s5017_s16 = sld [smem:[#allocation6 + $0x24]] }
  0xdc   :  { %v744_v0 = vmul.f32 %v4872_v11, %v743_v33  ;;  %v748_v7 = vmul.f32 %v4875_v26, %v747_v5  ;;  %v752_v2 = vstv %s4801_s2  ;;  %v756_v9 = vstv %s4803_s4  ;;  %s5007_s7 = sld [smem:[#allocation9 + $0xc8]] }
  0xdd   :  { %v760_v32 = vstv %s4806_s5  ;;  %v670_v20 = vmul.f32 %v669_v19, %v667_v53  ;;  %v674_v14 = vmul.f32 %v673_v44, %v667_v53  ;;  %v764_v8 = vstv %s4808_s10  ;;  %s5009_s29 = sld [smem:[#allocation9 + $0xe8]] }
  0xde   :  { %v768_v6 = vstv %s4822_s18  ;;  %v741_v42 = vadd.f32 %v740_v40, %v737_v51  ;;  %v772_v54 = vstv %s4824_s1  ;;  %v776_v16 = vstv %s4835_s15  ;;  %s5015_s30 = sld [smem:[#allocation9 + $0x108]]  ;;  %s5050_s18 = sld [smem:[#allocation6 + $0x25]] }
  0xdf   :  { %v780_v12 = vstv %s4837_s11  ;;  %v678_v19 = vmul.f32 %v677_v1, %v667_v53  ;;  %v682_v44 = vmul.f32 %v681_v18, %v667_v53  ;;  %v784_v36 = vstv %s4847_s13  ;;  %s5024_s2 = sld [smem:[#allocation9 + $0x128]]  ;;  %s5052_s1 = sld [smem:[#allocation6 + $0x26]] }
  0xe0   :  { %v788_v58 = vstv %s4849_s14  ;;  %v686_v35 = vmul.f32 %v685_v10, %v667_v53  ;;  %v690_v57 = vmul.f32 %v689_v15, %v667_v53  ;;  %v694_v29 = vmul.f32 %v693_v13, %v667_v53  ;;  %s5026_s4 = sld [smem:[#allocation9 + $0x148]]  ;;  %s5059_s11 = sld [smem:[#allocation7 + $0x9]] }
  0xe1   :  { %v698_v48 = vmul.f32 %v697_v46, %v667_v53  ;;  %v4919_v1 = vadd.f32 %v670_v20, %v4779_v55  ;;  %v4922_v18 = vadd.f32 %v674_v14, %v4782_v17  ;;  %v702_v50 = vmul.f32 %v701_v45, %v667_v53  ;;  %s5036_s5 = sld [smem:[#allocation9 + $0x168]]  ;;  %s5063_s14 = sld [smem:[#allocation6 + $0x27]] }
  0xe2   :  { %v706_v59 = vmul.f32 %v705_v3, %v667_v53  ;;  %v710_v10 = vmul.f32 %v709_v4, %v667_v53  ;;  %v714_v15 = vmul.f32 %v713_v22, %v667_v53  ;;  %v718_v13 = vmul.f32 %v717_v62, %v667_v53  ;;  %s5038_s10 = sld [smem:[#allocation9 + $0x188]] }
  0xe3   :  { %v745_v46 = vadd.f32 %v744_v0, %v741_v42  ;;  %v4935_v55 = vadd.f32 %v678_v19, %v4785_v31  ;;  %v4938_v17 = vadd.f32 %v682_v44, %v4792_v30  ;;  %v722_v45 = vmul.f32 %v721_v34, %v667_v53  ;;  %s5057_s15 = sld [smem:[#allocation9 + $0x1a8]] }
  0xe4   :  { %v726_v21 = vmul.f32 %v725_v61, %v667_v53  ;;  %v4943_v52 = vadd.f32 %v686_v35, %v4799_v23  ;;  %v4946_v33 = vadd.f32 %v690_v57, %v4811_v27  ;;  %v730_v3 = vmul.f32 %v729_v63, %v667_v53  ;;  %s5061_s13 = sld [smem:[#allocation9 + $0x1c8]] }
  0xe5   :  { %v749_v4 = vadd.f32 %v748_v7, %v745_v46  ;;  %v4953_v31 = vadd.f32 %v694_v29, %v4814_v37  ;;  %v4956_v30 = vadd.f32 %v698_v48, %v4817_v38  ;;  %v4959_v23 = vadd.f32 %v702_v50, %v4820_v49 }
  0xe6   :  { %v818_v27 = vstv %s4887_s19  ;;  %v4967_v37 = vadd.f32 %v706_v59, %v4827_v28  ;;  %v4970_v38 = vadd.f32 %v710_v10, %v4830_v25  ;;  %v4973_v49 = vadd.f32 %v714_v15, %v4840_v43  ;;  %s5074_s19 = sld [smem:[#allocation9 + $0x1e8]] }
  0xe7   :  { %v4976_v53 = vadd.f32 %v718_v13, %v4843_v39  ;;  %v4979_v5 = vadd.f32 %v722_v45, %v4852_v47  ;;  %v4982_v22 = vadd.f32 %v726_v21, %v4855_v60  ;;  %v750_v28 = vmax.f32 %v749_v4, 0.0 }
  0xe8   :  { %v822_v62 = vstv %s4904_s24  ;;  %v4986_v25 = vadd.f32 %v730_v3, %v4858_v56  ;;  %v819_v43 = vmul.f32 %v4832_v41, %v818_v27  ;;  %v826_v51 = vstv %s4914_s0  ;;  %s5101_s24 = sld [smem:[#allocation9 + $0x69]] }
  0xe9   :  { %v830_v40 = vstv %s4916_s25  ;;  %v792_v39 = vstv %s4892_s8  ;;  %v796_v34 = vstv %s4894_s9  ;;  %v800_v47 = vstv %s4902_s23  ;;  %s5076_s8 = sld [smem:[#allocation9 + $0x9]] }
  0xea   :  { %v816_v61 = vstv %s4928_s27  ;;  %v804_v60 = vstv %s4926_s26  ;;  %v808_v63 = vstv %s4930_s22  ;;  %v812_v0 = vstv %s4932_s17  ;;  %s5090_s9 = sld [smem:[#allocation9 + $0x29]] }
  0xeb   :  { %v823_v7 = vmul.f32 %v4866_v24, %v822_v62  ;;  %v753_v56 = vmul.f32 %v752_v2, %v750_v28  ;;  %v757_v20 = vmul.f32 %v756_v9, %v750_v28  ;;  %v827_v14 = vmul.f32 %v4872_v11, %v826_v51  ;;  %s5092_s23 = sld [smem:[#allocation9 + $0x49]] }
  0xec   :  { %v831_v42 = vmul.f32 %v4875_v26, %v830_v40  ;;  %v761_v19 = vmul.f32 %v760_v32, %v750_v28  ;;  %v820_v44 = vadd.f32 %v819_v43, %v816_v61  ;;  %v835_v35 = vstv %s4940_s21  ;;  %s5103_s0 = sld [smem:[#allocation9 + $0x89]] }
  0xed   :  { %v839_v57 = vstv %s4948_s3  ;;  %v765_v2 = vmul.f32 %v764_v8, %v750_v28  ;;  %v843_v9 = vstv %s4950_s28  ;;  %v847_v29 = vstv %s4962_s20  ;;  %s5117_s25 = sld [smem:[#allocation9 + $0xa9]]  ;;  %s5165_s3 = sld [smem:[#allocation6 + $0x28]] }
  0xee   :  { %v851_v48 = vstv %s4964_s12  ;;  %v769_v32 = vmul.f32 %v768_v6, %v750_v28  ;;  %v773_v50 = vmul.f32 %v772_v54, %v750_v28  ;;  %v777_v59 = vmul.f32 %v776_v16, %v750_v28  ;;  %s5119_s26 = sld [smem:[#allocation9 + $0xc9]]  ;;  %s5179_s28 = sld [smem:[#allocation6 + $0x2a]] }
  0xef   :  { %v781_v10 = vmul.f32 %v780_v12, %v750_v28  ;;  %v5041_v8 = vadd.f32 %v753_v56, %v4919_v1  ;;  %v5044_v15 = vadd.f32 %v757_v20, %v4922_v18  ;;  %v785_v13 = vmul.f32 %v784_v36, %v750_v28  ;;  %s5145_s27 = sld [smem:[#allocation9 + $0xe9]]  ;;  %s5181_s20 = sld [smem:[#allocation6 + $0x2b]] }
  0xf0   :  { %v789_v6 = vmul.f32 %v788_v58, %v750_v28  ;;  %v5055_v54 = vadd.f32 %v761_v19, %v4935_v55  ;;  %v793_v16 = vmul.f32 %v792_v39, %v750_v28  ;;  %v797_v12 = vmul.f32 %v796_v34, %v750_v28  ;;  %s5147_s22 = sld [smem:[#allocation9 + $0x109]] }
  0xf1   :  { %v824_v46 = vadd.f32 %v823_v7, %v820_v44  ;;  %v801_v1 = vmul.f32 %v800_v47, %v750_v28  ;;  %v805_v18 = vmul.f32 %v804_v60, %v750_v28  ;;  %v809_v45 = vmul.f32 %v808_v63, %v750_v28  ;;  %s5153_s17 = sld [smem:[#allocation9 + $0x129]] }
  0xf2   :  { %v813_v36 = vmul.f32 %v812_v0, %v750_v28  ;;  %v5066_v58 = vadd.f32 %v765_v2, %v4938_v17  ;;  %v5069_v55 = vadd.f32 %v769_v32, %v4943_v52  ;;  %v5072_v21 = vadd.f32 %v773_v50, %v4946_v33  ;;  %s5163_s21 = sld [smem:[#allocation9 + $0x169]] }
  0xf3   :  { %v828_v3 = vadd.f32 %v827_v14, %v824_v46  ;;  %v5079_v4 = vadd.f32 %v777_v59, %v4953_v31  ;;  %v5082_v27 = vadd.f32 %v781_v10, %v4956_v30  ;;  %v5085_v17 = vadd.f32 %v785_v13, %v4959_v23  ;;  %s5183_s12 = sld [smem:[#allocation9 + $0x1a9]] }
  0xf4   :  { %v5088_v52 = vadd.f32 %v789_v6, %v4967_v37  ;;  %v5095_v33 = vadd.f32 %v793_v16, %v4970_v38  ;;  %v5098_v31 = vadd.f32 %v797_v12, %v4973_v49  ;;  %v901_v23 = vstv %s5017_s16  ;;  %s5190_s16 = sld [smem:[#allocation9 + $0x1e9]] }
  0xf5   :  { %v832_v30 = vadd.f32 %v831_v42, %v828_v3  ;;  %v5106_v37 = vadd.f32 %v801_v1, %v4976_v53  ;;  %v5109_v38 = vadd.f32 %v805_v18, %v4979_v5  ;;  %v5112_v49 = vadd.f32 %v809_v45, %v4982_v22 }
  0xf6   :  { %v5115_v28 = vadd.f32 %v813_v36, %v4986_v25  ;;  %v855_v53 = vstv %s4999_s6  ;;  %v859_v62 = vstv %s5007_s7  ;;  %v863_v5 = vstv %s5009_s29  ;;  %s5155_s6 = sld [smem:[#allocation9 + $0x149]] }
  0xf7   :  { %v867_v43 = vstv %s5015_s30  ;;  %v833_v51 = vmax.f32 %v832_v30, 0.0  ;;  %v902_v22 = vmul.f32 %v4832_v41, %v901_v23  ;;  %v905_v25 = vstv %s5050_s18  ;;  %s5169_s7 = sld [smem:[#allocation9 + $0x189]]  ;;  %s5221_s18 = sld [smem:[#allocation9 + $0x6a]] }
  0xf8   :  { %v909_v40 = vstv %s5052_s1  ;;  %v871_v39 = vstv %s5024_s2  ;;  %v875_v34 = vstv %s5026_s4  ;;  %v879_v47 = vstv %s5036_s5  ;;  %s5171_s29 = sld [smem:[#allocation6 + $0x29]]  ;;  %s5192_s2 = sld [smem:[#allocation7 + $0xa]] }
  0xf9   :  { %v899_v61 = vstv %s5059_s11  ;;  %v883_v60 = vstv %s5038_s10  ;;  %v887_v63 = vstv %s5057_s15  ;;  %v891_v0 = vstv %s5061_s13  ;;  %s5185_s30 = sld [smem:[#allocation9 + $0x1c9]]  ;;  %s5203_s4 = sld [smem:[#allocation9 + $0xa]] }
  0xfa   :  { %v913_v7 = vstv %s5063_s14  ;;  %v895_v56 = vstv %s5074_s19  ;;  %v906_v20 = vmul.f32 %v4866_v24, %v905_v25  ;;  %v910_v14 = vmul.f32 %v4872_v11, %v909_v40  ;;  %s5205_s5 = sld [smem:[#allocation9 + $0x2a]]  ;;  %s5271_s19 = sld [smem:[#allocation6 + $0x2c]] }
  0xfb   :  { %v918_v42 = vstv %s5076_s8  ;;  %v836_v19 = vmul.f32 %v835_v35, %v833_v51  ;;  %v840_v44 = vmul.f32 %v839_v57, %v833_v51  ;;  %v903_v2 = vadd.f32 %v902_v22, %v899_v61  ;;  %s5219_s10 = sld [smem:[#allocation9 + $0x4a]]  ;;  %s5295_s8 = sld [smem:[#allocation7 + $0xb]] }
  0xfc   :  { %v922_v32 = vstv %s5090_s9  ;;  %v914_v50 = vmul.f32 %v4875_v26, %v913_v7  ;;  %v926_v59 = vstv %s5092_s23  ;;  %v930_v10 = vstv %s5101_s24  ;;  %s5232_s1 = sld [smem:[#allocation9 + $0x8a]]  ;;  %s5297_s9 = sld [smem:[#allocation6 + $0x2d]] }
  0xfd   :  { %v934_v13 = vstv %s5103_s0  ;;  %v844_v35 = vmul.f32 %v843_v9, %v833_v51  ;;  %v848_v57 = vmul.f32 %v847_v29, %v833_v51  ;;  %v938_v6 = vstv %s5117_s25  ;;  %s5234_s15 = sld [smem:[#allocation9 + $0xaa]]  ;;  %s5306_s24 = sld [smem:[#allocation6 + $0x2e]] }
  0xfe   :  { %v942_v16 = vstv %s5119_s26  ;;  %v852_v12 = vmul.f32 %v851_v48, %v833_v51  ;;  %v856_v46 = vmul.f32 %v855_v53, %v833_v51  ;;  %v860_v1 = vmul.f32 %v859_v62, %v833_v51  ;;  %s5246_s11 = sld [smem:[#allocation9 + $0xca]]  ;;  %s5319_s25 = sld [smem:[#allocation6 + $0x2f]] }
  0xff   :  { %v864_v18 = vmul.f32 %v863_v5, %v833_v51  ;;  %v5174_v45 = vadd.f32 %v836_v19, %v5041_v8  ;;  %v5177_v9 = vadd.f32 %v840_v44, %v5044_v15  ;;  %v868_v29 = vmul.f32 %v867_v43, %v833_v51  ;;  %s5248_s13 = sld [smem:[#allocation9 + $0xea]] }
 0x100   :  { %v872_v36 = vmul.f32 %v871_v39, %v833_v51  ;;  %v876_v48 = vmul.f32 %v875_v34, %v833_v51  ;;  %v880_v3 = vmul.f32 %v879_v47, %v833_v51  ;;  %v884_v30 = vmul.f32 %v883_v60, %v833_v51  ;;  %s5254_s14 = sld [smem:[#allocation9 + $0x10a]] }
 0x101   :  { %v907_v23 = vadd.f32 %v906_v20, %v903_v2  ;;  %v5188_v8 = vadd.f32 %v844_v35, %v5055_v54  ;;  %v888_v53 = vmul.f32 %v887_v63, %v833_v51  ;;  %v892_v15 = vmul.f32 %v891_v0, %v833_v51  ;;  %s5304_s23 = sld [smem:[#allocation9 + $0x18a]] }
 0x102   :  { %v896_v62 = vmul.f32 %v895_v56, %v833_v51  ;;  %v5195_v5 = vadd.f32 %v848_v57, %v5066_v58  ;;  %v5198_v43 = vadd.f32 %v852_v12, %v5069_v55  ;;  %v5201_v22 = vadd.f32 %v856_v46, %v5072_v21  ;;  %s5317_s0 = sld [smem:[#allocation9 + $0x1aa]] }
 0x103   :  { %v911_v25 = vadd.f32 %v910_v14, %v907_v23  ;;  %v5208_v54 = vadd.f32 %v860_v1, %v5079_v4  ;;  %v5211_v51 = vadd.f32 %v864_v18, %v5082_v27  ;;  %v5214_v58 = vadd.f32 %v868_v29, %v5085_v17  ;;  %s5324_s26 = sld [smem:[#allocation9 + $0x1ca]] }
 0x104   :  { %v5217_v55 = vadd.f32 %v872_v36, %v5088_v52  ;;  %v5224_v21 = vadd.f32 %v876_v48, %v5095_v33  ;;  %v5227_v4 = vadd.f32 %v880_v3, %v5098_v31  ;;  %v5230_v27 = vadd.f32 %v884_v30, %v5106_v37 }
 0x105   :  { %v915_v17 = vadd.f32 %v914_v50, %v911_v25  ;;  %v5237_v52 = vadd.f32 %v888_v53, %v5109_v38  ;;  %v5240_v33 = vadd.f32 %v892_v15, %v5112_v49  ;;  %v5243_v31 = vadd.f32 %v896_v62, %v5115_v28 }
 0x106   :  { %v984_v37 = vstv %s5165_s3  ;;  %v946_v40 = vstv %s5145_s27  ;;  %v950_v39 = vstv %s5147_s22  ;;  %v954_v38 = vstv %s5153_s17  ;;  %s5280_s27 = sld [smem:[#allocation9 + $0x12a]]  ;;  %s5333_s3 = sld [smem:[#allocation9 + $0x2b]] }
 0x107   :  { %v988_v34 = vstv %s5171_s29  ;;  %v916_v49 = vmax.f32 %v915_v17, 0.0  ;;  %v958_v47 = vstv %s5155_s6  ;;  %v992_v28 = vstv %s5179_s28  ;;  %s5286_s22 = sld [smem:[#allocation9 + $0x14a]]  ;;  %s5338_s29 = sld [smem:[#allocation9 + $0x6b]] }
 0x108   :  { %v996_v61 = vstv %s5181_s20  ;;  %v962_v60 = vstv %s5163_s21  ;;  %v966_v63 = vstv %s5169_s7  ;;  %v970_v0 = vstv %s5183_s12  ;;  %s5288_s17 = sld [smem:[#allocation9 + $0x16a]]  ;;  %s5331_s21 = sld [smem:[#allocation9 + $0xb]] }
 0x109   :  { %v985_v7 = vmul.f32 %v4832_v41, %v984_v37  ;;  %v974_v56 = vstv %s5185_s30  ;;  %v978_v20 = vstv %s5190_s16  ;;  %v982_v14 = vstv %s5192_s2  ;;  %s5326_s6 = sld [smem:[#allocation9 + $0x1ea]]  ;;  %s5336_s7 = sld [smem:[#allocation9 + $0x4b]] }
 0x10a   :  { %v989_v19 = vmul.f32 %v4866_v24, %v988_v34  ;;  %v993_v44 = vmul.f32 %v4872_v11, %v992_v28  ;;  %v997_v2 = vmul.f32 %v4875_v26, %v996_v61  ;;  %v1001_v50 = vstv %s5203_s4  ;;  %s5352_s28 = sld [smem:[#allocation9 + $0x8b]] }
 0x10b   :  { %v1005_v35 = vstv %s5205_s5  ;;  %v919_v57 = vmul.f32 %v918_v42, %v916_v49  ;;  %v923_v12 = vmul.f32 %v922_v32, %v916_v49  ;;  %v927_v46 = vmul.f32 %v926_v59, %v916_v49  ;;  %s5354_s20 = sld [smem:[#allocation9 + $0xab]]  ;;  %s5426_s5 = sld [smem:[#allocation6 + $0x31]] }
 0x10c   :  { %v1009_v1 = vstv %s5219_s10  ;;  %v931_v18 = vmul.f32 %v930_v10, %v916_v49  ;;  %v986_v29 = vadd.f32 %v985_v7, %v982_v14  ;;  %v1013_v36 = vstv %s5221_s18  ;;  %s5363_s12 = sld [smem:[#allocation9 + $0xcb]] }
 0x10d   :  { %v1017_v48 = vstv %s5232_s1  ;;  %v935_v42 = vmul.f32 %v934_v13, %v916_v49  ;;  %v1021_v32 = vstv %s5234_s15  ;;  %v1025_v3 = vstv %s5246_s11  ;;  %s5365_s30 = sld [smem:[#allocation9 + $0xeb]]  ;;  %s5450_s1 = sld [smem:[#allocation7 + $0xc]] }
 0x10e   :  { %v1029_v30 = vstv %s5248_s13  ;;  %v939_v59 = vmul.f32 %v938_v6, %v916_v49  ;;  %v943_v10 = vmul.f32 %v942_v16, %v916_v49  ;;  %v947_v23 = vmul.f32 %v946_v40, %v916_v49  ;;  %s5375_s16 = sld [smem:[#allocation9 + $0x10b]]  ;;  %s5462_s13 = sld [smem:[#allocation9 + $0xc]] }
 0x10f   :  { %v1033_v53 = vstv %s5254_s14  ;;  %v5309_v15 = vadd.f32 %v919_v57, %v5174_v45  ;;  %v5312_v13 = vadd.f32 %v923_v12, %v5177_v9  ;;  %v5315_v62 = vadd.f32 %v927_v46, %v5188_v8  ;;  %s5377_s2 = sld [smem:[#allocation9 + $0x12b]]  ;;  %s5470_s14 = sld [smem:[#allocation9 + $0x2c]] }
 0x110   :  { %v951_v25 = vmul.f32 %v950_v39, %v916_v49  ;;  %v5322_v6 = vadd.f32 %v931_v18, %v5195_v5  ;;  %v955_v16 = vmul.f32 %v954_v38, %v916_v49  ;;  %v959_v17 = vmul.f32 %v958_v47, %v916_v49  ;;  %s5424_s4 = sld [smem:[#allocation9 + $0x18b]] }
 0x111   :  { %v990_v37 = vadd.f32 %v989_v19, %v986_v29  ;;  %v5329_v45 = vadd.f32 %v935_v42, %v5198_v43  ;;  %v963_v9 = vmul.f32 %v962_v60, %v916_v49  ;;  %v967_v8 = vmul.f32 %v966_v63, %v916_v49  ;;  %s5438_s10 = sld [smem:[#allocation6 + $0x33]] }
 0x112   :  { %v971_v40 = vmul.f32 %v970_v0, %v916_v49  ;;  %v975_v39 = vmul.f32 %v974_v56, %v916_v49  ;;  %v979_v5 = vmul.f32 %v978_v20, %v916_v49  ;;  %v1067_v38 = vstv %s5271_s19  ;;  %s5409_s19 = sld [smem:[#allocation6 + $0x30]]  ;;  %s5448_s18 = sld [smem:[#allocation9 + $0x1ab]] }
 0x113   :  { %v994_v34 = vadd.f32 %v993_v44, %v990_v37  ;;  %v5341_v43 = vadd.f32 %v939_v59, %v5201_v22  ;;  %v5344_v47 = vadd.f32 %v943_v10, %v5208_v54  ;;  %v5347_v28 = vadd.f32 %v947_v23, %v5211_v51  ;;  %s5452_s15 = sld [smem:[#allocation9 + $0x1cb]] }
 0x114   :  { %v5350_v61 = vadd.f32 %v951_v25, %v5214_v58  ;;  %v5357_v49 = vadd.f32 %v955_v16, %v5217_v55  ;;  %v5360_v22 = vadd.f32 %v959_v17, %v5224_v21  ;;  %v1068_v51 = vmul.f32 %v4832_v41, %v1067_v38  ;;  %s5454_s11 = sld [smem:[#allocation9 + $0x1eb]] }
 0x115   :  { %v998_v54 = vadd.f32 %v997_v2, %v994_v34  ;;  %v5368_v58 = vadd.f32 %v963_v9, %v5227_v4  ;;  %v5371_v55 = vadd.f32 %v967_v8, %v5230_v27  ;;  %v1065_v21 = vstv %s5295_s8  ;;  %s5472_s8 = sld [smem:[#allocation9 + $0x4c]] }
 0x116   :  { %v1071_v60 = vstv %s5297_s9  ;;  %v5380_v63 = vadd.f32 %v971_v40, %v5237_v52  ;;  %v5383_v0 = vadd.f32 %v975_v39, %v5240_v33  ;;  %v5386_v4 = vadd.f32 %v979_v5, %v5243_v31  ;;  %s5484_s9 = sld [smem:[#allocation9 + $0x6c]] }
 0x117   :  { %v1075_v27 = vstv %s5306_s24  ;;  %v999_v7 = vmax.f32 %v998_v54, 0.0  ;;  %v1037_v56 = vstv %s5280_s27  ;;  %v1041_v20 = vstv %s5286_s22  ;;  %s5414_s27 = sld [smem:[#allocation9 + $0x14b]]  ;;  %s5521_s24 = sld [smem:[#allocation9 + $0xac]] }
 0x118   :  { %v1079_v14 = vstv %s5319_s25  ;;  %v1045_v52 = vstv %s5288_s17  ;;  %v1049_v19 = vstv %s5304_s23  ;;  %v1069_v44 = vadd.f32 %v1068_v51, %v1065_v21  ;;  %s5416_s22 = sld [smem:[#allocation9 + $0x16b]]  ;;  %s5436_s17 = sld [smem:[#allocation6 + $0x32]] }
 0x119   :  { %v1072_v33 = vmul.f32 %v4866_v24, %v1071_v60  ;;  %v1053_v31 = vstv %s5317_s0  ;;  %v1057_v2 = vstv %s5324_s26  ;;  %v1061_v57 = vstv %s5326_s6  ;;  %s5486_s23 = sld [smem:[#allocation9 + $0x8c]] }
 0x11a   :  { %v1076_v12 = vmul.f32 %v4872_v11, %v1075_v27  ;;  %v1080_v46 = vmul.f32 %v4875_v26, %v1079_v14  ;;  %v1084_v18 = vstv %s5331_s21  ;;  %v1088_v29 = vstv %s5333_s3  ;;  %s5529_s0 = sld [smem:[#allocation9 + $0xcc]] }
 0x11b   :  { %v1092_v42 = vstv %s5336_s7  ;;  %v1002_v59 = vmul.f32 %v1001_v50, %v999_v7  ;;  %v1006_v10 = vmul.f32 %v1005_v35, %v999_v7  ;;  %v1096_v23 = vstv %s5338_s29  ;;  %s5531_s25 = sld [smem:[#allocation9 + $0xec]] }
 0x11c   :  { %v1100_v25 = vstv %s5352_s28  ;;  %v1073_v16 = vadd.f32 %v1072_v33, %v1069_v44  ;;  %v1104_v17 = vstv %s5354_s20  ;;  %v1108_v37 = vstv %s5363_s12  ;;  %s5537_s26 = sld [smem:[#allocation9 + $0x10c]]  ;;  %s5572_s28 = sld [smem:[#allocation6 + $0x35]] }
 0x11d   :  { %v1112_v9 = vstv %s5365_s30  ;;  %v1010_v50 = vmul.f32 %v1009_v1, %v999_v7  ;;  %v1014_v35 = vmul.f32 %v1013_v36, %v999_v7  ;;  %v1116_v8 = vstv %s5375_s16  ;;  %s5539_s6 = sld [smem:[#allocation6 + $0x34]]  ;;  %s5574_s20 = sld [smem:[#allocation6 + $0x36]] }
 0x11e   :  { %v1120_v40 = vstv %s5377_s2  ;;  %v1018_v39 = vmul.f32 %v1017_v48, %v999_v7  ;;  %v1022_v5 = vmul.f32 %v1021_v32, %v999_v7  ;;  %v1026_v34 = vmul.f32 %v1025_v3, %v999_v7  ;;  %s5546_s21 = sld [smem:[#allocation9 + $0x12c]]  ;;  %s5581_s30 = sld [smem:[#allocation7 + $0xd]] }
 0x11f   :  { %v1030_v38 = vmul.f32 %v1029_v30, %v999_v7  ;;  %v5441_v1 = vadd.f32 %v1002_v59, %v5309_v15  ;;  %v5444_v36 = vadd.f32 %v1006_v10, %v5312_v13  ;;  %v1034_v54 = vmul.f32 %v1033_v53, %v999_v7  ;;  %s5548_s3 = sld [smem:[#allocation9 + $0x14c]]  ;;  %s5585_s2 = sld [smem:[#allocation6 + $0x37]] }
 0x120   :  { %v1038_v51 = vmul.f32 %v1037_v56, %v999_v7  ;;  %v1042_v48 = vmul.f32 %v1041_v20, %v999_v7  ;;  %v1046_v32 = vmul.f32 %v1045_v52, %v999_v7  ;;  %v1050_v3 = vmul.f32 %v1049_v19, %v999_v7  ;;  %s5558_s7 = sld [smem:[#allocation9 + $0x16c]] }
 0x121   :  { %v1077_v30 = vadd.f32 %v1076_v12, %v1073_v16  ;;  %v5457_v15 = vadd.f32 %v1010_v50, %v5315_v62  ;;  %v5460_v13 = vadd.f32 %v1014_v35, %v5322_v6  ;;  %v1054_v53 = vmul.f32 %v1053_v31, %v999_v7  ;;  %s5560_s29 = sld [smem:[#allocation9 + $0x18c]] }
 0x122   :  { %v1058_v21 = vmul.f32 %v1057_v2, %v999_v7  ;;  %v5465_v60 = vadd.f32 %v1018_v39, %v5329_v45  ;;  %v5468_v27 = vadd.f32 %v1022_v5, %v5341_v43  ;;  %v1062_v56 = vmul.f32 %v1061_v57, %v999_v7  ;;  %s5579_s12 = sld [smem:[#allocation9 + $0x1ac]] }
 0x123   :  { %v1081_v20 = vadd.f32 %v1080_v46, %v1077_v30  ;;  %v5475_v62 = vadd.f32 %v1026_v34, %v5344_v47  ;;  %v5478_v6 = vadd.f32 %v1030_v38, %v5347_v28  ;;  %v5481_v45 = vadd.f32 %v1034_v54, %v5350_v61  ;;  %s5583_s16 = sld [smem:[#allocation9 + $0x1cc]] }
 0x124   :  { %v1150_v43 = vstv %s5409_s19  ;;  %v5489_v47 = vadd.f32 %v1038_v51, %v5357_v49  ;;  %v5492_v28 = vadd.f32 %v1042_v48, %v5360_v22  ;;  %v5495_v61 = vadd.f32 %v1046_v32, %v5368_v58  ;;  %s5596_s19 = sld [smem:[#allocation9 + $0x1ec]] }
 0x125   :  { %v5498_v7 = vadd.f32 %v1050_v3, %v5371_v55  ;;  %v5501_v14 = vadd.f32 %v1054_v53, %v5380_v63  ;;  %v5504_v52 = vadd.f32 %v1058_v21, %v5383_v0  ;;  %v1082_v49 = vmax.f32 %v1081_v20, 0.0 }
 0x126   :  { %v1154_v19 = vstv %s5426_s5  ;;  %v5508_v22 = vadd.f32 %v1062_v56, %v5386_v4  ;;  %v1151_v58 = vmul.f32 %v4832_v41, %v1150_v43  ;;  %v1158_v44 = vstv %s5436_s17  ;;  %s5623_s5 = sld [smem:[#allocation9 + $0x6d]] }
 0x127   :  { %v1162_v33 = vstv %s5438_s10  ;;  %v1124_v55 = vstv %s5414_s27  ;;  %v1128_v31 = vstv %s5416_s22  ;;  %v1132_v63 = vstv %s5424_s4  ;;  %s5598_s27 = sld [smem:[#allocation9 + $0xd]] }
 0x128   :  { %v1148_v2 = vstv %s5450_s1  ;;  %v1136_v0 = vstv %s5448_s18  ;;  %v1140_v57 = vstv %s5452_s15  ;;  %v1144_v12 = vstv %s5454_s11  ;;  %s5612_s22 = sld [smem:[#allocation9 + $0x2d]] }
 0x129   :  { %v1155_v46 = vmul.f32 %v4866_v24, %v1154_v19  ;;  %v1085_v4 = vmul.f32 %v1084_v18, %v1082_v49  ;;  %v1089_v59 = vmul.f32 %v1088_v29, %v1082_v49  ;;  %v1159_v10 = vmul.f32 %v4872_v11, %v1158_v44  ;;  %s5614_s4 = sld [smem:[#allocation9 + $0x4d]] }
 0x12a   :  { %v1163_v16 = vmul.f32 %v4875_v26, %v1162_v33  ;;  %v1093_v50 = vmul.f32 %v1092_v42, %v1082_v49  ;;  %v1152_v35 = vadd.f32 %v1151_v58, %v1148_v2  ;;  %v1167_v39 = vstv %s5462_s13  ;;  %s5625_s17 = sld [smem:[#allocation9 + $0x8d]] }
 0x12b   :  { %v1171_v5 = vstv %s5470_s14  ;;  %v1097_v18 = vmul.f32 %v1096_v23, %v1082_v49  ;;  %v1175_v29 = vstv %s5472_s8  ;;  %v1179_v34 = vstv %s5484_s9  ;;  %s5639_s10 = sld [smem:[#allocation9 + $0xad]]  ;;  %s5687_s14 = sld [smem:[#allocation6 + $0x38]] }
 0x12c   :  { %v1183_v38 = vstv %s5486_s23  ;;  %v1101_v42 = vmul.f32 %v1100_v25, %v1082_v49  ;;  %v1105_v54 = vmul.f32 %v1104_v17, %v1082_v49  ;;  %v1109_v51 = vmul.f32 %v1108_v37, %v1082_v49  ;;  %s5641_s18 = sld [smem:[#allocation9 + $0xcd]]  ;;  %s5701_s8 = sld [smem:[#allocation6 + $0x3a]] }
 0x12d   :  { %v1113_v48 = vmul.f32 %v1112_v9, %v1082_v49  ;;  %v5563_v23 = vadd.f32 %v1085_v4, %v5441_v1  ;;  %v5566_v32 = vadd.f32 %v1089_v59, %v5444_v36  ;;  %v1117_v3 = vmul.f32 %v1116_v8, %v1082_v49  ;;  %s5667_s1 = sld [smem:[#allocation9 + $0xed]]  ;;  %s5703_s9 = sld [smem:[#allocation6 + $0x3b]] }
 0x12e   :  { %v1121_v25 = vmul.f32 %v1120_v40, %v1082_v49  ;;  %v5577_v17 = vadd.f32 %v1093_v50, %v5457_v15  ;;  %v1125_v37 = vmul.f32 %v1124_v55, %v1082_v49  ;;  %v1129_v9 = vmul.f32 %v1128_v31, %v1082_v49  ;;  %s5669_s15 = sld [smem:[#allocation9 + $0x10d]] }
 0x12f   :  { %v1156_v30 = vadd.f32 %v1155_v46, %v1152_v35  ;;  %v1133_v1 = vmul.f32 %v1132_v63, %v1082_v49  ;;  %v1137_v36 = vmul.f32 %v1136_v0, %v1082_v49  ;;  %v1141_v53 = vmul.f32 %v1140_v57, %v1082_v49  ;;  %s5675_s11 = sld [smem:[#allocation9 + $0x12d]] }
 0x130   :  { %v1145_v8 = vmul.f32 %v1144_v12, %v1082_v49  ;;  %v5588_v40 = vadd.f32 %v1097_v18, %v5460_v13  ;;  %v5591_v15 = vadd.f32 %v1101_v42, %v5465_v60  ;;  %v5594_v21 = vadd.f32 %v1105_v54, %v5468_v27  ;;  %s5685_s13 = sld [smem:[#allocation9 + $0x16d]] }
 0x131   :  { %v1160_v56 = vadd.f32 %v1159_v10, %v1156_v30  ;;  %v5601_v20 = vadd.f32 %v1109_v51, %v5475_v62  ;;  %v5604_v43 = vadd.f32 %v1113_v48, %v5478_v6  ;;  %v5607_v13 = vadd.f32 %v1117_v3, %v5481_v45  ;;  %s5705_s23 = sld [smem:[#allocation9 + $0x1ad]] }
 0x132   :  { %v5610_v60 = vadd.f32 %v1121_v25, %v5489_v47  ;;  %v5617_v27 = vadd.f32 %v1125_v37, %v5492_v28  ;;  %v5620_v62 = vadd.f32 %v1129_v9, %v5495_v61  ;;  %v1233_v45 = vstv %s5539_s6  ;;  %s5712_s6 = sld [smem:[#allocation9 + $0x1ed]] }
 0x133   :  { %v1164_v6 = vadd.f32 %v1163_v16, %v1160_v56  ;;  %v5628_v47 = vadd.f32 %v1133_v1, %v5498_v7  ;;  %v5631_v28 = vadd.f32 %v1137_v36, %v5501_v14  ;;  %v5634_v61 = vadd.f32 %v1141_v53, %v5504_v52 }
 0x134   :  { %v5637_v49 = vadd.f32 %v1145_v8, %v5508_v22  ;;  %v1187_v7 = vstv %s5521_s24  ;;  %v1191_v19 = vstv %s5529_s0  ;;  %v1195_v14 = vstv %s5531_s25  ;;  %s5677_s24 = sld [smem:[#allocation9 + $0x14d]]  ;;  %s5693_s25 = sld [smem:[#allocation6 + $0x39]] }
 0x135   :  { %v1199_v58 = vstv %s5537_s26  ;;  %v1165_v44 = vmax.f32 %v1164_v6, 0.0  ;;  %v1234_v52 = vmul.f32 %v4832_v41, %v1233_v45  ;;  %v1237_v22 = vstv %s5572_s28  ;;  %s5691_s0 = sld [smem:[#allocation9 + $0x18d]]  ;;  %s5743_s28 = sld [smem:[#allocation9 + $0x6e]] }
 0x136   :  { %v1241_v33 = vstv %s5574_s20  ;;  %v1203_v55 = vstv %s5546_s21  ;;  %v1207_v31 = vstv %s5548_s3  ;;  %v1211_v63 = vstv %s5558_s7  ;;  %s5707_s26 = sld [smem:[#allocation9 + $0x1cd]]  ;;  %s5714_s21 = sld [smem:[#allocation7 + $0xe]] }
 0x137   :  { %v1231_v2 = vstv %s5581_s30  ;;  %v1215_v0 = vstv %s5560_s29  ;;  %v1219_v57 = vstv %s5579_s12  ;;  %v1223_v12 = vstv %s5583_s16  ;;  %s5725_s3 = sld [smem:[#allocation9 + $0xe]] }
 0x138   :  { %v1245_v46 = vstv %s5585_s2  ;;  %v1227_v4 = vstv %s5596_s19  ;;  %v1238_v59 = vmul.f32 %v4866_v24, %v1237_v22  ;;  %v1242_v41 = vmul.f32 %v4872_v11, %v1241_v33  ;;  %s5727_s7 = sld [smem:[#allocation9 + $0x2e]]  ;;  %s5803_s19 = sld [smem:[#allocation6 + $0x3c]] }
 0x139   :  { %v1250_v10 = vstv %s5598_s27  ;;  %v1168_v16 = vmul.f32 %v1167_v39, %v1165_v44  ;;  %v1172_v50 = vmul.f32 %v1171_v5, %v1165_v44  ;;  %v1235_v35 = vadd.f32 %v1234_v52, %v1231_v2  ;;  %s5741_s29 = sld [smem:[#allocation9 + $0x4e]]  ;;  %v5786_v2 = vld [vmem:[#allocation2] sm:$0xff] }
 0x13a   :  { %v1254_v18 = vstv %s5612_s22  ;;  %v1246_v42 = vmul.f32 %v4875_v26, %v1245_v46  ;;  %v1258_v24 = vstv %s5614_s4  ;;  %v1262_v54 = vstv %s5623_s5  ;;  %s5754_s20 = sld [smem:[#allocation9 + $0x8e]]  ;;  %s5832_s22 = sld [smem:[#allocation7 + $0xf]] }
 0x13b   :  { %v1266_v51 = vstv %s5625_s17  ;;  %v1176_v11 = vmul.f32 %v1175_v29, %v1165_v44  ;;  %v1180_v39 = vmul.f32 %v1179_v34, %v1165_v44  ;;  %v1270_v5 = vstv %s5639_s10  ;;  %s5756_s12 = sld [smem:[#allocation9 + $0xae]]  ;;  %s5834_s4 = sld [smem:[#allocation6 + $0x3d]] }
 0x13c   :  { %v1274_v48 = vstv %s5641_s18  ;;  %v1184_v3 = vmul.f32 %v1183_v38, %v1165_v44  ;;  %v1188_v26 = vmul.f32 %v1187_v7, %v1165_v44  ;;  %v1192_v25 = vmul.f32 %v1191_v19, %v1165_v44  ;;  %s5768_s30 = sld [smem:[#allocation9 + $0xce]]  ;;  %s5860_s18 = sld [smem:[#allocation6 + $0x3f]] }
 0x13d   :  { %v1196_v37 = vmul.f32 %v1195_v14, %v1165_v44  ;;  %v5696_v9 = vadd.f32 %v1168_v16, %v5563_v23  ;;  %v5699_v29 = vadd.f32 %v1172_v50, %v5566_v32  ;;  %v1200_v34 = vmul.f32 %v1199_v58, %v1165_v44  ;;  %s5770_s16 = sld [smem:[#allocation9 + $0xee]]  ;;  %v5798_v50 = vld [vmem:[#allocation2 + $0x18] sm:$0xff] }
 0x13e   :  { %v1204_v30 = vmul.f32 %v1203_v55, %v1165_v44  ;;  %v1208_v38 = vmul.f32 %v1207_v31, %v1165_v44  ;;  %v1212_v1 = vmul.f32 %v1211_v63, %v1165_v44  ;;  %v1216_v36 = vmul.f32 %v1215_v0, %v1165_v44  ;;  %s5776_s2 = sld [smem:[#allocation9 + $0x10e]] }
 0x13f   :  { %v1239_v53 = vadd.f32 %v1238_v59, %v1235_v35  ;;  %v5710_v23 = vadd.f32 %v1176_v11, %v5577_v17  ;;  %v1220_v8 = vmul.f32 %v1219_v57, %v1165_v44  ;;  %v1224_v32 = vmul.f32 %v1223_v12, %v1165_v44  ;;  %s5822_s27 = sld [smem:[#allocation9 + $0x14e]] }
 0x140   :  { %v1228_v56 = vmul.f32 %v1227_v4, %v1165_v44  ;;  %v5717_v6 = vadd.f32 %v1180_v39, %v5588_v40  ;;  %v5720_v45 = vadd.f32 %v1184_v3, %v5591_v15  ;;  %v5723_v7 = vadd.f32 %v1188_v26, %v5594_v21  ;;  %v5792_v4 = vld [vmem:[#allocation2 + $0x8] sm:$0xff]  ;;  %s5844_s5 = sld [smem:[#allocation9 + $0x18e]] }
 0x141   :  { %v1243_v19 = vadd.f32 %v1242_v41, %v1239_v53  ;;  %v5730_v17 = vadd.f32 %v1192_v25, %v5601_v20  ;;  %v5733_v14 = vadd.f32 %v1196_v37, %v5604_v43  ;;  %v5736_v40 = vadd.f32 %v1200_v34, %v5607_v13  ;;  %v5795_v41 = vld [vmem:[#allocation2 + $0x10] sm:$0xff]  ;;  %s5846_s17 = sld [smem:[#allocation6 + $0x3e]] }
 0x142   :  { %v5739_v15 = vadd.f32 %v1204_v30, %v5610_v60  ;;  %v5746_v21 = vadd.f32 %v1208_v38, %v5617_v27  ;;  %v5749_v20 = vadd.f32 %v1212_v1, %v5620_v62  ;;  %v5752_v43 = vadd.f32 %v1216_v36, %v5628_v47  ;;  %s5858_s10 = sld [smem:[#allocation9 + $0x1ae]] }
 0x143   :  { %v1247_v13 = vadd.f32 %v1246_v42, %v1243_v19  ;;  %v5759_v60 = vadd.f32 %v1220_v8, %v5631_v28  ;;  %v5762_v27 = vadd.f32 %v1224_v32, %v5634_v61  ;;  %v5765_v62 = vadd.f32 %v1228_v56, %v5637_v49 }
 0x144   :  { %v1316_v47 = vstv %s5687_s14  ;;  %v1278_v58 = vstv %s5667_s1  ;;  %v1282_v44 = vstv %s5669_s15  ;;  %v1286_v28 = vstv %s5675_s11  ;;  %s5815_s1 = sld [smem:[#allocation9 + $0x12e]]  ;;  %s5879_s14 = sld [smem:[#allocation9 + $0x2f]] }
 0x145   :  { %v1320_v52 = vstv %s5693_s25  ;;  %v5778_v61 = vmax.f32 %v1247_v13, 0.0  ;;  %v1290_v22 = vstv %s5677_s24  ;;  %v1324_v33 = vstv %s5701_s8  ;;  %s5824_s15 = sld [smem:[#allocation9 + $0x16e]]  ;;  %s5886_s25 = sld [smem:[#allocation9 + $0x6f]] }
 0x146   :  { %v1328_v49 = vstv %s5703_s9  ;;  %v1294_v55 = vstv %s5685_s13  ;;  %v1298_v31 = vstv %s5691_s0  ;;  %v1302_v63 = vstv %s5705_s23  ;;  %s5867_s11 = sld [smem:[#allocation9 + $0x1ce]]  ;;  %s5877_s13 = sld [smem:[#allocation9 + $0xf]] }
 0x147   :  { %v1317_v0 = vmul.f32 %v5786_v2, %v1316_v47  ;;  %v1306_v57 = vstv %s5707_s26  ;;  %v1310_v12 = vstv %s5712_s6  ;;  %v1314_v46 = vstv %s5714_s21  ;;  %s5869_s24 = sld [smem:[#allocation9 + $0x1ee]]  ;;  %s5884_s0 = sld [smem:[#allocation9 + $0x4f]] }
 0x148   :  { %v1321_v59 = vmul.f32 %v5792_v4, %v1320_v52  ;;  %v1325_v16 = vmul.f32 %v5795_v41, %v1324_v33  ;;  %v1329_v35 = vmul.f32 %v5798_v50, %v1328_v49  ;;  %v1333_v42 = vstv %s5725_s3  ;;  %s5900_s8 = sld [smem:[#allocation9 + $0x8f]] }
 0x149   :  { %v1337_v11 = vstv %s5727_s7  ;;  %v1251_v39 = vmul.f32 %v1250_v10, %v5778_v61  ;;  %v1255_v3 = vmul.f32 %v1254_v18, %v5778_v61  ;;  %v1259_v26 = vmul.f32 %v1258_v24, %v5778_v61  ;;  %s5902_s9 = sld [smem:[#allocation9 + $0xaf]]  ;;  %s5974_s7 = sld [smem:[#allocation6 + $0x41]] }
 0x14a   :  { %v1341_v25 = vstv %s5741_s29  ;;  %v1263_v37 = vmul.f32 %v1262_v54, %v5778_v61  ;;  %v1318_v34 = vadd.f32 %v1317_v0, %v1314_v46  ;;  %v1345_v30 = vstv %s5743_s28  ;;  %s5911_s23 = sld [smem:[#allocation9 + $0xcf]]  ;;  %s5986_s29 = sld [smem:[#allocation6 + $0x43]] }
 0x14b   :  { %v1349_v38 = vstv %s5754_s20  ;;  %v1267_v10 = vmul.f32 %v1266_v51, %v5778_v61  ;;  %v1353_v18 = vstv %s5756_s12  ;;  %v1357_v24 = vstv %s5768_s30  ;;  %s5913_s26 = sld [smem:[#allocation9 + $0xef]]  ;;  %s5998_s20 = sld [smem:[#allocation7 + $0x10]] }
 0x14c   :  { %v1361_v1 = vstv %s5770_s16  ;;  %v1271_v54 = vmul.f32 %v1270_v5, %v5778_v61  ;;  %v1275_v36 = vmul.f32 %v1274_v48, %v5778_v61  ;;  %v1279_v53 = vmul.f32 %v1278_v58, %v5778_v61  ;;  %s5923_s6 = sld [smem:[#allocation9 + $0x10f]]  ;;  %s6010_s16 = sld [smem:[#allocation9 + $0x10]] }
 0x14d   :  { %v1365_v8 = vstv %s5776_s2  ;;  %v5849_v51 = vadd.f32 %v1251_v39, %v5696_v9  ;;  %v5852_v32 = vadd.f32 %v1255_v3, %v5699_v29  ;;  %v5855_v56 = vadd.f32 %v1259_v26, %v5710_v23  ;;  %s5925_s21 = sld [smem:[#allocation9 + $0x12f]]  ;;  %s6018_s2 = sld [smem:[#allocation9 + $0x30]] }
 0x14e   :  { %v1283_v5 = vmul.f32 %v1282_v44, %v5778_v61  ;;  %v5863_v48 = vadd.f32 %v1263_v37, %v5717_v6  ;;  %v1287_v19 = vmul.f32 %v1286_v28, %v5778_v61  ;;  %v1291_v9 = vmul.f32 %v1290_v22, %v5778_v61  ;;  %s5972_s3 = sld [smem:[#allocation9 + $0x18f]] }
 0x14f   :  { %v1322_v13 = vadd.f32 %v1321_v59, %v1318_v34  ;;  %v5872_v29 = vadd.f32 %v1267_v10, %v5720_v45  ;;  %v1295_v23 = vmul.f32 %v1294_v55, %v5778_v61  ;;  %v1299_v47 = vmul.f32 %v1298_v31, %v5778_v61  ;;  %s5996_s28 = sld [smem:[#allocation9 + $0x1af]] }
 0x150   :  { %v1303_v58 = vmul.f32 %v1302_v63, %v5778_v61  ;;  %v1307_v6 = vmul.f32 %v1306_v57, %v5778_v61  ;;  %v1311_v44 = vmul.f32 %v1310_v12, %v5778_v61  ;;  %v1399_v52 = vstv %s5803_s19  ;;  %s5957_s19 = sld [smem:[#allocation6 + $0x40]]  ;;  %s6000_s12 = sld [smem:[#allocation9 + $0x1cf]] }
 0x151   :  { %v1326_v28 = vadd.f32 %v1325_v16, %v1322_v13  ;;  %v5889_v45 = vadd.f32 %v1271_v54, %v5723_v7  ;;  %v5892_v22 = vadd.f32 %v1275_v36, %v5730_v17  ;;  %v5895_v33 = vadd.f32 %v1279_v53, %v5733_v14  ;;  %s6002_s30 = sld [smem:[#allocation9 + $0x1ef]] }
 0x152   :  { %v5898_v49 = vadd.f32 %v1283_v5, %v5736_v40  ;;  %v5905_v61 = vadd.f32 %v1287_v19, %v5739_v15  ;;  %v5908_v7 = vadd.f32 %v1291_v9, %v5746_v21  ;;  %v1400_v14 = vmul.f32 %v5786_v2, %v1399_v52 }
 0x153   :  { %v1330_v17 = vadd.f32 %v1329_v35, %v1326_v28  ;;  %v5916_v40 = vadd.f32 %v1295_v23, %v5749_v20  ;;  %v5919_v15 = vadd.f32 %v1299_v47, %v5752_v43  ;;  %v1397_v21 = vstv %s5832_s22  ;;  %s6020_s22 = sld [smem:[#allocation9 + $0x50]] }
 0x154   :  { %v1403_v55 = vstv %s5834_s4  ;;  %v5928_v31 = vadd.f32 %v1303_v58, %v5759_v60  ;;  %v5931_v63 = vadd.f32 %v1307_v6, %v5762_v27  ;;  %v5934_v20 = vadd.f32 %v1311_v44, %v5765_v62  ;;  %s6032_s4 = sld [smem:[#allocation9 + $0x70]] }
 0x155   :  { %v1407_v43 = vstv %s5846_s17  ;;  %v1331_v0 = vmax.f32 %v1330_v17, 0.0  ;;  %v1369_v57 = vstv %s5815_s1  ;;  %v1373_v12 = vstv %s5822_s27  ;;  %s5962_s1 = sld [smem:[#allocation9 + $0x14f]]  ;;  %s6069_s17 = sld [smem:[#allocation9 + $0xb0]] }
 0x156   :  { %v1411_v46 = vstv %s5860_s18  ;;  %v1377_v60 = vstv %s5824_s15  ;;  %v1381_v59 = vstv %s5844_s5  ;;  %v1401_v16 = vadd.f32 %v1400_v14, %v1397_v21  ;;  %s5964_s27 = sld [smem:[#allocation9 + $0x16f]]  ;;  %s5984_s15 = sld [smem:[#allocation6 + $0x42]] }
 0x157   :  { %v1404_v27 = vmul.f32 %v5792_v4, %v1403_v55  ;;  %v1385_v62 = vstv %s5858_s10  ;;  %v1389_v35 = vstv %s5867_s11  ;;  %v1393_v39 = vstv %s5869_s24  ;;  %s6034_s5 = sld [smem:[#allocation9 + $0x90]]  ;;  %s6087_s24 = sld [smem:[#allocation6 + $0x44]] }
 0x158   :  { %v1408_v3 = vmul.f32 %v5795_v41, %v1407_v43  ;;  %v1412_v26 = vmul.f32 %v5798_v50, %v1411_v46  ;;  %v1416_v37 = vstv %s5877_s13  ;;  %v1420_v34 = vstv %s5879_s14  ;;  %s6077_s10 = sld [smem:[#allocation9 + $0xd0]] }
 0x159   :  { %v1424_v10 = vstv %s5884_s0  ;;  %v1334_v54 = vmul.f32 %v1333_v42, %v1331_v0  ;;  %v1338_v36 = vmul.f32 %v1337_v11, %v1331_v0  ;;  %v1428_v53 = vstv %s5886_s25  ;;  %s6079_s18 = sld [smem:[#allocation9 + $0xf0]] }
 0x15a   :  { %v1432_v5 = vstv %s5900_s8  ;;  %v1405_v19 = vadd.f32 %v1404_v27, %v1401_v16  ;;  %v1436_v9 = vstv %s5902_s9  ;;  %v1440_v13 = vstv %s5911_s23  ;;  %s6085_s11 = sld [smem:[#allocation9 + $0x110]]  ;;  %s6120_s8 = sld [smem:[#allocation6 + $0x45]] }
 0x15b   :  { %v1444_v23 = vstv %s5913_s26  ;;  %v1342_v42 = vmul.f32 %v1341_v25, %v1331_v0  ;;  %v1346_v11 = vmul.f32 %v1345_v30, %v1331_v0  ;;  %v1448_v47 = vstv %s5923_s6  ;;  %s6094_s13 = sld [smem:[#allocation9 + $0x130]]  ;;  %s6122_s9 = sld [smem:[#allocation6 + $0x46]] }
 0x15c   :  { %v1452_v58 = vstv %s5925_s21  ;;  %v1350_v6 = vmul.f32 %v1349_v38, %v1331_v0  ;;  %v1354_v44 = vmul.f32 %v1353_v18, %v1331_v0  ;;  %v1358_v28 = vmul.f32 %v1357_v24, %v1331_v0  ;;  %s6096_s14 = sld [smem:[#allocation9 + $0x150]]  ;;  %s6129_s26 = sld [smem:[#allocation7 + $0x11]] }
 0x15d   :  { %v1362_v52 = vmul.f32 %v1361_v1, %v1331_v0  ;;  %v5989_v25 = vadd.f32 %v1334_v54, %v5849_v51  ;;  %v5992_v30 = vadd.f32 %v1338_v36, %v5852_v32  ;;  %v1366_v17 = vmul.f32 %v1365_v8, %v1331_v0  ;;  %s6106_s0 = sld [smem:[#allocation9 + $0x170]]  ;;  %s6133_s21 = sld [smem:[#allocation6 + $0x47]] }
 0x15e   :  { %v1370_v14 = vmul.f32 %v1369_v57, %v1331_v0  ;;  %v1374_v38 = vmul.f32 %v1373_v12, %v1331_v0  ;;  %v1378_v18 = vmul.f32 %v1377_v60, %v1331_v0  ;;  %v1382_v24 = vmul.f32 %v1381_v59, %v1331_v0  ;;  %s6108_s25 = sld [smem:[#allocation9 + $0x190]] }
 0x15f   :  { %v1409_v1 = vadd.f32 %v1408_v3, %v1405_v19  ;;  %v6005_v51 = vadd.f32 %v1342_v42, %v5855_v56  ;;  %v6008_v32 = vadd.f32 %v1346_v11, %v5863_v48  ;;  %v1386_v8 = vmul.f32 %v1385_v62, %v1331_v0  ;;  %s6127_s23 = sld [smem:[#allocation9 + $0x1b0]] }
 0x160   :  { %v1390_v21 = vmul.f32 %v1389_v35, %v1331_v0  ;;  %v6013_v55 = vadd.f32 %v1350_v6, %v5872_v29  ;;  %v6016_v43 = vadd.f32 %v1354_v44, %v5889_v45  ;;  %v1394_v57 = vmul.f32 %v1393_v39, %v1331_v0  ;;  %s6131_s6 = sld [smem:[#allocation9 + $0x1d0]] }
 0x161   :  { %v1413_v12 = vadd.f32 %v1412_v26, %v1409_v1  ;;  %v6023_v56 = vadd.f32 %v1358_v28, %v5892_v22  ;;  %v6026_v48 = vadd.f32 %v1362_v52, %v5895_v33  ;;  %v6029_v29 = vadd.f32 %v1366_v17, %v5898_v49 }
 0x162   :  { %v1482_v45 = vstv %s5957_s19  ;;  %v6037_v22 = vadd.f32 %v1370_v14, %v5905_v61  ;;  %v6040_v33 = vadd.f32 %v1374_v38, %v5908_v7  ;;  %v6043_v49 = vadd.f32 %v1378_v18, %v5916_v40  ;;  %s6144_s19 = sld [smem:[#allocation9 + $0x1f0]] }
 0x163   :  { %v6046_v0 = vadd.f32 %v1382_v24, %v5919_v15  ;;  %v6049_v46 = vadd.f32 %v1386_v8, %v5928_v31  ;;  %v6052_v60 = vadd.f32 %v1390_v21, %v5931_v63  ;;  %v1414_v61 = vmax.f32 %v1413_v12, 0.0 }
 0x164   :  { %v1486_v59 = vstv %s5974_s7  ;;  %v6056_v7 = vadd.f32 %v1394_v57, %v5934_v20  ;;  %v1483_v40 = vmul.f32 %v5786_v2, %v1482_v45  ;;  %v1490_v16 = vstv %s5984_s15  ;;  %s6171_s7 = sld [smem:[#allocation9 + $0x71]] }
 0x165   :  { %v1494_v27 = vstv %s5986_s29  ;;  %v1456_v15 = vstv %s5962_s1  ;;  %v1460_v62 = vstv %s5964_s27  ;;  %v1464_v31 = vstv %s5972_s3  ;;  %s6146_s1 = sld [smem:[#allocation9 + $0x11]] }
 0x166   :  { %v1480_v35 = vstv %s5998_s20  ;;  %v1468_v63 = vstv %s5996_s28  ;;  %v1472_v39 = vstv %s6000_s12  ;;  %v1476_v3 = vstv %s6002_s30  ;;  %s6160_s27 = sld [smem:[#allocation9 + $0x31]] }
 0x167   :  { %v1487_v26 = vmul.f32 %v5792_v4, %v1486_v59  ;;  %v1417_v20 = vmul.f32 %v1416_v37, %v1414_v61  ;;  %v1421_v54 = vmul.f32 %v1420_v34, %v1414_v61  ;;  %v1491_v36 = vmul.f32 %v5795_v41, %v1490_v16  ;;  %s6162_s3 = sld [smem:[#allocation9 + $0x51]] }
 0x168   :  { %v1495_v19 = vmul.f32 %v5798_v50, %v1494_v27  ;;  %v1425_v42 = vmul.f32 %v1424_v10, %v1414_v61  ;;  %v1484_v11 = vadd.f32 %v1483_v40, %v1480_v35  ;;  %v1499_v6 = vstv %s6010_s16  ;;  %s6173_s15 = sld [smem:[#allocation9 + $0x91]] }
 0x169   :  { %v1503_v44 = vstv %s6018_s2  ;;  %v1429_v37 = vmul.f32 %v1428_v53, %v1414_v61  ;;  %v1507_v34 = vstv %s6020_s22  ;;  %v1511_v28 = vstv %s6032_s4  ;;  %s6187_s29 = sld [smem:[#allocation9 + $0xb1]]  ;;  %s6235_s2 = sld [smem:[#allocation6 + $0x48]] }
 0x16a   :  { %v1515_v52 = vstv %s6034_s5  ;;  %v1433_v10 = vmul.f32 %v1432_v5, %v1414_v61  ;;  %v1437_v17 = vmul.f32 %v1436_v9, %v1414_v61  ;;  %v1441_v14 = vmul.f32 %v1440_v13, %v1414_v61  ;;  %s6189_s28 = sld [smem:[#allocation9 + $0xd1]]  ;;  %s6249_s22 = sld [smem:[#allocation6 + $0x4a]] }
 0x16b   :  { %v1445_v38 = vmul.f32 %v1444_v23, %v1414_v61  ;;  %v6111_v53 = vadd.f32 %v1417_v20, %v5989_v25  ;;  %v6114_v18 = vadd.f32 %v1421_v54, %v5992_v30  ;;  %v1449_v24 = vmul.f32 %v1448_v47, %v1414_v61  ;;  %s6215_s20 = sld [smem:[#allocation9 + $0xf1]]  ;;  %s6251_s4 = sld [smem:[#allocation6 + $0x4b]] }
 0x16c   :  { %v1453_v5 = vmul.f32 %v1452_v58, %v1414_v61  ;;  %v6125_v9 = vadd.f32 %v1425_v42, %v6005_v51  ;;  %v1457_v13 = vmul.f32 %v1456_v15, %v1414_v61  ;;  %v1461_v23 = vmul.f32 %v1460_v62, %v1414_v61  ;;  %s6217_s12 = sld [smem:[#allocation9 + $0x111]] }
 0x16d   :  { %v1488_v1 = vadd.f32 %v1487_v26, %v1484_v11  ;;  %v1465_v25 = vmul.f32 %v1464_v31, %v1414_v61  ;;  %v1469_v30 = vmul.f32 %v1468_v63, %v1414_v61  ;;  %v1473_v8 = vmul.f32 %v1472_v39, %v1414_v61  ;;  %s6223_s30 = sld [smem:[#allocation9 + $0x131]] }
 0x16e   :  { %v1477_v47 = vmul.f32 %v1476_v3, %v1414_v61  ;;  %v6136_v58 = vadd.f32 %v1429_v37, %v6008_v32  ;;  %v6139_v51 = vadd.f32 %v1433_v10, %v6013_v55  ;;  %v6142_v21 = vadd.f32 %v1437_v17, %v6016_v43  ;;  %s6233_s16 = sld [smem:[#allocation9 + $0x171]] }
 0x16f   :  { %v1492_v57 = vadd.f32 %v1491_v36, %v1488_v1  ;;  %v6149_v12 = vadd.f32 %v1441_v14, %v6023_v56  ;;  %v6152_v45 = vadd.f32 %v1445_v38, %v6026_v48  ;;  %v6155_v32 = vadd.f32 %v1449_v24, %v6029_v29  ;;  %s6253_s5 = sld [smem:[#allocation9 + $0x1b1]] }
 0x170   :  { %v6158_v55 = vadd.f32 %v1453_v5, %v6037_v22  ;;  %v6165_v43 = vadd.f32 %v1457_v13, %v6040_v33  ;;  %v6168_v56 = vadd.f32 %v1461_v23, %v6043_v49  ;;  %v1565_v29 = vstv %s6087_s24  ;;  %s6260_s24 = sld [smem:[#allocation9 + $0x1f1]] }
 0x171   :  { %v1496_v48 = vadd.f32 %v1495_v19, %v1492_v57  ;;  %v6176_v22 = vadd.f32 %v1465_v25, %v6046_v0  ;;  %v6179_v33 = vadd.f32 %v1469_v30, %v6049_v46  ;;  %v6182_v49 = vadd.f32 %v1473_v8, %v6052_v60 }
 0x172   :  { %v6185_v61 = vadd.f32 %v1477_v47, %v6056_v7  ;;  %v1519_v0 = vstv %s6069_s17  ;;  %v1523_v59 = vstv %s6077_s10  ;;  %v1527_v46 = vstv %s6079_s18  ;;  %s6225_s17 = sld [smem:[#allocation9 + $0x151]] }
 0x173   :  { %v1531_v40 = vstv %s6085_s11  ;;  %v1497_v16 = vmax.f32 %v1496_v48, 0.0  ;;  %v1566_v60 = vmul.f32 %v5786_v2, %v1565_v29  ;;  %v1569_v7 = vstv %s6120_s8  ;;  %s6239_s10 = sld [smem:[#allocation9 + $0x191]]  ;;  %s6291_s8 = sld [smem:[#allocation9 + $0x72]] }
 0x174   :  { %v1573_v27 = vstv %s6122_s9  ;;  %v1535_v15 = vstv %s6094_s13  ;;  %v1539_v62 = vstv %s6096_s14  ;;  %v1543_v31 = vstv %s6106_s0  ;;  %s6241_s18 = sld [smem:[#allocation6 + $0x49]]  ;;  %s6262_s13 = sld [smem:[#allocation7 + $0x12]] }
 0x175   :  { %v1563_v35 = vstv %s6129_s26  ;;  %v1547_v63 = vstv %s6108_s25  ;;  %v1551_v39 = vstv %s6127_s23  ;;  %v1555_v3 = vstv %s6131_s6  ;;  %s6255_s11 = sld [smem:[#allocation9 + $0x1d1]]  ;;  %s6273_s14 = sld [smem:[#allocation9 + $0x12]] }
 0x176   :  { %v1577_v26 = vstv %s6133_s21  ;;  %v1559_v20 = vstv %s6144_s19  ;;  %v1570_v54 = vmul.f32 %v5792_v4, %v1569_v7  ;;  %v1574_v36 = vmul.f32 %v5795_v41, %v1573_v27  ;;  %s6275_s0 = sld [smem:[#allocation9 + $0x32]]  ;;  %s6341_s19 = sld [smem:[#allocation6 + $0x4c]] }
 0x177   :  { %v1582_v19 = vstv %s6146_s1  ;;  %v1500_v42 = vmul.f32 %v1499_v6, %v1497_v16  ;;  %v1504_v11 = vmul.f32 %v1503_v44, %v1497_v16  ;;  %v1567_v37 = vadd.f32 %v1566_v60, %v1563_v35  ;;  %s6289_s25 = sld [smem:[#allocation9 + $0x52]]  ;;  %s6365_s1 = sld [smem:[#allocation7 + $0x13]] }
 0x178   :  { %v1586_v10 = vstv %s6160_s27  ;;  %v1578_v17 = vmul.f32 %v5798_v50, %v1577_v26  ;;  %v1590_v14 = vstv %s6162_s3  ;;  %v1594_v38 = vstv %s6171_s7  ;;  %s6302_s9 = sld [smem:[#allocation9 + $0x92]]  ;;  %s6367_s27 = sld [smem:[#allocation6 + $0x4d]] }
 0x179   :  { %v1598_v24 = vstv %s6173_s15  ;;  %v1508_v6 = vmul.f32 %v1507_v34, %v1497_v16  ;;  %v1512_v44 = vmul.f32 %v1511_v28, %v1497_v16  ;;  %v1602_v5 = vstv %s6187_s29  ;;  %s6304_s23 = sld [smem:[#allocation9 + $0xb2]]  ;;  %s6376_s7 = sld [smem:[#allocation6 + $0x4e]] }
 0x17a   :  { %v1606_v13 = vstv %s6189_s28  ;;  %v1516_v23 = vmul.f32 %v1515_v52, %v1497_v16  ;;  %v1520_v1 = vmul.f32 %v1519_v0, %v1497_v16  ;;  %v1524_v25 = vmul.f32 %v1523_v59, %v1497_v16  ;;  %s6316_s26 = sld [smem:[#allocation9 + $0xd2]]  ;;  %s6389_s29 = sld [smem:[#allocation6 + $0x4f]] }
 0x17b   :  { %v1528_v30 = vmul.f32 %v1527_v46, %v1497_v16  ;;  %v6244_v8 = vadd.f32 %v1500_v42, %v6111_v53  ;;  %v6247_v34 = vadd.f32 %v1504_v11, %v6114_v18  ;;  %v1532_v28 = vmul.f32 %v1531_v40, %v1497_v16  ;;  %s6318_s6 = sld [smem:[#allocation9 + $0xf2]] }
 0x17c   :  { %v1536_v47 = vmul.f32 %v1535_v15, %v1497_v16  ;;  %v1540_v52 = vmul.f32 %v1539_v62, %v1497_v16  ;;  %v1544_v57 = vmul.f32 %v1543_v31, %v1497_v16  ;;  %v1548_v48 = vmul.f32 %v1547_v63, %v1497_v16  ;;  %s6324_s21 = sld [smem:[#allocation9 + $0x112]] }
 0x17d   :  { %v1571_v29 = vadd.f32 %v1570_v54, %v1567_v37  ;;  %v6258_v53 = vadd.f32 %v1508_v6, %v6125_v9  ;;  %v1552_v0 = vmul.f32 %v1551_v39, %v1497_v16  ;;  %v1556_v18 = vmul.f32 %v1555_v3, %v1497_v16  ;;  %s6374_s3 = sld [smem:[#allocation9 + $0x192]] }
 0x17e   :  { %v1560_v59 = vmul.f32 %v1559_v20, %v1497_v16  ;;  %v6265_v46 = vadd.f32 %v1512_v44, %v6136_v58  ;;  %v6268_v40 = vadd.f32 %v1516_v23, %v6139_v51  ;;  %v6271_v60 = vadd.f32 %v1520_v1, %v6142_v21  ;;  %s6387_s15 = sld [smem:[#allocation9 + $0x1b2]] }
 0x17f   :  { %v1575_v7 = vadd.f32 %v1574_v36, %v1571_v29  ;;  %v6278_v9 = vadd.f32 %v1524_v25, %v6149_v12  ;;  %v6281_v16 = vadd.f32 %v1528_v30, %v6152_v45  ;;  %v6284_v58 = vadd.f32 %v1532_v28, %v6155_v32  ;;  %s6394_s28 = sld [smem:[#allocation9 + $0x1d2]] }
 0x180   :  { %v6287_v51 = vadd.f32 %v1536_v47, %v6158_v55  ;;  %v6294_v21 = vadd.f32 %v1540_v52, %v6165_v43  ;;  %v6297_v12 = vadd.f32 %v1544_v57, %v6168_v56  ;;  %v6300_v45 = vadd.f32 %v1548_v48, %v6176_v22 }
 0x181   :  { %v1579_v32 = vadd.f32 %v1578_v17, %v1575_v7  ;;  %v6307_v55 = vadd.f32 %v1552_v0, %v6179_v33  ;;  %v6310_v43 = vadd.f32 %v1556_v18, %v6182_v49  ;;  %v6313_v56 = vadd.f32 %v1560_v59, %v6185_v61 }
 0x182   :  { %v1648_v22 = vstv %s6235_s2  ;;  %v1610_v27 = vstv %s6215_s20  ;;  %v1614_v15 = vstv %s6217_s12  ;;  %v1618_v33 = vstv %s6223_s30  ;;  %s6350_s20 = sld [smem:[#allocation9 + $0x132]]  ;;  %s6403_s2 = sld [smem:[#allocation9 + $0x33]] }
 0x183   :  { %v1652_v62 = vstv %s6241_s18  ;;  %v1580_v49 = vmax.f32 %v1579_v32, 0.0  ;;  %v1622_v31 = vstv %s6225_s17  ;;  %v1656_v61 = vstv %s6249_s22  ;;  %s6356_s12 = sld [smem:[#allocation9 + $0x152]]  ;;  %s6408_s18 = sld [smem:[#allocation9 + $0x73]] }
 0x184   :  { %v1660_v35 = vstv %s6251_s4  ;;  %v1626_v63 = vstv %s6233_s16  ;;  %v1630_v39 = vstv %s6239_s10  ;;  %v1634_v3 = vstv %s6253_s5  ;;  %s6358_s30 = sld [smem:[#allocation9 + $0x172]]  ;;  %s6401_s16 = sld [smem:[#allocation9 + $0x13]] }
 0x185   :  { %v1649_v26 = vmul.f32 %v5786_v2, %v1648_v22  ;;  %v1638_v20 = vstv %s6255_s11  ;;  %v1642_v54 = vstv %s6260_s24  ;;  %v1646_v36 = vstv %s6262_s13  ;;  %s6396_s17 = sld [smem:[#allocation9 + $0x1f2]]  ;;  %s6406_s10 = sld [smem:[#allocation9 + $0x53]] }
 0x186   :  { %v1653_v42 = vmul.f32 %v5792_v4, %v1652_v62  ;;  %v1657_v11 = vmul.f32 %v5795_v41, %v1656_v61  ;;  %v1661_v37 = vmul.f32 %v5798_v50, %v1660_v35  ;;  %v1665_v17 = vstv %s6273_s14  ;;  %s6422_s22 = sld [smem:[#allocation9 + $0x93]] }
 0x187   :  { %v1669_v6 = vstv %s6275_s0  ;;  %v1583_v44 = vmul.f32 %v1582_v19, %v1580_v49  ;;  %v1587_v23 = vmul.f32 %v1586_v10, %v1580_v49  ;;  %v1591_v1 = vmul.f32 %v1590_v14, %v1580_v49  ;;  %s6424_s4 = sld [smem:[#allocation9 + $0xb3]]  ;;  %s6496_s0 = sld [smem:[#allocation6 + $0x51]] }
 0x188   :  { %v1673_v25 = vstv %s6289_s25  ;;  %v1595_v30 = vmul.f32 %v1594_v38, %v1580_v49  ;;  %v1650_v28 = vadd.f32 %v1649_v26, %v1646_v36  ;;  %v1677_v47 = vstv %s6291_s8  ;;  %s6433_s5 = sld [smem:[#allocation9 + $0xd3]] }
 0x189   :  { %v1681_v52 = vstv %s6302_s9  ;;  %v1599_v19 = vmul.f32 %v1598_v24, %v1580_v49  ;;  %v1685_v10 = vstv %s6304_s23  ;;  %v1689_v57 = vstv %s6316_s26  ;;  %s6435_s11 = sld [smem:[#allocation9 + $0xf3]]  ;;  %s6520_s9 = sld [smem:[#allocation7 + $0x14]] }
 0x18a   :  { %v1693_v48 = vstv %s6318_s6  ;;  %v1603_v14 = vmul.f32 %v1602_v5, %v1580_v49  ;;  %v1607_v38 = vmul.f32 %v1606_v13, %v1580_v49  ;;  %v1611_v29 = vmul.f32 %v1610_v27, %v1580_v49  ;;  %s6445_s24 = sld [smem:[#allocation9 + $0x113]]  ;;  %s6532_s6 = sld [smem:[#allocation9 + $0x14]] }
 0x18b   :  { %v1697_v0 = vstv %s6324_s21  ;;  %v6379_v18 = vadd.f32 %v1583_v44, %v6244_v8  ;;  %v6382_v24 = vadd.f32 %v1587_v23, %v6247_v34  ;;  %v6385_v59 = vadd.f32 %v1591_v1, %v6258_v53  ;;  %s6447_s13 = sld [smem:[#allocation9 + $0x133]]  ;;  %s6540_s21 = sld [smem:[#allocation9 + $0x34]] }
 0x18c   :  { %v1615_v7 = vmul.f32 %v1614_v15, %v1580_v49  ;;  %v6392_v5 = vadd.f32 %v1595_v30, %v6265_v46  ;;  %v1619_v13 = vmul.f32 %v1618_v33, %v1580_v49  ;;  %v1623_v32 = vmul.f32 %v1622_v31, %v1580_v49  ;;  %s6494_s14 = sld [smem:[#allocation9 + $0x193]] }
 0x18d   :  { %v1654_v22 = vadd.f32 %v1653_v42, %v1650_v28  ;;  %v6399_v8 = vadd.f32 %v1599_v19, %v6268_v40  ;;  %v1627_v34 = vmul.f32 %v1626_v63, %v1580_v49  ;;  %v1631_v53 = vmul.f32 %v1630_v39, %v1580_v49  ;;  %s6508_s25 = sld [smem:[#allocation6 + $0x53]] }
 0x18e   :  { %v1635_v27 = vmul.f32 %v1634_v3, %v1580_v49  ;;  %v1639_v15 = vmul.f32 %v1638_v20, %v1580_v49  ;;  %v1643_v46 = vmul.f32 %v1642_v54, %v1580_v49  ;;  %v1731_v33 = vstv %s6341_s19  ;;  %s6479_s19 = sld [smem:[#allocation6 + $0x50]]  ;;  %s6518_s8 = sld [smem:[#allocation9 + $0x1b3]] }
 0x18f   :  { %v1658_v62 = vadd.f32 %v1657_v11, %v1654_v22  ;;  %v6411_v40 = vadd.f32 %v1603_v14, %v6271_v60  ;;  %v6414_v31 = vadd.f32 %v1607_v38, %v6278_v9  ;;  %v6417_v61 = vadd.f32 %v1611_v29, %v6281_v16  ;;  %s6522_s23 = sld [smem:[#allocation9 + $0x1d3]] }
 0x190   :  { %v6420_v35 = vadd.f32 %v1615_v7, %v6284_v58  ;;  %v6427_v49 = vadd.f32 %v1619_v13, %v6287_v51  ;;  %v6430_v60 = vadd.f32 %v1623_v32, %v6294_v21  ;;  %v1732_v16 = vmul.f32 %v5786_v2, %v1731_v33  ;;  %s6524_s26 = sld [smem:[#allocation9 + $0x1f3]] }
 0x191   :  { %v1662_v9 = vadd.f32 %v1661_v37, %v1658_v62  ;;  %v6438_v58 = vadd.f32 %v1627_v34, %v6297_v12  ;;  %v6441_v51 = vadd.f32 %v1631_v53, %v6300_v45  ;;  %v1729_v21 = vstv %s6365_s1  ;;  %s6542_s1 = sld [smem:[#allocation9 + $0x54]] }
 0x192   :  { %v1735_v63 = vstv %s6367_s27  ;;  %v6450_v39 = vadd.f32 %v1635_v27, %v6307_v55  ;;  %v6453_v3 = vadd.f32 %v1639_v15, %v6310_v43  ;;  %v6456_v12 = vadd.f32 %v1643_v46, %v6313_v56  ;;  %s6554_s27 = sld [smem:[#allocation9 + $0x74]] }
 0x193   :  { %v1739_v45 = vstv %s6376_s7  ;;  %v1663_v26 = vmax.f32 %v1662_v9, 0.0  ;;  %v1701_v20 = vstv %s6350_s20  ;;  %v1705_v54 = vstv %s6356_s12  ;;  %s6484_s20 = sld [smem:[#allocation9 + $0x153]]  ;;  %s6591_s7 = sld [smem:[#allocation9 + $0xb4]] }
 0x194   :  { %v1743_v36 = vstv %s6389_s29  ;;  %v1709_v55 = vstv %s6358_s30  ;;  %v1713_v42 = vstv %s6374_s3  ;;  %v1733_v11 = vadd.f32 %v1732_v16, %v1729_v21  ;;  %s6486_s12 = sld [smem:[#allocation9 + $0x173]]  ;;  %s6506_s30 = sld [smem:[#allocation6 + $0x52]] }
 0x195   :  { %v1736_v43 = vmul.f32 %v5792_v4, %v1735_v63  ;;  %v1717_v56 = vstv %s6387_s15  ;;  %v1721_v37 = vstv %s6394_s28  ;;  %v1725_v44 = vstv %s6396_s17  ;;  %s6556_s3 = sld [smem:[#allocation9 + $0x94]] }
 0x196   :  { %v1740_v23 = vmul.f32 %v5795_v41, %v1739_v45  ;;  %v1744_v1 = vmul.f32 %v5798_v50, %v1743_v36  ;;  %v1748_v30 = vstv %s6401_s16  ;;  %v1752_v28 = vstv %s6403_s2  ;;  %s6599_s15 = sld [smem:[#allocation9 + $0xd4]] }
 0x197   :  { %v1756_v19 = vstv %s6406_s10  ;;  %v1666_v14 = vmul.f32 %v1665_v17, %v1663_v26  ;;  %v1670_v38 = vmul.f32 %v1669_v6, %v1663_v26  ;;  %v1760_v29 = vstv %s6408_s18  ;;  %s6601_s29 = sld [smem:[#allocation9 + $0xf4]] }
 0x198   :  { %v1764_v7 = vstv %s6422_s22  ;;  %v1737_v13 = vadd.f32 %v1736_v43, %v1733_v11  ;;  %v1768_v32 = vstv %s6424_s4  ;;  %v1772_v22 = vstv %s6433_s5  ;;  %s6607_s28 = sld [smem:[#allocation9 + $0x114]]  ;;  %s6642_s22 = sld [smem:[#allocation6 + $0x55]] }
 0x199   :  { %v1776_v34 = vstv %s6435_s11  ;;  %v1674_v17 = vmul.f32 %v1673_v25, %v1663_v26  ;;  %v1678_v6 = vmul.f32 %v1677_v47, %v1663_v26  ;;  %v1780_v53 = vstv %s6445_s24  ;;  %s6609_s17 = sld [smem:[#allocation6 + $0x54]]  ;;  %s6644_s4 = sld [smem:[#allocation6 + $0x56]] }
 0x19a   :  { %v1784_v27 = vstv %s6447_s13  ;;  %v1682_v15 = vmul.f32 %v1681_v52, %v1663_v26  ;;  %v1686_v46 = vmul.f32 %v1685_v10, %v1663_v26  ;;  %v1690_v62 = vmul.f32 %v1689_v57, %v1663_v26  ;;  %s6616_s16 = sld [smem:[#allocation9 + $0x134]]  ;;  %s6651_s11 = sld [smem:[#allocation7 + $0x15]] }
 0x19b   :  { %v1694_v33 = vmul.f32 %v1693_v48, %v1663_v26  ;;  %v6511_v25 = vadd.f32 %v1666_v14, %v6379_v18  ;;  %v6514_v47 = vadd.f32 %v1670_v38, %v6382_v24  ;;  %v1698_v9 = vmul.f32 %v1697_v0, %v1663_v26  ;;  %s6618_s2 = sld [smem:[#allocation9 + $0x154]]  ;;  %s6655_s13 = sld [smem:[#allocation6 + $0x57]] }
 0x19c   :  { %v1702_v16 = vmul.f32 %v1701_v20, %v1663_v26  ;;  %v1706_v52 = vmul.f32 %v1705_v54, %v1663_v26  ;;  %v1710_v10 = vmul.f32 %v1709_v55, %v1663_v26  ;;  %v1714_v57 = vmul.f32 %v1713_v42, %v1663_v26  ;;  %s6628_s10 = sld [smem:[#allocation9 + $0x174]] }
 0x19d   :  { %v1741_v48 = vadd.f32 %v1740_v23, %v1737_v13  ;;  %v6527_v18 = vadd.f32 %v1674_v17, %v6385_v59  ;;  %v6530_v24 = vadd.f32 %v1678_v6, %v6392_v5  ;;  %v1718_v0 = vmul.f32 %v1717_v56, %v1663_v26  ;;  %s6630_s18 = sld [smem:[#allocation9 + $0x194]] }
 0x19e   :  { %v1722_v21 = vmul.f32 %v1721_v37, %v1663_v26  ;;  %v6535_v63 = vadd.f32 %v1682_v15, %v6399_v8  ;;  %v6538_v45 = vadd.f32 %v1686_v46, %v6411_v40  ;;  %v1726_v20 = vmul.f32 %v1725_v44, %v1663_v26  ;;  %s6649_s5 = sld [smem:[#allocation9 + $0x1b4]] }
 0x19f   :  { %v1745_v54 = vadd.f32 %v1744_v1, %v1741_v48  ;;  %v6545_v59 = vadd.f32 %v1690_v62, %v6414_v31  ;;  %v6548_v5 = vadd.f32 %v1694_v33, %v6417_v61  ;;  %v6551_v8 = vadd.f32 %v1698_v9, %v6420_v35  ;;  %s6653_s24 = sld [smem:[#allocation9 + $0x1d4]] }
 0x1a0   :  { %v1814_v40 = vstv %s6479_s19  ;;  %v6559_v31 = vadd.f32 %v1702_v16, %v6427_v49  ;;  %v6562_v61 = vadd.f32 %v1706_v52, %v6430_v60  ;;  %v6565_v35 = vadd.f32 %v1710_v10, %v6438_v58  ;;  %s6666_s19 = sld [smem:[#allocation9 + $0x1f4]] }
 0x1a1   :  { %v6568_v26 = vadd.f32 %v1714_v57, %v6441_v51  ;;  %v6571_v36 = vadd.f32 %v1718_v0, %v6450_v39  ;;  %v6574_v55 = vadd.f32 %v1722_v21, %v6453_v3  ;;  %v1746_v49 = vmax.f32 %v1745_v54, 0.0 }
 0x1a2   :  { %v1818_v42 = vstv %s6496_s0  ;;  %v6578_v60 = vadd.f32 %v1726_v20, %v6456_v12  ;;  %v1815_v58 = vmul.f32 %v5786_v2, %v1814_v40  ;;  %v1822_v11 = vstv %s6506_s30  ;;  %s6693_s0 = sld [smem:[#allocation9 + $0x75]] }
 0x1a3   :  { %v1826_v43 = vstv %s6508_s25  ;;  %v1788_v51 = vstv %s6484_s20  ;;  %v1792_v56 = vstv %s6486_s12  ;;  %v1796_v39 = vstv %s6494_s14  ;;  %s6668_s20 = sld [smem:[#allocation9 + $0x15]] }
 0x1a4   :  { %v1812_v37 = vstv %s6520_s9  ;;  %v1800_v3 = vstv %s6518_s8  ;;  %v1804_v44 = vstv %s6522_s23  ;;  %v1808_v23 = vstv %s6524_s26  ;;  %s6682_s12 = sld [smem:[#allocation9 + $0x35]] }
 0x1a5   :  { %v1819_v1 = vmul.f32 %v5792_v4, %v1818_v42  ;;  %v1749_v2 = vmul.f32 %v1748_v30, %v1746_v49  ;;  %v1753_v12 = vmul.f32 %v1752_v28, %v1746_v49  ;;  %v1823_v14 = vmul.f32 %v5795_v41, %v1822_v11  ;;  %s6684_s14 = sld [smem:[#allocation9 + $0x55]] }
 0x1a6   :  { %v1827_v38 = vmul.f32 %v5798_v50, %v1826_v43  ;;  %v1757_v4 = vmul.f32 %v1756_v19, %v1746_v49  ;;  %v1816_v13 = vadd.f32 %v1815_v58, %v1812_v37  ;;  %v1831_v17 = vstv %s6532_s6  ;;  %s6695_s30 = sld [smem:[#allocation9 + $0x95]] }
 0x1a7   :  { %v1835_v6 = vstv %s6540_s21  ;;  %v1761_v41 = vmul.f32 %v1760_v29, %v1746_v49  ;;  %v1839_v50 = vstv %s6542_s1  ;;  %v1843_v30 = vstv %s6554_s27  ;;  %s6709_s25 = sld [smem:[#allocation9 + $0xb5]]  ;;  %s6779_s1 = sld [smem:[#allocation6 + $0x5a]] }
 0x1a8   :  { %v1847_v28 = vstv %s6556_s3  ;;  %v1765_v19 = vmul.f32 %v1764_v7, %v1746_v49  ;;  %v1769_v15 = vmul.f32 %v1768_v32, %v1746_v49  ;;  %v1773_v46 = vmul.f32 %v1772_v22, %v1746_v49  ;;  %s6711_s8 = sld [smem:[#allocation9 + $0xd5]]  ;;  %s6781_s27 = sld [smem:[#allocation6 + $0x5b]] }
 0x1a9   :  { %v1777_v62 = vmul.f32 %v1776_v34, %v1746_v49  ;;  %v6633_v29 = vadd.f32 %v1749_v2, %v6511_v25  ;;  %v6636_v33 = vadd.f32 %v1753_v12, %v6514_v47  ;;  %v1781_v9 = vmul.f32 %v1780_v53, %v1746_v49  ;;  %v6734_v2 = vld [vmem:[#allocation2 + $0x10] sm:$0xff]  ;;  %s6743_s9 = sld [smem:[#allocation9 + $0xf5]] }
 0x1aa   :  { %v1785_v7 = vmul.f32 %v1784_v27, %v1746_v49  ;;  %v6647_v32 = vadd.f32 %v1757_v4, %v6527_v18  ;;  %v1789_v22 = vmul.f32 %v1788_v51, %v1746_v49  ;;  %v1793_v34 = vmul.f32 %v1792_v56, %v1746_v49  ;;  %s6745_s23 = sld [smem:[#allocation9 + $0x115]] }
 0x1ab   :  { %v1820_v16 = vadd.f32 %v1819_v1, %v1816_v13  ;;  %v1797_v25 = vmul.f32 %v1796_v39, %v1746_v49  ;;  %v1801_v47 = vmul.f32 %v1800_v3, %v1746_v49  ;;  %v1805_v52 = vmul.f32 %v1804_v44, %v1746_v49  ;;  %s6753_s26 = sld [smem:[#allocation9 + $0x135]] }
 0x1ac   :  { %v1809_v53 = vmul.f32 %v1808_v23, %v1746_v49  ;;  %v6658_v27 = vadd.f32 %v1761_v41, %v6530_v24  ;;  %v6661_v10 = vadd.f32 %v1765_v19, %v6535_v63  ;;  %v6664_v57 = vadd.f32 %v1769_v15, %v6538_v45  ;;  %v6731_v23 = vld [vmem:[#allocation2 + $0x8] sm:$0xff]  ;;  %v6747_v19 = vld [vmem:[#allocation2 + $0x18] sm:$0xff]  ;;  %s6755_s6 = sld [smem:[#allocation9 + $0x155]] }
 0x1ad   :  { %v1824_v48 = vadd.f32 %v1823_v14, %v1820_v16  ;;  %v6671_v18 = vadd.f32 %v1773_v46, %v6545_v59  ;;  %v6674_v0 = vadd.f32 %v1777_v62, %v6548_v5  ;;  %v6677_v24 = vadd.f32 %v1781_v9, %v6551_v8  ;;  %s6763_s21 = sld [smem:[#allocation9 + $0x175]] }
 0x1ae   :  { %v6680_v21 = vadd.f32 %v1785_v7, %v6559_v31  ;;  %v6687_v63 = vadd.f32 %v1789_v22, %v6562_v61  ;;  %v6690_v45 = vadd.f32 %v1793_v34, %v6565_v35  ;;  %v1897_v54 = vstv %s6609_s17  ;;  %s6783_s3 = sld [smem:[#allocation9 + $0x1b5]] }
 0x1af   :  { %v1828_v20 = vadd.f32 %v1827_v38, %v1824_v48  ;;  %v6698_v59 = vadd.f32 %v1797_v25, %v6568_v26  ;;  %v6701_v5 = vadd.f32 %v1801_v47, %v6571_v36  ;;  %v6704_v8 = vadd.f32 %v1805_v52, %v6574_v55  ;;  %v6717_v55 = vld [vmem:[#allocation2] sm:$0xff]  ;;  %s6790_s17 = sld [smem:[#allocation9 + $0x1f5]] }
 0x1b0   :  { %v6707_v40 = vadd.f32 %v1809_v53, %v6578_v60  ;;  %v1851_v31 = vstv %s6591_s7  ;;  %v1855_v61 = vstv %s6599_s15  ;;  %v1859_v35 = vstv %s6601_s29  ;;  %s6765_s7 = sld [smem:[#allocation6 + $0x58]]  ;;  %s6769_s15 = sld [smem:[#allocation9 + $0x195]] }
 0x1b1   :  { %v1863_v26 = vstv %s6607_s28  ;;  %v1829_v36 = vmax.f32 %v1828_v20, 0.0  ;;  %v1898_v49 = vmul.f32 %v6717_v55, %v1897_v54  ;;  %v1901_v42 = vstv %s6642_s22  ;;  %s6771_s29 = sld [smem:[#allocation6 + $0x59]]  ;;  %s6785_s28 = sld [smem:[#allocation9 + $0x1d5]] }
 0x1b2   :  { %v1905_v60 = vstv %s6644_s4  ;;  %v1867_v58 = vstv %s6616_s16  ;;  %v1871_v11 = vstv %s6618_s2  ;;  %v1875_v43 = vstv %s6628_s10  ;;  %s6792_s16 = sld [smem:[#allocation7 + $0x16]] }
 0x1b3   :  { %v1895_v51 = vstv %s6651_s11  ;;  %v1879_v56 = vstv %s6630_s18  ;;  %v1883_v39 = vstv %s6649_s5  ;;  %v1887_v37 = vstv %s6653_s24  ;;  %s6803_s2 = sld [smem:[#allocation9 + $0x16]] }
 0x1b4   :  { %v1909_v3 = vstv %s6655_s13  ;;  %v1891_v44 = vstv %s6666_s19  ;;  %v1902_v1 = vmul.f32 %v6731_v23, %v1901_v42  ;;  %v1906_v12 = vmul.f32 %v6734_v2, %v1905_v60  ;;  %s6805_s10 = sld [smem:[#allocation9 + $0x36]]  ;;  %s6871_s19 = sld [smem:[#allocation6 + $0x5c]] }
 0x1b5   :  { %v1914_v14 = vstv %s6668_s20  ;;  %v1832_v38 = vmul.f32 %v1831_v17, %v1829_v36  ;;  %v1836_v4 = vmul.f32 %v1835_v6, %v1829_v36  ;;  %v1899_v13 = vadd.f32 %v1898_v49, %v1895_v51  ;;  %s6819_s18 = sld [smem:[#allocation9 + $0x56]] }
 0x1b6   :  { %v1918_v41 = vstv %s6682_s12  ;;  %v1910_v15 = vmul.f32 %v6747_v19, %v1909_v3  ;;  %v1922_v46 = vstv %s6684_s14  ;;  %v1926_v62 = vstv %s6693_s0  ;;  %s6821_s22 = sld [smem:[#allocation9 + $0x76]]  ;;  %s6897_s12 = sld [smem:[#allocation6 + $0x5f]] }
 0x1b7   :  { %v1930_v9 = vstv %s6695_s30  ;;  %v1840_v17 = vmul.f32 %v1839_v50, %v1829_v36  ;;  %v1844_v6 = vmul.f32 %v1843_v30, %v1829_v36  ;;  %v1934_v7 = vstv %s6709_s25  ;;  %s6832_s4 = sld [smem:[#allocation9 + $0x96]] }
 0x1b8   :  { %v1938_v22 = vstv %s6711_s8  ;;  %v1848_v34 = vmul.f32 %v1847_v28, %v1829_v36  ;;  %v1852_v16 = vmul.f32 %v1851_v31, %v1829_v36  ;;  %v1856_v25 = vmul.f32 %v1855_v61, %v1829_v36  ;;  %s6834_s5 = sld [smem:[#allocation9 + $0xb6]] }
 0x1b9   :  { %v1860_v47 = vmul.f32 %v1859_v35, %v1829_v36  ;;  %v6774_v52 = vadd.f32 %v1832_v38, %v6633_v29  ;;  %v6777_v50 = vadd.f32 %v1836_v4, %v6636_v33  ;;  %v1864_v30 = vmul.f32 %v1863_v26, %v1829_v36  ;;  %s6846_s11 = sld [smem:[#allocation9 + $0xd6]] }
 0x1ba   :  { %v1868_v53 = vmul.f32 %v1867_v58, %v1829_v36  ;;  %v1872_v28 = vmul.f32 %v1871_v11, %v1829_v36  ;;  %v1876_v48 = vmul.f32 %v1875_v43, %v1829_v36  ;;  %v1880_v20 = vmul.f32 %v1879_v56, %v1829_v36  ;;  %s6848_s24 = sld [smem:[#allocation9 + $0xf6]] }
 0x1bb   :  { %v1903_v54 = vadd.f32 %v1902_v1, %v1899_v13  ;;  %v6788_v29 = vadd.f32 %v1840_v17, %v6647_v32  ;;  %v1884_v31 = vmul.f32 %v1883_v39, %v1829_v36  ;;  %v1888_v33 = vmul.f32 %v1887_v37, %v1829_v36  ;;  %s6854_s13 = sld [smem:[#allocation9 + $0x116]] }
 0x1bc   :  { %v1892_v61 = vmul.f32 %v1891_v44, %v1829_v36  ;;  %v6795_v35 = vadd.f32 %v1844_v6, %v6658_v27  ;;  %v6798_v26 = vadd.f32 %v1848_v34, %v6661_v10  ;;  %v6801_v49 = vadd.f32 %v1852_v16, %v6664_v57  ;;  %s6895_s20 = sld [smem:[#allocation9 + $0x136]] }
 0x1bd   :  { %v1907_v42 = vadd.f32 %v1906_v12, %v1903_v54  ;;  %v6808_v32 = vadd.f32 %v1856_v25, %v6671_v18  ;;  %v6811_v36 = vadd.f32 %v1860_v47, %v6674_v0  ;;  %v6814_v27 = vadd.f32 %v1864_v30, %v6677_v24  ;;  %s6904_s14 = sld [smem:[#allocation9 + $0x156]] }
 0x1be   :  { %v6817_v10 = vadd.f32 %v1868_v53, %v6680_v21  ;;  %v6824_v57 = vadd.f32 %v1872_v28, %v6687_v63  ;;  %v6827_v18 = vadd.f32 %v1876_v48, %v6690_v45  ;;  %v6830_v0 = vadd.f32 %v1880_v20, %v6698_v59  ;;  %s6906_s0 = sld [smem:[#allocation9 + $0x176]] }
 0x1bf   :  { %v1911_v24 = vadd.f32 %v1910_v15, %v1907_v42  ;;  %v6837_v21 = vadd.f32 %v1884_v31, %v6701_v5  ;;  %v6840_v63 = vadd.f32 %v1888_v33, %v6704_v8  ;;  %v6843_v45 = vadd.f32 %v1892_v61, %v6707_v40  ;;  %s6917_s30 = sld [smem:[#allocation9 + $0x196]] }
 0x1c0   :  { %v1980_v59 = vstv %s6765_s7  ;;  %v1942_v60 = vstv %s6743_s9  ;;  %v1946_v58 = vstv %s6745_s23  ;;  %v1950_v5 = vstv %s6753_s26  ;;  %s6880_s9 = sld [smem:[#allocation7 + $0x17]]  ;;  %s6886_s23 = sld [smem:[#allocation6 + $0x5d]] }
 0x1c1   :  { %v1984_v11 = vstv %s6771_s29  ;;  %v1912_v8 = vmax.f32 %v1911_v24, 0.0  ;;  %v1954_v43 = vstv %s6755_s6  ;;  %v1988_v40 = vstv %s6779_s1  ;;  %s6888_s26 = sld [smem:[#allocation6 + $0x5e]]  ;;  %s6933_s7 = sld [smem:[#allocation9 + $0x37]] }
 0x1c2   :  { %v1992_v51 = vstv %s6781_s27  ;;  %v1958_v56 = vstv %s6763_s21  ;;  %v1962_v39 = vstv %s6769_s15  ;;  %v1966_v37 = vstv %s6783_s3  ;;  %s6919_s25 = sld [smem:[#allocation9 + $0x1b6]]  ;;  %s6931_s21 = sld [smem:[#allocation9 + $0x17]] }
 0x1c3   :  { %v1981_v3 = vmul.f32 %v6717_v55, %v1980_v59  ;;  %v1970_v44 = vstv %s6785_s28  ;;  %v1974_v1 = vstv %s6790_s17  ;;  %v1978_v12 = vstv %s6792_s16  ;;  %s6924_s8 = sld [smem:[#allocation9 + $0x1d6]]  ;;  %s6936_s15 = sld [smem:[#allocation9 + $0x57]] }
 0x1c4   :  { %v1985_v38 = vmul.f32 %v6731_v23, %v1984_v11  ;;  %v1989_v4 = vmul.f32 %v6734_v2, %v1988_v40  ;;  %v1993_v13 = vmul.f32 %v6747_v19, %v1992_v51  ;;  %v1997_v15 = vstv %s6803_s2  ;;  %s6926_s6 = sld [smem:[#allocation9 + $0x1f6]]  ;;  %s6938_s29 = sld [smem:[#allocation9 + $0x77]] }
 0x1c5   :  { %v2001_v17 = vstv %s6805_s10  ;;  %v1915_v6 = vmul.f32 %v1914_v14, %v1912_v8  ;;  %v1919_v34 = vmul.f32 %v1918_v41, %v1912_v8  ;;  %v1923_v16 = vmul.f32 %v1922_v46, %v1912_v8  ;;  %s6952_s1 = sld [smem:[#allocation9 + $0x97]]  ;;  %s7024_s2 = sld [smem:[#allocation6 + $0x62]] }
 0x1c6   :  { %v2005_v25 = vstv %s6819_s18  ;;  %v1927_v47 = vmul.f32 %v1926_v62, %v1912_v8  ;;  %v1982_v30 = vadd.f32 %v1981_v3, %v1978_v12  ;;  %v2009_v53 = vstv %s6821_s22  ;;  %s6954_s27 = sld [smem:[#allocation9 + $0xb7]]  ;;  %s7026_s10 = sld [smem:[#allocation6 + $0x63]] }
 0x1c7   :  { %v2013_v28 = vstv %s6832_s4  ;;  %v1931_v14 = vmul.f32 %v1930_v9, %v1912_v8  ;;  %v2017_v41 = vstv %s6834_s5  ;;  %v2021_v48 = vstv %s6846_s11  ;;  %s6963_s3 = sld [smem:[#allocation9 + $0xd7]] }
 0x1c8   :  { %v2025_v20 = vstv %s6848_s24  ;;  %v1935_v46 = vmul.f32 %v1934_v7, %v1912_v8  ;;  %v1939_v62 = vmul.f32 %v1938_v22, %v1912_v8  ;;  %v1943_v54 = vmul.f32 %v1942_v60, %v1912_v8  ;;  %s6965_s28 = sld [smem:[#allocation9 + $0xf7]]  ;;  %s7062_s24 = sld [smem:[#allocation9 + $0x18]] }
 0x1c9   :  { %v2029_v31 = vstv %s6854_s13  ;;  %v6909_v33 = vadd.f32 %v1915_v6, %v6774_v52  ;;  %v6912_v9 = vadd.f32 %v1919_v34, %v6777_v50  ;;  %v6915_v61 = vadd.f32 %v1923_v16, %v6788_v29  ;;  %s6975_s17 = sld [smem:[#allocation9 + $0x117]]  ;;  %s7070_s13 = sld [smem:[#allocation9 + $0x38]] }
 0x1ca   :  { %v1947_v42 = vmul.f32 %v1946_v58, %v1912_v8  ;;  %v6922_v7 = vadd.f32 %v1927_v47, %v6795_v35  ;;  %v1951_v22 = vmul.f32 %v1950_v5, %v1912_v8  ;;  %v1955_v24 = vmul.f32 %v1954_v43, %v1912_v8  ;;  %s6977_s16 = sld [smem:[#allocation9 + $0x137]] }
 0x1cb   :  { %v1986_v59 = vadd.f32 %v1985_v38, %v1982_v30  ;;  %v6929_v52 = vadd.f32 %v1931_v14, %v6798_v26  ;;  %v1959_v50 = vmul.f32 %v1958_v56, %v1912_v8  ;;  %v1963_v29 = vmul.f32 %v1962_v39, %v1912_v8  ;;  %s7038_s18 = sld [smem:[#allocation9 + $0x177]] }
 0x1cc   :  { %v1967_v60 = vmul.f32 %v1966_v37, %v1912_v8  ;;  %v1971_v58 = vmul.f32 %v1970_v44, %v1912_v8  ;;  %v1975_v35 = vmul.f32 %v1974_v1, %v1912_v8  ;;  %v2063_v5 = vstv %s6871_s19  ;;  %s7009_s19 = sld [smem:[#allocation6 + $0x60]]  ;;  %s7048_s22 = sld [smem:[#allocation9 + $0x197]] }
 0x1cd   :  { %v1990_v11 = vadd.f32 %v1989_v4, %v1986_v59  ;;  %v6941_v26 = vadd.f32 %v1935_v46, %v6801_v49  ;;  %v6944_v43 = vadd.f32 %v1939_v62, %v6808_v32  ;;  %v6947_v40 = vadd.f32 %v1943_v54, %v6811_v36  ;;  %s7050_s4 = sld [smem:[#allocation9 + $0x1b7]] }
 0x1ce   :  { %v6950_v51 = vadd.f32 %v1947_v42, %v6814_v27  ;;  %v6957_v8 = vadd.f32 %v1951_v22, %v6817_v10  ;;  %v6960_v49 = vadd.f32 %v1955_v24, %v6824_v57  ;;  %v2064_v36 = vmul.f32 %v6717_v55, %v2063_v5  ;;  %s7052_s5 = sld [smem:[#allocation9 + $0x1d7]] }
 0x1cf   :  { %v1994_v32 = vadd.f32 %v1993_v13, %v1990_v11  ;;  %v6968_v27 = vadd.f32 %v1959_v50, %v6827_v18  ;;  %v6971_v10 = vadd.f32 %v1963_v29, %v6830_v0  ;;  %v2061_v57 = vstv %s6880_s9  ;;  %s7014_s9 = sld [smem:[#allocation7 + $0x18]]  ;;  %s7054_s11 = sld [smem:[#allocation9 + $0x1f7]] }
 0x1d0   :  { %v2067_v56 = vstv %s6886_s23  ;;  %v6980_v39 = vadd.f32 %v1967_v60, %v6837_v21  ;;  %v6983_v37 = vadd.f32 %v1971_v58, %v6840_v63  ;;  %v6986_v18 = vadd.f32 %v1975_v35, %v6843_v45  ;;  %s7016_s23 = sld [smem:[#allocation6 + $0x61]] }
 0x1d1   :  { %v2071_v0 = vstv %s6888_s26  ;;  %v1995_v3 = vmax.f32 %v1994_v32, 0.0  ;;  %v2033_v44 = vstv %s6895_s20  ;;  %v2037_v1 = vstv %s6904_s14  ;;  %s7036_s26 = sld [smem:[#allocation9 + $0x157]]  ;;  %s7072_s20 = sld [smem:[#allocation9 + $0x58]] }
 0x1d2   :  { %v2075_v12 = vstv %s6897_s12  ;;  %v2041_v21 = vstv %s6906_s0  ;;  %v2045_v38 = vstv %s6917_s30  ;;  %v2065_v4 = vadd.f32 %v2064_v36, %v2061_v57  ;;  %s7084_s12 = sld [smem:[#allocation9 + $0x78]]  ;;  %s7121_s0 = sld [smem:[#allocation7 + $0x19]] }
 0x1d3   :  { %v2068_v63 = vmul.f32 %v6731_v23, %v2067_v56  ;;  %v2049_v45 = vstv %s6919_s25  ;;  %v2053_v13 = vstv %s6924_s8  ;;  %v2057_v6 = vstv %s6926_s6  ;;  %s7086_s14 = sld [smem:[#allocation9 + $0x98]]  ;;  %s7129_s30 = sld [smem:[#allocation6 + $0x64]] }
 0x1d4   :  { %v2072_v34 = vmul.f32 %v6734_v2, %v2071_v0  ;;  %v2076_v16 = vmul.f32 %v6747_v19, %v2075_v12  ;;  %v2080_v47 = vstv %s6931_s21  ;;  %v2084_v30 = vstv %s6933_s7  ;;  %s7131_s25 = sld [smem:[#allocation6 + $0x65]]  ;;  %s7137_s8 = sld [smem:[#allocation9 + $0xb8]] }
 0x1d5   :  { %v2088_v14 = vstv %s6936_s15  ;;  %v1998_v46 = vmul.f32 %v1997_v15, %v1995_v3  ;;  %v2002_v62 = vmul.f32 %v2001_v17, %v1995_v3  ;;  %v2092_v54 = vstv %s6938_s29  ;;  %s7139_s6 = sld [smem:[#allocation6 + $0x66]]  ;;  %s7146_s21 = sld [smem:[#allocation9 + $0xd8]] }
 0x1d6   :  { %v2096_v42 = vstv %s6952_s1  ;;  %v2069_v22 = vadd.f32 %v2068_v63, %v2065_v4  ;;  %v2100_v24 = vstv %s6954_s27  ;;  %v2104_v59 = vstv %s6963_s3  ;;  %s7148_s7 = sld [smem:[#allocation9 + $0xf8]]  ;;  %s7160_s29 = sld [smem:[#allocation6 + $0x67]] }
 0x1d7   :  { %v2108_v50 = vstv %s6965_s28  ;;  %v2006_v15 = vmul.f32 %v2005_v25, %v1995_v3  ;;  %v2010_v17 = vmul.f32 %v2009_v53, %v1995_v3  ;;  %v2112_v29 = vstv %s6975_s17  ;;  %s7158_s15 = sld [smem:[#allocation9 + $0x118]] }
 0x1d8   :  { %v2116_v60 = vstv %s6977_s16  ;;  %v2014_v58 = vmul.f32 %v2013_v28, %v1995_v3  ;;  %v2018_v35 = vmul.f32 %v2017_v41, %v1995_v3  ;;  %v2022_v11 = vmul.f32 %v2021_v48, %v1995_v3  ;;  %s7172_s1 = sld [smem:[#allocation9 + $0x138]] }
 0x1d9   :  { %v2026_v5 = vmul.f32 %v2025_v20, %v1995_v3  ;;  %v7041_v25 = vadd.f32 %v1998_v46, %v6909_v33  ;;  %v7044_v53 = vadd.f32 %v2002_v62, %v6912_v9  ;;  %v2030_v32 = vmul.f32 %v2029_v31, %v1995_v3  ;;  %s7174_s27 = sld [smem:[#allocation9 + $0x158]] }
 0x1da   :  { %v2034_v36 = vmul.f32 %v2033_v44, %v1995_v3  ;;  %v2038_v28 = vmul.f32 %v2037_v1, %v1995_v3  ;;  %v2042_v41 = vmul.f32 %v2041_v21, %v1995_v3  ;;  %v2046_v48 = vmul.f32 %v2045_v38, %v1995_v3  ;;  %s7179_s3 = sld [smem:[#allocation9 + $0x178]] }
 0x1db   :  { %v2073_v20 = vadd.f32 %v2072_v34, %v2069_v22  ;;  %v7057_v33 = vadd.f32 %v2006_v15, %v6915_v61  ;;  %v7060_v9 = vadd.f32 %v2010_v17, %v6922_v7  ;;  %v2050_v31 = vmul.f32 %v2049_v45, %v1995_v3  ;;  %s7181_s28 = sld [smem:[#allocation9 + $0x198]] }
 0x1dc   :  { %v2054_v57 = vmul.f32 %v2053_v13, %v1995_v3  ;;  %v7065_v56 = vadd.f32 %v2014_v58, %v6929_v52  ;;  %v7068_v0 = vadd.f32 %v2018_v35, %v6941_v26  ;;  %v2058_v44 = vmul.f32 %v2057_v6, %v1995_v3  ;;  %s7183_s17 = sld [smem:[#allocation9 + $0x1b8]] }
 0x1dd   :  { %v2077_v1 = vadd.f32 %v2076_v16, %v2073_v20  ;;  %v7075_v61 = vadd.f32 %v2022_v11, %v6944_v43  ;;  %v7078_v7 = vadd.f32 %v2026_v5, %v6947_v40  ;;  %v7081_v52 = vadd.f32 %v2030_v32, %v6950_v51  ;;  %s7185_s16 = sld [smem:[#allocation9 + $0x1d8]] }
 0x1de   :  { %v2146_v26 = vstv %s7009_s19  ;;  %v7089_v43 = vadd.f32 %v2034_v36, %v6957_v8  ;;  %v7092_v40 = vadd.f32 %v2038_v28, %v6960_v49  ;;  %v7095_v51 = vadd.f32 %v2042_v41, %v6968_v27  ;;  %s7196_s19 = sld [smem:[#allocation9 + $0x1f8]] }
 0x1df   :  { %v7098_v3 = vadd.f32 %v2046_v48, %v6971_v10  ;;  %v7101_v12 = vadd.f32 %v2050_v31, %v6980_v39  ;;  %v7104_v21 = vadd.f32 %v2054_v57, %v6983_v37  ;;  %v2078_v8 = vmax.f32 %v2077_v1, 0.0 }
 0x1e0   :  { %v2150_v38 = vstv %s7016_s23  ;;  %v7108_v49 = vadd.f32 %v2058_v44, %v6986_v18  ;;  %v2147_v27 = vmul.f32 %v6717_v55, %v2146_v26  ;;  %v2154_v4 = vstv %s7024_s2  ;;  %s7212_s23 = sld [smem:[#allocation9 + $0x39]] }
 0x1e1   :  { %v2158_v63 = vstv %s7026_s10  ;;  %v2120_v10 = vstv %s7036_s26  ;;  %v2124_v45 = vstv %s7038_s18  ;;  %v2128_v39 = vstv %s7048_s22  ;;  %s7214_s2 = sld [smem:[#allocation9 + $0x59]] }
 0x1e2   :  { %v2144_v13 = vstv %s7014_s9  ;;  %v2132_v37 = vstv %s7050_s4  ;;  %v2136_v6 = vstv %s7052_s5  ;;  %v2140_v34 = vstv %s7054_s11  ;;  %s7198_s9 = sld [smem:[#allocation9 + $0x19]]  ;;  %s7267_s4 = sld [smem:[#allocation7 + $0x1a]] }
 0x1e3   :  { %v2151_v16 = vmul.f32 %v6731_v23, %v2150_v38  ;;  %v2081_v18 = vmul.f32 %v2080_v47, %v2078_v8  ;;  %v2085_v46 = vmul.f32 %v2084_v30, %v2078_v8  ;;  %v2155_v62 = vmul.f32 %v6734_v2, %v2154_v4  ;;  %s7223_s10 = sld [smem:[#allocation9 + $0x79]]  ;;  %s7269_s5 = sld [smem:[#allocation6 + $0x68]] }
 0x1e4   :  { %v2159_v22 = vmul.f32 %v6747_v19, %v2158_v63  ;;  %v2089_v15 = vmul.f32 %v2088_v14, %v2078_v8  ;;  %v2148_v17 = vadd.f32 %v2147_v27, %v2144_v13  ;;  %v2163_v58 = vstv %s7062_s24  ;;  %s7225_s26 = sld [smem:[#allocation9 + $0x99]] }
 0x1e5   :  { %v2167_v35 = vstv %s7070_s13  ;;  %v2093_v47 = vmul.f32 %v2092_v54, %v2078_v8  ;;  %v2171_v30 = vstv %s7072_s20  ;;  %v2175_v11 = vstv %s7084_s12  ;;  %s7239_s18 = sld [smem:[#allocation9 + $0xb9]] }
 0x1e6   :  { %v2179_v5 = vstv %s7086_s14  ;;  %v2097_v14 = vmul.f32 %v2096_v42, %v2078_v8  ;;  %v2101_v32 = vmul.f32 %v2100_v24, %v2078_v8  ;;  %v2105_v36 = vmul.f32 %v2104_v59, %v2078_v8  ;;  %s7241_s22 = sld [smem:[#allocation9 + $0xd9]] }
 0x1e7   :  { %v2109_v28 = vmul.f32 %v2108_v50, %v2078_v8  ;;  %v7163_v54 = vadd.f32 %v2081_v18, %v7041_v25  ;;  %v7166_v41 = vadd.f32 %v2085_v46, %v7044_v53  ;;  %v2113_v48 = vmul.f32 %v2112_v29, %v2078_v8  ;;  %s7275_s11 = sld [smem:[#allocation6 + $0x69]] }
 0x1e8   :  { %v2117_v42 = vmul.f32 %v2116_v60, %v2078_v8  ;;  %v7177_v24 = vadd.f32 %v2089_v15, %v7057_v33  ;;  %v2121_v59 = vmul.f32 %v2120_v10, %v2078_v8  ;;  %v2125_v50 = vmul.f32 %v2124_v45, %v2078_v8  ;;  %s7285_s24 = sld [smem:[#allocation9 + $0xf9]] }
 0x1e9   :  { %v2152_v20 = vadd.f32 %v2151_v16, %v2148_v17  ;;  %v2129_v25 = vmul.f32 %v2128_v39, %v2078_v8  ;;  %v2133_v53 = vmul.f32 %v2132_v37, %v2078_v8  ;;  %v2137_v31 = vmul.f32 %v2136_v6, %v2078_v8  ;;  %s7287_s13 = sld [smem:[#allocation9 + $0x119]] }
 0x1ea   :  { %v2141_v29 = vmul.f32 %v2140_v34, %v2078_v8  ;;  %v7188_v60 = vadd.f32 %v2093_v47, %v7060_v9  ;;  %v7191_v33 = vadd.f32 %v2097_v14, %v7065_v56  ;;  %v7194_v57 = vadd.f32 %v2101_v32, %v7068_v0  ;;  %s7301_s20 = sld [smem:[#allocation9 + $0x159]] }
 0x1eb   :  { %v2156_v44 = vadd.f32 %v2155_v62, %v2152_v20  ;;  %v7201_v1 = vadd.f32 %v2105_v36, %v7075_v61  ;;  %v7204_v26 = vadd.f32 %v2109_v28, %v7078_v7  ;;  %v7207_v9 = vadd.f32 %v2113_v48, %v7081_v52  ;;  %s7303_s12 = sld [smem:[#allocation9 + $0x179]] }
 0x1ec   :  { %v7210_v56 = vadd.f32 %v2117_v42, %v7089_v43  ;;  %v7217_v0 = vadd.f32 %v2121_v59, %v7092_v40  ;;  %v7220_v61 = vadd.f32 %v2125_v50, %v7095_v51  ;;  %v2229_v52 = vstv %s7129_s30  ;;  %s7291_s30 = sld [smem:[#allocation9 + $0x139]] }
 0x1ed   :  { %v2160_v7 = vadd.f32 %v2159_v22, %v2156_v44  ;;  %v7228_v43 = vadd.f32 %v2129_v25, %v7098_v3  ;;  %v7231_v40 = vadd.f32 %v2133_v53, %v7101_v12  ;;  %v7234_v51 = vadd.f32 %v2137_v31, %v7104_v21  ;;  %s7305_s14 = sld [smem:[#allocation9 + $0x199]] }
 0x1ee   :  { %v7237_v8 = vadd.f32 %v2141_v29, %v7108_v49  ;;  %v2183_v3 = vstv %s7137_s8  ;;  %v2187_v38 = vstv %s7146_s21  ;;  %v2191_v12 = vstv %s7148_s7  ;;  %s7307_s8 = sld [smem:[#allocation9 + $0x1b9]]  ;;  %s7325_s7 = sld [smem:[#allocation9 + $0x1a]] }
 0x1ef   :  { %v2195_v27 = vstv %s7158_s15  ;;  %v2161_v4 = vmax.f32 %v2160_v7, 0.0  ;;  %v2230_v21 = vmul.f32 %v6717_v55, %v2229_v52  ;;  %v2233_v49 = vstv %s7131_s25  ;;  %s7293_s25 = sld [smem:[#allocation6 + $0x6b]]  ;;  %s7314_s21 = sld [smem:[#allocation9 + $0x1f9]] }
 0x1f0   :  { %v2237_v63 = vstv %s7139_s6  ;;  %v2199_v10 = vstv %s7172_s1  ;;  %v2203_v45 = vstv %s7174_s27  ;;  %v2207_v39 = vstv %s7179_s3  ;;  %s7312_s6 = sld [smem:[#allocation9 + $0x1d9]]  ;;  %s7327_s15 = sld [smem:[#allocation9 + $0x3a]] }
 0x1f1   :  { %v2227_v13 = vstv %s7121_s0  ;;  %v2211_v37 = vstv %s7181_s28  ;;  %v2215_v6 = vstv %s7183_s17  ;;  %v2219_v34 = vstv %s7185_s16  ;;  %s7277_s0 = sld [smem:[#allocation6 + $0x6a]] }
 0x1f2   :  { %v2241_v16 = vstv %s7160_s29  ;;  %v2223_v18 = vstv %s7196_s19  ;;  %v2234_v46 = vmul.f32 %v6731_v23, %v2233_v49  ;;  %v2238_v62 = vmul.f32 %v6734_v2, %v2237_v63  ;;  %s7341_s29 = sld [smem:[#allocation9 + $0x5a]]  ;;  %s7393_s19 = sld [smem:[#allocation6 + $0x6c]] }
 0x1f3   :  { %v2246_v22 = vstv %s7198_s9  ;;  %v2164_v15 = vmul.f32 %v2163_v58, %v2161_v4  ;;  %v2168_v17 = vmul.f32 %v2167_v35, %v2161_v4  ;;  %v2231_v47 = vadd.f32 %v2230_v21, %v2227_v13  ;;  %s7343_s1 = sld [smem:[#allocation9 + $0x7a]] }
 0x1f4   :  { %v2250_v14 = vstv %s7212_s23  ;;  %v2242_v32 = vmul.f32 %v6747_v19, %v2241_v16  ;;  %v2254_v36 = vstv %s7214_s2  ;;  %v2258_v28 = vstv %s7223_s10  ;;  %s7354_s27 = sld [smem:[#allocation9 + $0x9a]]  ;;  %s7419_s23 = sld [smem:[#allocation6 + $0x6f]] }
 0x1f5   :  { %v2262_v48 = vstv %s7225_s26  ;;  %v2172_v58 = vmul.f32 %v2171_v30, %v2161_v4  ;;  %v2176_v35 = vmul.f32 %v2175_v11, %v2161_v4  ;;  %v2266_v42 = vstv %s7239_s18  ;;  %s7356_s3 = sld [smem:[#allocation9 + $0xba]] }
 0x1f6   :  { %v2270_v59 = vstv %s7241_s22  ;;  %v2180_v50 = vmul.f32 %v2179_v5, %v2161_v4  ;;  %v2184_v20 = vmul.f32 %v2183_v3, %v2161_v4  ;;  %v2188_v25 = vmul.f32 %v2187_v38, %v2161_v4  ;;  %s7368_s28 = sld [smem:[#allocation9 + $0xda]] }
 0x1f7   :  { %v2192_v53 = vmul.f32 %v2191_v12, %v2161_v4  ;;  %v7296_v31 = vadd.f32 %v2164_v15, %v7163_v54  ;;  %v7299_v30 = vadd.f32 %v2168_v17, %v7166_v41  ;;  %v2196_v11 = vmul.f32 %v2195_v27, %v2161_v4  ;;  %s7370_s17 = sld [smem:[#allocation9 + $0xfa]] }
 0x1f8   :  { %v2200_v29 = vmul.f32 %v2199_v10, %v2161_v4  ;;  %v2204_v5 = vmul.f32 %v2203_v45, %v2161_v4  ;;  %v2208_v44 = vmul.f32 %v2207_v39, %v2161_v4  ;;  %v2212_v7 = vmul.f32 %v2211_v37, %v2161_v4  ;;  %s7376_s16 = sld [smem:[#allocation9 + $0x11a]] }
 0x1f9   :  { %v2235_v52 = vadd.f32 %v2234_v46, %v2231_v47  ;;  %v7310_v54 = vadd.f32 %v2172_v58, %v7177_v24  ;;  %v2216_v3 = vmul.f32 %v2215_v6, %v2161_v4  ;;  %v2220_v41 = vmul.f32 %v2219_v34, %v2161_v4  ;;  %s7417_s9 = sld [smem:[#allocation9 + $0x13a]] }
 0x1fa   :  { %v2224_v38 = vmul.f32 %v2223_v18, %v2161_v4  ;;  %v7317_v12 = vadd.f32 %v2176_v35, %v7188_v60  ;;  %v7320_v27 = vadd.f32 %v2180_v50, %v7191_v33  ;;  %v7323_v21 = vadd.f32 %v2184_v20, %v7194_v57  ;;  %s7426_s2 = sld [smem:[#allocation9 + $0x15a]] }
 0x1fb   :  { %v2239_v49 = vadd.f32 %v2238_v62, %v2235_v52  ;;  %v7330_v24 = vadd.f32 %v2188_v25, %v7201_v1  ;;  %v7333_v4 = vadd.f32 %v2192_v53, %v7204_v26  ;;  %v7336_v60 = vadd.f32 %v2196_v11, %v7207_v9  ;;  %s7428_s10 = sld [smem:[#allocation9 + $0x17a]] }
 0x1fc   :  { %v7339_v33 = vadd.f32 %v2200_v29, %v7210_v56  ;;  %v7346_v57 = vadd.f32 %v2204_v5, %v7217_v0  ;;  %v7349_v1 = vadd.f32 %v2208_v44, %v7220_v61  ;;  %v7352_v26 = vadd.f32 %v2212_v7, %v7228_v43  ;;  %s7439_s26 = sld [smem:[#allocation9 + $0x19a]] }
 0x1fd   :  { %v2243_v9 = vadd.f32 %v2242_v32, %v2239_v49  ;;  %v7359_v56 = vadd.f32 %v2216_v3, %v7231_v40  ;;  %v7362_v0 = vadd.f32 %v2220_v41, %v7234_v51  ;;  %v7365_v61 = vadd.f32 %v2224_v38, %v7237_v8  ;;  %s7441_s18 = sld [smem:[#allocation9 + $0x1ba]] }
 0x1fe   :  { %v2312_v43 = vstv %s7269_s5  ;;  %v2274_v63 = vstv %s7285_s24  ;;  %v2278_v10 = vstv %s7287_s13  ;;  %v2282_v40 = vstv %s7291_s30  ;;  %s7408_s5 = sld [smem:[#allocation6 + $0x6d]]  ;;  %s7446_s22 = sld [smem:[#allocation9 + $0x1da]] }
 0x1ff   :  { %v2316_v45 = vstv %s7275_s11  ;;  %v2244_v51 = vmax.f32 %v2243_v9, 0.0  ;;  %v2286_v39 = vstv %s7301_s20  ;;  %v2320_v8 = vstv %s7277_s0  ;;  %s7410_s11 = sld [smem:[#allocation6 + $0x6e]]  ;;  %s7448_s0 = sld [smem:[#allocation9 + $0x1fa]] }
 0x200   :  { %v2324_v13 = vstv %s7293_s25  ;;  %v2290_v37 = vstv %s7303_s12  ;;  %v2294_v6 = vstv %s7305_s14  ;;  %v2298_v34 = vstv %s7307_s8  ;;  %s7453_s24 = sld [smem:[#allocation9 + $0x1b]] }
 0x201   :  { %v2313_v16 = vmul.f32 %v6717_v55, %v2312_v43  ;;  %v2302_v18 = vstv %s7312_s6  ;;  %v2306_v46 = vstv %s7314_s21  ;;  %v2310_v62 = vstv %s7267_s4  ;;  %s7402_s4 = sld [smem:[#allocation7 + $0x1b]] }
 0x202   :  { %v2317_v15 = vmul.f32 %v6731_v23, %v2316_v45  ;;  %v2321_v17 = vmul.f32 %v6734_v2, %v2320_v8  ;;  %v2325_v47 = vmul.f32 %v6747_v19, %v2324_v13  ;;  %v2329_v32 = vstv %s7325_s7  ;;  %s7455_s13 = sld [smem:[#allocation9 + $0x3b]]  ;;  %s7546_s7 = sld [smem:[#allocation6 + $0x72]] }
 0x203   :  { %v2333_v58 = vstv %s7327_s15  ;;  %v2247_v35 = vmul.f32 %v2246_v22, %v2244_v51  ;;  %v2251_v50 = vmul.f32 %v2250_v14, %v2244_v51  ;;  %v2255_v20 = vmul.f32 %v2254_v36, %v2244_v51  ;;  %s7458_s30 = sld [smem:[#allocation9 + $0x5b]] }
 0x204   :  { %v2337_v25 = vstv %s7341_s29  ;;  %v2259_v53 = vmul.f32 %v2258_v28, %v2244_v51  ;;  %v2314_v11 = vadd.f32 %v2313_v16, %v2310_v62  ;;  %v2341_v29 = vstv %s7343_s1  ;;  %s7460_s25 = sld [smem:[#allocation9 + $0x7b]] }
 0x205   :  { %v2345_v5 = vstv %s7354_s27  ;;  %v2263_v22 = vmul.f32 %v2262_v48, %v2244_v51  ;;  %v2349_v14 = vstv %s7356_s3  ;;  %v2353_v44 = vstv %s7368_s28  ;;  %s7474_s20 = sld [smem:[#allocation9 + $0x9b]] }
 0x206   :  { %v2357_v7 = vstv %s7370_s17  ;;  %v2267_v36 = vmul.f32 %v2266_v42, %v2244_v51  ;;  %v2271_v28 = vmul.f32 %v2270_v59, %v2244_v51  ;;  %v2275_v52 = vmul.f32 %v2274_v63, %v2244_v51  ;;  %s7476_s12 = sld [smem:[#allocation9 + $0xbb]]  ;;  %s7584_s17 = sld [smem:[#allocation9 + $0x1c]] }
 0x207   :  { %v2361_v3 = vstv %s7376_s16  ;;  %v7431_v41 = vadd.f32 %v2247_v35, %v7296_v31  ;;  %v7434_v48 = vadd.f32 %v2251_v50, %v7299_v30  ;;  %v7437_v38 = vadd.f32 %v2255_v20, %v7310_v54  ;;  %s7485_s14 = sld [smem:[#allocation9 + $0xdb]]  ;;  %s7592_s16 = sld [smem:[#allocation9 + $0x3c]] }
 0x208   :  { %v2279_v49 = vmul.f32 %v2278_v10, %v2244_v51  ;;  %v7444_v42 = vadd.f32 %v2259_v53, %v7317_v12  ;;  %v2283_v59 = vmul.f32 %v2282_v40, %v2244_v51  ;;  %v2287_v9 = vmul.f32 %v2286_v39, %v2244_v51  ;;  %s7487_s8 = sld [smem:[#allocation9 + $0xfb]] }
 0x209   :  { %v2318_v43 = vadd.f32 %v2317_v15, %v2314_v11  ;;  %v7451_v31 = vadd.f32 %v2263_v22, %v7320_v27  ;;  %v2291_v30 = vmul.f32 %v2290_v37, %v2244_v51  ;;  %v2295_v54 = vmul.f32 %v2294_v6, %v2244_v51  ;;  %s7497_s6 = sld [smem:[#allocation9 + $0x11b]] }
 0x20a   :  { %v2299_v63 = vmul.f32 %v2298_v34, %v2244_v51  ;;  %v2303_v10 = vmul.f32 %v2302_v18, %v2244_v51  ;;  %v2307_v12 = vmul.f32 %v2306_v46, %v2244_v51  ;;  %v2395_v40 = vstv %s7393_s19  ;;  %s7499_s21 = sld [smem:[#allocation9 + $0x13b]]  ;;  %s7531_s19 = sld [smem:[#allocation6 + $0x70]] }
 0x20b   :  { %v2322_v45 = vadd.f32 %v2321_v17, %v2318_v43  ;;  %v7463_v27 = vadd.f32 %v2267_v36, %v7323_v21  ;;  %v7466_v39 = vadd.f32 %v2271_v28, %v7330_v24  ;;  %v7469_v8 = vadd.f32 %v2275_v52, %v7333_v4  ;;  %s7548_s15 = sld [smem:[#allocation6 + $0x73]] }
 0x20c   :  { %v7472_v13 = vadd.f32 %v2279_v49, %v7336_v60  ;;  %v7479_v51 = vadd.f32 %v2283_v59, %v7339_v33  ;;  %v7482_v21 = vadd.f32 %v2287_v9, %v7346_v57  ;;  %v2396_v4 = vmul.f32 %v6717_v55, %v2395_v40  ;;  %s7560_s29 = sld [smem:[#allocation9 + $0x17b]] }
 0x20d   :  { %v2326_v24 = vadd.f32 %v2325_v47, %v2322_v45  ;;  %v7490_v60 = vadd.f32 %v2291_v30, %v7349_v1  ;;  %v7493_v33 = vadd.f32 %v2295_v54, %v7352_v26  ;;  %v2393_v57 = vstv %s7402_s4  ;;  %s7536_s4 = sld [smem:[#allocation7 + $0x1c]]  ;;  %s7570_s1 = sld [smem:[#allocation9 + $0x19b]] }
 0x20e   :  { %v2399_v37 = vstv %s7408_s5  ;;  %v7502_v55 = vadd.f32 %v2299_v63, %v7359_v56  ;;  %v7505_v6 = vadd.f32 %v2303_v10, %v7362_v0  ;;  %v7508_v1 = vadd.f32 %v2307_v12, %v7365_v61  ;;  %s7538_s5 = sld [smem:[#allocation6 + $0x71]]  ;;  %s7572_s27 = sld [smem:[#allocation9 + $0x1bb]] }
 0x20f   :  { %v2403_v26 = vstv %s7410_s11  ;;  %v2327_v34 = vmax.f32 %v2326_v24, 0.0  ;;  %v2365_v16 = vstv %s7417_s9  ;;  %v2369_v18 = vstv %s7426_s2  ;;  %s7558_s11 = sld [smem:[#allocation9 + $0x15b]]  ;;  %s7594_s9 = sld [smem:[#allocation9 + $0x5c]] }
 0x210   :  { %v2407_v46 = vstv %s7419_s23  ;;  %v2373_v56 = vstv %s7428_s10  ;;  %v2377_v62 = vstv %s7439_s26  ;;  %v2397_v15 = vadd.f32 %v2396_v4, %v2393_v57  ;;  %s7574_s3 = sld [smem:[#allocation9 + $0x1db]]  ;;  %s7606_s23 = sld [smem:[#allocation9 + $0x7c]] }
 0x211   :  { %v2400_v0 = vmul.f32 %v6731_v23, %v2399_v37  ;;  %v2381_v61 = vstv %s7441_s18  ;;  %v2385_v17 = vstv %s7446_s22  ;;  %v2389_v47 = vstv %s7448_s0  ;;  %s7576_s28 = sld [smem:[#allocation9 + $0x1fb]]  ;;  %s7608_s2 = sld [smem:[#allocation9 + $0x9c]] }
 0x212   :  { %v2404_v35 = vmul.f32 %v6734_v2, %v2403_v26  ;;  %v2408_v50 = vmul.f32 %v6747_v19, %v2407_v46  ;;  %v2412_v20 = vstv %s7453_s24  ;;  %v2416_v53 = vstv %s7455_s13  ;;  %s7647_s10 = sld [smem:[#allocation7 + $0x1d]]  ;;  %s7659_s26 = sld [smem:[#allocation6 + $0x74]] }
 0x213   :  { %v2420_v11 = vstv %s7458_s30  ;;  %v2330_v22 = vmul.f32 %v2329_v32, %v2327_v34  ;;  %v2334_v23 = vmul.f32 %v2333_v58, %v2327_v34  ;;  %v2424_v36 = vstv %s7460_s25  ;;  %s7661_s18 = sld [smem:[#allocation6 + $0x75]]  ;;  %s7667_s22 = sld [smem:[#allocation9 + $0xbc]] }
 0x214   :  { %v2428_v28 = vstv %s7474_s20  ;;  %v2401_v2 = vadd.f32 %v2400_v0, %v2397_v15  ;;  %v2432_v19 = vstv %s7476_s12  ;;  %v2436_v52 = vstv %s7485_s14  ;;  %s7669_s0 = sld [smem:[#allocation6 + $0x76]]  ;;  %s7676_s24 = sld [smem:[#allocation9 + $0xdc]] }
 0x215   :  { %v2440_v49 = vstv %s7487_s8  ;;  %v2338_v32 = vmul.f32 %v2337_v25, %v2327_v34  ;;  %v2342_v58 = vmul.f32 %v2341_v29, %v2327_v34  ;;  %v2444_v59 = vstv %s7497_s6  ;;  %s7678_s13 = sld [smem:[#allocation9 + $0xfc]]  ;;  %s7690_s25 = sld [smem:[#allocation6 + $0x77]] }
 0x216   :  { %v2448_v9 = vstv %s7499_s21  ;;  %v2346_v43 = vmul.f32 %v2345_v5, %v2327_v34  ;;  %v2350_v30 = vmul.f32 %v2349_v14, %v2327_v34  ;;  %v2354_v54 = vmul.f32 %v2353_v44, %v2327_v34  ;;  %s7688_s30 = sld [smem:[#allocation9 + $0x11c]] }
 0x217   :  { %v2358_v63 = vmul.f32 %v2357_v7, %v2327_v34  ;;  %v7563_v25 = vadd.f32 %v2330_v22, %v7431_v41  ;;  %v7566_v29 = vadd.f32 %v2334_v23, %v7434_v48  ;;  %v2362_v10 = vmul.f32 %v2361_v3, %v2327_v34  ;;  %v7656_v23 = vld [vmem:[#allocation2 + $0x18] sm:$0xff]  ;;  %s7702_s20 = sld [smem:[#allocation9 + $0x13c]] }
 0x218   :  { %v2366_v12 = vmul.f32 %v2365_v16, %v2327_v34  ;;  %v2370_v5 = vmul.f32 %v2369_v18, %v2327_v34  ;;  %v2374_v14 = vmul.f32 %v2373_v56, %v2327_v34  ;;  %v2378_v44 = vmul.f32 %v2377_v62, %v2327_v34  ;;  %s7704_s12 = sld [smem:[#allocation9 + $0x15c]] }
 0x219   :  { %v2405_v7 = vadd.f32 %v2404_v35, %v2401_v2  ;;  %v7579_v41 = vadd.f32 %v2338_v32, %v7437_v38  ;;  %v7582_v48 = vadd.f32 %v2342_v58, %v7444_v42  ;;  %v2382_v3 = vmul.f32 %v2381_v61, %v2327_v34  ;;  %s7709_s14 = sld [smem:[#allocation9 + $0x17c]] }
 0x21a   :  { %v2386_v45 = vmul.f32 %v2385_v17, %v2327_v34  ;;  %v7587_v40 = vadd.f32 %v2346_v43, %v7451_v31  ;;  %v7590_v24 = vadd.f32 %v2350_v30, %v7463_v27  ;;  %v2390_v4 = vmul.f32 %v2389_v47, %v2327_v34  ;;  %v7644_v17 = vld [vmem:[#allocation2 + $0x8] sm:$0xff]  ;;  %s7711_s8 = sld [smem:[#allocation9 + $0x19c]] }
 0x21b   :  { %v2409_v57 = vadd.f32 %v2408_v50, %v2405_v7  ;;  %v7597_v38 = vadd.f32 %v2354_v54, %v7466_v39  ;;  %v7600_v42 = vadd.f32 %v2358_v63, %v7469_v8  ;;  %v7603_v31 = vadd.f32 %v2362_v10, %v7472_v13  ;;  %v7653_v50 = vld [vmem:[#allocation2 + $0x10] sm:$0xff]  ;;  %s7713_s6 = sld [smem:[#allocation9 + $0x1bc]] }
 0x21c   :  { %v2478_v27 = vstv %s7531_s19  ;;  %v7611_v37 = vadd.f32 %v2366_v12, %v7479_v51  ;;  %v7614_v39 = vadd.f32 %v2370_v5, %v7482_v21  ;;  %v7617_v8 = vadd.f32 %v2374_v14, %v7490_v60  ;;  %v7632_v60 = vld [vmem:[#allocation2] sm:$0xff]  ;;  %s7715_s21 = sld [smem:[#allocation9 + $0x1dc]] }
 0x21d   :  { %v7620_v13 = vadd.f32 %v2378_v44, %v7493_v33  ;;  %v7623_v26 = vadd.f32 %v2382_v3, %v7502_v55  ;;  %v7626_v34 = vadd.f32 %v2386_v45, %v7505_v6  ;;  %v2410_v51 = vmax.f32 %v2409_v57, 0.0  ;;  %s7726_s19 = sld [smem:[#allocation9 + $0x1fc]] }
 0x21e   :  { %v2482_v16 = vstv %s7538_s5  ;;  %v7630_v21 = vadd.f32 %v2390_v4, %v7508_v1  ;;  %v2479_v18 = vmul.f32 %v7632_v60, %v2478_v27  ;;  %v2486_v33 = vstv %s7546_s7  ;;  %s7742_s5 = sld [smem:[#allocation9 + $0x3d]] }
 0x21f   :  { %v2490_v46 = vstv %s7548_s15  ;;  %v2452_v56 = vstv %s7558_s11  ;;  %v2456_v62 = vstv %s7560_s29  ;;  %v2460_v55 = vstv %s7570_s1  ;;  %s7744_s7 = sld [smem:[#allocation9 + $0x5d]] }
 0x220   :  { %v2476_v15 = vstv %s7536_s4  ;;  %v2464_v6 = vstv %s7572_s27  ;;  %v2468_v0 = vstv %s7574_s3  ;;  %v2472_v61 = vstv %s7576_s28  ;;  %s7728_s4 = sld [smem:[#allocation9 + $0x1d]]  ;;  %s7797_s27 = sld [smem:[#allocation7 + $0x1e]] }
 0x221   :  { %v2483_v1 = vmul.f32 %v7644_v17, %v2482_v16  ;;  %v2413_v47 = vmul.f32 %v2412_v20, %v2410_v51  ;;  %v2417_v35 = vmul.f32 %v2416_v53, %v2410_v51  ;;  %v2487_v22 = vmul.f32 %v7653_v50, %v2486_v33  ;;  %s7753_s15 = sld [smem:[#allocation9 + $0x7d]]  ;;  %s7799_s3 = sld [smem:[#allocation6 + $0x78]] }
 0x222   :  { %v2491_v2 = vmul.f32 %v7656_v23, %v2490_v46  ;;  %v2421_v20 = vmul.f32 %v2420_v11, %v2410_v51  ;;  %v2480_v53 = vadd.f32 %v2479_v18, %v2476_v15  ;;  %v2495_v32 = vstv %s7584_s17  ;;  %s7755_s11 = sld [smem:[#allocation9 + $0x9d]]  ;;  %s7805_s28 = sld [smem:[#allocation6 + $0x79]] }
 0x223   :  { %v2499_v58 = vstv %s7592_s16  ;;  %v2425_v43 = vmul.f32 %v2424_v36, %v2410_v51  ;;  %v2503_v30 = vstv %s7594_s9  ;;  %v2507_v54 = vstv %s7606_s23  ;;  %s7769_s29 = sld [smem:[#allocation9 + $0xbd]] }
 0x224   :  { %v2511_v63 = vstv %s7608_s2  ;;  %v2429_v11 = vmul.f32 %v2428_v28, %v2410_v51  ;;  %v2433_v10 = vmul.f32 %v2432_v19, %v2410_v51  ;;  %v2437_v12 = vmul.f32 %v2436_v52, %v2410_v51  ;;  %s7771_s1 = sld [smem:[#allocation9 + $0xdd]] }
 0x225   :  { %v2441_v5 = vmul.f32 %v2440_v49, %v2410_v51  ;;  %v7693_v36 = vadd.f32 %v2413_v47, %v7563_v25  ;;  %v7696_v14 = vadd.f32 %v2417_v35, %v7566_v29  ;;  %v2445_v44 = vmul.f32 %v2444_v59, %v2410_v51  ;;  %s7815_s17 = sld [smem:[#allocation9 + $0xfd]] }
 0x226   :  { %v2449_v28 = vmul.f32 %v2448_v9, %v2410_v51  ;;  %v7707_v19 = vadd.f32 %v2421_v20, %v7579_v41  ;;  %v2453_v52 = vmul.f32 %v2452_v56, %v2410_v51  ;;  %v2457_v49 = vmul.f32 %v2456_v62, %v2410_v51  ;;  %s7817_s16 = sld [smem:[#allocation9 + $0x11d]] }
 0x227   :  { %v2484_v7 = vadd.f32 %v2483_v1, %v2480_v53  ;;  %v2461_v25 = vmul.f32 %v2460_v55, %v2410_v51  ;;  %v2465_v29 = vmul.f32 %v2464_v6, %v2410_v51  ;;  %v2469_v3 = vmul.f32 %v2468_v0, %v2410_v51  ;;  %s7831_s9 = sld [smem:[#allocation9 + $0x15d]] }
 0x228   :  { %v2473_v59 = vmul.f32 %v2472_v61, %v2410_v51  ;;  %v7718_v9 = vadd.f32 %v2425_v43, %v7582_v48  ;;  %v7721_v41 = vadd.f32 %v2429_v11, %v7587_v40  ;;  %v7724_v45 = vadd.f32 %v2433_v10, %v7590_v24  ;;  %s7833_s23 = sld [smem:[#allocation9 + $0x17d]] }
 0x229   :  { %v2488_v4 = vadd.f32 %v2487_v22, %v2484_v7  ;;  %v7731_v57 = vadd.f32 %v2437_v12, %v7597_v38  ;;  %v7734_v27 = vadd.f32 %v2441_v5, %v7600_v42  ;;  %v7737_v48 = vadd.f32 %v2445_v44, %v7603_v31  ;;  %s7835_s2 = sld [smem:[#allocation9 + $0x19d]] }
 0x22a   :  { %v7740_v40 = vadd.f32 %v2449_v28, %v7611_v37  ;;  %v7747_v24 = vadd.f32 %v2453_v52, %v7614_v39  ;;  %v7750_v38 = vadd.f32 %v2457_v49, %v7617_v8  ;;  %v2561_v31 = vstv %s7659_s26  ;;  %s7821_s26 = sld [smem:[#allocation9 + $0x13d]] }
 0x22b   :  { %v2492_v42 = vadd.f32 %v2491_v2, %v2488_v4  ;;  %v7758_v37 = vadd.f32 %v2461_v25, %v7620_v13  ;;  %v7761_v39 = vadd.f32 %v2465_v29, %v7623_v26  ;;  %v7764_v8 = vadd.f32 %v2469_v3, %v7626_v34 }
 0x22c   :  { %v7767_v51 = vadd.f32 %v2473_v59, %v7630_v21  ;;  %v2515_v13 = vstv %s7667_s22  ;;  %v2519_v16 = vstv %s7676_s24  ;;  %v2523_v26 = vstv %s7678_s13  ;;  %s7837_s22 = sld [smem:[#allocation9 + $0x1bd]]  ;;  %s7855_s13 = sld [smem:[#allocation9 + $0x1e]] }
 0x22d   :  { %v2527_v18 = vstv %s7688_s30  ;;  %v2493_v33 = vmax.f32 %v2492_v42, 0.0  ;;  %v2562_v34 = vmul.f32 %v7632_v60, %v2561_v31  ;;  %v2565_v21 = vstv %s7661_s18  ;;  %s7823_s18 = sld [smem:[#allocation6 + $0x7b]]  ;;  %s7844_s24 = sld [smem:[#allocation9 + $0x1fd]] }
 0x22e   :  { %v2569_v46 = vstv %s7669_s0  ;;  %v2531_v56 = vstv %s7702_s20  ;;  %v2535_v62 = vstv %s7704_s12  ;;  %v2539_v55 = vstv %s7709_s14  ;;  %s7842_s0 = sld [smem:[#allocation9 + $0x1dd]]  ;;  %s7857_s30 = sld [smem:[#allocation9 + $0x3e]] }
 0x22f   :  { %v2559_v15 = vstv %s7647_s10  ;;  %v2543_v6 = vstv %s7711_s8  ;;  %v2547_v0 = vstv %s7713_s6  ;;  %v2551_v61 = vstv %s7715_s21  ;;  %s7807_s10 = sld [smem:[#allocation6 + $0x7a]]  ;;  %s7873_s20 = sld [smem:[#allocation9 + $0x7e]] }
 0x230   :  { %v2573_v1 = vstv %s7690_s25  ;;  %v2555_v47 = vstv %s7726_s19  ;;  %v2566_v35 = vmul.f32 %v7644_v17, %v2565_v21  ;;  %v2570_v22 = vmul.f32 %v7653_v50, %v2569_v46  ;;  %s7871_s25 = sld [smem:[#allocation9 + $0x5e]]  ;;  %s7923_s19 = sld [smem:[#allocation6 + $0x7c]] }
 0x231   :  { %v2578_v2 = vstv %s7728_s4  ;;  %v2496_v20 = vmul.f32 %v2495_v32, %v2493_v33  ;;  %v2500_v53 = vmul.f32 %v2499_v58, %v2493_v33  ;;  %v2563_v43 = vadd.f32 %v2562_v34, %v2559_v15  ;;  %s7884_s12 = sld [smem:[#allocation9 + $0x9e]] }
 0x232   :  { %v2582_v11 = vstv %s7742_s5  ;;  %v2574_v10 = vmul.f32 %v7656_v23, %v2573_v1  ;;  %v2586_v12 = vstv %s7744_s7  ;;  %v2590_v5 = vstv %s7753_s15  ;;  %s7886_s14 = sld [smem:[#allocation9 + $0xbe]]  ;;  %s7949_s5 = sld [smem:[#allocation6 + $0x7f]] }
 0x233   :  { %v2594_v44 = vstv %s7755_s11  ;;  %v2504_v32 = vmul.f32 %v2503_v30, %v2493_v33  ;;  %v2508_v58 = vmul.f32 %v2507_v54, %v2493_v33  ;;  %v2598_v28 = vstv %s7769_s29  ;;  %s7898_s8 = sld [smem:[#allocation9 + $0xde]] }
 0x234   :  { %v2602_v52 = vstv %s7771_s1  ;;  %v2512_v49 = vmul.f32 %v2511_v63, %v2493_v33  ;;  %v2516_v7 = vmul.f32 %v2515_v13, %v2493_v33  ;;  %v2520_v25 = vmul.f32 %v2519_v16, %v2493_v33  ;;  %s7900_s6 = sld [smem:[#allocation9 + $0xfe]] }
 0x235   :  { %v2524_v29 = vmul.f32 %v2523_v26, %v2493_v33  ;;  %v7826_v3 = vadd.f32 %v2496_v20, %v7693_v36  ;;  %v7829_v30 = vadd.f32 %v2500_v53, %v7696_v14  ;;  %v2528_v54 = vmul.f32 %v2527_v18, %v2493_v33  ;;  %s7906_s21 = sld [smem:[#allocation9 + $0x11e]] }
 0x236   :  { %v2532_v59 = vmul.f32 %v2531_v56, %v2493_v33  ;;  %v2536_v63 = vmul.f32 %v2535_v62, %v2493_v33  ;;  %v2540_v4 = vmul.f32 %v2539_v55, %v2493_v33  ;;  %v2544_v42 = vmul.f32 %v2543_v6, %v2493_v33  ;;  %s7947_s4 = sld [smem:[#allocation9 + $0x13e]] }
 0x237   :  { %v2567_v31 = vadd.f32 %v2566_v35, %v2563_v43  ;;  %v7840_v36 = vadd.f32 %v2504_v32, %v7707_v19  ;;  %v2548_v13 = vmul.f32 %v2547_v0, %v2493_v33  ;;  %v2552_v14 = vmul.f32 %v2551_v61, %v2493_v33  ;;  %s7956_s7 = sld [smem:[#allocation9 + $0x15e]] }
 0x238   :  { %v2556_v16 = vmul.f32 %v2555_v47, %v2493_v33  ;;  %v7847_v26 = vadd.f32 %v2508_v58, %v7718_v9  ;;  %v7850_v18 = vadd.f32 %v2512_v49, %v7721_v41  ;;  %v7853_v34 = vadd.f32 %v2516_v7, %v7724_v45  ;;  %s7958_s15 = sld [smem:[#allocation9 + $0x17e]] }
 0x239   :  { %v2571_v21 = vadd.f32 %v2570_v22, %v2567_v31  ;;  %v7860_v19 = vadd.f32 %v2520_v25, %v7731_v57  ;;  %v7863_v33 = vadd.f32 %v2524_v29, %v7734_v27  ;;  %v7866_v9 = vadd.f32 %v2528_v54, %v7737_v48  ;;  %s7969_s11 = sld [smem:[#allocation9 + $0x19e]] }
 0x23a   :  { %v7869_v41 = vadd.f32 %v2532_v59, %v7740_v40  ;;  %v7876_v45 = vadd.f32 %v2536_v63, %v7747_v24  ;;  %v7879_v57 = vadd.f32 %v2540_v4, %v7750_v38  ;;  %v7882_v27 = vadd.f32 %v2544_v42, %v7758_v37  ;;  %s7971_s29 = sld [smem:[#allocation9 + $0x1be]] }
 0x23b   :  { %v2575_v48 = vadd.f32 %v2574_v10, %v2571_v21  ;;  %v7889_v40 = vadd.f32 %v2548_v13, %v7761_v39  ;;  %v7892_v24 = vadd.f32 %v2552_v14, %v7764_v8  ;;  %v7895_v38 = vadd.f32 %v2556_v16, %v7767_v51  ;;  %s7976_s1 = sld [smem:[#allocation9 + $0x1de]] }
 0x23c   :  { %v2644_v37 = vstv %s7799_s3  ;;  %v2606_v46 = vstv %s7815_s17  ;;  %v2610_v56 = vstv %s7817_s16  ;;  %v2614_v39 = vstv %s7821_s26  ;;  %s7938_s3 = sld [smem:[#allocation6 + $0x7d]]  ;;  %s7983_s17 = sld [smem:[#allocation9 + $0x1f]] }
 0x23d   :  { %v2648_v62 = vstv %s7805_s28  ;;  %v2576_v8 = vmax.f32 %v2575_v48, 0.0  ;;  %v2618_v55 = vstv %s7831_s9  ;;  %v2652_v51 = vstv %s7807_s10  ;;  %s7940_s28 = sld [smem:[#allocation6 + $0x7e]]  ;;  %s7985_s16 = sld [smem:[#allocation9 + $0x3f]] }
 0x23e   :  { %v2656_v15 = vstv %s7823_s18  ;;  %v2622_v6 = vstv %s7833_s23  ;;  %v2626_v0 = vstv %s7835_s2  ;;  %v2630_v61 = vstv %s7837_s22  ;;  %s7978_s10 = sld [smem:[#allocation9 + $0x1fe]]  ;;  %s7988_s26 = sld [smem:[#allocation9 + $0x5f]] }
 0x23f   :  { %v2645_v1 = vmul.f32 %v7632_v60, %v2644_v37  ;;  %v2634_v47 = vstv %s7842_s0  ;;  %v2638_v35 = vstv %s7844_s24  ;;  %v2642_v22 = vstv %s7797_s27  ;;  %s7932_s27 = sld [smem:[#allocation7 + $0x1f]] }
 0x240   :  { %v2649_v20 = vmul.f32 %v7644_v17, %v2648_v62  ;;  %v2653_v53 = vmul.f32 %v7653_v50, %v2652_v51  ;;  %v2657_v43 = vmul.f32 %v7656_v23, %v2656_v15  ;;  %v2661_v10 = vstv %s7855_s13  ;;  %s7990_s18 = sld [smem:[#allocation9 + $0x7f]] }
 0x241   :  { %v2665_v32 = vstv %s7857_s30  ;;  %v2579_v58 = vmul.f32 %v2578_v2, %v2576_v8  ;;  %v2583_v49 = vmul.f32 %v2582_v11, %v2576_v8  ;;  %v2587_v7 = vmul.f32 %v2586_v12, %v2576_v8  ;;  %s8004_s9 = sld [smem:[#allocation9 + $0x9f]]  ;;  %s8076_s30 = sld [smem:[#allocation12]] }
 0x242   :  { %v2669_v25 = vstv %s7871_s25  ;;  %v2591_v29 = vmul.f32 %v2590_v5, %v2576_v8  ;;  %v2646_v54 = vadd.f32 %v2645_v1, %v2642_v22  ;;  %v2673_v59 = vstv %s7873_s20  ;;  %s8006_s23 = sld [smem:[#allocation9 + $0xbf]] }
 0x243   :  { %v2677_v63 = vstv %s7884_s12  ;;  %v2595_v2 = vmul.f32 %v2594_v44, %v2576_v8  ;;  %v2681_v11 = vstv %s7886_s14  ;;  %v2685_v4 = vstv %s7898_s8  ;;  %s8015_s2 = sld [smem:[#allocation9 + $0xdf]]  ;;  %s8100_s8 = sld [smem:[#allocation12 + $0x10]] }
 0x244   :  { %v2689_v42 = vstv %s7900_s6  ;;  %v2599_v12 = vmul.f32 %v2598_v28, %v2576_v8  ;;  %v2603_v5 = vmul.f32 %v2602_v52, %v2576_v8  ;;  %v2607_v31 = vmul.f32 %v2606_v46, %v2576_v8  ;;  %s8017_s22 = sld [smem:[#allocation9 + $0xff]]  ;;  %s8103_s6 = sld [smem:[#allocation12 + $0x1]] }
 0x245   :  { %v2693_v13 = vstv %s7906_s21  ;;  %v7961_v14 = vadd.f32 %v2579_v58, %v7826_v3  ;;  %v7964_v44 = vadd.f32 %v2583_v49, %v7829_v30  ;;  %v7967_v16 = vadd.f32 %v2587_v7, %v7840_v36  ;;  %s8027_s0 = sld [smem:[#allocation9 + $0x11f]]  ;;  %s8105_s21 = sld [smem:[#allocation12 + $0x11]] }
 0x246   :  { %v2611_v21 = vmul.f32 %v2610_v56, %v2576_v8  ;;  %v7974_v28 = vadd.f32 %v2591_v29, %v7847_v26  ;;  %v2615_v52 = vmul.f32 %v2614_v39, %v2576_v8  ;;  %v2619_v48 = vmul.f32 %v2618_v55, %v2576_v8  ;;  %s8029_s24 = sld [smem:[#allocation9 + $0x13f]] }
 0x247   :  { %v2650_v37 = vadd.f32 %v2649_v20, %v2646_v54  ;;  %v7981_v3 = vadd.f32 %v2595_v2, %v7850_v18  ;;  %v2623_v30 = vmul.f32 %v2622_v6, %v2576_v8  ;;  %v2627_v36 = vmul.f32 %v2626_v0, %v2576_v8  ;;  %s8074_s13 = sld [smem:[#allocation9 + $0x15f]] }
 0x248   :  { %v2631_v46 = vmul.f32 %v2630_v61, %v2576_v8  ;;  %v2635_v56 = vmul.f32 %v2634_v47, %v2576_v8  ;;  %v2639_v26 = vmul.f32 %v2638_v35, %v2576_v8  ;;  %v2727_v39 = vstv %s7923_s19  ;;  %s8064_s19 = sld [smem:[#allocation13]]  ;;  %s8088_s25 = sld [smem:[#allocation9 + $0x19f]] }
 0x249   :  { %v2654_v62 = vadd.f32 %v2653_v53, %v2650_v37  ;;  %v7993_v18 = vadd.f32 %v2599_v12, %v7853_v34  ;;  %v7996_v55 = vadd.f32 %v2603_v5, %v7860_v19  ;;  %v7999_v51 = vadd.f32 %v2607_v31, %v7863_v33  ;;  %s8094_s20 = sld [smem:[#allocation9 + $0x1bf]] }
 0x24a   :  { %v8002_v15 = vadd.f32 %v2611_v21, %v7866_v9  ;;  %v8009_v8 = vadd.f32 %v2615_v52, %v7869_v41  ;;  %v8012_v34 = vadd.f32 %v2619_v48, %v7876_v45  ;;  %v2728_v33 = vmul.f32 %v7632_v60, %v2727_v39  ;;  %s8096_s12 = sld [smem:[#allocation9 + $0x1df]] }
 0x24b   :  { %v2658_v19 = vadd.f32 %v2657_v43, %v2654_v62  ;;  %v8020_v9 = vadd.f32 %v2623_v30, %v7879_v57  ;;  %v8023_v41 = vadd.f32 %v2627_v36, %v7882_v27  ;;  %v2725_v45 = vstv %s7932_s27  ;;  %s8066_s27 = sld [smem:[#allocation13 + $0x1]]  ;;  %s8098_s14 = sld [smem:[#allocation9 + $0x1ff]] }
 0x24c   :  { %v2731_v6 = vstv %s7938_s3  ;;  %v8032_v60 = vadd.f32 %v2631_v46, %v7889_v40  ;;  %v8035_v0 = vadd.f32 %v2635_v56, %v7892_v24  ;;  %v8038_v57 = vadd.f32 %v2639_v26, %v7895_v38  ;;  %s8086_s3 = sld [smem:[#allocation9 + $0x17f]] }
 0x24d   :  { %v2735_v27 = vstv %s7940_s28  ;;  %v2659_v61 = vmax.f32 %v2658_v19, 0.0  ;;  %v2697_v1 = vstv %s7947_s4  ;;  %v2701_v47 = vstv %s7956_s7  ;;  %s8110_s28 = sld [smem:[#allocation12 + $0x2]]  ;;  %s8124_s7 = sld [smem:[#allocation12 + $0x13]] }
 0x24e   :  { %v2739_v35 = vstv %s7949_s5  ;;  %v2705_v40 = vstv %s7958_s15  ;;  %v2709_v22 = vstv %s7969_s11  ;;  %v2729_v24 = vadd.f32 %v2728_v33, %v2725_v45  ;;  %s8112_s4 = sld [smem:[#allocation12 + $0x12]]  ;;  %s8122_s5 = sld [smem:[#allocation12 + $0x3]] }
 0x24f   :  { %v2732_v20 = vmul.f32 %v7644_v17, %v2731_v6  ;;  %v2713_v38 = vstv %s7971_s29  ;;  %v2717_v53 = vstv %s7976_s1  ;;  %v2721_v43 = vstv %s7978_s10  ;;  %s8137_s15 = sld [smem:[#allocation12 + $0x4]]  ;;  %s8151_s29 = sld [smem:[#allocation12 + $0x5]] }
 0x250   :  { %v2736_v58 = vmul.f32 %v7653_v50, %v2735_v27  ;;  %v2740_v49 = vmul.f32 %v7656_v23, %v2739_v35  ;;  %v2744_v7 = vstv %s7983_s17  ;;  %v2748_v29 = vstv %s7985_s16  ;;  %s8139_s11 = sld [smem:[#allocation12 + $0x14]]  ;;  %s8153_s1 = sld [smem:[#allocation12 + $0x15]] }
 0x251   :  { %v2752_v54 = vstv %s7988_s26  ;;  %v2662_v2 = vmul.f32 %v2661_v10, %v2659_v61  ;;  %v2666_v17 = vmul.f32 %v2665_v32, %v2659_v61  ;;  %v2756_v12 = vstv %s7990_s18  ;;  %s8165_s10 = sld [smem:[#allocation12 + $0x6]]  ;;  %s8205_s16 = sld [smem:[#allocation12 + $0x7]] }
 0x252   :  { %v2760_v5 = vstv %s8004_s9  ;;  %v2733_v31 = vadd.f32 %v2732_v20, %v2729_v24  ;;  %v2764_v50 = vstv %s8006_s23  ;;  %v2768_v21 = vstv %s8015_s2  ;;  %s8203_s17 = sld [smem:[#allocation12 + $0x16]]  ;;  %s8214_s26 = sld [smem:[#allocation12 + $0x17]] }
 0x253   :  { %v2772_v52 = vstv %s8017_s22  ;;  %v2670_v23 = vmul.f32 %v2669_v25, %v2659_v61  ;;  %v2674_v10 = vmul.f32 %v2673_v59, %v2659_v61  ;;  %v2776_v48 = vstv %s8027_s0  ;;  %s8216_s18 = sld [smem:[#allocation12 + $0x8]]  ;;  %s8223_s23 = sld [smem:[#allocation12 + $0x9]] }
 0x254   :  { %v2780_v32 = vstv %s8029_s24  ;;  %v2678_v37 = vmul.f32 %v2677_v63, %v2659_v61  ;;  %v2682_v30 = vmul.f32 %v2681_v11, %v2659_v61  ;;  %v2686_v36 = vmul.f32 %v2685_v4, %v2659_v61  ;;  %s8221_s9 = sld [smem:[#allocation12 + $0x18]]  ;;  %s8230_s2 = sld [smem:[#allocation12 + $0x19]] }
 0x255   :  { %v2690_v46 = vmul.f32 %v2689_v42, %v2659_v61  ;;  %v2663_v25 = vadd.f32 %v2662_v2, %v7961_v14  ;;  %v2667_v59 = vadd.f32 %v2666_v17, %v7964_v44  ;;  %v2694_v56 = vmul.f32 %v2693_v13, %v2659_v61  ;;  %s8232_s22 = sld [smem:[#allocation12 + $0xa]]  ;;  %s8240_s24 = sld [smem:[#allocation12 + $0xb]] }
 0x256   :  { %v2698_v26 = vmul.f32 %v2697_v1, %v2659_v61  ;;  %v2702_v63 = vmul.f32 %v2701_v47, %v2659_v61  ;;  %v2706_v11 = vmul.f32 %v2705_v40, %v2659_v61  ;;  %v2710_v4 = vmul.f32 %v2709_v22, %v2659_v61  ;;  %s8237_s0 = sld [smem:[#allocation12 + $0x1a]] }
 0x257   :  { %v2737_v62 = vadd.f32 %v2736_v58, %v2733_v31  ;;  %v2671_v42 = vadd.f32 %v2670_v23, %v7967_v16  ;;  %v2714_v14 = vmul.f32 %v2713_v38, %v2659_v61  ;;  %v2718_v39 = vmul.f32 %v2717_v53, %v2659_v61 }
 0x258   :  { %v2722_v44 = vmul.f32 %v2721_v43, %v2659_v61  ;;  %v2675_v13 = vadd.f32 %v2674_v10, %v7974_v28  ;;  %v2679_v19 = vadd.f32 %v2678_v37, %v7981_v3  ;;  %v2683_v33 = vadd.f32 %v2682_v30, %v7993_v18 }
 0x259   :  { %v2741_v45 = vadd.f32 %v2740_v49, %v2737_v62  ;;  %v2687_v16 = vadd.f32 %v2686_v36, %v7996_v55  ;;  %v2691_v6 = vadd.f32 %v2690_v46, %v7999_v51  ;;  %v8117_v27 = vadd.f32 %v2694_v56, %v8002_v15 }
 0x25a   :  { %v8120_v28 = vadd.f32 %v2698_v26, %v8009_v8  ;;  %v8127_v3 = vadd.f32 %v2702_v63, %v8012_v34  ;;  %v8130_v18 = vadd.f32 %v2706_v11, %v8020_v9  ;;  %v8133_v55 = vadd.f32 %v2710_v4, %v8023_v41 }
 0x25b   :  { %v8135_v51 = vmax.f32 %v2741_v45, 0.0  ;;  %v8142_v15 = vadd.f32 %v2714_v14, %v8032_v60  ;;  %v8145_v8 = vadd.f32 %v2718_v39, %v8035_v0  ;;  %v8148_v34 = vadd.f32 %v2722_v44, %v8038_v57 }
 0x25c   :  { %v2784_v9 = vstv %s8074_s13  ;;  %v2788_v57 = vstv %s8086_s3  ;;  %v2792_v1 = vstv %s8088_s25  ;;  %v2796_v47 = vstv %s8094_s20  ;;  %s8251_s13 = sld [smem:[#allocation12 + $0x1c]]  ;;  %s8258_s3 = sld [smem:[#allocation12 + $0x1d]] }
 0x25d   :  { %v2745_v41 = vmul.f32 %v2744_v7, %v8135_v51  ;;  %v2749_v60 = vmul.f32 %v2748_v29, %v8135_v51  ;;  %v2753_v0 = vmul.f32 %v2752_v54, %v8135_v51  ;;  %v2757_v61 = vmul.f32 %v2756_v12, %v8135_v51  ;;  %s8263_s25 = sld [smem:[#allocation12 + $0xe]] }
 0x25e   :  { %v2800_v35 = vstv %s8096_s12  ;;  %v2804_v40 = vstv %s8098_s14  ;;  %v2808_v22 = vstv %s8064_s19  ;;  %v2810_v24 = vstv %s8066_s27  ;;  %s8244_s19 = sld [smem:[#allocation12 + $0x1b]]  ;;  %s8247_s27 = sld [smem:[#allocation12 + $0xc]] }
 0x25f   :  { %v2813_v20 = vstv %s8076_s30  ;;  %v2761_v38 = vmul.f32 %v2760_v5, %v8135_v51  ;;  %v2817_v53 = vstv %s8100_s8  ;;  %v2822_v43 = vstv %s8103_s6  ;;  %s8254_s30 = sld [smem:[#allocation12 + $0xd]]  ;;  %s8265_s20 = sld [smem:[#allocation12 + $0x1e]] }
 0x260   :  { %v2826_v58 = vstv %s8105_s21  ;;  %v2746_v49 = vadd.f32 %v2745_v41, %v2663_v25  ;;  %v2750_v7 = vadd.f32 %v2749_v60, %v2667_v59  ;;  %v2754_v29 = vadd.f32 %v2753_v0, %v2671_v42  ;;  %s8270_s12 = sld [smem:[#allocation12 + $0xf]]  ;;  %s3876_s8 = smov [#allocation15]  }
 0x261   :  { %v2831_v54 = vstv %s8110_s28  ;;  %v2758_v2 = vadd.f32 %v2757_v61, %v2675_v13  ;;  %v2765_v17 = vmul.f32 %v2764_v50, %v8135_v51  ;;  %v2769_v12 = vmul.f32 %v2768_v21, %v8135_v51  ;;  %s8272_s14 = sld [smem:[#allocation12 + $0x1f]]  ;;  %s2975_s6 = sshll.u32 %s3876_s8, 4  ;;  %s2976_s6 = int_to_ptr.vmem [resolvable:$true] %s2975_s6 }
 0x262   :  { %v2773_v5 = vmul.f32 %v2772_v52, %v8135_v51  ;;  %v2835_v31 = vstv %s8112_s4  ;;  %v2840_v23 = vstv %s8122_s5  ;;  %v2844_v10 = vstv %s8124_s7  ;;  %s3833_s21 = scalar_lea.vmem %s2976_s6, 256  ;;  %p3838_p11 = scmp.lt.s32.totalorder %s2976_s6, %s2976_s6 }
 0x263   :  { %v2849_v37 = vstv %s8137_s15  ;;  %v2762_v30 = vadd.f32 %v2761_v38, %v2679_v19  ;;  %v2853_v36 = vstv %s8139_s11  ;;  %v2858_v46 = vstv %s8151_s29  ;;  %p3834_p10 = scmp.ne.s32.totalorder %s2976_s6, %s3833_s21  ;;  %p3839_p12 = scmp.lt.s32.totalorder %s3833_s21, %s3833_s21 }
 0x264   :  { %v2862_v25 = vstv %s8153_s1  ;;  %v2811_v59 = vmax.f32 %v2746_v49, 0.0  ;;  %v2820_v56 = vmax.f32 %v2750_v7, 0.0  ;;  %v2829_v26 = vmax.f32 %v2754_v29, 0.0 }
 0x265   :  { %v2867_v50 = vstv %s8165_s10  ;;  %v2766_v63 = vadd.f32 %v2765_v17, %v2683_v33  ;;  %v2770_v11 = vadd.f32 %v2769_v12, %v2687_v16  ;;  %v8201_v21 = vadd.f32 %v2773_v5, %v2691_v6  ;;  %p3840_p13 = por %p3839_p12, %p3838_p11 }
 0x266   :  { %v2838_v4 = vmax.f32 %v2758_v2, 0.0  ;;  %v2814_v52 = vmul.f32 %v2813_v20, %v2811_v59  ;;  %v2818_v62 = vmul.f32 %v2817_v53, %v2811_v59  ;;  %v2823_v42 = vmul.f32 %v2822_v43, %v2820_v56 }
 0x267   :  { %v2827_v14 = vmul.f32 %v2826_v58, %v2820_v56  ;;  %v2777_v39 = vmul.f32 %v2776_v48, %v8135_v51  ;;  %v2781_v44 = vmul.f32 %v2780_v32, %v8135_v51  ;;  %v2785_v13 = vmul.f32 %v2784_v9, %v8135_v51  ;;  %p3841_p0 = pnand %p3840_p13, %p3834_p10 }
 0x268   :  { %v2847_v19 = vmax.f32 %v2762_v30, 0.0  ;;  %v2815_v33 = vadd.f32 %v2814_v52, %v2808_v22  ;;  %v2819_v45 = vadd.f32 %v2818_v62, %v2810_v24  ;;  %v2832_v16 = vmul.f32 %v2831_v54, %v2829_v26 }
 0x269   :  { %v2836_v6 = vmul.f32 %v2835_v31, %v2829_v26  ;;  %v2789_v41 = vmul.f32 %v2788_v57, %v8135_v51  ;;  %v2793_v60 = vmul.f32 %v2792_v1, %v8135_v51  ;;  %v2797_v48 = vmul.f32 %v2796_v47, %v8135_v51 }
 0x26a   :  { %v2856_v0 = vmax.f32 %v2766_v63, 0.0  ;;  %v2824_v32 = vadd.f32 %v2823_v42, %v2815_v33  ;;  %v2828_v9 = vadd.f32 %v2827_v14, %v2819_v45  ;;  %v2841_v61 = vmul.f32 %v2840_v23, %v2838_v4 }
 0x26b   :  { %v2845_v20 = vmul.f32 %v2844_v10, %v2838_v4  ;;  %v2778_v22 = vadd.f32 %v2777_v39, %v8117_v27  ;;  %v2801_v24 = vmul.f32 %v2800_v35, %v8135_v51  ;;  %v8228_v57 = vmul.f32 %v2804_v40, %v8135_v51 }
 0x26c   :  { %v2865_v1 = vmax.f32 %v2770_v11, 0.0  ;;  %v2833_v47 = vadd.f32 %v2832_v16, %v2824_v32  ;;  %v2837_v38 = vadd.f32 %v2836_v6, %v2828_v9  ;;  %v2850_v53 = vmul.f32 %v2849_v37, %v2847_v19 }
 0x26d   :  { %v2854_v43 = vmul.f32 %v2853_v36, %v2847_v19  ;;  %v2782_v58 = vadd.f32 %v2781_v44, %v8120_v28  ;;  %v2859_v49 = vmul.f32 %v2858_v46, %v2856_v0  ;;  %v2871_v27 = vstv %s8203_s17 }
 0x26e   :  { %v2874_v35 = vmax.f32 %v8201_v21, 0.0  ;;  %v2842_v51 = vadd.f32 %v2841_v61, %v2833_v47  ;;  %v2846_v40 = vadd.f32 %v2845_v20, %v2837_v38  ;;  %v2863_v7 = vmul.f32 %v2862_v25, %v2856_v0 }
 0x26f   :  { %v2876_v29 = vstv %s8205_s16  ;;  %v2786_v54 = vadd.f32 %v2785_v13, %v8127_v3  ;;  %v2868_v2 = vmul.f32 %v2867_v50, %v2865_v1  ;;  %v2880_v17 = vstv %s8214_s26 }
 0x270   :  { %v2883_v28 = vmax.f32 %v2778_v22, 0.0  ;;  %v2851_v12 = vadd.f32 %v2850_v53, %v2842_v51  ;;  %v2855_v5 = vadd.f32 %v2854_v43, %v2846_v40  ;;  %v2872_v31 = vmul.f32 %v2871_v27, %v2865_v1 }
 0x271   :  { %v2885_v23 = vstv %s8216_s18  ;;  %v2790_v10 = vadd.f32 %v2789_v41, %v8130_v18  ;;  %v2877_v37 = vmul.f32 %v2876_v29, %v2874_v35  ;;  %v2889_v30 = vstv %s8221_s9 }
 0x272   :  { %v2892_v36 = vmax.f32 %v2782_v58, 0.0  ;;  %v2860_v3 = vadd.f32 %v2859_v49, %v2851_v12  ;;  %v2864_v46 = vadd.f32 %v2863_v7, %v2855_v5  ;;  %v2881_v25 = vmul.f32 %v2880_v17, %v2874_v35 }
 0x273   :  { %v2894_v59 = vstv %s8223_s23  ;;  %v2794_v56 = vadd.f32 %v2793_v60, %v8133_v55  ;;  %v2886_v26 = vmul.f32 %v2885_v23, %v2883_v28  ;;  %v2898_v50 = vstv %s8230_s2 }
 0x274   :  { %v2901_v63 = vmax.f32 %v2786_v54, 0.0  ;;  %v2869_v18 = vadd.f32 %v2868_v2, %v2860_v3  ;;  %v2873_v11 = vadd.f32 %v2872_v31, %v2864_v46  ;;  %v2890_v21 = vmul.f32 %v2889_v30, %v2883_v28 }
 0x275   :  { %v2903_v4 = vstv %s8232_s22  ;;  %v2798_v52 = vadd.f32 %v2797_v48, %v8142_v15  ;;  %v2895_v62 = vmul.f32 %v2894_v59, %v2892_v36  ;;  %v2907_v42 = vstv %s8237_s0 }
 0x276   :  { %v2910_v14 = vmax.f32 %v2790_v10, 0.0  ;;  %v2878_v55 = vadd.f32 %v2877_v37, %v2869_v18  ;;  %v2882_v39 = vadd.f32 %v2881_v25, %v2873_v11  ;;  %v2899_v44 = vmul.f32 %v2898_v50, %v2892_v36 }
 0x277   :  { %v2912_v13 = vstv %s8240_s24  ;;  %v2802_v19 = vadd.f32 %v2801_v24, %v8145_v8  ;;  %v2904_v33 = vmul.f32 %v2903_v4, %v2901_v63  ;;  %v2916_v45 = vstv %s8244_s19 }
 0x278   :  { %v2919_v16 = vmax.f32 %v2794_v56, 0.0  ;;  %v2887_v15 = vadd.f32 %v2886_v26, %v2878_v55  ;;  %v2891_v6 = vadd.f32 %v2890_v21, %v2882_v39  ;;  %v2908_v41 = vmul.f32 %v2907_v42, %v2901_v63 }
 0x279   :  { %v2921_v60 = vstv %s8247_s27  ;;  %v2806_v48 = vadd.f32 %v8228_v57, %v8148_v34  ;;  %v2913_v0 = vmul.f32 %v2912_v13, %v2910_v14  ;;  %v2925_v8 = vstv %s8251_s13 }
 0x27a   :  { %v2928_v32 = vmax.f32 %v2798_v52, 0.0  ;;  %v2896_v9 = vadd.f32 %v2895_v62, %v2887_v15  ;;  %v2900_v61 = vadd.f32 %v2899_v44, %v2891_v6  ;;  %v2917_v20 = vmul.f32 %v2916_v45, %v2910_v14 }
 0x27b   :  { %v2930_v22 = vstv %s8254_s30  ;;  %v2922_v24 = vmul.f32 %v2921_v60, %v2919_v16  ;;  %v2934_v1 = vstv %s8258_s3  ;;  %v2926_v53 = vmul.f32 %v2925_v8, %v2919_v16 }
 0x27c   :  { %v2905_v47 = vadd.f32 %v2904_v33, %v2896_v9  ;;  %v2909_v38 = vadd.f32 %v2908_v41, %v2900_v61  ;;  %v2937_v43 = vmax.f32 %v2802_v19, 0.0  ;;  %v2931_v58 = vmul.f32 %v2930_v22, %v2928_v32 }
 0x27d   :  { %v2939_v49 = vstv %s8263_s25  ;;  %v2943_v27 = vstv %s8265_s20  ;;  %v2935_v35 = vmul.f32 %v2934_v1, %v2928_v32  ;;  %v2946_v51 = vmax.f32 %v2806_v48, 0.0 }
 0x27e   :  { %v2914_v34 = vadd.f32 %v2913_v0, %v2905_v47  ;;  %v2918_v57 = vadd.f32 %v2917_v20, %v2909_v38  ;;  %v2948_v40 = vstv %s8270_s12  ;;  %v2952_v7 = vstv %s8272_s14 }
 0x27f   :  { %v2940_v2 = vmul.f32 %v2939_v49, %v2937_v43  ;;  %v2944_v17 = vmul.f32 %v2943_v27, %v2937_v43  ;;  %v2949_v5 = vmul.f32 %v2948_v40, %v2946_v51  ;;  %v2953_v31 = vmul.f32 %v2952_v7, %v2946_v51 }
 0x280   :  { %v2923_v29 = vadd.f32 %v2922_v24, %v2914_v34  ;;  %v2927_v54 = vadd.f32 %v2926_v53, %v2918_v57 }
 0x282   :  { %v2932_v28 = vadd.f32 %v2931_v58, %v2923_v29  ;;  %v2936_v12 = vadd.f32 %v2935_v35, %v2927_v54 }
 0x284   :  { %v2941_v23 = vadd.f32 %v2940_v2, %v2932_v28  ;;  %v2945_v10 = vadd.f32 %v2944_v17, %v2936_v12 }
 0x286   :  { %v2950_v37 = vadd.f32 %v2949_v5, %v2941_v23  ;;  %v2954_v30 = vadd.f32 %v2953_v31, %v2945_v10 }
 0x288   :  { %v2955_v36 = vmax.f32 %v2950_v37, %v2954_v30 }
 0x28a   :  { %v2956_v3 = vsub.f32 %v2950_v37, %v2955_v36  ;;  %v2959_v46 = vsub.f32 %v2954_v30, %v2955_v36 }
 0x28c   :  { %v2957_v25 = vmul.f32 1.442695, %v2956_v3  ;;  %v2960_v59 = vmul.f32 1.442695, %v2959_v46 }
 0x28e   :  { %3717 = vpow2.f32 %v2957_v25 }
 0x28f   :  { %3719 = vpow2.f32 %v2960_v59 }
 0x298   :  { %v3718_v56 = vpop.eup %3717 }
 0x299   :  { %v3720_v26 = vpop.eup %3719 }
 0x29a   :  { %v2962_v50 = vadd.f32 %v3720_v26, %v3718_v56 }
 0x29c   :  { %3721 = vrcp.f32 %v2962_v50 }
 0x2a6   :  { %v3722_v63 = vpop.eup %3721 }
 0x2a7   :  { %v2965_v18 = vmul.f32 %v3722_v63, %v3718_v56  ;;  %v2967_v11 = vmul.f32 %v3722_v63, %v3720_v26 }
 0x2a9   :  { %2966 = vst [vmem:[#allocation15] sm:$0xff] %v2965_v18  ;;  %2969 = vst [vmem:[#allocation15 + $0x8] sm:$0xff] %v2967_v11 }
 0x2aa   :  { %3844 = shalt.err (!%p3841_p0)
}
 0x2ab   :  { %s8341_s5 = sld [smem:[#allocation32_spill]] }
 0x2b1   :  { %s3845_s7 = scalar_lea.hbm %s8341_s5, 256 }
 0x2b2   :  { %p3846_p1 = scmp.ne.s32.totalorder %s8341_s5, %s3845_s7  ;;  %p3849_p2 = scmp.lt.u32.totalorder %s3845_s7, %s8341_s5 }
 0x2b4   :  { %p3851_p3 = pnand %p3849_p2, %p3846_p1 }
 0x2b6   :  { %3854 = shalt.err (!%p3851_p3)
}
 0x2b7   :  { %s8342_s10 = smov 8   ;;  %s8343_s17 = smov 128  }
 0x2b8   :  { %2981 = dma.vmem_to_hbm [thread:$0]  %s2976_s6, 256, %s8341_s5, [#allocation4], %s8343_s17, %s8343_s17, %s8342_s10  }
 0x2b9   :  { %3865 = dma.done.wait [#allocation4], 256  }
 0x2ba   :  { %3866 = vsyncadd [#allocation4], 4294967040 }
 0x2bb   :  { %2985 = vsyncpa [#allocation3], 1 }
 0x2bc   :  { %2986 = vsyncpa [#allocation4], 1 }
 0x2bd   :  { %2987 = vsyncpa [#allocation5], 1 }
 0x2be   :  { %2988 = vsyncpa [#allocation8], 1 }
 0x2bf   :  { %2989 = vsyncpa [#allocation11], 1 }
 0x2c0   :  { %2990 = vsyncpa [#allocation14], 1 }

</bundles_post_ra>
